<compile_context>
chip_gen: v5e
topology: v5e:2x2
jax: 0.10.0
libtpu: 0.0.40
codegen_flags: <defaults>
</compile_context>

<pallas_src>
import functools

import jax
import jax.numpy as jnp
from jax.experimental import pallas as pl
from jax.experimental.pallas import tpu as pltpu


_LAYER_CFG = [
    # (Cin, Cout, k, stride, pad, activation actually applied)
    (1, 256, 3, 2, 1, "relu"),
    (256, 256, 3, 2, 1, "relu"),
    (256, 128, 3, 1, 1, "relu"),
    (128, 128, 3, 1, 1, "relu"),
    (128, 16, 3, 1, 1, "tanh"),   # act='None' in reference still appends Tanh
]

_LANE = 128  # last layer's 16 channels are padded to a lane-dense width


def _round_up(x, m):
    return (x + m - 1) // m * m


# -----------------------------------------------------------------------------
# Fused encoder kernel (one grid step == `bt` images)
# -----------------------------------------------------------------------------
def _encoder_kernel(mask_ref, xq_ref, w1_ref, b1_ref, w2_ref, b2_ref,
                    w3_ref, b3_ref, w4_ref, b4_ref, w5_ref, b5_ref, o_ref,
                    y1_ref, a2_ref, a3_ref, a4_ref, *, oh, ow, bt, guard):
    f32, bf16 = jnp.float32, jnp.bfloat16
    row = ow + 2                      # padded-grid row length
    mp = (oh + 2) * row               # padded-grid size (flat)
    mp8 = _round_up(mp, 8)            # sublane-aligned per-image row count
    m_all = bt * mp8                  # matmul M (batch folded in)

    mask = mask_ref[...] > 0.0        # (mp8, 1): True on interior rows only

    def masked(x):                    # zero ring/dead rows -> next layer's pad
        return jnp.where(mask, x.reshape(bt, mp8, x.shape[-1]), 0.0)

    # ---- Layer 1: Conv(1->256, k3, s2, p1) + ReLU on the VPU ---------------
    # Output parity phase (i, j); tap (kh, kw) is a contiguous shifted slice of
    # the 4x4-phase-split input (Cin=1 -> 9 lane-broadcast FMAs per phase).
    c1 = w1_ref.shape[1]
    b1 = b1_ref[0]
    for i in range(2):
        for j in range(2):
            acc = jnp.broadcast_to(b1, (bt, mp8, c1))
            for kh in range(3):
                er = 2 * i + kh
                pr, dr = (3, -1) if er == 0 else (er - 1, 0)
                for kw in range(3):
                    ec = 2 * j + kw
                    pc, dc = (3, -1) if ec == 0 else (ec - 1, 0)
                    st = guard + dr * row + dc
                    tap = xq_ref[:, pr, pc, st:st + mp8, :]      # (bt, mp8, 1)
                    acc = acc + tap * w1_ref[3 * kh + kw]
            y1_ref[i, j, :, guard:guard + mp8, :] = (
                masked(jnp.maximum(acc, 0.0)).astype(bf16))

    # ---- Layer 2: Conv(256->256, k3, s2, p1) + ReLU on the MXU -------------
    PH2 = ((1, -1), (0, 0), (1, 0))   # tap k -> (y1 parity, flat-row offset)
    c2 = w2_ref.shape[2]
    acc = jnp.broadcast_to(b2_ref[0], (m_all, c2))
    for kh in range(3):
        rp, dr = PH2[kh]
        for kw in range(3):
            cp, dc = PH2[kw]
            st = guard + dr * row + dc
            lhs = y1_ref[rp, cp, :, st:st + mp8, :].reshape(m_all, c1)
            acc = acc + jnp.dot(lhs, w2_ref[3 * kh + kw],
                                preferred_element_type=f32)
    a2_ref[:, guard:guard + mp8, :] = masked(jnp.maximum(acc, 0.0)).astype(bf16)

    # ---- Layers 3..5: Conv(k3, s1, p1); ReLU / ReLU / Tanh -----------------
    def s1_conv(in_ref, w_ref, b_ref):
        cin, cout = w_ref.shape[1], w_ref.shape[2]
        acc = jnp.broadcast_to(b_ref[0], (m_all, cout))
        for kh in range(3):
            for kw in range(3):
                st = guard + (kh - 1) * row + (kw - 1)
                lhs = in_ref[:, st:st + mp8, :].reshape(m_all, cin)
                acc = acc + jnp.dot(lhs, w_ref[3 * kh + kw],
                                    preferred_element_type=f32)
        return acc

    a3_ref[:, guard:guard + mp8, :] = masked(
        jnp.maximum(s1_conv(a2_ref, w3_ref, b3_ref), 0.0)).astype(bf16)
    a4_ref[:, guard:guard + mp8, :] = masked(
        jnp.maximum(s1_conv(a3_ref, w4_ref, b4_ref), 0.0)).astype(bf16)
    # Faithful reproduction of the reference's always-Tanh last layer.
    o_ref[...] = masked(jnp.tanh(s1_conv(a4_ref, w5_ref, b5_ref)))


# -----------------------------------------------------------------------------
# Wrapper-side prep (tiny, input-only) and forward
# -----------------------------------------------------------------------------
def _prepare_input(x, oh, ow, mp8, guard):
    """(n,H,W) -> (n,4,4,guard+mp8+guard,1): 4x4 phase-split, padded-flat rows."""
    n = x.shape[0]
    mp = (oh + 2) * (ow + 2)
    xr = x.reshape(n, oh, 4, ow, 4).transpose(0, 2, 4, 1, 3)     # (n,4,4,oh,ow)
    xp = jnp.pad(xr, ((0, 0), (0, 0), (0, 0), (1, 1), (1, 1)))   # ring zeros
    xf = xp.reshape(n, 4, 4, mp)
    xf = jnp.pad(xf, ((0, 0), (0, 0), (0, 0), (guard, guard + mp8 - mp)))
    return xf[..., None]


def _interior_mask(oh, ow, mp8):
    mp = (oh + 2) * (ow + 2)
    m = jnp.arange(mp8)
    r, c = m // (ow + 2), m % (ow + 2)
    inside = (m < mp) & (r >= 1) & (r <= oh) & (c >= 1) & (c <= ow)
    return inside.astype(jnp.float32)[:, None]                   # (mp8, 1)


def init_torch_params(key):
    """PyTorch-Conv2d-style uniform init in torch (Cout,Cin,kh,kw) layout."""
    params = []
    for (cin, cout, k, s, p, act) in _LAYER_CFG:
        key, wk, bk = jax.random.split(key, 3)
        bound = 1.0 / ((cin * k * k) ** 0.5)
        w = jax.random.uniform(wk, (cout, cin, k, k), jnp.float32, -bound, bound)
        b = jax.random.uniform(bk, (cout,), jnp.float32, -bound, bound)
        params.append((w, b))
    return params


def prepare_params(torch_params):
    """(Cout,Cin,3,3) -> (9, Cin, Cout); MXU weights bf16 (f32 accumulate in
    kernel); layer-1 weight stays f32 (VPU path); last layer zero-padded
    16 -> 128 output lanes for dense stores."""
    prep = []
    last = len(torch_params) - 1
    for idx, (w, b) in enumerate(torch_params):
        cout, cin, kh, kw = w.shape
        wm = jnp.transpose(w, (2, 3, 1, 0)).reshape(kh * kw, cin, cout)
        bm = b.reshape(1, cout).astype(jnp.float32)
        if idx == 0:
            wm = wm.reshape(kh * kw, cout).astype(jnp.float32)   # Cin == 1
        else:
            wm = wm.astype(jnp.bfloat16)
        if idx == last:
            pad = _LANE - cout
            wm = jnp.pad(wm, ((0, 0), (0, 0), (0, pad)))
            bm = jnp.pad(bm, ((0, 0), (0, pad)))
        prep.append((wm, bm))
    return prep


def autoencoder_forward(x, prepared, *, block_batch=1):
    """x: (N, H, W) f32 -> (N, 16, H//4, W//4) f32 (PyTorch NCHW convention)."""
    n, h, w = x.shape
    bt = block_batch
    assert h % 4 == 0 and w % 4 == 0 and n % bt == 0
    oh, ow = h // 4, w // 4
    row = ow + 2
    mp = (oh + 2) * row
    mp8 = _round_up(mp, 8)
    guard = _round_up(ow + 3, 8)
    rows = guard + mp8 + guard
    c1, c2 = _LAYER_CFG[0][1], _LAYER_CFG[1][1]
    c3, c4 = _LAYER_CFG[2][1], _LAYER_CFG[3][1]
    c_true = _LAYER_CFG[-1][1]

    xq = _prepare_input(x, oh, ow, mp8, guard)
    mask = _interior_mask(oh, ow, mp8)
    flat = [a for wb in prepared for a in wb]
    args = [mask, xq] + flat

    def _const_spec(a):
        return pl.BlockSpec(a.shape, lambda i, nd=a.ndim: (0,) * nd)

    in_specs = [_const_spec(mask),
                pl.BlockSpec((bt, 4, 4, rows, 1), lambda i: (i, 0, 0, 0, 0))]
    in_specs += [_const_spec(a) for a in flat]

    out_shape = jax.ShapeDtypeStruct((n, mp8, _LANE), jnp.float32)
    out_spec = pl.BlockSpec((bt, mp8, _LANE), lambda i: (i, 0, 0))

    flops = 2 * n * ((h // 2) * (w // 2) * 9 * c1
                     + oh * ow * 9 * (c1 * c2 + c2 * c3 + c3 * c4 + c4 * c_true))
    nbytes = int(x.size * 4 + n * mp8 * _LANE * 4
                 + sum(a.size * a.dtype.itemsize for a in flat))
    cost = pl.CostEstimate(flops=int(flops),
                           transcendentals=int(n * oh * ow * c_true),
                           bytes_accessed=nbytes)

    out = pl.pallas_call(
        functools.partial(_encoder_kernel, oh=oh, ow=ow, bt=bt, guard=guard),
        out_shape=out_shape,
        grid=(n // bt,),
        in_specs=in_specs,
        out_specs=out_spec,
        scratch_shapes=[
            pltpu.VMEM((2, 2, bt, rows, c1), jnp.bfloat16),   # phase-split y1
            pltpu.VMEM((bt, rows, c2), jnp.bfloat16),         # act 2 (flat, padded)
            pltpu.VMEM((bt, rows, c3), jnp.bfloat16),         # act 3
            pltpu.VMEM((bt, rows, c4), jnp.bfloat16),         # act 4
        ],
        compiler_params=pltpu.CompilerParams(
            dimension_semantics=("parallel",),
            vmem_limit_bytes=48 * 1024 * 1024),
        cost_estimate=cost,
    )(*args)

    # Drop ring/alignment rows + lane padding on the tiny final tensor, NCHW.
    out = out[:, :mp, :].reshape(n, oh + 2, ow + 2, _LANE)
    out = out[:, 1:1 + oh, 1:1 + ow, :c_true]
    return jnp.transpose(out, (0, 3, 1, 2))


# -----------------------------------------------------------------------------
# Pure-JAX reference (f32) for a correctness check
# -----------------------------------------------------------------------------
def reference_forward(x, torch_params):
    y = x[..., None]                                           # NHWC, C=1
    for (w, b), (cin, cout, k, s, p, act) in zip(torch_params, _LAYER_CFG):
        y = jax.lax.conv_general_dilated(
            y, jnp.transpose(w, (2, 3, 1, 0)), window_strides=(s, s),
            padding=((p, p), (p, p)),
            dimension_numbers=("NHWC", "HWIO", "NHWC"))
        y = y + b
        y = jnp.maximum(y, 0.0) if act == "relu" else jnp.tanh(y)
    return jnp.transpose(y, (0, 3, 1, 2))


if __name__ == "__main__":
    key = jax.random.PRNGKey(0)
    kx, kp = jax.random.split(key)
    x = jax.random.normal(kx, (2, 16, 16), jnp.float32)        # batch=2, 16x16

    torch_params = init_torch_params(kp)
    params = prepare_params(torch_params)

    # --- single image per grid step (grid parallel over batch) -------------
    fwd = jax.jit(functools.partial(autoencoder_forward, prepared=params,
                                    block_batch=1))
    out = jax.block_until_ready(fwd(x))
    assert out.shape == (2, 16, 4, 4), out.shape
    assert bool(jnp.all(jnp.isfinite(out)))
    ref = reference_forward(x, torch_params)
    err = float(jnp.max(jnp.abs(out - ref)))
    assert err < 8e-2, f"max abs err {err}"

    # --- batched grid step (B_TILE=2 folded into matmul M) ------------------
    x4 = jax.random.normal(jax.random.PRNGKey(1), (4, 16, 16), jnp.float32)
    fwd2 = jax.jit(functools.partial(autoencoder_forward, prepared=params,
                                     block_batch=2))
    out4 = jax.block_until_ready(fwd2(x4))
    ref4 = reference_forward(x4, torch_params)
    err4 = float(jnp.max(jnp.abs(out4 - ref4)))
    assert out4.shape == (4, 16, 4, 4) and err4 < 8e-2, f"max abs err {err4}"

    print("KERNEL_OK")
</pallas_src>

<mosaic_0001>
module attributes {stable_mosaic.version = 11 : i64} {
  func.func @_encoder_kernel(%arg0: i32, %arg1: memref<40x1xf32, #tpu.memory_space<vmem>>, %arg2: memref<1x4x4x56x1xf32, #tpu.memory_space<vmem>>, %arg3: memref<9x256xf32, #tpu.memory_space<vmem>>, %arg4: memref<1x256xf32, #tpu.memory_space<vmem>>, %arg5: memref<9x256x256xbf16, #tpu.memory_space<vmem>>, %arg6: memref<1x256xf32, #tpu.memory_space<vmem>>, %arg7: memref<9x256x128xbf16, #tpu.memory_space<vmem>>, %arg8: memref<1x128xf32, #tpu.memory_space<vmem>>, %arg9: memref<9x128x128xbf16, #tpu.memory_space<vmem>>, %arg10: memref<1x128xf32, #tpu.memory_space<vmem>>, %arg11: memref<9x128x128xbf16, #tpu.memory_space<vmem>>, %arg12: memref<1x128xf32, #tpu.memory_space<vmem>>, %arg13: memref<1x40x128xf32, #tpu.memory_space<vmem>>, %arg14: memref<2x2x1x56x256xbf16, #tpu.memory_space<vmem>>, %arg15: memref<1x56x256xbf16, #tpu.memory_space<vmem>>, %arg16: memref<1x56x128xbf16, #tpu.memory_space<vmem>>, %arg17: memref<1x56x128xbf16, #tpu.memory_space<vmem>>) attributes {dimension_semantics = [#tpu.dimension_semantics<parallel>], iteration_bounds = array<i64: 2>, scalar_prefetch = 0 : i64, scratch_operands = 4 : i64, tpu.core_type = #tpu.core_type<tc>, window_params = [{pipeline_mode = #tpu.pipeline_mode<synchronous>, transform_indices = @transform_0, window_bounds = array<i64: 40, 1>}, {transform_indices = @transform_1, window_bounds = array<i64: 1, 4, 4, 56, 1>}, {pipeline_mode = #tpu.pipeline_mode<synchronous>, transform_indices = @transform_2, window_bounds = array<i64: 9, 256>}, {pipeline_mode = #tpu.pipeline_mode<synchronous>, transform_indices = @transform_3, window_bounds = array<i64: 1, 256>}, {pipeline_mode = #tpu.pipeline_mode<synchronous>, transform_indices = @transform_4, window_bounds = array<i64: 9, 256, 256>}, {pipeline_mode = #tpu.pipeline_mode<synchronous>, transform_indices = @transform_5, window_bounds = array<i64: 1, 256>}, {pipeline_mode = #tpu.pipeline_mode<synchronous>, transform_indices = @transform_6, window_bounds = array<i64: 9, 256, 128>}, {pipeline_mode = #tpu.pipeline_mode<synchronous>, transform_indices = @transform_7, window_bounds = array<i64: 1, 128>}, {pipeline_mode = #tpu.pipeline_mode<synchronous>, transform_indices = @transform_8, window_bounds = array<i64: 9, 128, 128>}, {pipeline_mode = #tpu.pipeline_mode<synchronous>, transform_indices = @transform_9, window_bounds = array<i64: 1, 128>}, {pipeline_mode = #tpu.pipeline_mode<synchronous>, transform_indices = @transform_10, window_bounds = array<i64: 9, 128, 128>}, {pipeline_mode = #tpu.pipeline_mode<synchronous>, transform_indices = @transform_11, window_bounds = array<i64: 1, 128>}, {transform_indices = @transform_12, window_bounds = array<i64: 1, 40, 128>}]} {
    %c0 = arith.constant 0 : index
    %c0_0 = arith.constant 0 : index
    %0 = vector.load %arg1[%c0, %c0_0] : memref<40x1xf32, #tpu.memory_space<vmem>>, vector<40x1xf32>
    %cst = arith.constant 0.000000e+00 : f32
    %1 = vector.broadcast %cst : f32 to vector<40x1xf32>
    %2 = arith.cmpf ogt, %0, %1 : vector<40x1xf32>
    %c0_1 = arith.constant 0 : index
    %c0_2 = arith.constant 0 : index
    %3 = vector.load %arg4[%c0_1, %c0_2] : memref<1x256xf32, #tpu.memory_space<vmem>>, vector<1x256xf32>
    %4 = vector.shape_cast %3 : vector<1x256xf32> to vector<256xf32>
    %5 = vector.shape_cast %4 : vector<256xf32> to vector<1x1x256xf32>
    %6 = vector.broadcast %5 : vector<1x1x256xf32> to vector<1x40x256xf32>
    %c0_3 = arith.constant 0 : index
    %c3 = arith.constant 3 : index
    %c3_4 = arith.constant 3 : index
    %c1 = arith.constant 1 : index
    %c0_5 = arith.constant 0 : index
    %7 = vector.load %arg2[%c0_3, %c3, %c3_4, %c1, %c0_5] : memref<1x4x4x56x1xf32, #tpu.memory_space<vmem>>, vector<1x1x1x40x1xf32>
    %8 = vector.shape_cast %7 : vector<1x1x1x40x1xf32> to vector<1x40x1xf32>
    %c0_6 = arith.constant 0 : index
    %c0_7 = arith.constant 0 : index
    %9 = vector.load %arg3[%c0_6, %c0_7] : memref<9x256xf32, #tpu.memory_space<vmem>>, vector<1x256xf32>
    %10 = vector.shape_cast %9 : vector<1x256xf32> to vector<256xf32>
    %11 = vector.shape_cast %10 : vector<256xf32> to vector<1x1x256xf32>
    %12 = vector.broadcast %8 : vector<1x40x1xf32> to vector<1x40x256xf32>
    %13 = vector.broadcast %11 : vector<1x1x256xf32> to vector<1x40x256xf32>
    %14 = arith.mulf %12, %13 : vector<1x40x256xf32>
    %15 = arith.addf %6, %14 : vector<1x40x256xf32>
    %c0_8 = arith.constant 0 : index
    %c3_9 = arith.constant 3 : index
    %c0_10 = arith.constant 0 : index
    %c2 = arith.constant 2 : index
    %c0_11 = arith.constant 0 : index
    %16 = vector.load %arg2[%c0_8, %c3_9, %c0_10, %c2, %c0_11] : memref<1x4x4x56x1xf32, #tpu.memory_space<vmem>>, vector<1x1x1x40x1xf32>
    %17 = vector.shape_cast %16 : vector<1x1x1x40x1xf32> to vector<1x40x1xf32>
    %c1_12 = arith.constant 1 : index
    %c0_13 = arith.constant 0 : index
    %18 = vector.load %arg3[%c1_12, %c0_13] : memref<9x256xf32, #tpu.memory_space<vmem>>, vector<1x256xf32>
    %19 = vector.shape_cast %18 : vector<1x256xf32> to vector<256xf32>
    %20 = vector.shape_cast %19 : vector<256xf32> to vector<1x1x256xf32>
    %21 = vector.broadcast %17 : vector<1x40x1xf32> to vector<1x40x256xf32>
    %22 = vector.broadcast %20 : vector<1x1x256xf32> to vector<1x40x256xf32>
    %23 = arith.mulf %21, %22 : vector<1x40x256xf32>
    %24 = arith.addf %15, %23 : vector<1x40x256xf32>
    %c0_14 = arith.constant 0 : index
    %c3_15 = arith.constant 3 : index
    %c1_16 = arith.constant 1 : index
    %c2_17 = arith.constant 2 : index
    %c0_18 = arith.constant 0 : index
    %25 = vector.load %arg2[%c0_14, %c3_15, %c1_16, %c2_17, %c0_18] : memref<1x4x4x56x1xf32, #tpu.memory_space<vmem>>, vector<1x1x1x40x1xf32>
    %26 = vector.shape_cast %25 : vector<1x1x1x40x1xf32> to vector<1x40x1xf32>
    %c2_19 = arith.constant 2 : index
    %c0_20 = arith.constant 0 : index
    %27 = vector.load %arg3[%c2_19, %c0_20] : memref<9x256xf32, #tpu.memory_space<vmem>>, vector<1x256xf32>
    %28 = vector.shape_cast %27 : vector<1x256xf32> to vector<256xf32>
    %29 = vector.shape_cast %28 : vector<256xf32> to vector<1x1x256xf32>
    %30 = vector.broadcast %26 : vector<1x40x1xf32> to vector<1x40x256xf32>
    %31 = vector.broadcast %29 : vector<1x1x256xf32> to vector<1x40x256xf32>
    %32 = arith.mulf %30, %31 : vector<1x40x256xf32>
    %33 = arith.addf %24, %32 : vector<1x40x256xf32>
    %c0_21 = arith.constant 0 : index
    %c0_22 = arith.constant 0 : index
    %c3_23 = arith.constant 3 : index
    %c7 = arith.constant 7 : index
    %c0_24 = arith.constant 0 : index
    %34 = vector.load %arg2[%c0_21, %c0_22, %c3_23, %c7, %c0_24] : memref<1x4x4x56x1xf32, #tpu.memory_space<vmem>>, vector<1x1x1x40x1xf32>
    %35 = vector.shape_cast %34 : vector<1x1x1x40x1xf32> to vector<1x40x1xf32>
    %c3_25 = arith.constant 3 : index
    %c0_26 = arith.constant 0 : index
    %36 = vector.load %arg3[%c3_25, %c0_26] : memref<9x256xf32, #tpu.memory_space<vmem>>, vector<1x256xf32>
    %37 = vector.shape_cast %36 : vector<1x256xf32> to vector<256xf32>
    %38 = vector.shape_cast %37 : vector<256xf32> to vector<1x1x256xf32>
    %39 = vector.broadcast %35 : vector<1x40x1xf32> to vector<1x40x256xf32>
    %40 = vector.broadcast %38 : vector<1x1x256xf32> to vector<1x40x256xf32>
    %41 = arith.mulf %39, %40 : vector<1x40x256xf32>
    %42 = arith.addf %33, %41 : vector<1x40x256xf32>
    %c0_27 = arith.constant 0 : index
    %c0_28 = arith.constant 0 : index
    %c0_29 = arith.constant 0 : index
    %c8 = arith.constant 8 : index
    %c0_30 = arith.constant 0 : index
    %43 = vector.load %arg2[%c0_27, %c0_28, %c0_29, %c8, %c0_30] : memref<1x4x4x56x1xf32, #tpu.memory_space<vmem>>, vector<1x1x1x40x1xf32>
    %44 = vector.shape_cast %43 : vector<1x1x1x40x1xf32> to vector<1x40x1xf32>
    %c4 = arith.constant 4 : index
    %c0_31 = arith.constant 0 : index
    %45 = vector.load %arg3[%c4, %c0_31] : memref<9x256xf32, #tpu.memory_space<vmem>>, vector<1x256xf32>
    %46 = vector.shape_cast %45 : vector<1x256xf32> to vector<256xf32>
    %47 = vector.shape_cast %46 : vector<256xf32> to vector<1x1x256xf32>
    %48 = vector.broadcast %44 : vector<1x40x1xf32> to vector<1x40x256xf32>
    %49 = vector.broadcast %47 : vector<1x1x256xf32> to vector<1x40x256xf32>
    %50 = arith.mulf %48, %49 : vector<1x40x256xf32>
    %51 = arith.addf %42, %50 : vector<1x40x256xf32>
    %c0_32 = arith.constant 0 : index
    %c0_33 = arith.constant 0 : index
    %c1_34 = arith.constant 1 : index
    %c8_35 = arith.constant 8 : index
    %c0_36 = arith.constant 0 : index
    %52 = vector.load %arg2[%c0_32, %c0_33, %c1_34, %c8_35, %c0_36] : memref<1x4x4x56x1xf32, #tpu.memory_space<vmem>>, vector<1x1x1x40x1xf32>
    %53 = vector.shape_cast %52 : vector<1x1x1x40x1xf32> to vector<1x40x1xf32>
    %c5 = arith.constant 5 : index
    %c0_37 = arith.constant 0 : index
    %54 = vector.load %arg3[%c5, %c0_37] : memref<9x256xf32, #tpu.memory_space<vmem>>, vector<1x256xf32>
    %55 = vector.shape_cast %54 : vector<1x256xf32> to vector<256xf32>
    %56 = vector.shape_cast %55 : vector<256xf32> to vector<1x1x256xf32>
    %57 = vector.broadcast %53 : vector<1x40x1xf32> to vector<1x40x256xf32>
    %58 = vector.broadcast %56 : vector<1x1x256xf32> to vector<1x40x256xf32>
    %59 = arith.mulf %57, %58 : vector<1x40x256xf32>
    %60 = arith.addf %51, %59 : vector<1x40x256xf32>
    %c0_38 = arith.constant 0 : index
    %c1_39 = arith.constant 1 : index
    %c3_40 = arith.constant 3 : index
    %c7_41 = arith.constant 7 : index
    %c0_42 = arith.constant 0 : index
    %61 = vector.load %arg2[%c0_38, %c1_39, %c3_40, %c7_41, %c0_42] : memref<1x4x4x56x1xf32, #tpu.memory_space<vmem>>, vector<1x1x1x40x1xf32>
    %62 = vector.shape_cast %61 : vector<1x1x1x40x1xf32> to vector<1x40x1xf32>
    %c6 = arith.constant 6 : index
    %c0_43 = arith.constant 0 : index
    %63 = vector.load %arg3[%c6, %c0_43] : memref<9x256xf32, #tpu.memory_space<vmem>>, vector<1x256xf32>
    %64 = vector.shape_cast %63 : vector<1x256xf32> to vector<256xf32>
    %65 = vector.shape_cast %64 : vector<256xf32> to vector<1x1x256xf32>
    %66 = vector.broadcast %62 : vector<1x40x1xf32> to vector<1x40x256xf32>
    %67 = vector.broadcast %65 : vector<1x1x256xf32> to vector<1x40x256xf32>
    %68 = arith.mulf %66, %67 : vector<1x40x256xf32>
    %69 = arith.addf %60, %68 : vector<1x40x256xf32>
    %c0_44 = arith.constant 0 : index
    %c1_45 = arith.constant 1 : index
    %c0_46 = arith.constant 0 : index
    %c8_47 = arith.constant 8 : index
    %c0_48 = arith.constant 0 : index
    %70 = vector.load %arg2[%c0_44, %c1_45, %c0_46, %c8_47, %c0_48] : memref<1x4x4x56x1xf32, #tpu.memory_space<vmem>>, vector<1x1x1x40x1xf32>
    %71 = vector.shape_cast %70 : vector<1x1x1x40x1xf32> to vector<1x40x1xf32>
    %c7_49 = arith.constant 7 : index
    %c0_50 = arith.constant 0 : index
    %72 = vector.load %arg3[%c7_49, %c0_50] : memref<9x256xf32, #tpu.memory_space<vmem>>, vector<1x256xf32>
    %73 = vector.shape_cast %72 : vector<1x256xf32> to vector<256xf32>
    %74 = vector.shape_cast %73 : vector<256xf32> to vector<1x1x256xf32>
    %75 = vector.broadcast %71 : vector<1x40x1xf32> to vector<1x40x256xf32>
    %76 = vector.broadcast %74 : vector<1x1x256xf32> to vector<1x40x256xf32>
    %77 = arith.mulf %75, %76 : vector<1x40x256xf32>
    %78 = arith.addf %69, %77 : vector<1x40x256xf32>
    %c0_51 = arith.constant 0 : index
    %c1_52 = arith.constant 1 : index
    %c1_53 = arith.constant 1 : index
    %c8_54 = arith.constant 8 : index
    %c0_55 = arith.constant 0 : index
    %79 = vector.load %arg2[%c0_51, %c1_52, %c1_53, %c8_54, %c0_55] : memref<1x4x4x56x1xf32, #tpu.memory_space<vmem>>, vector<1x1x1x40x1xf32>
    %80 = vector.shape_cast %79 : vector<1x1x1x40x1xf32> to vector<1x40x1xf32>
    %c8_56 = arith.constant 8 : index
    %c0_57 = arith.constant 0 : index
    %81 = vector.load %arg3[%c8_56, %c0_57] : memref<9x256xf32, #tpu.memory_space<vmem>>, vector<1x256xf32>
    %82 = vector.shape_cast %81 : vector<1x256xf32> to vector<256xf32>
    %83 = vector.shape_cast %82 : vector<256xf32> to vector<1x1x256xf32>
    %84 = vector.broadcast %80 : vector<1x40x1xf32> to vector<1x40x256xf32>
    %85 = vector.broadcast %83 : vector<1x1x256xf32> to vector<1x40x256xf32>
    %86 = arith.mulf %84, %85 : vector<1x40x256xf32>
    %87 = arith.addf %78, %86 : vector<1x40x256xf32>
    %cst_58 = arith.constant 0.000000e+00 : f32
    %88 = vector.broadcast %cst_58 : f32 to vector<1x40x256xf32>
    %89 = arith.maximumf %87, %88 : vector<1x40x256xf32>
    %cst_59 = arith.constant 0.000000e+00 : f32
    %90 = vector.shape_cast %2 : vector<40x1xi1> to vector<1x40x1xi1>
    %91 = vector.broadcast %90 : vector<1x40x1xi1> to vector<1x40x256xi1>
    %92 = vector.broadcast %cst_59 : f32 to vector<1x40x256xf32>
    %93 = arith.select %91, %89, %92 : vector<1x40x256xi1>, vector<1x40x256xf32>
    %94 = arith.truncf %93 : vector<1x40x256xf32> to vector<1x40x256xbf16>
    %c0_60 = arith.constant 0 : index
    %c0_61 = arith.constant 0 : index
    %c0_62 = arith.constant 0 : index
    %c8_63 = arith.constant 8 : index
    %c0_64 = arith.constant 0 : index
    %95 = vector.load %arg14[%c0_60, %c0_61, %c0_62, %c8_63, %c0_64] : memref<2x2x1x56x256xbf16, #tpu.memory_space<vmem>>, vector<1x1x1x40x256xbf16>
    %96 = vector.shape_cast %95 : vector<1x1x1x40x256xbf16> to vector<1x40x256xbf16>
    %97 = vector.shape_cast %94 : vector<1x40x256xbf16> to vector<1x1x1x40x256xbf16>
    tpu.vector_store %arg14[%c0_60, %c0_61, %c0_62, %c8_63, %c0_64], %97 {strides = array<i32>} : memref<2x2x1x56x256xbf16, #tpu.memory_space<vmem>>, vector<1x1x1x40x256xbf16>,
    %98 = vector.shape_cast %4 : vector<256xf32> to vector<1x1x256xf32>
    %99 = vector.broadcast %98 : vector<1x1x256xf32> to vector<1x40x256xf32>
    %c0_65 = arith.constant 0 : index
    %c3_66 = arith.constant 3 : index
    %c1_67 = arith.constant 1 : index
    %c2_68 = arith.constant 2 : index
    %c0_69 = arith.constant 0 : index
    %100 = vector.load %arg2[%c0_65, %c3_66, %c1_67, %c2_68, %c0_69] : memref<1x4x4x56x1xf32, #tpu.memory_space<vmem>>, vector<1x1x1x40x1xf32>
    %101 = vector.shape_cast %100 : vector<1x1x1x40x1xf32> to vector<1x40x1xf32>
    %c0_70 = arith.constant 0 : index
    %c0_71 = arith.constant 0 : index
    %102 = vector.load %arg3[%c0_70, %c0_71] : memref<9x256xf32, #tpu.memory_space<vmem>>, vector<1x256xf32>
    %103 = vector.shape_cast %102 : vector<1x256xf32> to vector<256xf32>
    %104 = vector.shape_cast %103 : vector<256xf32> to vector<1x1x256xf32>
    %105 = vector.broadcast %101 : vector<1x40x1xf32> to vector<1x40x256xf32>
    %106 = vector.broadcast %104 : vector<1x1x256xf32> to vector<1x40x256xf32>
    %107 = arith.mulf %105, %106 : vector<1x40x256xf32>
    %108 = arith.addf %99, %107 : vector<1x40x256xf32>
    %c0_72 = arith.constant 0 : index
    %c3_73 = arith.constant 3 : index
    %c2_74 = arith.constant 2 : index
    %c2_75 = arith.constant 2 : index
    %c0_76 = arith.constant 0 : index
    %109 = vector.load %arg2[%c0_72, %c3_73, %c2_74, %c2_75, %c0_76] : memref<1x4x4x56x1xf32, #tpu.memory_space<vmem>>, vector<1x1x1x40x1xf32>
    %110 = vector.shape_cast %109 : vector<1x1x1x40x1xf32> to vector<1x40x1xf32>
    %c1_77 = arith.constant 1 : index
    %c0_78 = arith.constant 0 : index
    %111 = vector.load %arg3[%c1_77, %c0_78] : memref<9x256xf32, #tpu.memory_space<vmem>>, vector<1x256xf32>
    %112 = vector.shape_cast %111 : vector<1x256xf32> to vector<256xf32>
    %113 = vector.shape_cast %112 : vector<256xf32> to vector<1x1x256xf32>
    %114 = vector.broadcast %110 : vector<1x40x1xf32> to vector<1x40x256xf32>
    %115 = vector.broadcast %113 : vector<1x1x256xf32> to vector<1x40x256xf32>
    %116 = arith.mulf %114, %115 : vector<1x40x256xf32>
    %117 = arith.addf %108, %116 : vector<1x40x256xf32>
    %c0_79 = arith.constant 0 : index
    %c3_80 = arith.constant 3 : index
    %c3_81 = arith.constant 3 : index
    %c2_82 = arith.constant 2 : index
    %c0_83 = arith.constant 0 : index
    %118 = vector.load %arg2[%c0_79, %c3_80, %c3_81, %c2_82, %c0_83] : memref<1x4x4x56x1xf32, #tpu.memory_space<vmem>>, vector<1x1x1x40x1xf32>
    %119 = vector.shape_cast %118 : vector<1x1x1x40x1xf32> to vector<1x40x1xf32>
    %c2_84 = arith.constant 2 : index
    %c0_85 = arith.constant 0 : index
    %120 = vector.load %arg3[%c2_84, %c0_85] : memref<9x256xf32, #tpu.memory_space<vmem>>, vector<1x256xf32>
    %121 = vector.shape_cast %120 : vector<1x256xf32> to vector<256xf32>
    %122 = vector.shape_cast %121 : vector<256xf32> to vector<1x1x256xf32>
    %123 = vector.broadcast %119 : vector<1x40x1xf32> to vector<1x40x256xf32>
    %124 = vector.broadcast %122 : vector<1x1x256xf32> to vector<1x40x256xf32>
    %125 = arith.mulf %123, %124 : vector<1x40x256xf32>
    %126 = arith.addf %117, %125 : vector<1x40x256xf32>
    %c0_86 = arith.constant 0 : index
    %c0_87 = arith.constant 0 : index
    %c1_88 = arith.constant 1 : index
    %c8_89 = arith.constant 8 : index
    %c0_90 = arith.constant 0 : index
    %127 = vector.load %arg2[%c0_86, %c0_87, %c1_88, %c8_89, %c0_90] : memref<1x4x4x56x1xf32, #tpu.memory_space<vmem>>, vector<1x1x1x40x1xf32>
    %128 = vector.shape_cast %127 : vector<1x1x1x40x1xf32> to vector<1x40x1xf32>
    %c3_91 = arith.constant 3 : index
    %c0_92 = arith.constant 0 : index
    %129 = vector.load %arg3[%c3_91, %c0_92] : memref<9x256xf32, #tpu.memory_space<vmem>>, vector<1x256xf32>
    %130 = vector.shape_cast %129 : vector<1x256xf32> to vector<256xf32>
    %131 = vector.shape_cast %130 : vector<256xf32> to vector<1x1x256xf32>
    %132 = vector.broadcast %128 : vector<1x40x1xf32> to vector<1x40x256xf32>
    %133 = vector.broadcast %131 : vector<1x1x256xf32> to vector<1x40x256xf32>
    %134 = arith.mulf %132, %133 : vector<1x40x256xf32>
    %135 = arith.addf %126, %134 : vector<1x40x256xf32>
    %c0_93 = arith.constant 0 : index
    %c0_94 = arith.constant 0 : index
    %c2_95 = arith.constant 2 : index
    %c8_96 = arith.constant 8 : index
    %c0_97 = arith.constant 0 : index
    %136 = vector.load %arg2[%c0_93, %c0_94, %c2_95, %c8_96, %c0_97] : memref<1x4x4x56x1xf32, #tpu.memory_space<vmem>>, vector<1x1x1x40x1xf32>
    %137 = vector.shape_cast %136 : vector<1x1x1x40x1xf32> to vector<1x40x1xf32>
    %c4_98 = arith.constant 4 : index
    %c0_99 = arith.constant 0 : index
    %138 = vector.load %arg3[%c4_98, %c0_99] : memref<9x256xf32, #tpu.memory_space<vmem>>, vector<1x256xf32>
    %139 = vector.shape_cast %138 : vector<1x256xf32> to vector<256xf32>
    %140 = vector.shape_cast %139 : vector<256xf32> to vector<1x1x256xf32>
    %141 = vector.broadcast %137 : vector<1x40x1xf32> to vector<1x40x256xf32>
    %142 = vector.broadcast %140 : vector<1x1x256xf32> to vector<1x40x256xf32>
    %143 = arith.mulf %141, %142 : vector<1x40x256xf32>
    %144 = arith.addf %135, %143 : vector<1x40x256xf32>
    %c0_100 = arith.constant 0 : index
    %c0_101 = arith.constant 0 : index
    %c3_102 = arith.constant 3 : index
    %c8_103 = arith.constant 8 : index
    %c0_104 = arith.constant 0 : index
    %145 = vector.load %arg2[%c0_100, %c0_101, %c3_102, %c8_103, %c0_104] : memref<1x4x4x56x1xf32, #tpu.memory_space<vmem>>, vector<1x1x1x40x1xf32>
    %146 = vector.shape_cast %145 : vector<1x1x1x40x1xf32> to vector<1x40x1xf32>
    %c5_105 = arith.constant 5 : index
    %c0_106 = arith.constant 0 : index
    %147 = vector.load %arg3[%c5_105, %c0_106] : memref<9x256xf32, #tpu.memory_space<vmem>>, vector<1x256xf32>
    %148 = vector.shape_cast %147 : vector<1x256xf32> to vector<256xf32>
    %149 = vector.shape_cast %148 : vector<256xf32> to vector<1x1x256xf32>
    %150 = vector.broadcast %146 : vector<1x40x1xf32> to vector<1x40x256xf32>
    %151 = vector.broadcast %149 : vector<1x1x256xf32> to vector<1x40x256xf32>
    %152 = arith.mulf %150, %151 : vector<1x40x256xf32>
    %153 = arith.addf %144, %152 : vector<1x40x256xf32>
    %c0_107 = arith.constant 0 : index
    %c1_108 = arith.constant 1 : index
    %c1_109 = arith.constant 1 : index
    %c8_110 = arith.constant 8 : index
    %c0_111 = arith.constant 0 : index
    %154 = vector.load %arg2[%c0_107, %c1_108, %c1_109, %c8_110, %c0_111] : memref<1x4x4x56x1xf32, #tpu.memory_space<vmem>>, vector<1x1x1x40x1xf32>
    %155 = vector.shape_cast %154 : vector<1x1x1x40x1xf32> to vector<1x40x1xf32>
    %c6_112 = arith.constant 6 : index
    %c0_113 = arith.constant 0 : index
    %156 = vector.load %arg3[%c6_112, %c0_113] : memref<9x256xf32, #tpu.memory_space<vmem>>, vector<1x256xf32>
    %157 = vector.shape_cast %156 : vector<1x256xf32> to vector<256xf32>
    %158 = vector.shape_cast %157 : vector<256xf32> to vector<1x1x256xf32>
    %159 = vector.broadcast %155 : vector<1x40x1xf32> to vector<1x40x256xf32>
    %160 = vector.broadcast %158 : vector<1x1x256xf32> to vector<1x40x256xf32>
    %161 = arith.mulf %159, %160 : vector<1x40x256xf32>
    %162 = arith.addf %153, %161 : vector<1x40x256xf32>
    %c0_114 = arith.constant 0 : index
    %c1_115 = arith.constant 1 : index
    %c2_116 = arith.constant 2 : index
    %c8_117 = arith.constant 8 : index
    %c0_118 = arith.constant 0 : index
    %163 = vector.load %arg2[%c0_114, %c1_115, %c2_116, %c8_117, %c0_118] : memref<1x4x4x56x1xf32, #tpu.memory_space<vmem>>, vector<1x1x1x40x1xf32>
    %164 = vector.shape_cast %163 : vector<1x1x1x40x1xf32> to vector<1x40x1xf32>
    %c7_119 = arith.constant 7 : index
    %c0_120 = arith.constant 0 : index
    %165 = vector.load %arg3[%c7_119, %c0_120] : memref<9x256xf32, #tpu.memory_space<vmem>>, vector<1x256xf32>
    %166 = vector.shape_cast %165 : vector<1x256xf32> to vector<256xf32>
    %167 = vector.shape_cast %166 : vector<256xf32> to vector<1x1x256xf32>
    %168 = vector.broadcast %164 : vector<1x40x1xf32> to vector<1x40x256xf32>
    %169 = vector.broadcast %167 : vector<1x1x256xf32> to vector<1x40x256xf32>
    %170 = arith.mulf %168, %169 : vector<1x40x256xf32>
    %171 = arith.addf %162, %170 : vector<1x40x256xf32>
    %c0_121 = arith.constant 0 : index
    %c1_122 = arith.constant 1 : index
    %c3_123 = arith.constant 3 : index
    %c8_124 = arith.constant 8 : index
    %c0_125 = arith.constant 0 : index
    %172 = vector.load %arg2[%c0_121, %c1_122, %c3_123, %c8_124, %c0_125] : memref<1x4x4x56x1xf32, #tpu.memory_space<vmem>>, vector<1x1x1x40x1xf32>
    %173 = vector.shape_cast %172 : vector<1x1x1x40x1xf32> to vector<1x40x1xf32>
    %c8_126 = arith.constant 8 : index
    %c0_127 = arith.constant 0 : index
    %174 = vector.load %arg3[%c8_126, %c0_127] : memref<9x256xf32, #tpu.memory_space<vmem>>, vector<1x256xf32>
    %175 = vector.shape_cast %174 : vector<1x256xf32> to vector<256xf32>
    %176 = vector.shape_cast %175 : vector<256xf32> to vector<1x1x256xf32>
    %177 = vector.broadcast %173 : vector<1x40x1xf32> to vector<1x40x256xf32>
    %178 = vector.broadcast %176 : vector<1x1x256xf32> to vector<1x40x256xf32>
    %179 = arith.mulf %177, %178 : vector<1x40x256xf32>
    %180 = arith.addf %171, %179 : vector<1x40x256xf32>
    %cst_128 = arith.constant 0.000000e+00 : f32
    %181 = vector.broadcast %cst_128 : f32 to vector<1x40x256xf32>
    %182 = arith.maximumf %180, %181 : vector<1x40x256xf32>
    %cst_129 = arith.constant 0.000000e+00 : f32
    %183 = vector.shape_cast %2 : vector<40x1xi1> to vector<1x40x1xi1>
    %184 = vector.broadcast %183 : vector<1x40x1xi1> to vector<1x40x256xi1>
    %185 = vector.broadcast %cst_129 : f32 to vector<1x40x256xf32>
    %186 = arith.select %184, %182, %185 : vector<1x40x256xi1>, vector<1x40x256xf32>
    %187 = arith.truncf %186 : vector<1x40x256xf32> to vector<1x40x256xbf16>
    %c0_130 = arith.constant 0 : index
    %c1_131 = arith.constant 1 : index
    %c0_132 = arith.constant 0 : index
    %c8_133 = arith.constant 8 : index
    %c0_134 = arith.constant 0 : index
    %188 = vector.load %arg14[%c0_130, %c1_131, %c0_132, %c8_133, %c0_134] : memref<2x2x1x56x256xbf16, #tpu.memory_space<vmem>>, vector<1x1x1x40x256xbf16>
    %189 = vector.shape_cast %188 : vector<1x1x1x40x256xbf16> to vector<1x40x256xbf16>
    %190 = vector.shape_cast %187 : vector<1x40x256xbf16> to vector<1x1x1x40x256xbf16>
    tpu.vector_store %arg14[%c0_130, %c1_131, %c0_132, %c8_133, %c0_134], %190 {strides = array<i32>} : memref<2x2x1x56x256xbf16, #tpu.memory_space<vmem>>, vector<1x1x1x40x256xbf16>,
    %191 = vector.shape_cast %4 : vector<256xf32> to vector<1x1x256xf32>
    %192 = vector.broadcast %191 : vector<1x1x256xf32> to vector<1x40x256xf32>
    %c0_135 = arith.constant 0 : index
    %c1_136 = arith.constant 1 : index
    %c3_137 = arith.constant 3 : index
    %c7_138 = arith.constant 7 : index
    %c0_139 = arith.constant 0 : index
    %193 = vector.load %arg2[%c0_135, %c1_136, %c3_137, %c7_138, %c0_139] : memref<1x4x4x56x1xf32, #tpu.memory_space<vmem>>, vector<1x1x1x40x1xf32>
    %194 = vector.shape_cast %193 : vector<1x1x1x40x1xf32> to vector<1x40x1xf32>
    %c0_140 = arith.constant 0 : index
    %c0_141 = arith.constant 0 : index
    %195 = vector.load %arg3[%c0_140, %c0_141] : memref<9x256xf32, #tpu.memory_space<vmem>>, vector<1x256xf32>
    %196 = vector.shape_cast %195 : vector<1x256xf32> to vector<256xf32>
    %197 = vector.shape_cast %196 : vector<256xf32> to vector<1x1x256xf32>
    %198 = vector.broadcast %194 : vector<1x40x1xf32> to vector<1x40x256xf32>
    %199 = vector.broadcast %197 : vector<1x1x256xf32> to vector<1x40x256xf32>
    %200 = arith.mulf %198, %199 : vector<1x40x256xf32>
    %201 = arith.addf %192, %200 : vector<1x40x256xf32>
    %c0_142 = arith.constant 0 : index
    %c1_143 = arith.constant 1 : index
    %c0_144 = arith.constant 0 : index
    %c8_145 = arith.constant 8 : index
    %c0_146 = arith.constant 0 : index
    %202 = vector.load %arg2[%c0_142, %c1_143, %c0_144, %c8_145, %c0_146] : memref<1x4x4x56x1xf32, #tpu.memory_space<vmem>>, vector<1x1x1x40x1xf32>
    %203 = vector.shape_cast %202 : vector<1x1x1x40x1xf32> to vector<1x40x1xf32>
    %c1_147 = arith.constant 1 : index
    %c0_148 = arith.constant 0 : index
    %204 = vector.load %arg3[%c1_147, %c0_148] : memref<9x256xf32, #tpu.memory_space<vmem>>, vector<1x256xf32>
    %205 = vector.shape_cast %204 : vector<1x256xf32> to vector<256xf32>
    %206 = vector.shape_cast %205 : vector<256xf32> to vector<1x1x256xf32>
    %207 = vector.broadcast %203 : vector<1x40x1xf32> to vector<1x40x256xf32>
    %208 = vector.broadcast %206 : vector<1x1x256xf32> to vector<1x40x256xf32>
    %209 = arith.mulf %207, %208 : vector<1x40x256xf32>
    %210 = arith.addf %201, %209 : vector<1x40x256xf32>
    %c0_149 = arith.constant 0 : index
    %c1_150 = arith.constant 1 : index
    %c1_151 = arith.constant 1 : index
    %c8_152 = arith.constant 8 : index
    %c0_153 = arith.constant 0 : index
    %211 = vector.load %arg2[%c0_149, %c1_150, %c1_151, %c8_152, %c0_153] : memref<1x4x4x56x1xf32, #tpu.memory_space<vmem>>, vector<1x1x1x40x1xf32>
    %212 = vector.shape_cast %211 : vector<1x1x1x40x1xf32> to vector<1x40x1xf32>
    %c2_154 = arith.constant 2 : index
    %c0_155 = arith.constant 0 : index
    %213 = vector.load %arg3[%c2_154, %c0_155] : memref<9x256xf32, #tpu.memory_space<vmem>>, vector<1x256xf32>
    %214 = vector.shape_cast %213 : vector<1x256xf32> to vector<256xf32>
    %215 = vector.shape_cast %214 : vector<256xf32> to vector<1x1x256xf32>
    %216 = vector.broadcast %212 : vector<1x40x1xf32> to vector<1x40x256xf32>
    %217 = vector.broadcast %215 : vector<1x1x256xf32> to vector<1x40x256xf32>
    %218 = arith.mulf %216, %217 : vector<1x40x256xf32>
    %219 = arith.addf %210, %218 : vector<1x40x256xf32>
    %c0_156 = arith.constant 0 : index
    %c2_157 = arith.constant 2 : index
    %c3_158 = arith.constant 3 : index
    %c7_159 = arith.constant 7 : index
    %c0_160 = arith.constant 0 : index
    %220 = vector.load %arg2[%c0_156, %c2_157, %c3_158, %c7_159, %c0_160] : memref<1x4x4x56x1xf32, #tpu.memory_space<vmem>>, vector<1x1x1x40x1xf32>
    %221 = vector.shape_cast %220 : vector<1x1x1x40x1xf32> to vector<1x40x1xf32>
    %c3_161 = arith.constant 3 : index
    %c0_162 = arith.constant 0 : index
    %222 = vector.load %arg3[%c3_161, %c0_162] : memref<9x256xf32, #tpu.memory_space<vmem>>, vector<1x256xf32>
    %223 = vector.shape_cast %222 : vector<1x256xf32> to vector<256xf32>
    %224 = vector.shape_cast %223 : vector<256xf32> to vector<1x1x256xf32>
    %225 = vector.broadcast %221 : vector<1x40x1xf32> to vector<1x40x256xf32>
    %226 = vector.broadcast %224 : vector<1x1x256xf32> to vector<1x40x256xf32>
    %227 = arith.mulf %225, %226 : vector<1x40x256xf32>
    %228 = arith.addf %219, %227 : vector<1x40x256xf32>
    %c0_163 = arith.constant 0 : index
    %c2_164 = arith.constant 2 : index
    %c0_165 = arith.constant 0 : index
    %c8_166 = arith.constant 8 : index
    %c0_167 = arith.constant 0 : index
    %229 = vector.load %arg2[%c0_163, %c2_164, %c0_165, %c8_166, %c0_167] : memref<1x4x4x56x1xf32, #tpu.memory_space<vmem>>, vector<1x1x1x40x1xf32>
    %230 = vector.shape_cast %229 : vector<1x1x1x40x1xf32> to vector<1x40x1xf32>
    %c4_168 = arith.constant 4 : index
    %c0_169 = arith.constant 0 : index
    %231 = vector.load %arg3[%c4_168, %c0_169] : memref<9x256xf32, #tpu.memory_space<vmem>>, vector<1x256xf32>
    %232 = vector.shape_cast %231 : vector<1x256xf32> to vector<256xf32>
    %233 = vector.shape_cast %232 : vector<256xf32> to vector<1x1x256xf32>
    %234 = vector.broadcast %230 : vector<1x40x1xf32> to vector<1x40x256xf32>
    %235 = vector.broadcast %233 : vector<1x1x256xf32> to vector<1x40x256xf32>
    %236 = arith.mulf %234, %235 : vector<1x40x256xf32>
    %237 = arith.addf %228, %236 : vector<1x40x256xf32>
    %c0_170 = arith.constant 0 : index
    %c2_171 = arith.constant 2 : index
    %c1_172 = arith.constant 1 : index
    %c8_173 = arith.constant 8 : index
    %c0_174 = arith.constant 0 : index
    %238 = vector.load %arg2[%c0_170, %c2_171, %c1_172, %c8_173, %c0_174] : memref<1x4x4x56x1xf32, #tpu.memory_space<vmem>>, vector<1x1x1x40x1xf32>
    %239 = vector.shape_cast %238 : vector<1x1x1x40x1xf32> to vector<1x40x1xf32>
    %c5_175 = arith.constant 5 : index
    %c0_176 = arith.constant 0 : index
    %240 = vector.load %arg3[%c5_175, %c0_176] : memref<9x256xf32, #tpu.memory_space<vmem>>, vector<1x256xf32>
    %241 = vector.shape_cast %240 : vector<1x256xf32> to vector<256xf32>
    %242 = vector.shape_cast %241 : vector<256xf32> to vector<1x1x256xf32>
    %243 = vector.broadcast %239 : vector<1x40x1xf32> to vector<1x40x256xf32>
    %244 = vector.broadcast %242 : vector<1x1x256xf32> to vector<1x40x256xf32>
    %245 = arith.mulf %243, %244 : vector<1x40x256xf32>
    %246 = arith.addf %237, %245 : vector<1x40x256xf32>
    %c0_177 = arith.constant 0 : index
    %c3_178 = arith.constant 3 : index
    %c3_179 = arith.constant 3 : index
    %c7_180 = arith.constant 7 : index
    %c0_181 = arith.constant 0 : index
    %247 = vector.load %arg2[%c0_177, %c3_178, %c3_179, %c7_180, %c0_181] : memref<1x4x4x56x1xf32, #tpu.memory_space<vmem>>, vector<1x1x1x40x1xf32>
    %248 = vector.shape_cast %247 : vector<1x1x1x40x1xf32> to vector<1x40x1xf32>
    %c6_182 = arith.constant 6 : index
    %c0_183 = arith.constant 0 : index
    %249 = vector.load %arg3[%c6_182, %c0_183] : memref<9x256xf32, #tpu.memory_space<vmem>>, vector<1x256xf32>
    %250 = vector.shape_cast %249 : vector<1x256xf32> to vector<256xf32>
    %251 = vector.shape_cast %250 : vector<256xf32> to vector<1x1x256xf32>
    %252 = vector.broadcast %248 : vector<1x40x1xf32> to vector<1x40x256xf32>
    %253 = vector.broadcast %251 : vector<1x1x256xf32> to vector<1x40x256xf32>
    %254 = arith.mulf %252, %253 : vector<1x40x256xf32>
    %255 = arith.addf %246, %254 : vector<1x40x256xf32>
    %c0_184 = arith.constant 0 : index
    %c3_185 = arith.constant 3 : index
    %c0_186 = arith.constant 0 : index
    %c8_187 = arith.constant 8 : index
    %c0_188 = arith.constant 0 : index
    %256 = vector.load %arg2[%c0_184, %c3_185, %c0_186, %c8_187, %c0_188] : memref<1x4x4x56x1xf32, #tpu.memory_space<vmem>>, vector<1x1x1x40x1xf32>
    %257 = vector.shape_cast %256 : vector<1x1x1x40x1xf32> to vector<1x40x1xf32>
    %c7_189 = arith.constant 7 : index
    %c0_190 = arith.constant 0 : index
    %258 = vector.load %arg3[%c7_189, %c0_190] : memref<9x256xf32, #tpu.memory_space<vmem>>, vector<1x256xf32>
    %259 = vector.shape_cast %258 : vector<1x256xf32> to vector<256xf32>
    %260 = vector.shape_cast %259 : vector<256xf32> to vector<1x1x256xf32>
    %261 = vector.broadcast %257 : vector<1x40x1xf32> to vector<1x40x256xf32>
    %262 = vector.broadcast %260 : vector<1x1x256xf32> to vector<1x40x256xf32>
    %263 = arith.mulf %261, %262 : vector<1x40x256xf32>
    %264 = arith.addf %255, %263 : vector<1x40x256xf32>
    %c0_191 = arith.constant 0 : index
    %c3_192 = arith.constant 3 : index
    %c1_193 = arith.constant 1 : index
    %c8_194 = arith.constant 8 : index
    %c0_195 = arith.constant 0 : index
    %265 = vector.load %arg2[%c0_191, %c3_192, %c1_193, %c8_194, %c0_195] : memref<1x4x4x56x1xf32, #tpu.memory_space<vmem>>, vector<1x1x1x40x1xf32>
    %266 = vector.shape_cast %265 : vector<1x1x1x40x1xf32> to vector<1x40x1xf32>
    %c8_196 = arith.constant 8 : index
    %c0_197 = arith.constant 0 : index
    %267 = vector.load %arg3[%c8_196, %c0_197] : memref<9x256xf32, #tpu.memory_space<vmem>>, vector<1x256xf32>
    %268 = vector.shape_cast %267 : vector<1x256xf32> to vector<256xf32>
    %269 = vector.shape_cast %268 : vector<256xf32> to vector<1x1x256xf32>
    %270 = vector.broadcast %266 : vector<1x40x1xf32> to vector<1x40x256xf32>
    %271 = vector.broadcast %269 : vector<1x1x256xf32> to vector<1x40x256xf32>
    %272 = arith.mulf %270, %271 : vector<1x40x256xf32>
    %273 = arith.addf %264, %272 : vector<1x40x256xf32>
    %cst_198 = arith.constant 0.000000e+00 : f32
    %274 = vector.broadcast %cst_198 : f32 to vector<1x40x256xf32>
    %275 = arith.maximumf %273, %274 : vector<1x40x256xf32>
    %cst_199 = arith.constant 0.000000e+00 : f32
    %276 = vector.shape_cast %2 : vector<40x1xi1> to vector<1x40x1xi1>
    %277 = vector.broadcast %276 : vector<1x40x1xi1> to vector<1x40x256xi1>
    %278 = vector.broadcast %cst_199 : f32 to vector<1x40x256xf32>
    %279 = arith.select %277, %275, %278 : vector<1x40x256xi1>, vector<1x40x256xf32>
    %280 = arith.truncf %279 : vector<1x40x256xf32> to vector<1x40x256xbf16>
    %c1_200 = arith.constant 1 : index
    %c0_201 = arith.constant 0 : index
    %c0_202 = arith.constant 0 : index
    %c8_203 = arith.constant 8 : index
    %c0_204 = arith.constant 0 : index
    %281 = vector.load %arg14[%c1_200, %c0_201, %c0_202, %c8_203, %c0_204] : memref<2x2x1x56x256xbf16, #tpu.memory_space<vmem>>, vector<1x1x1x40x256xbf16>
    %282 = vector.shape_cast %281 : vector<1x1x1x40x256xbf16> to vector<1x40x256xbf16>
    %283 = vector.shape_cast %280 : vector<1x40x256xbf16> to vector<1x1x1x40x256xbf16>
    tpu.vector_store %arg14[%c1_200, %c0_201, %c0_202, %c8_203, %c0_204], %283 {strides = array<i32>} : memref<2x2x1x56x256xbf16, #tpu.memory_space<vmem>>, vector<1x1x1x40x256xbf16>,
    %284 = vector.shape_cast %4 : vector<256xf32> to vector<1x1x256xf32>
    %285 = vector.broadcast %284 : vector<1x1x256xf32> to vector<1x40x256xf32>
    %c0_205 = arith.constant 0 : index
    %c1_206 = arith.constant 1 : index
    %c1_207 = arith.constant 1 : index
    %c8_208 = arith.constant 8 : index
    %c0_209 = arith.constant 0 : index
    %286 = vector.load %arg2[%c0_205, %c1_206, %c1_207, %c8_208, %c0_209] : memref<1x4x4x56x1xf32, #tpu.memory_space<vmem>>, vector<1x1x1x40x1xf32>
    %287 = vector.shape_cast %286 : vector<1x1x1x40x1xf32> to vector<1x40x1xf32>
    %c0_210 = arith.constant 0 : index
    %c0_211 = arith.constant 0 : index
    %288 = vector.load %arg3[%c0_210, %c0_211] : memref<9x256xf32, #tpu.memory_space<vmem>>, vector<1x256xf32>
    %289 = vector.shape_cast %288 : vector<1x256xf32> to vector<256xf32>
    %290 = vector.shape_cast %289 : vector<256xf32> to vector<1x1x256xf32>
    %291 = vector.broadcast %287 : vector<1x40x1xf32> to vector<1x40x256xf32>
    %292 = vector.broadcast %290 : vector<1x1x256xf32> to vector<1x40x256xf32>
    %293 = arith.mulf %291, %292 : vector<1x40x256xf32>
    %294 = arith.addf %285, %293 : vector<1x40x256xf32>
    %c0_212 = arith.constant 0 : index
    %c1_213 = arith.constant 1 : index
    %c2_214 = arith.constant 2 : index
    %c8_215 = arith.constant 8 : index
    %c0_216 = arith.constant 0 : index
    %295 = vector.load %arg2[%c0_212, %c1_213, %c2_214, %c8_215, %c0_216] : memref<1x4x4x56x1xf32, #tpu.memory_space<vmem>>, vector<1x1x1x40x1xf32>
    %296 = vector.shape_cast %295 : vector<1x1x1x40x1xf32> to vector<1x40x1xf32>
    %c1_217 = arith.constant 1 : index
    %c0_218 = arith.constant 0 : index
    %297 = vector.load %arg3[%c1_217, %c0_218] : memref<9x256xf32, #tpu.memory_space<vmem>>, vector<1x256xf32>
    %298 = vector.shape_cast %297 : vector<1x256xf32> to vector<256xf32>
    %299 = vector.shape_cast %298 : vector<256xf32> to vector<1x1x256xf32>
    %300 = vector.broadcast %296 : vector<1x40x1xf32> to vector<1x40x256xf32>
    %301 = vector.broadcast %299 : vector<1x1x256xf32> to vector<1x40x256xf32>
    %302 = arith.mulf %300, %301 : vector<1x40x256xf32>
    %303 = arith.addf %294, %302 : vector<1x40x256xf32>
    %c0_219 = arith.constant 0 : index
    %c1_220 = arith.constant 1 : index
    %c3_221 = arith.constant 3 : index
    %c8_222 = arith.constant 8 : index
    %c0_223 = arith.constant 0 : index
    %304 = vector.load %arg2[%c0_219, %c1_220, %c3_221, %c8_222, %c0_223] : memref<1x4x4x56x1xf32, #tpu.memory_space<vmem>>, vector<1x1x1x40x1xf32>
    %305 = vector.shape_cast %304 : vector<1x1x1x40x1xf32> to vector<1x40x1xf32>
    %c2_224 = arith.constant 2 : index
    %c0_225 = arith.constant 0 : index
    %306 = vector.load %arg3[%c2_224, %c0_225] : memref<9x256xf32, #tpu.memory_space<vmem>>, vector<1x256xf32>
    %307 = vector.shape_cast %306 : vector<1x256xf32> to vector<256xf32>
    %308 = vector.shape_cast %307 : vector<256xf32> to vector<1x1x256xf32>
    %309 = vector.broadcast %305 : vector<1x40x1xf32> to vector<1x40x256xf32>
    %310 = vector.broadcast %308 : vector<1x1x256xf32> to vector<1x40x256xf32>
    %311 = arith.mulf %309, %310 : vector<1x40x256xf32>
    %312 = arith.addf %303, %311 : vector<1x40x256xf32>
    %c0_226 = arith.constant 0 : index
    %c2_227 = arith.constant 2 : index
    %c1_228 = arith.constant 1 : index
    %c8_229 = arith.constant 8 : index
    %c0_230 = arith.constant 0 : index
    %313 = vector.load %arg2[%c0_226, %c2_227, %c1_228, %c8_229, %c0_230] : memref<1x4x4x56x1xf32, #tpu.memory_space<vmem>>, vector<1x1x1x40x1xf32>
    %314 = vector.shape_cast %313 : vector<1x1x1x40x1xf32> to vector<1x40x1xf32>
    %c3_231 = arith.constant 3 : index
    %c0_232 = arith.constant 0 : index
    %315 = vector.load %arg3[%c3_231, %c0_232] : memref<9x256xf32, #tpu.memory_space<vmem>>, vector<1x256xf32>
    %316 = vector.shape_cast %315 : vector<1x256xf32> to vector<256xf32>
    %317 = vector.shape_cast %316 : vector<256xf32> to vector<1x1x256xf32>
    %318 = vector.broadcast %314 : vector<1x40x1xf32> to vector<1x40x256xf32>
    %319 = vector.broadcast %317 : vector<1x1x256xf32> to vector<1x40x256xf32>
    %320 = arith.mulf %318, %319 : vector<1x40x256xf32>
    %321 = arith.addf %312, %320 : vector<1x40x256xf32>
    %c0_233 = arith.constant 0 : index
    %c2_234 = arith.constant 2 : index
    %c2_235 = arith.constant 2 : index
    %c8_236 = arith.constant 8 : index
    %c0_237 = arith.constant 0 : index
    %322 = vector.load %arg2[%c0_233, %c2_234, %c2_235, %c8_236, %c0_237] : memref<1x4x4x56x1xf32, #tpu.memory_space<vmem>>, vector<1x1x1x40x1xf32>
    %323 = vector.shape_cast %322 : vector<1x1x1x40x1xf32> to vector<1x40x1xf32>
    %c4_238 = arith.constant 4 : index
    %c0_239 = arith.constant 0 : index
    %324 = vector.load %arg3[%c4_238, %c0_239] : memref<9x256xf32, #tpu.memory_space<vmem>>, vector<1x256xf32>
    %325 = vector.shape_cast %324 : vector<1x256xf32> to vector<256xf32>
    %326 = vector.shape_cast %325 : vector<256xf32> to vector<1x1x256xf32>
    %327 = vector.broadcast %323 : vector<1x40x1xf32> to vector<1x40x256xf32>
    %328 = vector.broadcast %326 : vector<1x1x256xf32> to vector<1x40x256xf32>
    %329 = arith.mulf %327, %328 : vector<1x40x256xf32>
    %330 = arith.addf %321, %329 : vector<1x40x256xf32>
    %c0_240 = arith.constant 0 : index
    %c2_241 = arith.constant 2 : index
    %c3_242 = arith.constant 3 : index
    %c8_243 = arith.constant 8 : index
    %c0_244 = arith.constant 0 : index
    %331 = vector.load %arg2[%c0_240, %c2_241, %c3_242, %c8_243, %c0_244] : memref<1x4x4x56x1xf32, #tpu.memory_space<vmem>>, vector<1x1x1x40x1xf32>
    %332 = vector.shape_cast %331 : vector<1x1x1x40x1xf32> to vector<1x40x1xf32>
    %c5_245 = arith.constant 5 : index
    %c0_246 = arith.constant 0 : index
    %333 = vector.load %arg3[%c5_245, %c0_246] : memref<9x256xf32, #tpu.memory_space<vmem>>, vector<1x256xf32>
    %334 = vector.shape_cast %333 : vector<1x256xf32> to vector<256xf32>
    %335 = vector.shape_cast %334 : vector<256xf32> to vector<1x1x256xf32>
    %336 = vector.broadcast %332 : vector<1x40x1xf32> to vector<1x40x256xf32>
    %337 = vector.broadcast %335 : vector<1x1x256xf32> to vector<1x40x256xf32>
    %338 = arith.mulf %336, %337 : vector<1x40x256xf32>
    %339 = arith.addf %330, %338 : vector<1x40x256xf32>
    %c0_247 = arith.constant 0 : index
    %c3_248 = arith.constant 3 : index
    %c1_249 = arith.constant 1 : index
    %c8_250 = arith.constant 8 : index
    %c0_251 = arith.constant 0 : index
    %340 = vector.load %arg2[%c0_247, %c3_248, %c1_249, %c8_250, %c0_251] : memref<1x4x4x56x1xf32, #tpu.memory_space<vmem>>, vector<1x1x1x40x1xf32>
    %341 = vector.shape_cast %340 : vector<1x1x1x40x1xf32> to vector<1x40x1xf32>
    %c6_252 = arith.constant 6 : index
    %c0_253 = arith.constant 0 : index
    %342 = vector.load %arg3[%c6_252, %c0_253] : memref<9x256xf32, #tpu.memory_space<vmem>>, vector<1x256xf32>
    %343 = vector.shape_cast %342 : vector<1x256xf32> to vector<256xf32>
    %344 = vector.shape_cast %343 : vector<256xf32> to vector<1x1x256xf32>
    %345 = vector.broadcast %341 : vector<1x40x1xf32> to vector<1x40x256xf32>
    %346 = vector.broadcast %344 : vector<1x1x256xf32> to vector<1x40x256xf32>
    %347 = arith.mulf %345, %346 : vector<1x40x256xf32>
    %348 = arith.addf %339, %347 : vector<1x40x256xf32>
    %c0_254 = arith.constant 0 : index
    %c3_255 = arith.constant 3 : index
    %c2_256 = arith.constant 2 : index
    %c8_257 = arith.constant 8 : index
    %c0_258 = arith.constant 0 : index
    %349 = vector.load %arg2[%c0_254, %c3_255, %c2_256, %c8_257, %c0_258] : memref<1x4x4x56x1xf32, #tpu.memory_space<vmem>>, vector<1x1x1x40x1xf32>
    %350 = vector.shape_cast %349 : vector<1x1x1x40x1xf32> to vector<1x40x1xf32>
    %c7_259 = arith.constant 7 : index
    %c0_260 = arith.constant 0 : index
    %351 = vector.load %arg3[%c7_259, %c0_260] : memref<9x256xf32, #tpu.memory_space<vmem>>, vector<1x256xf32>
    %352 = vector.shape_cast %351 : vector<1x256xf32> to vector<256xf32>
    %353 = vector.shape_cast %352 : vector<256xf32> to vector<1x1x256xf32>
    %354 = vector.broadcast %350 : vector<1x40x1xf32> to vector<1x40x256xf32>
    %355 = vector.broadcast %353 : vector<1x1x256xf32> to vector<1x40x256xf32>
    %356 = arith.mulf %354, %355 : vector<1x40x256xf32>
    %357 = arith.addf %348, %356 : vector<1x40x256xf32>
    %c0_261 = arith.constant 0 : index
    %c3_262 = arith.constant 3 : index
    %c3_263 = arith.constant 3 : index
    %c8_264 = arith.constant 8 : index
    %c0_265 = arith.constant 0 : index
    %358 = vector.load %arg2[%c0_261, %c3_262, %c3_263, %c8_264, %c0_265] : memref<1x4x4x56x1xf32, #tpu.memory_space<vmem>>, vector<1x1x1x40x1xf32>
    %359 = vector.shape_cast %358 : vector<1x1x1x40x1xf32> to vector<1x40x1xf32>
    %c8_266 = arith.constant 8 : index
    %c0_267 = arith.constant 0 : index
    %360 = vector.load %arg3[%c8_266, %c0_267] : memref<9x256xf32, #tpu.memory_space<vmem>>, vector<1x256xf32>
    %361 = vector.shape_cast %360 : vector<1x256xf32> to vector<256xf32>
    %362 = vector.shape_cast %361 : vector<256xf32> to vector<1x1x256xf32>
    %363 = vector.broadcast %359 : vector<1x40x1xf32> to vector<1x40x256xf32>
    %364 = vector.broadcast %362 : vector<1x1x256xf32> to vector<1x40x256xf32>
    %365 = arith.mulf %363, %364 : vector<1x40x256xf32>
    %366 = arith.addf %357, %365 : vector<1x40x256xf32>
    %cst_268 = arith.constant 0.000000e+00 : f32
    %367 = vector.broadcast %cst_268 : f32 to vector<1x40x256xf32>
    %368 = arith.maximumf %366, %367 : vector<1x40x256xf32>
    %cst_269 = arith.constant 0.000000e+00 : f32
    %369 = vector.shape_cast %2 : vector<40x1xi1> to vector<1x40x1xi1>
    %370 = vector.broadcast %369 : vector<1x40x1xi1> to vector<1x40x256xi1>
    %371 = vector.broadcast %cst_269 : f32 to vector<1x40x256xf32>
    %372 = arith.select %370, %368, %371 : vector<1x40x256xi1>, vector<1x40x256xf32>
    %373 = arith.truncf %372 : vector<1x40x256xf32> to vector<1x40x256xbf16>
    %c1_270 = arith.constant 1 : index
    %c1_271 = arith.constant 1 : index
    %c0_272 = arith.constant 0 : index
    %c8_273 = arith.constant 8 : index
    %c0_274 = arith.constant 0 : index
    %374 = vector.load %arg14[%c1_270, %c1_271, %c0_272, %c8_273, %c0_274] : memref<2x2x1x56x256xbf16, #tpu.memory_space<vmem>>, vector<1x1x1x40x256xbf16>
    %375 = vector.shape_cast %374 : vector<1x1x1x40x256xbf16> to vector<1x40x256xbf16>
    %376 = vector.shape_cast %373 : vector<1x40x256xbf16> to vector<1x1x1x40x256xbf16>
    tpu.vector_store %arg14[%c1_270, %c1_271, %c0_272, %c8_273, %c0_274], %376 {strides = array<i32>} : memref<2x2x1x56x256xbf16, #tpu.memory_space<vmem>>, vector<1x1x1x40x256xbf16>,
    %c0_275 = arith.constant 0 : index
    %c0_276 = arith.constant 0 : index
    %377 = vector.load %arg6[%c0_275, %c0_276] : memref<1x256xf32, #tpu.memory_space<vmem>>, vector<1x256xf32>
    %378 = vector.shape_cast %377 : vector<1x256xf32> to vector<256xf32>
    %379 = vector.shape_cast %378 : vector<256xf32> to vector<1x256xf32>
    %380 = vector.broadcast %379 : vector<1x256xf32> to vector<40x256xf32>
    %c1_277 = arith.constant 1 : index
    %c1_278 = arith.constant 1 : index
    %c0_279 = arith.constant 0 : index
    %c1_280 = arith.constant 1 : index
    %c0_281 = arith.constant 0 : index
    %381 = vector.load %arg14[%c1_277, %c1_278, %c0_279, %c1_280, %c0_281] : memref<2x2x1x56x256xbf16, #tpu.memory_space<vmem>>, vector<1x1x1x40x256xbf16>
    %382 = vector.shape_cast %381 : vector<1x1x1x40x256xbf16> to vector<1x40x256xbf16>
    %383 = vector.shape_cast %382 : vector<1x40x256xbf16> to vector<40x256xbf16>
    %c0_282 = arith.constant 0 : index
    %c0_283 = arith.constant 0 : index
    %c0_284 = arith.constant 0 : index
    %384 = vector.load %arg5[%c0_282, %c0_283, %c0_284] : memref<9x256x256xbf16, #tpu.memory_space<vmem>>, vector<1x256x256xbf16>
    %385 = vector.shape_cast %384 : vector<1x256x256xbf16> to vector<256x256xbf16>
    %cst_285 = arith.constant dense<0.000000e+00> : vector<40x256xf32>
    %386 = tpu.matmul %383, %385, %cst_285 {dimension_numbers = #tpu.dot_dimension_numbers<[1], [0], [0], [1], [0, 0, 1, 1], [], []>} : vector<40x256xbf16>, vector<256x256xbf16>, vector<40x256xf32> -> vector<40x256xf32>
    %387 = arith.addf %380, %386 : vector<40x256xf32>
    %c1_286 = arith.constant 1 : index
    %c0_287 = arith.constant 0 : index
    %c0_288 = arith.constant 0 : index
    %c2_289 = arith.constant 2 : index
    %c0_290 = arith.constant 0 : index
    %388 = vector.load %arg14[%c1_286, %c0_287, %c0_288, %c2_289, %c0_290] : memref<2x2x1x56x256xbf16, #tpu.memory_space<vmem>>, vector<1x1x1x40x256xbf16>
    %389 = vector.shape_cast %388 : vector<1x1x1x40x256xbf16> to vector<1x40x256xbf16>
    %390 = vector.shape_cast %389 : vector<1x40x256xbf16> to vector<40x256xbf16>
    %c1_291 = arith.constant 1 : index
    %c0_292 = arith.constant 0 : index
    %c0_293 = arith.constant 0 : index
    %391 = vector.load %arg5[%c1_291, %c0_292, %c0_293] : memref<9x256x256xbf16, #tpu.memory_space<vmem>>, vector<1x256x256xbf16>
    %392 = vector.shape_cast %391 : vector<1x256x256xbf16> to vector<256x256xbf16>
    %cst_294 = arith.constant dense<0.000000e+00> : vector<40x256xf32>
    %393 = tpu.matmul %390, %392, %cst_294 {dimension_numbers = #tpu.dot_dimension_numbers<[1], [0], [0], [1], [0, 0, 1, 1], [], []>} : vector<40x256xbf16>, vector<256x256xbf16>, vector<40x256xf32> -> vector<40x256xf32>
    %394 = arith.addf %387, %393 : vector<40x256xf32>
    %c1_295 = arith.constant 1 : index
    %c1_296 = arith.constant 1 : index
    %c0_297 = arith.constant 0 : index
    %c2_298 = arith.constant 2 : index
    %c0_299 = arith.constant 0 : index
    %395 = vector.load %arg14[%c1_295, %c1_296, %c0_297, %c2_298, %c0_299] : memref<2x2x1x56x256xbf16, #tpu.memory_space<vmem>>, vector<1x1x1x40x256xbf16>
    %396 = vector.shape_cast %395 : vector<1x1x1x40x256xbf16> to vector<1x40x256xbf16>
    %397 = vector.shape_cast %396 : vector<1x40x256xbf16> to vector<40x256xbf16>
    %c2_300 = arith.constant 2 : index
    %c0_301 = arith.constant 0 : index
    %c0_302 = arith.constant 0 : index
    %398 = vector.load %arg5[%c2_300, %c0_301, %c0_302] : memref<9x256x256xbf16, #tpu.memory_space<vmem>>, vector<1x256x256xbf16>
    %399 = vector.shape_cast %398 : vector<1x256x256xbf16> to vector<256x256xbf16>
    %cst_303 = arith.constant dense<0.000000e+00> : vector<40x256xf32>
    %400 = tpu.matmul %397, %399, %cst_303 {dimension_numbers = #tpu.dot_dimension_numbers<[1], [0], [0], [1], [0, 0, 1, 1], [], []>} : vector<40x256xbf16>, vector<256x256xbf16>, vector<40x256xf32> -> vector<40x256xf32>
    %401 = arith.addf %394, %400 : vector<40x256xf32>
    %c0_304 = arith.constant 0 : index
    %c1_305 = arith.constant 1 : index
    %c0_306 = arith.constant 0 : index
    %c7_307 = arith.constant 7 : index
    %c0_308 = arith.constant 0 : index
    %402 = vector.load %arg14[%c0_304, %c1_305, %c0_306, %c7_307, %c0_308] : memref<2x2x1x56x256xbf16, #tpu.memory_space<vmem>>, vector<1x1x1x40x256xbf16>
    %403 = vector.shape_cast %402 : vector<1x1x1x40x256xbf16> to vector<1x40x256xbf16>
    %404 = vector.shape_cast %403 : vector<1x40x256xbf16> to vector<40x256xbf16>
    %c3_309 = arith.constant 3 : index
    %c0_310 = arith.constant 0 : index
    %c0_311 = arith.constant 0 : index
    %405 = vector.load %arg5[%c3_309, %c0_310, %c0_311] : memref<9x256x256xbf16, #tpu.memory_space<vmem>>, vector<1x256x256xbf16>
    %406 = vector.shape_cast %405 : vector<1x256x256xbf16> to vector<256x256xbf16>
    %cst_312 = arith.constant dense<0.000000e+00> : vector<40x256xf32>
    %407 = tpu.matmul %404, %406, %cst_312 {dimension_numbers = #tpu.dot_dimension_numbers<[1], [0], [0], [1], [0, 0, 1, 1], [], []>} : vector<40x256xbf16>, vector<256x256xbf16>, vector<40x256xf32> -> vector<40x256xf32>
    %408 = arith.addf %401, %407 : vector<40x256xf32>
    %c0_313 = arith.constant 0 : index
    %c0_314 = arith.constant 0 : index
    %c0_315 = arith.constant 0 : index
    %c8_316 = arith.constant 8 : index
    %c0_317 = arith.constant 0 : index
    %409 = vector.load %arg14[%c0_313, %c0_314, %c0_315, %c8_316, %c0_317] : memref<2x2x1x56x256xbf16, #tpu.memory_space<vmem>>, vector<1x1x1x40x256xbf16>
    %410 = vector.shape_cast %409 : vector<1x1x1x40x256xbf16> to vector<1x40x256xbf16>
    %411 = vector.shape_cast %410 : vector<1x40x256xbf16> to vector<40x256xbf16>
    %c4_318 = arith.constant 4 : index
    %c0_319 = arith.constant 0 : index
    %c0_320 = arith.constant 0 : index
    %412 = vector.load %arg5[%c4_318, %c0_319, %c0_320] : memref<9x256x256xbf16, #tpu.memory_space<vmem>>, vector<1x256x256xbf16>
    %413 = vector.shape_cast %412 : vector<1x256x256xbf16> to vector<256x256xbf16>
    %cst_321 = arith.constant dense<0.000000e+00> : vector<40x256xf32>
    %414 = tpu.matmul %411, %413, %cst_321 {dimension_numbers = #tpu.dot_dimension_numbers<[1], [0], [0], [1], [0, 0, 1, 1], [], []>} : vector<40x256xbf16>, vector<256x256xbf16>, vector<40x256xf32> -> vector<40x256xf32>
    %415 = arith.addf %408, %414 : vector<40x256xf32>
    %c0_322 = arith.constant 0 : index
    %c1_323 = arith.constant 1 : index
    %c0_324 = arith.constant 0 : index
    %c8_325 = arith.constant 8 : index
    %c0_326 = arith.constant 0 : index
    %416 = vector.load %arg14[%c0_322, %c1_323, %c0_324, %c8_325, %c0_326] : memref<2x2x1x56x256xbf16, #tpu.memory_space<vmem>>, vector<1x1x1x40x256xbf16>
    %417 = vector.shape_cast %416 : vector<1x1x1x40x256xbf16> to vector<1x40x256xbf16>
    %418 = vector.shape_cast %417 : vector<1x40x256xbf16> to vector<40x256xbf16>
    %c5_327 = arith.constant 5 : index
    %c0_328 = arith.constant 0 : index
    %c0_329 = arith.constant 0 : index
    %419 = vector.load %arg5[%c5_327, %c0_328, %c0_329] : memref<9x256x256xbf16, #tpu.memory_space<vmem>>, vector<1x256x256xbf16>
    %420 = vector.shape_cast %419 : vector<1x256x256xbf16> to vector<256x256xbf16>
    %cst_330 = arith.constant dense<0.000000e+00> : vector<40x256xf32>
    %421 = tpu.matmul %418, %420, %cst_330 {dimension_numbers = #tpu.dot_dimension_numbers<[1], [0], [0], [1], [0, 0, 1, 1], [], []>} : vector<40x256xbf16>, vector<256x256xbf16>, vector<40x256xf32> -> vector<40x256xf32>
    %422 = arith.addf %415, %421 : vector<40x256xf32>
    %c1_331 = arith.constant 1 : index
    %c1_332 = arith.constant 1 : index
    %c0_333 = arith.constant 0 : index
    %c7_334 = arith.constant 7 : index
    %c0_335 = arith.constant 0 : index
    %423 = vector.load %arg14[%c1_331, %c1_332, %c0_333, %c7_334, %c0_335] : memref<2x2x1x56x256xbf16, #tpu.memory_space<vmem>>, vector<1x1x1x40x256xbf16>
    %424 = vector.shape_cast %423 : vector<1x1x1x40x256xbf16> to vector<1x40x256xbf16>
    %425 = vector.shape_cast %424 : vector<1x40x256xbf16> to vector<40x256xbf16>
    %c6_336 = arith.constant 6 : index
    %c0_337 = arith.constant 0 : index
    %c0_338 = arith.constant 0 : index
    %426 = vector.load %arg5[%c6_336, %c0_337, %c0_338] : memref<9x256x256xbf16, #tpu.memory_space<vmem>>, vector<1x256x256xbf16>
    %427 = vector.shape_cast %426 : vector<1x256x256xbf16> to vector<256x256xbf16>
    %cst_339 = arith.constant dense<0.000000e+00> : vector<40x256xf32>
    %428 = tpu.matmul %425, %427, %cst_339 {dimension_numbers = #tpu.dot_dimension_numbers<[1], [0], [0], [1], [0, 0, 1, 1], [], []>} : vector<40x256xbf16>, vector<256x256xbf16>, vector<40x256xf32> -> vector<40x256xf32>
    %429 = arith.addf %422, %428 : vector<40x256xf32>
    %c1_340 = arith.constant 1 : index
    %c0_341 = arith.constant 0 : index
    %c0_342 = arith.constant 0 : index
    %c8_343 = arith.constant 8 : index
    %c0_344 = arith.constant 0 : index
    %430 = vector.load %arg14[%c1_340, %c0_341, %c0_342, %c8_343, %c0_344] : memref<2x2x1x56x256xbf16, #tpu.memory_space<vmem>>, vector<1x1x1x40x256xbf16>
    %431 = vector.shape_cast %430 : vector<1x1x1x40x256xbf16> to vector<1x40x256xbf16>
    %432 = vector.shape_cast %431 : vector<1x40x256xbf16> to vector<40x256xbf16>
    %c7_345 = arith.constant 7 : index
    %c0_346 = arith.constant 0 : index
    %c0_347 = arith.constant 0 : index
    %433 = vector.load %arg5[%c7_345, %c0_346, %c0_347] : memref<9x256x256xbf16, #tpu.memory_space<vmem>>, vector<1x256x256xbf16>
    %434 = vector.shape_cast %433 : vector<1x256x256xbf16> to vector<256x256xbf16>
    %cst_348 = arith.constant dense<0.000000e+00> : vector<40x256xf32>
    %435 = tpu.matmul %432, %434, %cst_348 {dimension_numbers = #tpu.dot_dimension_numbers<[1], [0], [0], [1], [0, 0, 1, 1], [], []>} : vector<40x256xbf16>, vector<256x256xbf16>, vector<40x256xf32> -> vector<40x256xf32>
    %436 = arith.addf %429, %435 : vector<40x256xf32>
    %c1_349 = arith.constant 1 : index
    %c1_350 = arith.constant 1 : index
    %c0_351 = arith.constant 0 : index
    %c8_352 = arith.constant 8 : index
    %c0_353 = arith.constant 0 : index
    %437 = vector.load %arg14[%c1_349, %c1_350, %c0_351, %c8_352, %c0_353] : memref<2x2x1x56x256xbf16, #tpu.memory_space<vmem>>, vector<1x1x1x40x256xbf16>
    %438 = vector.shape_cast %437 : vector<1x1x1x40x256xbf16> to vector<1x40x256xbf16>
    %439 = vector.shape_cast %438 : vector<1x40x256xbf16> to vector<40x256xbf16>
    %c8_354 = arith.constant 8 : index
    %c0_355 = arith.constant 0 : index
    %c0_356 = arith.constant 0 : index
    %440 = vector.load %arg5[%c8_354, %c0_355, %c0_356] : memref<9x256x256xbf16, #tpu.memory_space<vmem>>, vector<1x256x256xbf16>
    %441 = vector.shape_cast %440 : vector<1x256x256xbf16> to vector<256x256xbf16>
    %cst_357 = arith.constant dense<0.000000e+00> : vector<40x256xf32>
    %442 = tpu.matmul %439, %441, %cst_357 {dimension_numbers = #tpu.dot_dimension_numbers<[1], [0], [0], [1], [0, 0, 1, 1], [], []>} : vector<40x256xbf16>, vector<256x256xbf16>, vector<40x256xf32> -> vector<40x256xf32>
    %443 = arith.addf %436, %442 : vector<40x256xf32>
    %cst_358 = arith.constant 0.000000e+00 : f32
    %444 = vector.broadcast %cst_358 : f32 to vector<40x256xf32>
    %445 = arith.maximumf %443, %444 : vector<40x256xf32>
    %446 = vector.shape_cast %445 : vector<40x256xf32> to vector<1x40x256xf32>
    %cst_359 = arith.constant 0.000000e+00 : f32
    %447 = vector.shape_cast %2 : vector<40x1xi1> to vector<1x40x1xi1>
    %448 = vector.broadcast %447 : vector<1x40x1xi1> to vector<1x40x256xi1>
    %449 = vector.broadcast %cst_359 : f32 to vector<1x40x256xf32>
    %450 = arith.select %448, %446, %449 : vector<1x40x256xi1>, vector<1x40x256xf32>
    %451 = arith.truncf %450 : vector<1x40x256xf32> to vector<1x40x256xbf16>
    %c0_360 = arith.constant 0 : index
    %c8_361 = arith.constant 8 : index
    %c0_362 = arith.constant 0 : index
    %452 = vector.load %arg15[%c0_360, %c8_361, %c0_362] : memref<1x56x256xbf16, #tpu.memory_space<vmem>>, vector<1x40x256xbf16>
    tpu.vector_store %arg15[%c0_360, %c8_361, %c0_362], %451 {strides = array<i32>} : memref<1x56x256xbf16, #tpu.memory_space<vmem>>, vector<1x40x256xbf16>,
    %c0_363 = arith.constant 0 : index
    %c0_364 = arith.constant 0 : index
    %453 = vector.load %arg8[%c0_363, %c0_364] : memref<1x128xf32, #tpu.memory_space<vmem>>, vector<1x128xf32>
    %454 = vector.shape_cast %453 : vector<1x128xf32> to vector<128xf32>
    %455 = vector.shape_cast %454 : vector<128xf32> to vector<1x128xf32>
    %456 = vector.broadcast %455 : vector<1x128xf32> to vector<40x128xf32>
    %c0_365 = arith.constant 0 : index
    %c1_366 = arith.constant 1 : index
    %c0_367 = arith.constant 0 : index
    %457 = vector.load %arg15[%c0_365, %c1_366, %c0_367] : memref<1x56x256xbf16, #tpu.memory_space<vmem>>, vector<1x40x256xbf16>
    %458 = vector.shape_cast %457 : vector<1x40x256xbf16> to vector<40x256xbf16>
    %c0_368 = arith.constant 0 : index
    %c0_369 = arith.constant 0 : index
    %c0_370 = arith.constant 0 : index
    %459 = vector.load %arg7[%c0_368, %c0_369, %c0_370] : memref<9x256x128xbf16, #tpu.memory_space<vmem>>, vector<1x256x128xbf16>
    %460 = vector.shape_cast %459 : vector<1x256x128xbf16> to vector<256x128xbf16>
    %cst_371 = arith.constant dense<0.000000e+00> : vector<40x128xf32>
    %461 = tpu.matmul %458, %460, %cst_371 {dimension_numbers = #tpu.dot_dimension_numbers<[1], [0], [0], [1], [0, 0, 1, 1], [], []>} : vector<40x256xbf16>, vector<256x128xbf16>, vector<40x128xf32> -> vector<40x128xf32>
    %462 = arith.addf %456, %461 : vector<40x128xf32>
    %c0_372 = arith.constant 0 : index
    %c2_373 = arith.constant 2 : index
    %c0_374 = arith.constant 0 : index
    %463 = vector.load %arg15[%c0_372, %c2_373, %c0_374] : memref<1x56x256xbf16, #tpu.memory_space<vmem>>, vector<1x40x256xbf16>
    %464 = vector.shape_cast %463 : vector<1x40x256xbf16> to vector<40x256xbf16>
    %c1_375 = arith.constant 1 : index
    %c0_376 = arith.constant 0 : index
    %c0_377 = arith.constant 0 : index
    %465 = vector.load %arg7[%c1_375, %c0_376, %c0_377] : memref<9x256x128xbf16, #tpu.memory_space<vmem>>, vector<1x256x128xbf16>
    %466 = vector.shape_cast %465 : vector<1x256x128xbf16> to vector<256x128xbf16>
    %cst_378 = arith.constant dense<0.000000e+00> : vector<40x128xf32>
    %467 = tpu.matmul %464, %466, %cst_378 {dimension_numbers = #tpu.dot_dimension_numbers<[1], [0], [0], [1], [0, 0, 1, 1], [], []>} : vector<40x256xbf16>, vector<256x128xbf16>, vector<40x128xf32> -> vector<40x128xf32>
    %468 = arith.addf %462, %467 : vector<40x128xf32>
    %c0_379 = arith.constant 0 : index
    %c3_380 = arith.constant 3 : index
    %c0_381 = arith.constant 0 : index
    %469 = vector.load %arg15[%c0_379, %c3_380, %c0_381] : memref<1x56x256xbf16, #tpu.memory_space<vmem>>, vector<1x40x256xbf16>
    %470 = vector.shape_cast %469 : vector<1x40x256xbf16> to vector<40x256xbf16>
    %c2_382 = arith.constant 2 : index
    %c0_383 = arith.constant 0 : index
    %c0_384 = arith.constant 0 : index
    %471 = vector.load %arg7[%c2_382, %c0_383, %c0_384] : memref<9x256x128xbf16, #tpu.memory_space<vmem>>, vector<1x256x128xbf16>
    %472 = vector.shape_cast %471 : vector<1x256x128xbf16> to vector<256x128xbf16>
    %cst_385 = arith.constant dense<0.000000e+00> : vector<40x128xf32>
    %473 = tpu.matmul %470, %472, %cst_385 {dimension_numbers = #tpu.dot_dimension_numbers<[1], [0], [0], [1], [0, 0, 1, 1], [], []>} : vector<40x256xbf16>, vector<256x128xbf16>, vector<40x128xf32> -> vector<40x128xf32>
    %474 = arith.addf %468, %473 : vector<40x128xf32>
    %c0_386 = arith.constant 0 : index
    %c7_387 = arith.constant 7 : index
    %c0_388 = arith.constant 0 : index
    %475 = vector.load %arg15[%c0_386, %c7_387, %c0_388] : memref<1x56x256xbf16, #tpu.memory_space<vmem>>, vector<1x40x256xbf16>
    %476 = vector.shape_cast %475 : vector<1x40x256xbf16> to vector<40x256xbf16>
    %c3_389 = arith.constant 3 : index
    %c0_390 = arith.constant 0 : index
    %c0_391 = arith.constant 0 : index
    %477 = vector.load %arg7[%c3_389, %c0_390, %c0_391] : memref<9x256x128xbf16, #tpu.memory_space<vmem>>, vector<1x256x128xbf16>
    %478 = vector.shape_cast %477 : vector<1x256x128xbf16> to vector<256x128xbf16>
    %cst_392 = arith.constant dense<0.000000e+00> : vector<40x128xf32>
    %479 = tpu.matmul %476, %478, %cst_392 {dimension_numbers = #tpu.dot_dimension_numbers<[1], [0], [0], [1], [0, 0, 1, 1], [], []>} : vector<40x256xbf16>, vector<256x128xbf16>, vector<40x128xf32> -> vector<40x128xf32>
    %480 = arith.addf %474, %479 : vector<40x128xf32>
    %c0_393 = arith.constant 0 : index
    %c8_394 = arith.constant 8 : index
    %c0_395 = arith.constant 0 : index
    %481 = vector.load %arg15[%c0_393, %c8_394, %c0_395] : memref<1x56x256xbf16, #tpu.memory_space<vmem>>, vector<1x40x256xbf16>
    %482 = vector.shape_cast %481 : vector<1x40x256xbf16> to vector<40x256xbf16>
    %c4_396 = arith.constant 4 : index
    %c0_397 = arith.constant 0 : index
    %c0_398 = arith.constant 0 : index
    %483 = vector.load %arg7[%c4_396, %c0_397, %c0_398] : memref<9x256x128xbf16, #tpu.memory_space<vmem>>, vector<1x256x128xbf16>
    %484 = vector.shape_cast %483 : vector<1x256x128xbf16> to vector<256x128xbf16>
    %cst_399 = arith.constant dense<0.000000e+00> : vector<40x128xf32>
    %485 = tpu.matmul %482, %484, %cst_399 {dimension_numbers = #tpu.dot_dimension_numbers<[1], [0], [0], [1], [0, 0, 1, 1], [], []>} : vector<40x256xbf16>, vector<256x128xbf16>, vector<40x128xf32> -> vector<40x128xf32>
    %486 = arith.addf %480, %485 : vector<40x128xf32>
    %c0_400 = arith.constant 0 : index
    %c9 = arith.constant 9 : index
    %c0_401 = arith.constant 0 : index
    %487 = vector.load %arg15[%c0_400, %c9, %c0_401] : memref<1x56x256xbf16, #tpu.memory_space<vmem>>, vector<1x40x256xbf16>
    %488 = vector.shape_cast %487 : vector<1x40x256xbf16> to vector<40x256xbf16>
    %c5_402 = arith.constant 5 : index
    %c0_403 = arith.constant 0 : index
    %c0_404 = arith.constant 0 : index
    %489 = vector.load %arg7[%c5_402, %c0_403, %c0_404] : memref<9x256x128xbf16, #tpu.memory_space<vmem>>, vector<1x256x128xbf16>
    %490 = vector.shape_cast %489 : vector<1x256x128xbf16> to vector<256x128xbf16>
    %cst_405 = arith.constant dense<0.000000e+00> : vector<40x128xf32>
    %491 = tpu.matmul %488, %490, %cst_405 {dimension_numbers = #tpu.dot_dimension_numbers<[1], [0], [0], [1], [0, 0, 1, 1], [], []>} : vector<40x256xbf16>, vector<256x128xbf16>, vector<40x128xf32> -> vector<40x128xf32>
    %492 = arith.addf %486, %491 : vector<40x128xf32>
    %c0_406 = arith.constant 0 : index
    %c13 = arith.constant 13 : index
    %c0_407 = arith.constant 0 : index
    %493 = vector.load %arg15[%c0_406, %c13, %c0_407] : memref<1x56x256xbf16, #tpu.memory_space<vmem>>, vector<1x40x256xbf16>
    %494 = vector.shape_cast %493 : vector<1x40x256xbf16> to vector<40x256xbf16>
    %c6_408 = arith.constant 6 : index
    %c0_409 = arith.constant 0 : index
    %c0_410 = arith.constant 0 : index
    %495 = vector.load %arg7[%c6_408, %c0_409, %c0_410] : memref<9x256x128xbf16, #tpu.memory_space<vmem>>, vector<1x256x128xbf16>
    %496 = vector.shape_cast %495 : vector<1x256x128xbf16> to vector<256x128xbf16>
    %cst_411 = arith.constant dense<0.000000e+00> : vector<40x128xf32>
    %497 = tpu.matmul %494, %496, %cst_411 {dimension_numbers = #tpu.dot_dimension_numbers<[1], [0], [0], [1], [0, 0, 1, 1], [], []>} : vector<40x256xbf16>, vector<256x128xbf16>, vector<40x128xf32> -> vector<40x128xf32>
    %498 = arith.addf %492, %497 : vector<40x128xf32>
    %c0_412 = arith.constant 0 : index
    %c14 = arith.constant 14 : index
    %c0_413 = arith.constant 0 : index
    %499 = vector.load %arg15[%c0_412, %c14, %c0_413] : memref<1x56x256xbf16, #tpu.memory_space<vmem>>, vector<1x40x256xbf16>
    %500 = vector.shape_cast %499 : vector<1x40x256xbf16> to vector<40x256xbf16>
    %c7_414 = arith.constant 7 : index
    %c0_415 = arith.constant 0 : index
    %c0_416 = arith.constant 0 : index
    %501 = vector.load %arg7[%c7_414, %c0_415, %c0_416] : memref<9x256x128xbf16, #tpu.memory_space<vmem>>, vector<1x256x128xbf16>
    %502 = vector.shape_cast %501 : vector<1x256x128xbf16> to vector<256x128xbf16>
    %cst_417 = arith.constant dense<0.000000e+00> : vector<40x128xf32>
    %503 = tpu.matmul %500, %502, %cst_417 {dimension_numbers = #tpu.dot_dimension_numbers<[1], [0], [0], [1], [0, 0, 1, 1], [], []>} : vector<40x256xbf16>, vector<256x128xbf16>, vector<40x128xf32> -> vector<40x128xf32>
    %504 = arith.addf %498, %503 : vector<40x128xf32>
    %c0_418 = arith.constant 0 : index
    %c15 = arith.constant 15 : index
    %c0_419 = arith.constant 0 : index
    %505 = vector.load %arg15[%c0_418, %c15, %c0_419] : memref<1x56x256xbf16, #tpu.memory_space<vmem>>, vector<1x40x256xbf16>
    %506 = vector.shape_cast %505 : vector<1x40x256xbf16> to vector<40x256xbf16>
    %c8_420 = arith.constant 8 : index
    %c0_421 = arith.constant 0 : index
    %c0_422 = arith.constant 0 : index
    %507 = vector.load %arg7[%c8_420, %c0_421, %c0_422] : memref<9x256x128xbf16, #tpu.memory_space<vmem>>, vector<1x256x128xbf16>
    %508 = vector.shape_cast %507 : vector<1x256x128xbf16> to vector<256x128xbf16>
    %cst_423 = arith.constant dense<0.000000e+00> : vector<40x128xf32>
    %509 = tpu.matmul %506, %508, %cst_423 {dimension_numbers = #tpu.dot_dimension_numbers<[1], [0], [0], [1], [0, 0, 1, 1], [], []>} : vector<40x256xbf16>, vector<256x128xbf16>, vector<40x128xf32> -> vector<40x128xf32>
    %510 = arith.addf %504, %509 : vector<40x128xf32>
    %cst_424 = arith.constant 0.000000e+00 : f32
    %511 = vector.broadcast %cst_424 : f32 to vector<40x128xf32>
    %512 = arith.maximumf %510, %511 : vector<40x128xf32>
    %513 = vector.shape_cast %512 : vector<40x128xf32> to vector<1x40x128xf32>
    %cst_425 = arith.constant 0.000000e+00 : f32
    %514 = vector.shape_cast %2 : vector<40x1xi1> to vector<1x40x1xi1>
    %515 = vector.broadcast %514 : vector<1x40x1xi1> to vector<1x40x128xi1>
    %516 = vector.broadcast %cst_425 : f32 to vector<1x40x128xf32>
    %517 = arith.select %515, %513, %516 : vector<1x40x128xi1>, vector<1x40x128xf32>
    %518 = arith.truncf %517 : vector<1x40x128xf32> to vector<1x40x128xbf16>
    %c0_426 = arith.constant 0 : index
    %c8_427 = arith.constant 8 : index
    %c0_428 = arith.constant 0 : index
    %519 = vector.load %arg16[%c0_426, %c8_427, %c0_428] : memref<1x56x128xbf16, #tpu.memory_space<vmem>>, vector<1x40x128xbf16>
    tpu.vector_store %arg16[%c0_426, %c8_427, %c0_428], %518 {strides = array<i32>} : memref<1x56x128xbf16, #tpu.memory_space<vmem>>, vector<1x40x128xbf16>,
    %c0_429 = arith.constant 0 : index
    %c0_430 = arith.constant 0 : index
    %520 = vector.load %arg10[%c0_429, %c0_430] : memref<1x128xf32, #tpu.memory_space<vmem>>, vector<1x128xf32>
    %521 = vector.shape_cast %520 : vector<1x128xf32> to vector<128xf32>
    %522 = vector.shape_cast %521 : vector<128xf32> to vector<1x128xf32>
    %523 = vector.broadcast %522 : vector<1x128xf32> to vector<40x128xf32>
    %c0_431 = arith.constant 0 : index
    %c1_432 = arith.constant 1 : index
    %c0_433 = arith.constant 0 : index
    %524 = vector.load %arg16[%c0_431, %c1_432, %c0_433] : memref<1x56x128xbf16, #tpu.memory_space<vmem>>, vector<1x40x128xbf16>
    %525 = vector.shape_cast %524 : vector<1x40x128xbf16> to vector<40x128xbf16>
    %c0_434 = arith.constant 0 : index
    %c0_435 = arith.constant 0 : index
    %c0_436 = arith.constant 0 : index
    %526 = vector.load %arg9[%c0_434, %c0_435, %c0_436] : memref<9x128x128xbf16, #tpu.memory_space<vmem>>, vector<1x128x128xbf16>
    %527 = vector.shape_cast %526 : vector<1x128x128xbf16> to vector<128x128xbf16>
    %cst_437 = arith.constant dense<0.000000e+00> : vector<40x128xf32>
    %528 = tpu.matmul %525, %527, %cst_437 {dimension_numbers = #tpu.dot_dimension_numbers<[1], [0], [0], [1], [0, 0, 1, 1], [], []>} : vector<40x128xbf16>, vector<128x128xbf16>, vector<40x128xf32> -> vector<40x128xf32>
    %529 = arith.addf %523, %528 : vector<40x128xf32>
    %c0_438 = arith.constant 0 : index
    %c2_439 = arith.constant 2 : index
    %c0_440 = arith.constant 0 : index
    %530 = vector.load %arg16[%c0_438, %c2_439, %c0_440] : memref<1x56x128xbf16, #tpu.memory_space<vmem>>, vector<1x40x128xbf16>
    %531 = vector.shape_cast %530 : vector<1x40x128xbf16> to vector<40x128xbf16>
    %c1_441 = arith.constant 1 : index
    %c0_442 = arith.constant 0 : index
    %c0_443 = arith.constant 0 : index
    %532 = vector.load %arg9[%c1_441, %c0_442, %c0_443] : memref<9x128x128xbf16, #tpu.memory_space<vmem>>, vector<1x128x128xbf16>
    %533 = vector.shape_cast %532 : vector<1x128x128xbf16> to vector<128x128xbf16>
    %cst_444 = arith.constant dense<0.000000e+00> : vector<40x128xf32>
    %534 = tpu.matmul %531, %533, %cst_444 {dimension_numbers = #tpu.dot_dimension_numbers<[1], [0], [0], [1], [0, 0, 1, 1], [], []>} : vector<40x128xbf16>, vector<128x128xbf16>, vector<40x128xf32> -> vector<40x128xf32>
    %535 = arith.addf %529, %534 : vector<40x128xf32>
    %c0_445 = arith.constant 0 : index
    %c3_446 = arith.constant 3 : index
    %c0_447 = arith.constant 0 : index
    %536 = vector.load %arg16[%c0_445, %c3_446, %c0_447] : memref<1x56x128xbf16, #tpu.memory_space<vmem>>, vector<1x40x128xbf16>
    %537 = vector.shape_cast %536 : vector<1x40x128xbf16> to vector<40x128xbf16>
    %c2_448 = arith.constant 2 : index
    %c0_449 = arith.constant 0 : index
    %c0_450 = arith.constant 0 : index
    %538 = vector.load %arg9[%c2_448, %c0_449, %c0_450] : memref<9x128x128xbf16, #tpu.memory_space<vmem>>, vector<1x128x128xbf16>
    %539 = vector.shape_cast %538 : vector<1x128x128xbf16> to vector<128x128xbf16>
    %cst_451 = arith.constant dense<0.000000e+00> : vector<40x128xf32>
    %540 = tpu.matmul %537, %539, %cst_451 {dimension_numbers = #tpu.dot_dimension_numbers<[1], [0], [0], [1], [0, 0, 1, 1], [], []>} : vector<40x128xbf16>, vector<128x128xbf16>, vector<40x128xf32> -> vector<40x128xf32>
    %541 = arith.addf %535, %540 : vector<40x128xf32>
    %c0_452 = arith.constant 0 : index
    %c7_453 = arith.constant 7 : index
    %c0_454 = arith.constant 0 : index
    %542 = vector.load %arg16[%c0_452, %c7_453, %c0_454] : memref<1x56x128xbf16, #tpu.memory_space<vmem>>, vector<1x40x128xbf16>
    %543 = vector.shape_cast %542 : vector<1x40x128xbf16> to vector<40x128xbf16>
    %c3_455 = arith.constant 3 : index
    %c0_456 = arith.constant 0 : index
    %c0_457 = arith.constant 0 : index
    %544 = vector.load %arg9[%c3_455, %c0_456, %c0_457] : memref<9x128x128xbf16, #tpu.memory_space<vmem>>, vector<1x128x128xbf16>
    %545 = vector.shape_cast %544 : vector<1x128x128xbf16> to vector<128x128xbf16>
    %cst_458 = arith.constant dense<0.000000e+00> : vector<40x128xf32>
    %546 = tpu.matmul %543, %545, %cst_458 {dimension_numbers = #tpu.dot_dimension_numbers<[1], [0], [0], [1], [0, 0, 1, 1], [], []>} : vector<40x128xbf16>, vector<128x128xbf16>, vector<40x128xf32> -> vector<40x128xf32>
    %547 = arith.addf %541, %546 : vector<40x128xf32>
    %c0_459 = arith.constant 0 : index
    %c8_460 = arith.constant 8 : index
    %c0_461 = arith.constant 0 : index
    %548 = vector.load %arg16[%c0_459, %c8_460, %c0_461] : memref<1x56x128xbf16, #tpu.memory_space<vmem>>, vector<1x40x128xbf16>
    %549 = vector.shape_cast %548 : vector<1x40x128xbf16> to vector<40x128xbf16>
    %c4_462 = arith.constant 4 : index
    %c0_463 = arith.constant 0 : index
    %c0_464 = arith.constant 0 : index
    %550 = vector.load %arg9[%c4_462, %c0_463, %c0_464] : memref<9x128x128xbf16, #tpu.memory_space<vmem>>, vector<1x128x128xbf16>
    %551 = vector.shape_cast %550 : vector<1x128x128xbf16> to vector<128x128xbf16>
    %cst_465 = arith.constant dense<0.000000e+00> : vector<40x128xf32>
    %552 = tpu.matmul %549, %551, %cst_465 {dimension_numbers = #tpu.dot_dimension_numbers<[1], [0], [0], [1], [0, 0, 1, 1], [], []>} : vector<40x128xbf16>, vector<128x128xbf16>, vector<40x128xf32> -> vector<40x128xf32>
    %553 = arith.addf %547, %552 : vector<40x128xf32>
    %c0_466 = arith.constant 0 : index
    %c9_467 = arith.constant 9 : index
    %c0_468 = arith.constant 0 : index
    %554 = vector.load %arg16[%c0_466, %c9_467, %c0_468] : memref<1x56x128xbf16, #tpu.memory_space<vmem>>, vector<1x40x128xbf16>
    %555 = vector.shape_cast %554 : vector<1x40x128xbf16> to vector<40x128xbf16>
    %c5_469 = arith.constant 5 : index
    %c0_470 = arith.constant 0 : index
    %c0_471 = arith.constant 0 : index
    %556 = vector.load %arg9[%c5_469, %c0_470, %c0_471] : memref<9x128x128xbf16, #tpu.memory_space<vmem>>, vector<1x128x128xbf16>
    %557 = vector.shape_cast %556 : vector<1x128x128xbf16> to vector<128x128xbf16>
    %cst_472 = arith.constant dense<0.000000e+00> : vector<40x128xf32>
    %558 = tpu.matmul %555, %557, %cst_472 {dimension_numbers = #tpu.dot_dimension_numbers<[1], [0], [0], [1], [0, 0, 1, 1], [], []>} : vector<40x128xbf16>, vector<128x128xbf16>, vector<40x128xf32> -> vector<40x128xf32>
    %559 = arith.addf %553, %558 : vector<40x128xf32>
    %c0_473 = arith.constant 0 : index
    %c13_474 = arith.constant 13 : index
    %c0_475 = arith.constant 0 : index
    %560 = vector.load %arg16[%c0_473, %c13_474, %c0_475] : memref<1x56x128xbf16, #tpu.memory_space<vmem>>, vector<1x40x128xbf16>
    %561 = vector.shape_cast %560 : vector<1x40x128xbf16> to vector<40x128xbf16>
    %c6_476 = arith.constant 6 : index
    %c0_477 = arith.constant 0 : index
    %c0_478 = arith.constant 0 : index
    %562 = vector.load %arg9[%c6_476, %c0_477, %c0_478] : memref<9x128x128xbf16, #tpu.memory_space<vmem>>, vector<1x128x128xbf16>
    %563 = vector.shape_cast %562 : vector<1x128x128xbf16> to vector<128x128xbf16>
    %cst_479 = arith.constant dense<0.000000e+00> : vector<40x128xf32>
    %564 = tpu.matmul %561, %563, %cst_479 {dimension_numbers = #tpu.dot_dimension_numbers<[1], [0], [0], [1], [0, 0, 1, 1], [], []>} : vector<40x128xbf16>, vector<128x128xbf16>, vector<40x128xf32> -> vector<40x128xf32>
    %565 = arith.addf %559, %564 : vector<40x128xf32>
    %c0_480 = arith.constant 0 : index
    %c14_481 = arith.constant 14 : index
    %c0_482 = arith.constant 0 : index
    %566 = vector.load %arg16[%c0_480, %c14_481, %c0_482] : memref<1x56x128xbf16, #tpu.memory_space<vmem>>, vector<1x40x128xbf16>
    %567 = vector.shape_cast %566 : vector<1x40x128xbf16> to vector<40x128xbf16>
    %c7_483 = arith.constant 7 : index
    %c0_484 = arith.constant 0 : index
    %c0_485 = arith.constant 0 : index
    %568 = vector.load %arg9[%c7_483, %c0_484, %c0_485] : memref<9x128x128xbf16, #tpu.memory_space<vmem>>, vector<1x128x128xbf16>
    %569 = vector.shape_cast %568 : vector<1x128x128xbf16> to vector<128x128xbf16>
    %cst_486 = arith.constant dense<0.000000e+00> : vector<40x128xf32>
    %570 = tpu.matmul %567, %569, %cst_486 {dimension_numbers = #tpu.dot_dimension_numbers<[1], [0], [0], [1], [0, 0, 1, 1], [], []>} : vector<40x128xbf16>, vector<128x128xbf16>, vector<40x128xf32> -> vector<40x128xf32>
    %571 = arith.addf %565, %570 : vector<40x128xf32>
    %c0_487 = arith.constant 0 : index
    %c15_488 = arith.constant 15 : index
    %c0_489 = arith.constant 0 : index
    %572 = vector.load %arg16[%c0_487, %c15_488, %c0_489] : memref<1x56x128xbf16, #tpu.memory_space<vmem>>, vector<1x40x128xbf16>
    %573 = vector.shape_cast %572 : vector<1x40x128xbf16> to vector<40x128xbf16>
    %c8_490 = arith.constant 8 : index
    %c0_491 = arith.constant 0 : index
    %c0_492 = arith.constant 0 : index
    %574 = vector.load %arg9[%c8_490, %c0_491, %c0_492] : memref<9x128x128xbf16, #tpu.memory_space<vmem>>, vector<1x128x128xbf16>
    %575 = vector.shape_cast %574 : vector<1x128x128xbf16> to vector<128x128xbf16>
    %cst_493 = arith.constant dense<0.000000e+00> : vector<40x128xf32>
    %576 = tpu.matmul %573, %575, %cst_493 {dimension_numbers = #tpu.dot_dimension_numbers<[1], [0], [0], [1], [0, 0, 1, 1], [], []>} : vector<40x128xbf16>, vector<128x128xbf16>, vector<40x128xf32> -> vector<40x128xf32>
    %577 = arith.addf %571, %576 : vector<40x128xf32>
    %cst_494 = arith.constant 0.000000e+00 : f32
    %578 = vector.broadcast %cst_494 : f32 to vector<40x128xf32>
    %579 = arith.maximumf %577, %578 : vector<40x128xf32>
    %580 = vector.shape_cast %579 : vector<40x128xf32> to vector<1x40x128xf32>
    %cst_495 = arith.constant 0.000000e+00 : f32
    %581 = vector.shape_cast %2 : vector<40x1xi1> to vector<1x40x1xi1>
    %582 = vector.broadcast %581 : vector<1x40x1xi1> to vector<1x40x128xi1>
    %583 = vector.broadcast %cst_495 : f32 to vector<1x40x128xf32>
    %584 = arith.select %582, %580, %583 : vector<1x40x128xi1>, vector<1x40x128xf32>
    %585 = arith.truncf %584 : vector<1x40x128xf32> to vector<1x40x128xbf16>
    %c0_496 = arith.constant 0 : index
    %c8_497 = arith.constant 8 : index
    %c0_498 = arith.constant 0 : index
    %586 = vector.load %arg17[%c0_496, %c8_497, %c0_498] : memref<1x56x128xbf16, #tpu.memory_space<vmem>>, vector<1x40x128xbf16>
    tpu.vector_store %arg17[%c0_496, %c8_497, %c0_498], %585 {strides = array<i32>} : memref<1x56x128xbf16, #tpu.memory_space<vmem>>, vector<1x40x128xbf16>,
    %c0_499 = arith.constant 0 : index
    %c0_500 = arith.constant 0 : index
    %587 = vector.load %arg12[%c0_499, %c0_500] : memref<1x128xf32, #tpu.memory_space<vmem>>, vector<1x128xf32>
    %588 = vector.shape_cast %587 : vector<1x128xf32> to vector<128xf32>
    %589 = vector.shape_cast %588 : vector<128xf32> to vector<1x128xf32>
    %590 = vector.broadcast %589 : vector<1x128xf32> to vector<40x128xf32>
    %c0_501 = arith.constant 0 : index
    %c1_502 = arith.constant 1 : index
    %c0_503 = arith.constant 0 : index
    %591 = vector.load %arg17[%c0_501, %c1_502, %c0_503] : memref<1x56x128xbf16, #tpu.memory_space<vmem>>, vector<1x40x128xbf16>
    %592 = vector.shape_cast %591 : vector<1x40x128xbf16> to vector<40x128xbf16>
    %c0_504 = arith.constant 0 : index
    %c0_505 = arith.constant 0 : index
    %c0_506 = arith.constant 0 : index
    %593 = vector.load %arg11[%c0_504, %c0_505, %c0_506] : memref<9x128x128xbf16, #tpu.memory_space<vmem>>, vector<1x128x128xbf16>
    %594 = vector.shape_cast %593 : vector<1x128x128xbf16> to vector<128x128xbf16>
    %cst_507 = arith.constant dense<0.000000e+00> : vector<40x128xf32>
    %595 = tpu.matmul %592, %594, %cst_507 {dimension_numbers = #tpu.dot_dimension_numbers<[1], [0], [0], [1], [0, 0, 1, 1], [], []>} : vector<40x128xbf16>, vector<128x128xbf16>, vector<40x128xf32> -> vector<40x128xf32>
    %596 = arith.addf %590, %595 : vector<40x128xf32>
    %c0_508 = arith.constant 0 : index
    %c2_509 = arith.constant 2 : index
    %c0_510 = arith.constant 0 : index
    %597 = vector.load %arg17[%c0_508, %c2_509, %c0_510] : memref<1x56x128xbf16, #tpu.memory_space<vmem>>, vector<1x40x128xbf16>
    %598 = vector.shape_cast %597 : vector<1x40x128xbf16> to vector<40x128xbf16>
    %c1_511 = arith.constant 1 : index
    %c0_512 = arith.constant 0 : index
    %c0_513 = arith.constant 0 : index
    %599 = vector.load %arg11[%c1_511, %c0_512, %c0_513] : memref<9x128x128xbf16, #tpu.memory_space<vmem>>, vector<1x128x128xbf16>
    %600 = vector.shape_cast %599 : vector<1x128x128xbf16> to vector<128x128xbf16>
    %cst_514 = arith.constant dense<0.000000e+00> : vector<40x128xf32>
    %601 = tpu.matmul %598, %600, %cst_514 {dimension_numbers = #tpu.dot_dimension_numbers<[1], [0], [0], [1], [0, 0, 1, 1], [], []>} : vector<40x128xbf16>, vector<128x128xbf16>, vector<40x128xf32> -> vector<40x128xf32>
    %602 = arith.addf %596, %601 : vector<40x128xf32>
    %c0_515 = arith.constant 0 : index
    %c3_516 = arith.constant 3 : index
    %c0_517 = arith.constant 0 : index
    %603 = vector.load %arg17[%c0_515, %c3_516, %c0_517] : memref<1x56x128xbf16, #tpu.memory_space<vmem>>, vector<1x40x128xbf16>
    %604 = vector.shape_cast %603 : vector<1x40x128xbf16> to vector<40x128xbf16>
    %c2_518 = arith.constant 2 : index
    %c0_519 = arith.constant 0 : index
    %c0_520 = arith.constant 0 : index
    %605 = vector.load %arg11[%c2_518, %c0_519, %c0_520] : memref<9x128x128xbf16, #tpu.memory_space<vmem>>, vector<1x128x128xbf16>
    %606 = vector.shape_cast %605 : vector<1x128x128xbf16> to vector<128x128xbf16>
    %cst_521 = arith.constant dense<0.000000e+00> : vector<40x128xf32>
    %607 = tpu.matmul %604, %606, %cst_521 {dimension_numbers = #tpu.dot_dimension_numbers<[1], [0], [0], [1], [0, 0, 1, 1], [], []>} : vector<40x128xbf16>, vector<128x128xbf16>, vector<40x128xf32> -> vector<40x128xf32>
    %608 = arith.addf %602, %607 : vector<40x128xf32>
    %c0_522 = arith.constant 0 : index
    %c7_523 = arith.constant 7 : index
    %c0_524 = arith.constant 0 : index
    %609 = vector.load %arg17[%c0_522, %c7_523, %c0_524] : memref<1x56x128xbf16, #tpu.memory_space<vmem>>, vector<1x40x128xbf16>
    %610 = vector.shape_cast %609 : vector<1x40x128xbf16> to vector<40x128xbf16>
    %c3_525 = arith.constant 3 : index
    %c0_526 = arith.constant 0 : index
    %c0_527 = arith.constant 0 : index
    %611 = vector.load %arg11[%c3_525, %c0_526, %c0_527] : memref<9x128x128xbf16, #tpu.memory_space<vmem>>, vector<1x128x128xbf16>
    %612 = vector.shape_cast %611 : vector<1x128x128xbf16> to vector<128x128xbf16>
    %cst_528 = arith.constant dense<0.000000e+00> : vector<40x128xf32>
    %613 = tpu.matmul %610, %612, %cst_528 {dimension_numbers = #tpu.dot_dimension_numbers<[1], [0], [0], [1], [0, 0, 1, 1], [], []>} : vector<40x128xbf16>, vector<128x128xbf16>, vector<40x128xf32> -> vector<40x128xf32>
    %614 = arith.addf %608, %613 : vector<40x128xf32>
    %c0_529 = arith.constant 0 : index
    %c8_530 = arith.constant 8 : index
    %c0_531 = arith.constant 0 : index
    %615 = vector.load %arg17[%c0_529, %c8_530, %c0_531] : memref<1x56x128xbf16, #tpu.memory_space<vmem>>, vector<1x40x128xbf16>
    %616 = vector.shape_cast %615 : vector<1x40x128xbf16> to vector<40x128xbf16>
    %c4_532 = arith.constant 4 : index
    %c0_533 = arith.constant 0 : index
    %c0_534 = arith.constant 0 : index
    %617 = vector.load %arg11[%c4_532, %c0_533, %c0_534] : memref<9x128x128xbf16, #tpu.memory_space<vmem>>, vector<1x128x128xbf16>
    %618 = vector.shape_cast %617 : vector<1x128x128xbf16> to vector<128x128xbf16>
    %cst_535 = arith.constant dense<0.000000e+00> : vector<40x128xf32>
    %619 = tpu.matmul %616, %618, %cst_535 {dimension_numbers = #tpu.dot_dimension_numbers<[1], [0], [0], [1], [0, 0, 1, 1], [], []>} : vector<40x128xbf16>, vector<128x128xbf16>, vector<40x128xf32> -> vector<40x128xf32>
    %620 = arith.addf %614, %619 : vector<40x128xf32>
    %c0_536 = arith.constant 0 : index
    %c9_537 = arith.constant 9 : index
    %c0_538 = arith.constant 0 : index
    %621 = vector.load %arg17[%c0_536, %c9_537, %c0_538] : memref<1x56x128xbf16, #tpu.memory_space<vmem>>, vector<1x40x128xbf16>
    %622 = vector.shape_cast %621 : vector<1x40x128xbf16> to vector<40x128xbf16>
    %c5_539 = arith.constant 5 : index
    %c0_540 = arith.constant 0 : index
    %c0_541 = arith.constant 0 : index
    %623 = vector.load %arg11[%c5_539, %c0_540, %c0_541] : memref<9x128x128xbf16, #tpu.memory_space<vmem>>, vector<1x128x128xbf16>
    %624 = vector.shape_cast %623 : vector<1x128x128xbf16> to vector<128x128xbf16>
    %cst_542 = arith.constant dense<0.000000e+00> : vector<40x128xf32>
    %625 = tpu.matmul %622, %624, %cst_542 {dimension_numbers = #tpu.dot_dimension_numbers<[1], [0], [0], [1], [0, 0, 1, 1], [], []>} : vector<40x128xbf16>, vector<128x128xbf16>, vector<40x128xf32> -> vector<40x128xf32>
    %626 = arith.addf %620, %625 : vector<40x128xf32>
    %c0_543 = arith.constant 0 : index
    %c13_544 = arith.constant 13 : index
    %c0_545 = arith.constant 0 : index
    %627 = vector.load %arg17[%c0_543, %c13_544, %c0_545] : memref<1x56x128xbf16, #tpu.memory_space<vmem>>, vector<1x40x128xbf16>
    %628 = vector.shape_cast %627 : vector<1x40x128xbf16> to vector<40x128xbf16>
    %c6_546 = arith.constant 6 : index
    %c0_547 = arith.constant 0 : index
    %c0_548 = arith.constant 0 : index
    %629 = vector.load %arg11[%c6_546, %c0_547, %c0_548] : memref<9x128x128xbf16, #tpu.memory_space<vmem>>, vector<1x128x128xbf16>
    %630 = vector.shape_cast %629 : vector<1x128x128xbf16> to vector<128x128xbf16>
    %cst_549 = arith.constant dense<0.000000e+00> : vector<40x128xf32>
    %631 = tpu.matmul %628, %630, %cst_549 {dimension_numbers = #tpu.dot_dimension_numbers<[1], [0], [0], [1], [0, 0, 1, 1], [], []>} : vector<40x128xbf16>, vector<128x128xbf16>, vector<40x128xf32> -> vector<40x128xf32>
    %632 = arith.addf %626, %631 : vector<40x128xf32>
    %c0_550 = arith.constant 0 : index
    %c14_551 = arith.constant 14 : index
    %c0_552 = arith.constant 0 : index
    %633 = vector.load %arg17[%c0_550, %c14_551, %c0_552] : memref<1x56x128xbf16, #tpu.memory_space<vmem>>, vector<1x40x128xbf16>
    %634 = vector.shape_cast %633 : vector<1x40x128xbf16> to vector<40x128xbf16>
    %c7_553 = arith.constant 7 : index
    %c0_554 = arith.constant 0 : index
    %c0_555 = arith.constant 0 : index
    %635 = vector.load %arg11[%c7_553, %c0_554, %c0_555] : memref<9x128x128xbf16, #tpu.memory_space<vmem>>, vector<1x128x128xbf16>
    %636 = vector.shape_cast %635 : vector<1x128x128xbf16> to vector<128x128xbf16>
    %cst_556 = arith.constant dense<0.000000e+00> : vector<40x128xf32>
    %637 = tpu.matmul %634, %636, %cst_556 {dimension_numbers = #tpu.dot_dimension_numbers<[1], [0], [0], [1], [0, 0, 1, 1], [], []>} : vector<40x128xbf16>, vector<128x128xbf16>, vector<40x128xf32> -> vector<40x128xf32>
    %638 = arith.addf %632, %637 : vector<40x128xf32>
    %c0_557 = arith.constant 0 : index
    %c15_558 = arith.constant 15 : index
    %c0_559 = arith.constant 0 : index
    %639 = vector.load %arg17[%c0_557, %c15_558, %c0_559] : memref<1x56x128xbf16, #tpu.memory_space<vmem>>, vector<1x40x128xbf16>
    %640 = vector.shape_cast %639 : vector<1x40x128xbf16> to vector<40x128xbf16>
    %c8_560 = arith.constant 8 : index
    %c0_561 = arith.constant 0 : index
    %c0_562 = arith.constant 0 : index
    %641 = vector.load %arg11[%c8_560, %c0_561, %c0_562] : memref<9x128x128xbf16, #tpu.memory_space<vmem>>, vector<1x128x128xbf16>
    %642 = vector.shape_cast %641 : vector<1x128x128xbf16> to vector<128x128xbf16>
    %cst_563 = arith.constant dense<0.000000e+00> : vector<40x128xf32>
    %643 = tpu.matmul %640, %642, %cst_563 {dimension_numbers = #tpu.dot_dimension_numbers<[1], [0], [0], [1], [0, 0, 1, 1], [], []>} : vector<40x128xbf16>, vector<128x128xbf16>, vector<40x128xf32> -> vector<40x128xf32>
    %644 = arith.addf %638, %643 : vector<40x128xf32>
    %645 = math.tanh %644 : vector<40x128xf32>
    %646 = vector.shape_cast %645 : vector<40x128xf32> to vector<1x40x128xf32>
    %cst_564 = arith.constant 0.000000e+00 : f32
    %647 = vector.shape_cast %2 : vector<40x1xi1> to vector<1x40x1xi1>
    %648 = vector.broadcast %647 : vector<1x40x1xi1> to vector<1x40x128xi1>
    %649 = vector.broadcast %cst_564 : f32 to vector<1x40x128xf32>
    %650 = arith.select %648, %646, %649 : vector<1x40x128xi1>, vector<1x40x128xf32>
    %c0_565 = arith.constant 0 : index
    %c0_566 = arith.constant 0 : index
    %c0_567 = arith.constant 0 : index
    %651 = vector.load %arg13[%c0_565, %c0_566, %c0_567] : memref<1x40x128xf32, #tpu.memory_space<vmem>>, vector<1x40x128xf32>
    tpu.vector_store %arg13[%c0_565, %c0_566, %c0_567], %650 {strides = array<i32>} : memref<1x40x128xf32, #tpu.memory_space<vmem>>, vector<1x40x128xf32>,
    return
  }
  func.func @transform_0(%arg0: i32) -> (i32, i32) {
    %c0_i32 = arith.constant 0 : i32
    %c0_i32_0 = arith.constant 0 : i32
    %c0_i32_1 = arith.constant 0 : i32
    return %c0_i32, %c0_i32_0 : i32, i32
  }
  func.func @transform_1(%arg0: i32) -> (i32, i32, i32, i32, i32) {
    %c0_i32 = arith.constant 0 : i32
    %c0_i32_0 = arith.constant 0 : i32
    %c0_i32_1 = arith.constant 0 : i32
    %c0_i32_2 = arith.constant 0 : i32
    %c0_i32_3 = arith.constant 0 : i32
    return %arg0, %c0_i32, %c0_i32_0, %c0_i32_1, %c0_i32_2 : i32, i32, i32, i32, i32
  }
  func.func @transform_2(%arg0: i32) -> (i32, i32) {
    %c0_i32 = arith.constant 0 : i32
    %c0_i32_0 = arith.constant 0 : i32
    %c0_i32_1 = arith.constant 0 : i32
    return %c0_i32, %c0_i32_0 : i32, i32
  }
  func.func @transform_3(%arg0: i32) -> (i32, i32) {
    %c0_i32 = arith.constant 0 : i32
    %c0_i32_0 = arith.constant 0 : i32
    %c0_i32_1 = arith.constant 0 : i32
    return %c0_i32, %c0_i32_0 : i32, i32
  }
  func.func @transform_4(%arg0: i32) -> (i32, i32, i32) {
    %c0_i32 = arith.constant 0 : i32
    %c0_i32_0 = arith.constant 0 : i32
    %c0_i32_1 = arith.constant 0 : i32
    %c0_i32_2 = arith.constant 0 : i32
    return %c0_i32, %c0_i32_0, %c0_i32_1 : i32, i32, i32
  }
  func.func @transform_5(%arg0: i32) -> (i32, i32) {
    %c0_i32 = arith.constant 0 : i32
    %c0_i32_0 = arith.constant 0 : i32
    %c0_i32_1 = arith.constant 0 : i32
    return %c0_i32, %c0_i32_0 : i32, i32
  }
  func.func @transform_6(%arg0: i32) -> (i32, i32, i32) {
    %c0_i32 = arith.constant 0 : i32
    %c0_i32_0 = arith.constant 0 : i32
    %c0_i32_1 = arith.constant 0 : i32
    %c0_i32_2 = arith.constant 0 : i32
    return %c0_i32, %c0_i32_0, %c0_i32_1 : i32, i32, i32
  }
  func.func @transform_7(%arg0: i32) -> (i32, i32) {
    %c0_i32 = arith.constant 0 : i32
    %c0_i32_0 = arith.constant 0 : i32
    %c0_i32_1 = arith.constant 0 : i32
    return %c0_i32, %c0_i32_0 : i32, i32
  }
  func.func @transform_8(%arg0: i32) -> (i32, i32, i32) {
    %c0_i32 = arith.constant 0 : i32
    %c0_i32_0 = arith.constant 0 : i32
    %c0_i32_1 = arith.constant 0 : i32
    %c0_i32_2 = arith.constant 0 : i32
    return %c0_i32, %c0_i32_0, %c0_i32_1 : i32, i32, i32
  }
  func.func @transform_9(%arg0: i32) -> (i32, i32) {
    %c0_i32 = arith.constant 0 : i32
    %c0_i32_0 = arith.constant 0 : i32
    %c0_i32_1 = arith.constant 0 : i32
    return %c0_i32, %c0_i32_0 : i32, i32
  }
  func.func @transform_10(%arg0: i32) -> (i32, i32, i32) {
    %c0_i32 = arith.constant 0 : i32
    %c0_i32_0 = arith.constant 0 : i32
    %c0_i32_1 = arith.constant 0 : i32
    %c0_i32_2 = arith.constant 0 : i32
    return %c0_i32, %c0_i32_0, %c0_i32_1 : i32, i32, i32
  }
  func.func @transform_11(%arg0: i32) -> (i32, i32) {
    %c0_i32 = arith.constant 0 : i32
    %c0_i32_0 = arith.constant 0 : i32
    %c0_i32_1 = arith.constant 0 : i32
    return %c0_i32, %c0_i32_0 : i32, i32
  }
  func.func @transform_12(%arg0: i32) -> (i32, i32, i32) {
    %c0_i32 = arith.constant 0 : i32
    %c0_i32_0 = arith.constant 0 : i32
    %c0_i32_1 = arith.constant 0 : i32
    return %arg0, %c0_i32, %c0_i32_0 : i32, i32, i32
  }
}

</mosaic_0001>

<bundles_post_ra>
// kernel: autoencoder_forward.1
= control target key start
LH: loop header
LB: loop body
LE: loop exit
PB: predicated region body
PF: predicated region fallthrough
CT: control target
= control target key end

     0   :  { %17 = vsyncpa [#allocation7], 0  ;;  %s18833_s0 = inlined_call_operand.vmem [shape: f32[40,1], index: 0, kind: input, shape index: {}]   ;;  %s18834_s1 = inlined_call_operand.vmem [shape: f32[2,4,4,56,1], index: 1, kind: input, shape index: {}]   ;;  %s18835_s2 = inlined_call_operand.vmem [shape: f32[9,256], index: 2, kind: input, shape index: {}]   ;;  %s18836_s3 = inlined_call_operand.vmem [shape: f32[1,256], index: 3, kind: input, shape index: {}]   ;;  %s18837_s4 = inlined_call_operand.vmem [shape: bf16[9,256,256], index: 4, kind: input, shape index: {}]   ;;  %s18838_s5 = inlined_call_operand.vmem [shape: f32[1,256], index: 5, kind: input, shape index: {}]   ;;  %s18839_s6 = inlined_call_operand.hbm [shape: bf16[9,256,128], index: 6, kind: input, shape index: {}]   ;;  %s18840_s7 = inlined_call_operand.vmem [shape: f32[1,128], index: 7, kind: input, shape index: {}]   ;;  %s18841_s8 = inlined_call_operand.hbm [shape: bf16[9,128,128], index: 8, kind: input, shape index: {}]   ;;  %s18842_s9 = inlined_call_operand.vmem [shape: f32[1,128], index: 9, kind: input, shape index: {}]   ;;  %s18843_s10 = inlined_call_operand.vmem [shape: bf16[9,128,128], index: 10, kind: input, shape index: {}]   ;;  %s18844_s11 = inlined_call_operand.vmem [shape: f32[1,128], index: 11, kind: input, shape index: {}]   ;;  %s18845_s12 = inlined_call_operand.vmem [shape: f32[2,40,128], index: 12, kind: output, shape index: {}]  }
   0x1   :  { %18 = vsyncpa [#allocation9], 0  ;;  %s13850_s21 = smov 0  }
   0x2 LB: > { %s338_s24 = sshll.u32 %s18839_s6, 4  ;;  %s13859_s25 = sadd.s32 4294967295, %s13778_s21   ;;  %s13778_s21 = sphi %s13850_s21, %s24_s21   ;;  %s339_s24 = int_to_ptr.hbm [resolvable:$true] %s338_s24 }
   0x3   : > { %p10090_p0 = scmp.ge.s32.totalorder %s13778_s21, 1  ;;  %p312_p1 = scmp.lt.s32.totalorder %s13778_s21, 3 }
   0x4   : > { %p13671_p2 = scmp.eq.s32.totalorder %s13859_s25, 0  ;;  %s13780_s27 = smov [#allocation6]  }
   0x5   : > { %p13864_p3 = pnand %p10090_p0, %p312_p1  ;;  %s340_s28 = sshll.u32 %s13780_s27, 4  ;;  %s341_s28 = int_to_ptr.vmem [resolvable:$true] %s340_s28 }
   0x6   : > { %s355_s13 = sshll.u32 %s18841_s8, 4  ;;  %s13781_s14 = smov [#allocation8]   ;;  %s356_s13 = int_to_ptr.hbm [resolvable:$true] %s355_s13 }
   0x7   : > { %p13664_p4 = pneg %p13864_p3  ;;  %s357_s15 = sshll.u32 %s13781_s14, 4  ;;  %s358_s15 = int_to_ptr.vmem [resolvable:$true] %s357_s15 }
   0x8   : > { %s13782_s16 = smov 64   ;;  %s13783_s17 = smov 4  }
   0x9   : > { %p13665_p5 = pnand %p13671_p2, %p13664_p4  ;;  %390 = sbr.rel (%p13864_p3) target bundleno = 1883 (0x75b), region = 68 }
   0xb   : > { %13667 = dma.hbm_to_vmem [thread:$0]  (!%p13665_p5), %s339_s24, 18432, %s341_s28, [#allocation7], %s13782_s16, %s13782_s16, %s13783_s17  }
   0xc   : > { %13670 = dma.hbm_to_vmem [thread:$0]  (!%p13665_p5), %s356_s13, 9216, %s358_s15, [#allocation9], %s13782_s16, %s13782_s16, %s13783_s17  }
   0xe   : > { %13769 = dma.done.wait (%p13671_p2), [#allocation7], 18432  }
   0xf   : > { %13771 = vsyncadd (%p13671_p2), [#allocation7], 4294948864 }
  0x10   : > { %13773 = dma.done.wait (%p13671_p2), [#allocation9], 9216  }
  0x11   : > { %13775 = vsyncadd (%p13671_p2), [#allocation9], 4294958080  ;;  %p438_p6 = scmp.lt.s32.totalorder %s13859_s25, 1  ;;  %v13784_v0 = vmov 0   ;;  %v448_v31 = vld [vmem:[%s18833_s0] sm:$0xff]  ;;  %v450_v35 = vld [vmem:[%s18833_s0 + $0x10] sm:$0xff] }
  0x12   : > { %13690 = vset.pattern.permute.xlu2 %v13784_v0  ;;  %13689 = vset.pattern.permute.xlu1 %v13784_v0  ;;  %vm453_vm0 = vcmp.gt.f32.partialorder %v448_v31, 0.0  ;;  %v449_v36 = vld [vmem:[%s18833_s0 + $0x8] sm:$0xff]  ;;  %vm455_vm1 = vcmp.gt.f32.partialorder %v450_v35, 0.0  ;;  %v452_v58 = vld [vmem:[%s18833_s0 + $0x20] sm:$0xff]  ;;  %v451_v59 = vld [vmem:[%s18833_s0 + $0x18] sm:$0xff]  ;;  %vm3097_vm9 = vcmask 1046528  }
  0x13   : > { %13688 = vset.pattern.permute.xlu0 %v13784_v0  ;;  %s19146_s25 = smov (!%p438_p6, %s13859_s25), 1  ;;  %v994_v33 = vsel %vm453_vm0, 1, %v13784_v0  ;;  %vm454_vm2 = vcmp.gt.f32.partialorder %v449_v36, 0.0  ;;  %v996_v37 = vsel %vm455_vm1, 1, %v13784_v0  ;;  %vm457_vm3 = vcmp.gt.f32.partialorder %v452_v58, 0.0 }
  0x14   : > { %s13654_s18 = smul.u32 896, %s19146_s25  ;;  %v995_v38 = vsel %vm454_vm2, 1, %v13784_v0  ;;  %vm456_vm4 = vcmp.gt.f32.partialorder %v451_v59, 0.0  ;;  %v10269_v31 = vld [vmem:[%s18835_s2 + $0x2] ss:$8 sm:$0x3] }
  0x15   : > { %vm2719_vm8 = vsmask.f32 7424  ;;  %vm3756_vm10 = vsmask.f32 4352  ;;  %vm6220_vm13 = vsmask.f32 6400 }
  0x16   : > { %s13896_s22 = scalar_lea.vmem %s18834_s1, %s13654_s18  ;;  %vm7390_vm14 = vcmask 1044480   ;;  %vm7155_vm15 = vsmask.f32 5376  ;;  %s13655_s26 = smul.u32 40, %s19146_s25 }
  0x17   : > { %v10259_v1 = vld [vmem:[%s13896_s22 + $0x160] sm:$0xff]  ;;  %v13900_v2 = vld [vmem:[%s13896_s22 + $0x130] sm:$0xff]  ;;  %v10260_v4 = vld [vmem:[%s13896_s22 + $0x168] sm:$0xff] }
  0x18   : > { %v13903_v3 = vld [vmem:[%s13896_s22 + $0x120] sm:$0xff]  ;;  %2184 = vperm.xlu2 %13690, %v10259_v1   ;;  %2133 = vperm.xlu1 %13689, %v13900_v2   ;;  %v10258_v5 = vld [vmem:[%s13896_s22 + $0x158] sm:$0xff]  ;;  %v13910_v6 = vld [vmem:[%s13896_s22 + $0x128] sm:$0xff]  ;;  %v998_v1 = vsel %vm457_vm3, 1, %v13784_v0  ;;  %s18813_s29 = scalar_lea.vmem %s18845_s12, %s13655_s26 }
  0x19   : > { %2123 = vperm.xlu0 %13688, %v13903_v3   ;;  %v10266_v7 = vld [vmem:[%s13896_s22 + $0x1a0] sm:$0xff]  ;;  %v10265_v8 = vld [vmem:[%s13896_s22 + $0x198] sm:$0xff]  ;;  %v10264_v9 = vld [vmem:[%s13896_s22 + $0x190] sm:$0xff] }
  0x1a   : > { %v13917_v10 = vld [vmem:[%s13896_s22 + $0x210] sm:$0xff]  ;;  %v13920_v11 = vld [vmem:[%s13896_s22 + $0x208] sm:$0xff]  ;;  %v13923_v12 = vld [vmem:[%s13896_s22 + $0x200] sm:$0xff] }
  0x1b   : > { %v10278_v13 = vld [vmem:[%s13896_s22 + $0x248] sm:$0xff]  ;;  %v10277_v14 = vld [vmem:[%s13896_s22 + $0x240] sm:$0xff]  ;;  %v10276_v15 = vld [vmem:[%s13896_s22 + $0x238] sm:$0xff] }
  0x1c   : > { %v10284_v16 = vld [vmem:[%s13896_s22 + $0x280] sm:$0xff]  ;;  %v10283_v17 = vld [vmem:[%s13896_s22 + $0x278] sm:$0xff]  ;;  %v10282_v18 = vld [vmem:[%s13896_s22 + $0x270] sm:$0xff] }
  0x1d   : > { %v13935_v19 = vld [vmem:[%s13896_s22 + $0x2f0] sm:$0xff]  ;;  %v13938_v20 = vld [vmem:[%s13896_s22 + $0x2e8] sm:$0xff]  ;;  %v13941_v21 = vld [vmem:[%s13896_s22 + $0x2e0] sm:$0xff] }
  0x1e   : > { %18930 = vst [vmem:[#allocation12_spill] sm:$0xff] %v13935_v19  ;;  %v10296_v22 = vld [vmem:[%s13896_s22 + $0x328] sm:$0xff]  ;;  %v10295_v23 = vld [vmem:[%s13896_s22 + $0x320] sm:$0xff]  ;;  %v10294_v24 = vld [vmem:[%s13896_s22 + $0x318] sm:$0xff] }
  0x1f   : > { %v13950_v25 = vld [vmem:[%s13896_s22 + $0x140] sm:$0xff]  ;;  %v13953_v26 = vld [vmem:[%s13896_s22 + $0x138] sm:$0xff]  ;;  %v10300_v27 = vld [vmem:[%s13896_s22 + $0x350] sm:$0xff] }
  0x20   : > { %2189 = vperm.xlu2 %13690, %v10260_v4   ;;  %2179 = vperm.xlu1 %13689, %v10258_v5   ;;  %18931 = vst [vmem:[#allocation13_spill] sm:$0xff] %v13950_v25  ;;  %v10261_v28 = vld [vmem:[%s13896_s22 + $0x170] sm:$0xff]  ;;  %v10302_v29 = vld [vmem:[%s13896_s22 + $0x360] sm:$0xff]  ;;  %v10301_v30 = vld [vmem:[%s13896_s22 + $0x358] sm:$0xff]  ;;  %v997_v4 = vsel %vm456_vm4, 1, %v13784_v0 }
  0x21   : > { %2128 = vperm.xlu0 %13688, %v13910_v6   ;;  %18932 = vst [vmem:[#allocation14_spill] sm:$0xff] %v13953_v26  ;;  %v10267_v32 = vld [vmem:[%s13896_s22 + $0x1a8] sm:$0xff]  ;;  %v10262_v34 = vld [vmem:[%s13896_s22 + $0x178] sm:$0xff]  ;;  %v10268_v39 = vld [vmem:[%s13896_s22 + $0x1b0] sm:$0xff] }
  0x22   : > { %v10279_v41 = vld [vmem:[%s13896_s22 + $0x250] sm:$0xff]  ;;  %v10274_v42 = vld [vmem:[%s13896_s22 + $0x220] sm:$0xff]  ;;  %v10273_v43 = vld [vmem:[%s13896_s22 + $0x218] sm:$0xff] }
  0x23   : > { %v10286_v45 = vld [vmem:[%s13896_s22 + $0x290] sm:$0xff]  ;;  %v10285_v46 = vld [vmem:[%s13896_s22 + $0x288] sm:$0xff]  ;;  %v10280_v47 = vld [vmem:[%s13896_s22 + $0x258] sm:$0xff] }
  0x24   : > { %v10297_v49 = vld [vmem:[%s13896_s22 + $0x330] sm:$0xff]  ;;  %v10292_v50 = vld [vmem:[%s13896_s22 + $0x300] sm:$0xff]  ;;  %v10291_v51 = vld [vmem:[%s13896_s22 + $0x2f8] sm:$0xff] }
  0x25   : > { %v10304_v55 = vld [vmem:[%s13896_s22 + $0x370] sm:$0xff]  ;;  %v10303_v56 = vld [vmem:[%s13896_s22 + $0x368] sm:$0xff]  ;;  %v10298_v57 = vld [vmem:[%s13896_s22 + $0x338] sm:$0xff] }
  0x26   : > { %v10200_v63 = vld [vmem:[%s13896_s22 + $0x18f] sm:$0xff]  ;;  %v2120_v0 = vld [vmem:[%s18835_s2] ss:$8 sm:$0x3] }
  0x28   : > { %2245 = vperm.xlu2 %13690, %v10266_v7   ;;  %2240 = vperm.xlu1 %13689, %v10265_v8  }
  0x29   : > { %2235 = vperm.xlu0 %13688, %v10264_v9   ;;  %v10205_v9 = vld [vmem:[%s13896_s22 + $0xe8] sm:$0xff] }
  0x30   : > { %2301 = vperm.xlu2 %13690, %v13917_v10   ;;  %2296 = vperm.xlu1 %13689, %v13920_v11  }
  0x31   : > { %2291 = vperm.xlu0 %13688, %v13923_v12  }
  0x38   : > { %2358 = vperm.xlu2 %13690, %v10278_v13   ;;  %2353 = vperm.xlu1 %13689, %v10277_v14   ;;  %v10202_v13 = vld [vmem:[%s13896_s22 + $0x19f] sm:$0xff]  ;;  %v10201_v14 = vld [vmem:[%s13896_s22 + $0x197] sm:$0xff] }
  0x39   : > { %2348 = vperm.xlu0 %13688, %v10276_v15  }
  0x40   : > { %2414 = vperm.xlu2 %13690, %v10284_v16   ;;  %2409 = vperm.xlu1 %13689, %v10283_v17  }
  0x41   : > { %2404 = vperm.xlu0 %13688, %v10282_v18   ;;  %v10263_v18 = vld [vmem:[%s18835_s2 + $0x1] ss:$8 sm:$0x3] }
  0x48   : > { %2470 = vperm.xlu2 %13690, %v13935_v19   ;;  %2465 = vperm.xlu1 %13689, %v13938_v20  }
  0x49   : > { %2460 = vperm.xlu0 %13688, %v13941_v21  }
  0x50   : > { %2526 = vperm.xlu2 %13690, %v10296_v22   ;;  %2521 = vperm.xlu1 %13689, %v10295_v23   ;;  %v14034_v22 = vperm.slane %v2120_v0, 0  ;;  %v14036_v23 = vperm.slane %v2120_v0, 1 }
  0x51   : > { %2516 = vperm.xlu0 %13688, %v10294_v24   ;;  %v458_v24 = vld [vmem:[%s18836_s3] sm:$0x3] }
  0x58   : > { %2143 = vperm.xlu2 %13690, %v13950_v25   ;;  %2138 = vperm.xlu1 %13689, %v13953_v26   ;;  %v13036_v26 = vld [vmem:[%s18837_s4 + $0x44] sm:$0xf]  ;;  %v10342_v25 = vld [vmem:[%s18837_s4 + $0x48] sm:$0xf0] }
  0x59   : > { %2572 = vperm.xlu0 %13688, %v10300_v27   ;;  %v10207_v27 = vld [vmem:[%s13896_s22 + $0xf8] sm:$0xff] }
  0x60   : > { %2194 = vperm.xlu2 %13690, %v10261_v28   ;;  %2582 = vperm.xlu1 %13689, %v10302_v29   ;;  %v10206_v28 = vld [vmem:[%s13896_s22 + $0xf0] sm:$0xff]  ;;  %v14043_v29 = vperm.slane %v10263_v18, 0 }
  0x61   : > { %2577 = vperm.xlu0 %13688, %v10301_v30   ;;  %v14045_v30 = vperm.slane %v10263_v18, 1  ;;  %v13058_v18 = vld [vmem:[%s18837_s4 + $0xf4] sm:$0xf] }
  0x62   : > { %18933 = vst [vmem:[#allocation15_spill] sm:$0xff] %v14043_v29 }
  0x63   : > { %18934 = vst [vmem:[#allocation16_spill] sm:$0xff] %v14045_v30 }
  0x68   : > { %2250 = vperm.xlu2 %13690, %v10267_v32   ;;  %1000 = vperm.xlu1 %13689, %v994_v33   ;;  %v14050_v32 = vperm.slane %v458_v24, 0  ;;  %v14052_v33 = vperm.slane %v458_v24, 1  ;;  %v10430_v24 = vld [vmem:[%s18837_s4 + $0xf8] sm:$0xf0] }
  0x69   : > { %2199 = vperm.xlu0 %13688, %v10262_v34  }
  0x6a   : > { %18935 = vst [vmem:[#allocation17_spill] sm:$0xff] %v14050_v32 }
  0x6b   : > { %18936 = vst [vmem:[#allocation18_spill] sm:$0xff] %v14052_v33 }
  0x70   : > { %1006 = vperm.xlu2 %13690, %v996_v37   ;;  %1003 = vperm.xlu1 %13689, %v995_v38   ;;  %v14061_v38 = vperm.slane %v10269_v31, 0 }
  0x71   : > { %2255 = vperm.xlu0 %13688, %v10268_v39   ;;  %v14063_v39 = vperm.slane %v10269_v31, 1 }
  0x72   : > { %v13976_v40 = vpop.permute.xlu2 %2184 }
  0x78   : > { %2363 = vperm.xlu2 %13690, %v10279_v41   ;;  %2311 = vperm.xlu1 %13689, %v10274_v42   ;;  %v10275_v41 = vld [vmem:[%s18835_s2 + $0x3] ss:$8 sm:$0x3] }
  0x79   : > { %2306 = vperm.xlu0 %13688, %v10273_v43  }
  0x7a   : > { %v13981_v44 = vpop.permute.xlu2 %2189 }
  0x7b   : > { %v2211_v43 = vmul.f32 %v14043_v29, %v13981_v44 }
  0x80   : > { %2424 = vperm.xlu2 %13690, %v10286_v45   ;;  %2419 = vperm.xlu1 %13689, %v10285_v46  }
  0x81   : > { %2368 = vperm.xlu0 %13688, %v10280_v47   ;;  %v10217_v47 = vld [vmem:[%s13896_s22 + $0x26f] sm:$0xff] }
  0x82   : > { %v13986_v48 = vpop.permute.xlu2 %2245 }
  0x88   : > { %2531 = vperm.xlu2 %13690, %v10297_v49   ;;  %2480 = vperm.xlu1 %13689, %v10292_v50   ;;  %v14077_v49 = vperm.slane %v10275_v41, 0  ;;  %v14079_v50 = vperm.slane %v10275_v41, 1  ;;  %v13041_v41 = vld [vmem:[%s18837_s4 + $0x64] sm:$0xf0] }
  0x89   : > { %2475 = vperm.xlu0 %13688, %v10291_v51   ;;  %v10281_v51 = vld [vmem:[%s18835_s2 + $0x4] ss:$8 sm:$0x3] }
  0x8a   : > { %v13991_v52 = vpop.permute.xlu2 %2301  ;;  %v2134_v53 = vpop.permute.xlu1 %2133 }
  0x8b   : > { %v13993_v54 = vpop.permute.xlu0 %2123  ;;  %v2155_v34 = vmul.f32 %v14034_v22, %v2134_v53  ;;  %v2156_v35 = vmul.f32 %v14036_v23, %v2134_v53  ;;  %v2267_v53 = vmul.f32 %v14061_v38, %v13986_v48 }
  0x8d   : > { %v2165_v45 = vadd.f32 %v2155_v34, %v14050_v32  ;;  %v2166_v46 = vadd.f32 %v2156_v35, %v14052_v33  ;;  %v10223_v34 = vld [vmem:[%s13896_s22 + $0x1c8] sm:$0xff]  ;;  %v10356_v35 = vld [vmem:[%s18837_s4 + $0x60] sm:$0xf] }
  0x8f   : > { %v2221_v58 = vadd.f32 %v2211_v43, %v2165_v45  ;;  %v10420_v43 = vld [vmem:[%s18837_s4 + $0xe0] sm:$0xf] }
  0x90   : > { %2592 = vperm.xlu2 %13690, %v10304_v55   ;;  %2587 = vperm.xlu1 %13689, %v10303_v56   ;;  %v2268_v55 = vmul.f32 %v14063_v39, %v13986_v48  ;;  %v13043_v56 = vld [vmem:[%s18837_s4 + $0x74] sm:$0xf0]  ;;  %v10287_v48 = vld [vmem:[%s18835_s2 + $0x5] ss:$8 sm:$0x3] }
  0x91   : > { %2536 = vperm.xlu0 %13688, %v10298_v57   ;;  %v10428_v57 = vld [vmem:[%s18837_s4 + $0xf0] sm:$0xf] }
  0x92   : > { %v14004_v60 = vpop.permute.xlu2 %2358  ;;  %v14006_v61 = vpop.permute.xlu1 %2179 }
  0x93   : > { %v14008_v62 = vpop.permute.xlu0 %2128 }
  0x98   : > { %1585 = vperm.xlu2 %13690, %v10200_v63   ;;  %1012 = vperm.xlu1 %13689, %v998_v1   ;;  %v13059_v1 = vld [vmem:[%s18837_s4 + $0xf4] sm:$0xf0] }
  0x99   : > { %1009 = vperm.xlu0 %13688, %v997_v4   ;;  %v13042_v4 = vld [vmem:[%s18837_s4 + $0x74] sm:$0xf] }
  0x9a   : > { %v14013_v5 = vpop.permute.xlu2 %2414  ;;  %v14015_v7 = vpop.permute.xlu1 %2240 }
  0x9b   : > { %v14017_v8 = vpop.permute.xlu0 %2235 }
  0xa0   : > { %1641 = vperm.xlu2 %13690, %v10205_v9   ;;  %1595 = vperm.xlu1 %13689, %v10202_v13   ;;  %v14111_v9 = vperm.slane %v10281_v51, 0 }
  0xa1   : > { %1590 = vperm.xlu0 %13688, %v10201_v14  }
  0xa2   : > { %v14025_v15 = vpop.permute.xlu2 %2470  ;;  %v14027_v16 = vpop.permute.xlu1 %2296  ;;  %18937 = vst [vmem:[#allocation19_spill] sm:$0xff] %v14111_v9 }
  0xa3   : > { %v14029_v17 = vpop.permute.xlu0 %2291 }
  0xa8   : > { %1697 = vperm.xlu2 %13690, %v13903_v3   ;;  %1651 = vperm.xlu1 %13689, %v10207_v27   ;;  %v2212_v3 = vmul.f32 %v14045_v30, %v13981_v44  ;;  %v10364_v44 = vld [vmem:[%s18837_s4 + $0x70] sm:$0xf]  ;;  %v2323_v27 = vmul.f32 %v14077_v49, %v13991_v52 }
  0xa9   : > { %1646 = vperm.xlu0 %13688, %v10206_v28   ;;  %v10365_v63 = vor.u32 %v13043_v56, %v10364_v44  ;;  %v2324_v28 = vmul.f32 %v14079_v50, %v13991_v52  ;;  %v10433_v52 = vor.u32 %v13058_v18, %v10430_v24  ;;  %v10358_v44 = vld [vmem:[%s18837_s4 + $0x68] sm:$0xf0]  ;;  %v14148_v56 = vperm.slane %v10281_v51, 1  ;;  %v10348_v18 = vld [vmem:[%s18837_s4 + $0x50] sm:$0xf] }
  0xaa   : > { %v14057_v36 = vpop.permute.xlu2 %2526  ;;  %v14059_v37 = vpop.permute.xlu1 %2353  ;;  %v2222_v59 = vadd.f32 %v2212_v3, %v2166_v46  ;;  %v2277_v3 = vadd.f32 %v2267_v53, %v2221_v58  ;;  %v13057_v46 = vld [vmem:[%s18837_s4 + $0xe4] sm:$0xf0]  ;;  %v13056_v53 = vld [vmem:[%s18837_s4 + $0xe4] sm:$0xf]  ;;  %v14157_v58 = vperm.slane %v10287_v48, 0 }
  0xab   : > { %v14068_v42 = vpop.permute.xlu0 %2348  ;;  %2932 = vmatpush.bf16.msra.mxu0 %v10365_v63  ;;  %v10218_v63 = vld [vmem:[%s13896_s22 + $0x277] sm:$0xff]  ;;  %3001 = vmatpush.bf16.msra.mxu3 %v10433_v52  ;;  %v10421_v51 = vor.u32 %v13057_v46, %v10420_v43  ;;  %v2153_v52 = vmul.f32 %v14034_v22, %v14008_v62  ;;  %v2380_v46 = vmul.f32 %v14111_v9, %v14004_v60 }
  0xac   : > { %v2278_v45 = vadd.f32 %v2268_v55, %v2222_v59  ;;  %v10422_v55 = vld [vmem:[%s18837_s4 + $0xe8] sm:$0xf0]  ;;  %v13039_v24 = vld [vmem:[%s18837_s4 + $0x54] sm:$0xf0] }
  0xad   : > { %v10293_v59 = vld [vmem:[%s18835_s2 + $0x6] ss:$8 sm:$0x3] }
  0xae   : > { %v2334_v43 = vadd.f32 %v2324_v28, %v2278_v45  ;;  %v10350_v28 = vld [vmem:[%s18837_s4 + $0x58] sm:$0xf0] }
  0xb0   : > { %1754 = vperm.xlu2 %13690, %v10217_v47   ;;  %1707 = vperm.xlu1 %13689, %v13900_v2   ;;  %v10366_v2 = vld [vmem:[%s18837_s4 + $0x78] sm:$0xf0]  ;;  %v13040_v47 = vld [vmem:[%s18837_s4 + $0x64] sm:$0xf] }
  0xb1   : > { %1702 = vperm.xlu0 %13688, %v13910_v6   ;;  %v10429_v6 = vor.u32 %v13059_v1, %v10428_v57  ;;  %v10369_v0 = vor.u32 %v13042_v4, %v10366_v2  ;;  %v10219_v57 = vld [vmem:[%s13896_s22 + $0x27f] sm:$0xff]  ;;  %v10357_v1 = vor.u32 %v13041_v41, %v10356_v35  ;;  %v2151_v4 = vmul.f32 %v14034_v22, %v13993_v54  ;;  %v10412_v35 = vld [vmem:[%s18837_s4 + $0xd0] sm:$0xf] }
  0xb2   : > { %v14113_v13 = vpop.permute.xlu2 %2143  ;;  %v14115_v14 = vpop.permute.xlu1 %2409  ;;  %v2152_v2 = vmul.f32 %v14036_v23, %v13993_v54  ;;  %v2333_v41 = vadd.f32 %v2323_v27, %v2277_v3  ;;  %v14178_v54 = vperm.slane %v10287_v48, 1  ;;  %v13055_v27 = vld [vmem:[%s18837_s4 + $0xd4] sm:$0xf0]  ;;  %v13038_v48 = vld [vmem:[%s18837_s4 + $0x54] sm:$0xf]  ;;  %v14195_v3 = vperm.slane %v10293_v59, 0 }
  0xb3   : > { %v14127_v31 = vpop.permute.xlu0 %2404  ;;  %2955 = vmatpush.bf16.msra.mxu1 %v10429_v6  ;;  %2978 = vmatpush.bf16.msra.mxu2 %v10369_v0  ;;  %v10361_v6 = vor.u32 %v13040_v47, %v10358_v44  ;;  %v10425_v0 = vor.u32 %v13056_v53, %v10422_v55  ;;  %v2381_v47 = vmul.f32 %v14148_v56, %v14004_v60  ;;  %v13054_v55 = vld [vmem:[%s18837_s4 + $0xd4] sm:$0xf] }
  0xb4   : > { %2933 = vmatpush.bf16.msra.mxu0 %v10357_v1  ;;  %v10349_v44 = vor.u32 %v13039_v24, %v10348_v18  ;;  %v10353_v53 = vor.u32 %v13038_v48, %v10350_v28  ;;  %v2207_v1 = vmul.f32 %v14043_v29, %v14006_v61  ;;  %v10340_v18 = vld [vmem:[%s18837_s4 + $0x40] sm:$0xf]  ;;  %v13037_v24 = vld [vmem:[%s18837_s4 + $0x44] sm:$0xf0]  ;;  %v2390_v19 = vadd.f32 %v2380_v46, %v2333_v41 }
  0xb5   : > { %3002 = vmatpush.bf16.msra.mxu3 %v10425_v0  ;;  %v2163_v0 = vadd.f32 %v2153_v52, %v14050_v32  ;;  %v13053_v28 = vld [vmem:[%s18837_s4 + $0xc4] sm:$0xf0]  ;;  %v10341_v52 = vor.u32 %v13037_v24, %v10340_v18  ;;  %v10345_v41 = vor.u32 %v13036_v26, %v10342_v25  ;;  %v10332_v18 = vld [vmem:[%s18837_s4 + $0x30] sm:$0xf]  ;;  %v2265_v25 = vmul.f32 %v14061_v38, %v14015_v7  ;;  %v10398_v24 = vld [vmem:[%s18837_s4 + $0xb8] sm:$0xf0] }
  0xb6   : > { %v10396_v26 = vld [vmem:[%s18837_s4 + $0xb0] sm:$0xf] }
  0xb7   : > { %2956 = vmatpush.bf16.msra.mxu1 %v10421_v51  ;;  %2979 = vmatpush.bf16.msra.mxu2 %v10361_v6  ;;  %v2208_v51 = vmul.f32 %v14045_v30, %v14006_v61  ;;  %v2161_v61 = vadd.f32 %v2151_v4, %v14050_v32  ;;  %v2391_v4 = vadd.f32 %v2381_v47, %v2334_v43  ;;  %v10224_v32 = vld [vmem:[%s13896_s22 + $0x1d0] sm:$0xff] }
  0xb8   : > { %1811 = vperm.xlu2 %13690, %v10223_v34   ;;  %1764 = vperm.xlu1 %13689, %v10219_v57   ;;  %v2154_v34 = vmul.f32 %v14036_v23, %v14008_v62  ;;  %v10413_v57 = vor.u32 %v13055_v27, %v10412_v35  ;;  %v2209_v62 = vmul.f32 %v14043_v29, %v13976_v40  ;;  %v10404_v35 = vld [vmem:[%s18837_s4 + $0xc0] sm:$0xf] }
  0xb9   : > { %1759 = vperm.xlu0 %13688, %v10218_v63   ;;  %v10414_v63 = vld [vmem:[%s18837_s4 + $0xd8] sm:$0xf0]  ;;  %v2210_v27 = vmul.f32 %v14045_v30, %v13976_v40  ;;  %v2162_v40 = vadd.f32 %v2152_v2, %v14052_v33  ;;  %2934 = vmatpush.bf16.msra.mxu0 %v10349_v44  ;;  %v10405_v2 = vor.u32 %v13053_v28, %v10404_v35 }
  0xba   : > { %v14197_v60 = vpop.permute.xlu2 %2194  ;;  %v14199_v45 = vpop.permute.xlu1 %2465  ;;  %v10417_v48 = vor.u32 %v13054_v55, %v10414_v63  ;;  %v10225_v30 = vld [vmem:[%s13896_s22 + $0x1d8] sm:$0xff]  ;;  %v13052_v55 = vld [vmem:[%s18837_s4 + $0xc4] sm:$0xf]  ;;  %v10406_v63 = vld [vmem:[%s18837_s4 + $0xc8] sm:$0xf0]  ;;  %v2164_v29 = vadd.f32 %v2154_v34, %v14052_v33  ;;  %v2217_v43 = vadd.f32 %v2207_v1, %v2161_v61  ;;  %v2436_v47 = vmul.f32 %v14157_v58, %v14013_v5 }
  0xbb   : > { %18938 = vst [vmem:[#allocation20_spill] sm:$0xff] %v14197_v60  ;;  %v14213_v6 = vpop.permute.xlu0 %2460  ;;  %v14246_v60 = vperm.slane %v10293_v59, 1  ;;  %2957 = vmatpush.bf16.msra.mxu1 %v10413_v57  ;;  %2980 = vmatpush.bf16.msra.mxu2 %v10353_v53  ;;  %v2218_v46 = vadd.f32 %v2208_v51, %v2162_v40  ;;  %v10409_v44 = vor.u32 %v13052_v55, %v10406_v63  ;;  %v13035_v59 = vld [vmem:[%s18837_s4 + $0x34] sm:$0xf0]  ;;  %v13034_v1 = vld [vmem:[%s18837_s4 + $0x34] sm:$0xf] }
  0xbc   : > { %3003 = vmatpush.bf16.msra.mxu3 %v10417_v48  ;;  %v2437_v34 = vmul.f32 %v14178_v54, %v14013_v5  ;;  %v2219_v57 = vadd.f32 %v2209_v62, %v2163_v0  ;;  %v13051_v53 = vld [vmem:[%s18837_s4 + $0xb4] sm:$0xf0]  ;;  %v2266_v5 = vmul.f32 %v14063_v39, %v14015_v7  ;;  %v2263_v62 = vmul.f32 %v14061_v38, %v14017_v8  ;;  %v13050_v51 = vld [vmem:[%s18837_s4 + $0xb4] sm:$0xf]  ;;  %v10324_v55 = vld [vmem:[%s18837_s4 + $0x20] sm:$0xf] }
  0xbd   : > { %2935 = vmatpush.bf16.msra.mxu0 %v10341_v52  ;;  %v2220_v35 = vadd.f32 %v2210_v27, %v2164_v29  ;;  %v10299_v7 = vld [vmem:[%s18835_s2 + $0x7] ss:$8 sm:$0x3]  ;;  %v10397_v0 = vor.u32 %v13051_v53, %v10396_v26  ;;  %v2446_v28 = vadd.f32 %v2436_v47, %v2390_v19  ;;  %v2264_v40 = vmul.f32 %v14063_v39, %v14017_v8  ;;  %v13033_v63 = vld [vmem:[%s18837_s4 + $0x24] sm:$0xf0] }
  0xbe   : > { %v2492_v52 = vmul.f32 %v14195_v3, %v14025_v15  ;;  %v10401_v27 = vor.u32 %v13050_v51, %v10398_v24  ;;  %v10388_v19 = vld [vmem:[%s18837_s4 + $0xa0] sm:$0xf]  ;;  %v2447_v8 = vadd.f32 %v2437_v34, %v2391_v4  ;;  %v2322_v47 = vmul.f32 %v14079_v50, %v14027_v16  ;;  %v10326_v4 = vld [vmem:[%s18837_s4 + $0x28] sm:$0xf0]  ;;  %v10316_v24 = vld [vmem:[%s18837_s4 + $0x10] sm:$0xf] }
  0xbf   : > { %2958 = vmatpush.bf16.msra.mxu1 %v10405_v2  ;;  %2981 = vmatpush.bf16.msra.mxu2 %v10345_v41  ;;  %v2493_v2 = vmul.f32 %v14246_v60, %v14025_v15  ;;  %v2321_v41 = vmul.f32 %v14077_v49, %v14027_v16  ;;  %v2276_v15 = vadd.f32 %v2266_v5, %v2220_v35  ;;  %v10235_v26 = vld [vmem:[%s13896_s22 + $0x34f] sm:$0xff]  ;;  %v13048_v16 = vld [vmem:[%s18837_s4 + $0xa4] sm:$0xf]  ;;  %v14330_v51 = vperm.slane %v10299_v7, 0  ;;  %v13031_v35 = vld [vmem:[%s18837_s4 + $0x14] sm:$0xf0] }
  0xc0   : > { %1868 = vperm.xlu2 %13690, %v13923_v12   ;;  %1821 = vperm.xlu1 %13689, %v10225_v30   ;;  %v10333_v12 = vor.u32 %v13035_v59, %v10332_v18  ;;  %v10334_v30 = vld [vmem:[%s18837_s4 + $0x38] sm:$0xf0]  ;;  %v13032_v18 = vld [vmem:[%s18837_s4 + $0x24] sm:$0xf]  ;;  %v2275_v59 = vadd.f32 %v2265_v25, %v2219_v57  ;;  %v2273_v34 = vadd.f32 %v2263_v62, %v2217_v43 }
  0xc1   : > { %1816 = vperm.xlu0 %13688, %v10224_v32   ;;  %v10337_v48 = vor.u32 %v13034_v1, %v10334_v30  ;;  %3004 = vmatpush.bf16.msra.mxu3 %v10409_v44  ;;  %v13049_v44 = vld [vmem:[%s18837_s4 + $0xa4] sm:$0xf0]  ;;  %v10325_v53 = vor.u32 %v13033_v63, %v10324_v55  ;;  %v10390_v1 = vld [vmem:[%s18837_s4 + $0xa8] sm:$0xf0]  ;;  %v2319_v30 = vmul.f32 %v14077_v49, %v14029_v17  ;;  %v10318_v63 = vld [vmem:[%s18837_s4 + $0x18] sm:$0xf0] }
  0xc2   : > { %v14287_v32 = vpop.permute.xlu2 %2250  ;;  %v14289_v61 = vpop.permute.xlu1 %2521  ;;  %2936 = vmatpush.bf16.msra.mxu0 %v10333_v12  ;;  %v10389_v57 = vor.u32 %v13049_v44, %v10388_v19  ;;  %v10329_v43 = vor.u32 %v13032_v18, %v10326_v4  ;;  %v2274_v25 = vadd.f32 %v2264_v40, %v2218_v46  ;;  %v14332_v5 = vadd.f32 %v2492_v52, %v2446_v28  ;;  %v10305_v40 = vld [vmem:[%s18835_s2 + $0x10] ss:$8 sm:$0x3]  ;;  %v13046_v19 = vld [vmem:[%s18837_s4 + $0x94] sm:$0xf] }
  0xc3   : > { %v14295_v29 = vpop.permute.xlu0 %2516  ;;  %2959 = vmatpush.bf16.msra.mxu1 %v10397_v0  ;;  %2982 = vmatpush.bf16.msra.mxu2 %v10337_v48  ;;  %v2320_v62 = vmul.f32 %v14079_v50, %v14029_v17  ;;  %v10393_v12 = vor.u32 %v13048_v16, %v10390_v1  ;;  %v10380_v0 = vld [vmem:[%s18837_s4 + $0x90] sm:$0xf]  ;;  %v14345_v46 = vadd.f32 %v2493_v2, %v2447_v8  ;;  %v14351_v17 = vperm.slane %v10299_v7, 1  ;;  %v13047_v52 = vld [vmem:[%s18837_s4 + $0x94] sm:$0xf0] }
  0xc4   : > { %v14347_v48 = vadd.f32 %v2321_v41, %v2275_v59  ;;  %v14349_v28 = vadd.f32 %v2322_v47, %v2276_v15  ;;  %v2377_v55 = vmul.f32 %v14148_v56, %v14068_v42  ;;  %v10317_v7 = vor.u32 %v13031_v35, %v10316_v24  ;;  %v10382_v47 = vld [vmem:[%s18837_s4 + $0x98] sm:$0xf0]  ;;  %v10241_v15 = vld [vmem:[%s13896_s22 + $0x2a8] sm:$0xff] }
  0xc5   : > { %3005 = vmatpush.bf16.msra.mxu3 %v10401_v27  ;;  %v2376_v27 = vmul.f32 %v14111_v9, %v14068_v42  ;;  %v2329_v8 = vadd.f32 %v2319_v30, %v2273_v34  ;;  %v10381_v2 = vor.u32 %v13047_v52, %v10380_v0  ;;  %v2330_v44 = vadd.f32 %v2320_v62, %v2274_v25  ;;  %v10237_v34 = vld [vmem:[%s13896_s22 + $0x35f] sm:$0xff]  ;;  %v13029_v16 = vld [vmem:[%s18837_s4 + $0x4] sm:$0xf0] }
  0xc6   : > { %2937 = vmatpush.bf16.msra.mxu0 %v10325_v53  ;;  %v2432_v18 = vmul.f32 %v14157_v58, %v14127_v31  ;;  %v14383_v4 = vperm.slane %v10305_v40, 0  ;;  %v10308_v53 = vld [vmem:[%s18837_s4] sm:$0xf]  ;;  %v2548_v1 = vmul.f32 %v14330_v51, %v14057_v36  ;;  %v2549_v30 = vmul.f32 %v14351_v17, %v14057_v36  ;;  %v13045_v62 = vld [vmem:[%s18837_s4 + $0x84] sm:$0xf0] }
  0xc7   : > { %2960 = vmatpush.bf16.msra.mxu1 %v10389_v57  ;;  %2983 = vmatpush.bf16.msra.mxu2 %v10329_v43  ;;  %v2378_v57 = vmul.f32 %v14111_v9, %v14059_v37  ;;  %v2433_v43 = vmul.f32 %v14178_v54, %v14127_v31  ;;  %v10372_v25 = vld [vmem:[%s18837_s4 + $0x80] sm:$0xf]  ;;  %v2386_v36 = vadd.f32 %v2376_v27, %v2329_v8  ;;  %v10310_v31 = vld [vmem:[%s18837_s4 + $0x8] sm:$0xf0]  ;;  %v13044_v52 = vld [vmem:[%s18837_s4 + $0x84] sm:$0xf] }
  0xc8   : > { %1924 = vperm.xlu2 %13690, %v10235_v26   ;;  %1878 = vperm.xlu1 %13689, %v13917_v10   ;;  %v13030_v10 = vld [vmem:[%s18837_s4 + $0x14] sm:$0xf]  ;;  %v10385_v26 = vor.u32 %v13046_v19, %v10382_v47  ;;  %v2387_v24 = vadd.f32 %v2377_v55, %v2330_v44  ;;  %v2488_v35 = vmul.f32 %v14195_v3, %v14213_v6  ;;  %v14423_v55 = vperm.slane %v10305_v40, 1 }
  0xc9   : > { %1873 = vperm.xlu0 %13688, %v13920_v11   ;;  %v10321_v41 = vor.u32 %v13030_v10, %v10318_v63  ;;  %3006 = vmatpush.bf16.msra.mxu3 %v10393_v12  ;;  %v13028_v12 = vld [vmem:[%s18837_s4 + $0x4] sm:$0xf]  ;;  %v10309_v0 = vor.u32 %v13029_v16, %v10308_v53  ;;  %v10374_v10 = vld [vmem:[%s18837_s4 + $0x88] sm:$0xf0]  ;;  %v2489_v27 = vmul.f32 %v14246_v60, %v14213_v6  ;;  %v10236_v63 = vld [vmem:[%s13896_s22 + $0x357] sm:$0xff] }
  0xca   : > { %v14374_v42 = vpop.permute.xlu1 %2138  ;;  %v14376_v11 = vpop.permute.xlu2 %1006  ;;  %2938 = vmatpush.bf16.msra.mxu0 %v10317_v7  ;;  %v10373_v7 = vor.u32 %v13045_v62, %v10372_v25  ;;  %v10313_v19 = vor.u32 %v13028_v12, %v10310_v31  ;;  %v2379_v8 = vmul.f32 %v14148_v56, %v14059_v37  ;;  %v2442_v47 = vadd.f32 %v2432_v18, %v2386_v36 }
  0xcb   : > { %18939 = vst [vmem:[#allocation21_spill] sm:$0xff] %v14376_v11  ;;  %v2573_v59 = vpop.permute.xlu0 %2572  ;;  %2961 = vmatpush.bf16.msra.mxu1 %v10381_v2  ;;  %2984 = vmatpush.bf16.msra.mxu2 %v10321_v41  ;;  %v2544_v44 = vmul.f32 %v14330_v51, %v14295_v29  ;;  %v10377_v53 = vor.u32 %v13044_v52, %v10374_v10  ;;  %v10242_v52 = vld [vmem:[%s13896_s22 + $0x2b0] sm:$0xff]  ;;  %vm1016_vm5 = vcmp.eq.s32.totalorder %v14376_v11, 1 }
  0xcc   : > { %v2558_v16 = vadd.f32 %v2548_v1, %v14332_v5  ;;  %v2443_v9 = vadd.f32 %v2433_v43, %v2387_v24  ;;  %v2545_v6 = vmul.f32 %v14351_v17, %v14295_v29  ;;  %v2559_v40 = vadd.f32 %v2549_v30, %v14345_v46  ;;  %v10203_v24 = vld [vmem:[%s13896_s22 + $0x1a7] sm:$0xff] }
  0xcd   : > { %3007 = vmatpush.bf16.msra.mxu3 %v10385_v26  ;;  %v2498_v2 = vadd.f32 %v2488_v35, %v2442_v47  ;;  %v2600_v41 = vmul.f32 %v14383_v4, %v2573_v59  ;;  %v2434_v37 = vmul.f32 %v14157_v58, %v14115_v14  ;;  %v2601_v26 = vmul.f32 %v14423_v55, %v2573_v59  ;;  %v10243_v35 = vld [vmem:[%s13896_s22 + $0x2b8] sm:$0xff] }
  0xce   : > { %2939 = vmatpush.bf16.msra.mxu0 %v10309_v0  ;;  %v2499_v18 = vadd.f32 %v2489_v27, %v2443_v9  ;;  %v2435_v29 = vmul.f32 %v14178_v54, %v14115_v14  ;;  %v2388_v9 = vadd.f32 %v2378_v57, %v14347_v48  ;;  %v2389_v59 = vadd.f32 %v2379_v8, %v14349_v28 }
  0xcf   : > { %2962 = vmatpush.bf16.msra.mxu1 %v10373_v7  ;;  %2985 = vmatpush.bf16.msra.mxu2 %v10313_v19  ;;  %v2554_v46 = vadd.f32 %v2544_v44, %v2498_v2  ;;  %v2490_v43 = vmul.f32 %v14195_v3, %v14199_v45  ;;  %v2491_v62 = vmul.f32 %v14246_v60, %v14199_v45  ;;  %v2657_v2 = vld [vmem:[#allocation2 + $0xa8] sm:$0xff] }
  0xd0   : > { %1980 = vperm.xlu2 %13690, %v10241_v15   ;;  %1934 = vperm.xlu1 %13689, %v10237_v34   ;;  %v2555_v25 = vadd.f32 %v2545_v6, %v2499_v18  ;;  %v2444_v0 = vadd.f32 %v2434_v37, %v2388_v9  ;;  %v2445_v10 = vadd.f32 %v2435_v29, %v2389_v59  ;;  %v2702_v9 = vunpack.c.h.b16 %v2657_v2 }
  0xd1   : > { %1929 = vperm.xlu0 %13688, %v10236_v63   ;;  %3008 = vmatpush.bf16.msra.mxu3 %v10377_v53  ;;  %v2610_v14 = vadd.f32 %v2600_v41, %v2554_v46  ;;  %v2546_v28 = vmul.f32 %v14330_v51, %v14289_v61  ;;  %v2547_v63 = vmul.f32 %v14351_v17, %v14289_v61 }
  0xd2   : > { %v2583_v5 = vpop.permute.xlu1 %2582  ;;  %v14438_v1 = vpop.permute.xlu2 %2363  ;;  %v2611_v31 = vadd.f32 %v2601_v26, %v2555_v25  ;;  %v2500_v57 = vadd.f32 %v2490_v43, %v2444_v0  ;;  %v2501_v45 = vadd.f32 %v2491_v62, %v2445_v10  ;;  %v2159_v43 = vmul.f32 %v14034_v22, %v14113_v13 }
  0xd3   : > { %v2604_v15 = vmul.f32 %v14383_v4, %v2583_v5  ;;  %v2605_v34 = vmul.f32 %v14423_v55, %v2583_v5  ;;  %v2578_v30 = vpop.permute.xlu0 %2577  ;;  %v2620_v7 = vmax.f32 %v2610_v14, 0.0  ;;  %v2157_v25 = vmul.f32 %v14034_v22, %v14374_v42 }
  0xd4   : > { %v2621_v47 = vmax.f32 %v2611_v31, 0.0  ;;  %v2602_v53 = vmul.f32 %v14383_v4, %v2578_v30  ;;  %v2603_v61 = vmul.f32 %v14423_v55, %v2578_v30  ;;  %v2556_v41 = vadd.f32 %v2546_v28, %v2500_v57  ;;  %v10208_v57 = vld [vmem:[%s13896_s22 + $0x100] sm:$0xff]  ;;  %v3376_v28 = vld [vmem:[#allocation2 + $0xa8] sm:$0xee] }
  0xd5   : > { %v2614_v12 = vadd.f32 %v2604_v15, %v2558_v16  ;;  %v2615_v36 = vadd.f32 %v2605_v34, %v2559_v40  ;;  %v2557_v37 = vadd.f32 %v2547_v63, %v2501_v45  ;;  %v10204_v15 = vld [vmem:[%s13896_s22 + $0x1af] sm:$0xff]  ;;  %v2701_v34 = vunpack.c.l.b16 %v2657_v2 }
  0xd6   : > { %v2612_v29 = vadd.f32 %v2602_v53, %v2556_v41  ;;  %v2158_v62 = vmul.f32 %v14036_v23, %v14374_v42  ;;  %v2160_v0 = vmul.f32 %v14036_v23, %v14113_v13  ;;  %v18943_v2 = vld [vmem:[#allocation20_spill] sm:$0xff]  ;;  %v18944_v41 = vld [vmem:[#allocation15_spill] sm:$0xff] }
  0xd7   : > { %v2624_v27 = vmax.f32 %v2614_v12, 0.0  ;;  %v2625_v48 = vmax.f32 %v2615_v36, 0.0  ;;  %v2613_v46 = vadd.f32 %v2603_v61, %v2557_v37  ;;  %v2213_v37 = vmul.f32 %v18944_v41, %v18943_v2 }
  0xd8   : > { %1600 = vperm.xlu2 %13690, %v10203_v24   ;;  %1990 = vperm.xlu1 %13689, %v10243_v35   ;;  %v2622_v14 = vmax.f32 %v2612_v29, 0.0  ;;  %v2168_v23 = vadd.f32 %v2158_v62, %v14052_v33  ;;  %v14519_v61 = vadd.f32 %v2160_v0, %v14052_v33  ;;  %v2269_v29 = vmul.f32 %v14061_v38, %v14287_v32 }
  0xd9   : > { %v2634_v19 = vsel %vm1016_vm5, %v2624_v27, 0.0  ;;  %v2635_v8 = vsel %vm1016_vm5, %v2625_v48, 0.0  ;;  %1985 = vperm.xlu0 %13688, %v10242_v52   ;;  %v2623_v12 = vmax.f32 %v2613_v46, 0.0  ;;  %v18942_v52 = vld [vmem:[#allocation17_spill] sm:$0xff]  ;;  %v10209_v48 = vld [vmem:[%s13896_s22 + $0x108] sm:$0xff]  ;;  %v18946_v46 = vld [vmem:[#allocation12_spill] sm:$0xff] }
  0xda   : > { %v14462_v44 = vpack.c.bf16 %v2635_v8, %v2634_v19  ;;  %v14466_v16 = vpop.permute.xlu2 %2424  ;;  %v14468_v6 = vpop.permute.xlu1 %1000  ;;  %v14505_v10 = vadd.f32 %v2159_v43, %v18942_v52  ;;  %v2167_v45 = vadd.f32 %v2157_v25, %v18942_v52  ;;  %v2270_v43 = vmul.f32 %v14063_v39, %v14287_v32 }
  0xdb   : > { %18940 = vst [vmem:[#allocation22_spill] sm:$0xff] %v14468_v6  ;;  %v14470_v40 = vpop.permute.xlu0 %2199  ;;  %vm1014_vm6 = vcmp.eq.s32.totalorder %v14468_v6, 1 }
  0xdc   : > { %v2630_v18 = vsel %vm1014_vm6, %v2620_v7, 0.0  ;;  %v2631_v26 = vsel %vm1014_vm6, %v2621_v47, 0.0  ;;  %v18859_v13 = vunpack.c.l.b16 %v14462_v44  ;;  %v18858_v47 = vunpack.c.h.b16 %v14462_v44 }
  0xdd   : > { %v2640_v5 = vpack.c.bf16 %v2631_v26, %v2630_v18  ;;  %v18945_v18 = vld [vmem:[#allocation16_spill] sm:$0xff] }
  0xde   : > { %v2214_v26 = vmul.f32 %v18945_v18, %v18943_v2 }
  0xdf   : > { %v2703_v30 = vunpack.c.l.b16 %v2640_v5  ;;  %v14478_v59 = vunpack.c.h.b16 %v2640_v5  ;;  %v3411_v5 = vunpack.c.l.b16 %v3376_v28 }
  0xe0   : > { %2041 = vperm.xlu2 %13690, %v13938_v20   ;;  %2036 = vperm.xlu1 %13689, %v13941_v21   ;;  %v14492_v21 = vld [vmem:[#allocation2 + $0xa8] sm:$0x88] }
  0xe1   : > { %1605 = vperm.xlu0 %13688, %v10204_v15   ;;  %v2713_v20 = vpack.c.b16 %v2703_v30, %v2701_v34  ;;  %v2714_v22 = vpack.c.b16 %v14478_v59, %v2702_v9  ;;  %v4748_v63 = vunpack.c.l.b16 %v14492_v21  ;;  %v4749_v2 = vunpack.c.h.b16 %v14492_v21 }
  0xe2   : > { %v14488_v36 = vpop.permute.xlu2 %2531  ;;  %v14490_v24 = vpop.permute.xlu1 %1003  ;;  %v3413_v32 = vpack.c.b16 %v2703_v30, %v3411_v5  ;;  %v18949_v5 = vld [vmem:[#allocation14_spill] sm:$0xff] }
  0xe3   : > { %18941 = vst [vmem:[#allocation23_spill] sm:$0xff] %v14490_v24  ;;  %v14494_v35 = vpop.permute.xlu0 %2255  ;;  %vm1015_vm7 = vcmp.eq.s32.totalorder %v14490_v24, 1  ;;  %v2723_v7 = vshll.u32 %v2713_v20, 16  ;;  %v2735_v53 = vshll.u32 %v2714_v22, 16  ;;  %v4752_v9 = vpack.c.b16 %v2703_v30, %v4748_v63 }
  0xe4   : > { %v2632_v42 = vsel %vm1015_vm7, %v2622_v14, 0.0  ;;  %v2633_v31 = vsel %vm1015_vm7, %v2623_v12, 0.0  ;;  %v3412_v12 = vunpack.c.h.b16 %v3376_v28  ;;  %v2215_v28 = vmul.f32 %v18944_v41, %v14470_v40 }
  0xe5   : > { %v14507_v27 = vpack.c.bf16 %v2633_v31, %v2632_v42  ;;  %v2725_v14 = vrot.slane %v2723_v7, 1  ;;  %v2223_v42 = vadd.f32 %v2213_v37, %v2167_v45  ;;  %v2224_v31 = vadd.f32 %v2214_v26, %v2168_v23 }
  0xe6   : > { %v4757_v11 = vshrl.u32 %v4752_v9, 16  ;;  %v4760_v7 = vshll.u32 %v4752_v9, 16  ;;  %v3415_v37 = vrot.slane %v3413_v32, 1  ;;  %v3414_v26 = vpack.c.b16 %v14478_v59, %v3412_v12 }
  0xe7   : > { %v2705_v19 = vunpack.c.l.b16 %v14507_v27  ;;  %v18860_v8 = vunpack.c.h.b16 %v14507_v27 }
  0xe8   : > { %1661 = vperm.xlu2 %13690, %v10209_v48   ;;  %1656 = vperm.xlu1 %13689, %v10208_v57   ;;  %v2737_v57 = vrot.slane %v2735_v53, 1  ;;  %v4759_v9 = vrot.slane %v4757_v11, 3 }
  0xe9   : > { %2046 = vperm.xlu0 %13688, %v18946_v46   ;;  %v14530_v15 = vpack.c.b16 %v18859_v13, %v2705_v19  ;;  %v14536_v34 = vpack.c.b16 %v18858_v47, %v18860_v8  ;;  %v14544_v0 = vpack.c.b16 %v2705_v19, %v2703_v30  ;;  %v2721_v46 = vshrl.u32 %v2713_v20, 16  ;;  %v10220_v13 = vld [vmem:[%s13896_s22 + $0x287] sm:$0xff]  ;;  %v18948_v30 = vld [vmem:[#allocation13_spill] sm:$0xff] }
  0xea   : > { %v14540_v25 = vpop.permute.xlu2 %2592  ;;  %v14542_v62 = vpop.permute.xlu1 %2311  ;;  %v2733_v8 = vshrl.u32 %v2714_v22, 16 }
  0xeb   : > { %18947 = vst [vmem:[#allocation17_spill] sm:$0xff] %v14544_v0  ;;  %v2307_v48 = vpop.permute.xlu0 %2306  ;;  %v2728_v63 = vshll.u32 %v14530_v15, 16  ;;  %v2740_v47 = vshll.u32 %v14536_v34, 16  ;;  %v2726_v45 = vor.u32 %v2725_v14, %v2721_v46  ;;  %v18864_v20 = vshrl.u32 %v14530_v15, 16  ;;  %v10590_v0 = vld [vmem:[%s18837_s4 + $0x1f8] sm:$0xf0] }
  0xec   : > { %v2738_v19 = vor.u32 %v2737_v57, %v2733_v8  ;;  %v2752_v53 = vshrl.u32 %v14536_v34, 16  ;;  %v18863_v41 = vrot.slane %v14530_v15, 1  ;;  %v4762_v14 = vrot.slane %v4760_v7, 4 }
  0xed   : > { %v14552_v23 = vrot.slane %v2728_v63, 1  ;;  %v14554_v21 = vrot.slane %v2740_v47, 1  ;;  %v4764_v32 = vrot.slane %v18864_v20, 3  ;;  %v3419_v11 = vrot.slane %v14536_v34, 1 }
  0xee   : > { %v14574_v12 = vsel %vm3097_vm9, %v3415_v37, %v18863_v41  ;;  %v2279_v7 = vadd.f32 %v2269_v29, %v2223_v42  ;;  %v3418_v37 = vrot.slane %v3414_v26, 1  ;;  %v2271_v41 = vmul.f32 %v14061_v38, %v14494_v35  ;;  %v10226_v29 = vld [vmem:[%s13896_s22 + $0x1e0] sm:$0xff]  ;;  %v10221_v42 = vld [vmem:[%s13896_s22 + $0x28f] sm:$0xff] }
  0xef   : > { %v2731_v22 = vsel %vm2719_vm8, %v2726_v45, %v14552_v23  ;;  %v2743_v8 = vsel %vm2719_vm8, %v2738_v19, %v14554_v21  ;;  %18950 = vst [vmem:[#allocation20_spill] sm:$0xff] %v14574_v12  ;;  %v4777_v45 = vrot.slane %v2740_v47, 4  ;;  %v4776_v19 = vrot.slane %v2752_v53, 3  ;;  %v10227_v47 = vld [vmem:[%s13896_s22 + $0x1e8] sm:$0xff] }
  0xf0   : > { %1769 = vperm.xlu2 %13690, %v10220_v13   ;;  %1717 = vperm.xlu1 %13689, %v18948_v30   ;;  %v4753_v13 = vpack.c.b16 %v14478_v59, %v4749_v2  ;;  %v4765_v30 = vrot.slane %v2728_v63, 4  ;;  %v2216_v2 = vmul.f32 %v18945_v18, %v14470_v40  ;;  %v2272_v20 = vmul.f32 %v14063_v39, %v14494_v35  ;;  %v10566_v12 = vld [vmem:[%s18837_s4 + $0x1c8] sm:$0xf0] }
  0xf1   : > { %1712 = vperm.xlu0 %13688, %v18949_v5   ;;  %2940 = vmatmul.bf16.vlgmr.msra.gmra.mxu0 %v2731_v22  ;;  %v2280_v5 = vadd.f32 %v2270_v43, %v2224_v31  ;;  %v2325_v40 = vmul.f32 %v14077_v49, %v2307_v48  ;;  %v2326_v18 = vmul.f32 %v14079_v50, %v2307_v48  ;;  %v18952_v35 = vunpack.c.h.b16 %v14507_v27  ;;  %v18955_v27 = vld [vmem:[#allocation19_spill] sm:$0xff] }
  0xf2   : > { %v14567_v57 = vpop.permute.xlu2 %1585  ;;  %v2420_v46 = vpop.permute.xlu1 %2419  ;;  %2963 = vmatmul.bf16.vlgmr.msra.gmra.mxu1 %v2743_v8  ;;  %2986 = vmatmul.bf16.vlgmr.msra.gmra.mxu2 %v2731_v22  ;;  %v2225_v22 = vadd.f32 %v2215_v28, %v14505_v10  ;;  %v14594_v10 = vsel %vm3097_vm9, %v3418_v37, %v3419_v11  ;;  %v4763_v43 = vor.u32 %v4762_v14, %v4759_v9  ;;  %v4769_v28 = vshrl.u32 %v4753_v13, 16 }
  0xf3   : > { %v2369_v63 = vpop.permute.xlu0 %2368  ;;  %3009 = vmatmul.bf16.vlgmr.msra.gmra.mxu3 %v2743_v8  ;;  %18951 = vst [vmem:[#allocation15_spill] sm:$0xff] %v14594_v10  ;;  %v14596_v31 = vor.u32 %v4765_v30, %v4764_v32  ;;  %v2226_v38 = vadd.f32 %v2216_v2, %v14519_v61  ;;  %v4772_v26 = vshll.u32 %v4753_v13, 16  ;;  %v14599_v39 = vor.u32 %v4777_v45, %v4776_v19  ;;  %v13084_v10 = vld [vmem:[%s18837_s4 + $0x1c4] sm:$0xf] }
  0xf4   : > { %v14604_v48 = vpack.c.b16 %v18952_v35, %v14478_v59  ;;  %v2327_v8 = vmul.f32 %v14077_v49, %v14542_v62  ;;  %v2328_v37 = vmul.f32 %v14079_v50, %v14542_v62  ;;  %v2281_v61 = vadd.f32 %v2271_v41, %v2225_v22 }
  0xf5   : > { %v14612_v9 = vsel %vm3756_vm10, %v4763_v43, %v14596_v31  ;;  %v2282_v14 = vadd.f32 %v2272_v20, %v2226_v38  ;;  %v2335_v13 = vadd.f32 %v2325_v40, %v2279_v7  ;;  %v2336_v30 = vadd.f32 %v2326_v18, %v2280_v5  ;;  %v10232_v38 = vld [vmem:[%s13896_s22 + $0x218] sm:$0xff] }
  0xf6   : > { %18953 = vst [vmem:[#allocation16_spill] sm:$0xff] %v14604_v48  ;;  %v2384_v59 = vmul.f32 %v18955_v27, %v2369_v63  ;;  %v2385_v32 = vmul.f32 %v14148_v56, %v2369_v63  ;;  %v4771_v62 = vrot.slane %v4769_v28, 3  ;;  %v4774_v2 = vrot.slane %v4772_v26, 4  ;;  %v13090_v48 = vld [vmem:[%s18837_s4 + $0x1f4] sm:$0xf] }
  0xf7   : > { %18954 = vst [vmem:[#allocation12_spill] sm:$0xff] %v14612_v9  ;;  %v2382_v45 = vmul.f32 %v18955_v27, %v14438_v1  ;;  %v2383_v20 = vmul.f32 %v14148_v56, %v14438_v1  ;;  %v2438_v41 = vmul.f32 %v14157_v58, %v2420_v46  ;;  %v2439_v7 = vmul.f32 %v14178_v54, %v2420_v46  ;;  %v10510_v9 = vld [vmem:[%s18837_s4 + $0x158] sm:$0xf0] }
  0xf8   : > { %1831 = vperm.xlu2 %13690, %v10227_v47   ;;  %1826 = vperm.xlu1 %13689, %v10226_v29   ;;  %v2337_v63 = vadd.f32 %v2327_v8, %v2281_v61  ;;  %v2338_v22 = vadd.f32 %v2328_v37, %v2282_v14  ;;  %v10238_v29 = vld [vmem:[%s13896_s22 + $0x367] sm:$0xff]  ;;  %v4775_v26 = vor.u32 %v4774_v2, %v4771_v62 }
  0xf9   : > { %1774 = vperm.xlu0 %13688, %v10221_v42   ;;  %v2392_v5 = vadd.f32 %v2382_v45, %v2335_v13  ;;  %v2393_v40 = vadd.f32 %v2383_v20, %v2336_v30  ;;  %v10233_v42 = vld [vmem:[%s13896_s22 + $0x220] sm:$0xff]  ;;  %v2440_v56 = vmul.f32 %v14157_v58, %v14466_v16  ;;  %v2441_v1 = vmul.f32 %v14178_v54, %v14466_v16 }
  0xfa   : > { %v14616_v49 = vpop.permute.xlu2 %1641  ;;  %v2481_v50 = vpop.permute.xlu1 %2480  ;;  %v2394_v43 = vadd.f32 %v2384_v59, %v2337_v63  ;;  %v2395_v28 = vadd.f32 %v2385_v32, %v2338_v22  ;;  %v14637_v61 = vsel %vm3756_vm10, %v4775_v26, %v14599_v39  ;;  %v2608_v63 = vmul.f32 %v14383_v4, %v14540_v25 }
  0xfb   : > { %v2476_v19 = vpop.permute.xlu0 %2475  ;;  %v2448_v46 = vadd.f32 %v2438_v41, %v2392_v5  ;;  %v2449_v35 = vadd.f32 %v2439_v7, %v2393_v40  ;;  %v2496_v8 = vmul.f32 %v14195_v3, %v2481_v50  ;;  %v2497_v37 = vmul.f32 %v14246_v60, %v2481_v50  ;;  %18956 = vst [vmem:[#allocation13_spill] sm:$0xff] %v14637_v61  ;;  %v10245_v7 = vld [vmem:[%s13896_s22 + $0x2c8] sm:$0xff] }
  0xfc   : > { %v2494_v18 = vmul.f32 %v14195_v3, %v2476_v19  ;;  %v2495_v47 = vmul.f32 %v14246_v60, %v2476_v19  ;;  %v2450_v58 = vadd.f32 %v2440_v56, %v2394_v43  ;;  %v2451_v30 = vadd.f32 %v2441_v1, %v2395_v28  ;;  %v10244_v19 = vld [vmem:[%s13896_s22 + $0x2c0] sm:$0xff]  ;;  %v10239_v40 = vld [vmem:[%s13896_s22 + $0x36f] sm:$0xff] }
  0xfd   : > { %v2550_v3 = vmul.f32 %v14330_v51, %v14488_v36  ;;  %v2551_v60 = vmul.f32 %v14351_v17, %v14488_v36  ;;  %v2609_v36 = vmul.f32 %v14423_v55, %v14540_v25 }
  0xfe   : > { %v2504_v14 = vadd.f32 %v2494_v18, %v2448_v46  ;;  %v2505_v13 = vadd.f32 %v2495_v47, %v2449_v35  ;;  %v2506_v50 = vadd.f32 %v2496_v8, %v2450_v58  ;;  %v2507_v62 = vadd.f32 %v2497_v37, %v2451_v30  ;;  %v10147_v46 = vld [vmem:[%s13896_s22 + $0x2da] sm:$0xff] }
  0xff   : > { %v10251_v35 = vld [vmem:[%s13896_s22 + $0x300] sm:$0xff] }
 0x100   : > { %1939 = vperm.xlu2 %13690, %v10238_v29   ;;  %1888 = vperm.xlu1 %13689, %v10233_v42   ;;  %v2560_v20 = vadd.f32 %v2550_v3, %v2504_v14  ;;  %v2561_v41 = vadd.f32 %v2551_v60, %v2505_v13  ;;  %v10250_v14 = vld [vmem:[%s13896_s22 + $0x2f8] sm:$0xff]  ;;  %v18959_v3 = vunpack.c.l.b16 %v14462_v44 }
 0x101   : > { %1883 = vperm.xlu0 %13688, %v10232_v38  }
 0x102   : > { %v14639_v54 = vpop.permute.xlu2 %1697  ;;  %v2588_v16 = vpop.permute.xlu1 %2587 }
 0x103   : > { %v2537_v27 = vpop.permute.xlu0 %2536  ;;  %v2606_v59 = vmul.f32 %v14383_v4, %v2588_v16  ;;  %v2607_v32 = vmul.f32 %v14423_v55, %v2588_v16 }
 0x104   : > { %v2552_v2 = vmul.f32 %v14330_v51, %v2537_v27  ;;  %v2553_v45 = vmul.f32 %v14351_v17, %v2537_v27  ;;  %v18961_v27 = vunpack.c.h.b16 %v14462_v44 }
 0x105   : > { %v2616_v18 = vadd.f32 %v2606_v59, %v2560_v20  ;;  %v2617_v47 = vadd.f32 %v2607_v32, %v2561_v41 }
 0x106   : > { %v2562_v22 = vadd.f32 %v2552_v2, %v2506_v50  ;;  %v2563_v5 = vadd.f32 %v2553_v45, %v2507_v62  ;;  %v10152_v50 = vld [vmem:[%s13896_s22 + $0x312] sm:$0xff]  ;;  %v10149_v62 = vld [vmem:[%s13896_s22 + $0x2ea] sm:$0xff]  ;;  %v10148_v2 = vld [vmem:[%s13896_s22 + $0x2e2] sm:$0xff] }
 0x107   : > { %v2626_v55 = vmax.f32 %v2616_v18, 0.0  ;;  %v2627_v25 = vmax.f32 %v2617_v47, 0.0  ;;  %v10153_v47 = vld [vmem:[%s13896_s22 + $0x31a] sm:$0xff] }
 0x108   : > { %v2618_v29 = vadd.f32 %v2608_v63, %v2562_v22  ;;  %v2619_v42 = vadd.f32 %v2609_v36, %v2563_v5  ;;  %2000 = vperm.xlu2 %13690, %v10245_v7   ;;  %1995 = vperm.xlu1 %13689, %v10244_v19   ;;  %v10158_v5 = vld [vmem:[%s13896_s22 + $0x34a] sm:$0xff] }
 0x109   : > { %1944 = vperm.xlu0 %13688, %v10239_v40   ;;  %v10154_v40 = vld [vmem:[%s13896_s22 + $0x322] sm:$0xff] }
 0x10a   : > { %v2628_v51 = vmax.f32 %v2618_v29, 0.0  ;;  %v2629_v17 = vmax.f32 %v2619_v42, 0.0  ;;  %v14656_v43 = vpop.permute.xlu2 %1754  ;;  %v14658_v4 = vpop.permute.xlu1 %1012 }
 0x10b   : > { %18957 = vst [vmem:[#allocation14_spill] sm:$0xff] %v14658_v4  ;;  %v14660_v28 = vpop.permute.xlu0 %1009  ;;  %vm1018_vm11 = vcmp.eq.s32.totalorder %v14658_v4, 1  ;;  %v10550_v4 = vld [vmem:[%s18837_s4 + $0x1a8] sm:$0xf0] }
 0x10c   : > { %18958 = vst [vmem:[#allocation19_spill] sm:$0xff] %v14660_v28  ;;  %vm1017_vm12 = vcmp.eq.s32.totalorder %v14660_v28, 1  ;;  %v2638_v38 = vsel %vm1018_vm11, %v2628_v51, 0.0  ;;  %v2639_v26 = vsel %vm1018_vm11, %v2629_v17, 0.0  ;;  %v18965_v17 = vshrl.u32 %v14530_v15, 16 }
 0x10d   : > { %v2636_v56 = vsel %vm1017_vm12, %v2626_v55, 0.0  ;;  %v2637_v1 = vsel %vm1017_vm12, %v2627_v25, 0.0  ;;  %v2644_v37 = vpack.c.bf16 %v2639_v26, %v2638_v38  ;;  %v2754_v38 = vor.u32 %v2752_v53, %v14554_v21  ;;  %v1582_v53 = vld [vmem:[%s18835_s2] ss:$8 sm:$0x3] }
 0x10e   : > { %v2643_v8 = vpack.c.bf16 %v2637_v1, %v2636_v56  ;;  %v2746_v55 = vor.u32 %v18965_v17, %v14552_v23 }
 0x10f   : > { %2650 = vst [vmem:[#allocation2 + $0xd0] sm:$0xff] %v2644_v37 }
 0x110   : > { %1047 = vperm.xlu2 %13690, %v10147_v46   ;;  %2056 = vperm.xlu1 %13689, %v10251_v35   ;;  %v2709_v13 = vunpack.c.l.b16 %v2643_v8  ;;  %v2710_v58 = vunpack.c.h.b16 %v2643_v8 }
 0x111   : > { %2051 = vperm.xlu0 %13688, %v10250_v14  }
 0x112   : > { %v14675_v30 = vpop.permute.xlu2 %1811  ;;  %v14677_v16 = vpop.permute.xlu1 %1595  ;;  %v14681_v60 = vpack.c.b16 %v2709_v13, %v18959_v3  ;;  %v14685_v59 = vpack.c.b16 %v2710_v58, %v18961_v27  ;;  %v10164_v27 = vld [vmem:[%s13896_s22 + $0x40] sm:$0xff] }
 0x113   : > { %v14687_v32 = vpop.permute.xlu0 %1590 }
 0x114   : > { %18960 = vst [vmem:[#allocation24_spill] sm:$0xff] %v14681_v60  ;;  %v13074_v60 = vld [vmem:[%s18837_s4 + $0x174] sm:$0xf] }
 0x115   : > { %18962 = vst [vmem:[#allocation25_spill] sm:$0xff] %v14685_v59  ;;  %v13091_v59 = vld [vmem:[%s18837_s4 + $0x1f4] sm:$0xf0] }
 0x116   : > { %v2662_v45 = vld [vmem:[#allocation2 + $0xd0] sm:$0x11] }
 0x117   : > { %v2711_v20 = vunpack.c.l.b16 %v2662_v45  ;;  %v2712_v41 = vunpack.c.h.b16 %v2662_v45  ;;  %v4712_v44 = vld [vmem:[#allocation2 + $0xd0] sm:$0xff]  ;;  %v14750_v45 = vperm.slane %v1582_v53, 0 }
 0x118   : > { %1104 = vperm.xlu2 %13690, %v10152_v50   ;;  %1057 = vperm.xlu1 %13689, %v10149_v62   ;;  %v14704_v18 = vunpack.c.l.b16 %v4712_v44  ;;  %v14709_v51 = vunpack.c.h.b16 %v4712_v44  ;;  %v10160_v50 = vld [vmem:[%s13896_s22 + $0x35a] sm:$0xff]  ;;  %v18968_v62 = vrot.slane %v14530_v15, 1 }
 0x119   : > { %1052 = vperm.xlu0 %13688, %v10148_v2   ;;  %v14698_v36 = vpack.c.b16 %v2711_v20, %v2709_v13  ;;  %v14700_v22 = vpack.c.b16 %v2712_v41, %v2710_v58  ;;  %v14752_v20 = vperm.slane %v1582_v53, 1  ;;  %v10210_v41 = vld [vmem:[%s18835_s2 + $0x1] ss:$8 sm:$0x3]  ;;  %v1613_v34 = vmul.f32 %v14750_v45, %v14567_v57 }
 0x11a   : > { %v14692_v7 = vpop.permute.xlu2 %1868  ;;  %v14694_v19 = vpop.permute.xlu1 %1651  ;;  %18963 = vst [vmem:[#allocation26_spill] sm:$0xff] %v14704_v18  ;;  %v4754_v1 = vpack.c.b16 %v14704_v18, %v2709_v13  ;;  %v4755_v13 = vpack.c.b16 %v14709_v51, %v2710_v58  ;;  %v10159_v58 = vld [vmem:[%s13896_s22 + $0x352] sm:$0xff]  ;;  %v14782_v53 = vperm.slane %v10210_v41, 1 }
 0x11b   : > { %v14696_v63 = vpop.permute.xlu0 %1646  ;;  %v2748_v29 = vshll.u32 %v14698_v36, 16  ;;  %v2756_v42 = vshll.u32 %v14700_v22, 16  ;;  %18964 = vst [vmem:[#allocation27_spill] sm:$0xff] %v14709_v51  ;;  %v14722_v56 = vrot.slane %v14698_v36, 1  ;;  %v14734_v21 = vrot.slane %v14700_v22, 1 }
 0x11c   : > { %v4781_v14 = vshrl.u32 %v4754_v1, 16  ;;  %v4784_v3 = vshll.u32 %v4754_v1, 16 }
 0x11d   : > { %v14714_v25 = vrot.slane %v2748_v29, 1  ;;  %v14719_v26 = vrot.slane %v2756_v42, 1  ;;  %18966 = vst [vmem:[#allocation28_spill] sm:$0xff] %v14722_v56  ;;  %v14748_v2 = vsel %vm3097_vm9, %v18968_v62, %v14722_v56  ;;  %v14762_v44 = vsel %vm3097_vm9, %v3419_v11, %v14734_v21  ;;  %v10216_v29 = vld [vmem:[%s18835_s2 + $0x2] ss:$8 sm:$0x3] }
 0x11e   : > { %18967 = vst [vmem:[#allocation29_spill] sm:$0xff] %v14734_v21  ;;  %v4786_v15 = vrot.slane %v4784_v3, 4  ;;  %v14771_v11 = vperm.slane %v10210_v41, 0  ;;  %v14788_v3 = vperm.slane %v10216_v29, 1  ;;  %v10165_v41 = vld [vmem:[%s13896_s22 + $0x48] sm:$0xff] }
 0x11f   : > { %v2751_v46 = vsel %vm2719_vm8, %v2746_v55, %v14714_v25  ;;  %v2759_v23 = vsel %vm2719_vm8, %v2754_v38, %v14719_v26  ;;  %18969 = vst [vmem:[#allocation30_spill] sm:$0xff] %v14748_v2  ;;  %v10222_v38 = vld [vmem:[%s18835_s2 + $0x3] ss:$8 sm:$0x3] }
 0x120   : > { %1160 = vperm.xlu2 %13690, %v10158_v5   ;;  %1114 = vperm.xlu1 %13689, %v10154_v40   ;;  %18970 = vst [vmem:[#allocation31_spill] sm:$0xff] %v14762_v44  ;;  %v4783_v5 = vrot.slane %v4781_v14, 3  ;;  %v4790_v40 = vshrl.u32 %v4755_v13, 16  ;;  %v14784_v14 = vperm.slane %v10216_v29, 0  ;;  %v1669_v29 = vmul.f32 %v14771_v11, %v14616_v49  ;;  %v10178_v2 = vld [vmem:[%s13896_s22 + $0xc0] sm:$0xff] }
 0x121   : > { %1109 = vperm.xlu0 %13688, %v10153_v47   ;;  %2945 = vmatmul.bf16.gmra.mxu0 %v2751_v46  ;;  %v4793_v47 = vshll.u32 %v4755_v13, 16  ;;  %v1674_v44 = vmul.f32 %v14782_v53, %v14694_v19 }
 0x122   : > { %v14729_v35 = vpop.permute.xlu2 %1924  ;;  %v14731_v8 = vpop.permute.xlu1 %1707  ;;  %2968 = vmatmul.bf16.gmra.mxu1 %v2759_v23  ;;  %2991 = vmatmul.bf16.gmra.mxu2 %v2751_v46  ;;  %v14767_v42 = vor.u32 %v4786_v15, %v4783_v5  ;;  %v4792_v17 = vrot.slane %v4790_v40, 3  ;;  %v10166_v5 = vld [vmem:[%s13896_s22 + $0x50] sm:$0xff]  ;;  %v2760_v15 = vshrl.u32 %v14698_v36, 16  ;;  %v2763_v40 = vshrl.u32 %v14700_v22, 16 }
 0x123   : > { %v14739_v37 = vpop.permute.xlu0 %1702  ;;  %3014 = vmatmul.bf16.gmra.mxu3 %v2759_v23  ;;  %v4795_v55 = vrot.slane %v4793_v47, 4  ;;  %v1614_v23 = vmul.f32 %v14752_v20, %v14567_v57  ;;  %v14800_v57 = vperm.slane %v10222_v38, 0  ;;  %v1623_v47 = vadd.f32 %v1613_v34, %v18942_v52 }
 0x124   : > { %18971 = vst [vmem:[#allocation32_spill] sm:$0xff] %v14767_v42  ;;  %v1670_v34 = vmul.f32 %v14782_v53, %v14616_v49  ;;  %v1725_v51 = vmul.f32 %v14784_v14, %v14639_v54  ;;  %v14840_v49 = vperm.slane %v10222_v38, 1  ;;  %v2762_v38 = vor.u32 %v2760_v15, %v14714_v25  ;;  %v10516_v25 = vld [vmem:[%s18837_s4 + $0x160] sm:$0xf] }
 0x125   : > { %v14798_v62 = vor.u32 %v4795_v55, %v4792_v17  ;;  %18974 = vst [vmem:[#allocation35_spill] sm:$0xff] %v14800_v57  ;;  %v13075_v17 = vld [vmem:[%s18837_s4 + $0x174] sm:$0xf0]  ;;  %v10588_v55 = vld [vmem:[%s18837_s4 + $0x1f0] sm:$0xf]  ;;  %v1624_v22 = vadd.f32 %v1614_v23, %v14052_v33  ;;  %v1726_v23 = vmul.f32 %v14788_v3, %v14639_v54 }
 0x126   : > { %18976 = vst [vmem:[#allocation37_spill] sm:$0xff] %v14840_v49  ;;  %v10234_v54 = vld [vmem:[%s18835_s2 + $0x5] ss:$8 sm:$0x3] }
 0x127   : > { %18973 = vst [vmem:[#allocation34_spill] sm:$0xff] %v14798_v62  ;;  %v14822_v36 = vsel %vm3756_vm10, %v14599_v39, %v14798_v62  ;;  %v10526_v39 = vld [vmem:[%s18837_s4 + $0x178] sm:$0xf0] }
 0x128   : > { %1216 = vperm.xlu2 %13690, %v10164_v27   ;;  %1170 = vperm.xlu1 %13689, %v10160_v50   ;;  %v10228_v27 = vld [vmem:[%s18835_s2 + $0x4] ss:$8 sm:$0x3]  ;;  %v14796_v50 = vsel %vm3756_vm10, %v14596_v31, %v14767_v42  ;;  %v10524_v31 = vld [vmem:[%s18837_s4 + $0x170] sm:$0xf]  ;;  %18975 = vst [vmem:[#allocation36_spill] sm:$0xff] %v14822_v36 }
 0x129   : > { %1165 = vperm.xlu0 %13688, %v10159_v58   ;;  %18972 = vst [vmem:[#allocation33_spill] sm:$0xff] %v14796_v50  ;;  %v10170_v58 = vld [vmem:[%s13896_s22 + $0x78] sm:$0xff]  ;;  %v10525_v18 = vor.u32 %v13075_v17, %v10524_v31  ;;  %v10589_v31 = vor.u32 %v13091_v59, %v10588_v55  ;;  %v10529_v17 = vor.u32 %v13074_v60, %v10526_v39  ;;  %v14848_v62 = vperm.slane %v10228_v27, 0  ;;  %v10582_v36 = vld [vmem:[%s18837_s4 + $0x1e8] sm:$0xf0] }
 0x12a   : > { %v14776_v1 = vpop.permute.xlu2 %1980  ;;  %v14778_v46 = vpop.permute.xlu1 %1764  ;;  %v2765_v59 = vor.u32 %v2763_v40, %v14719_v26  ;;  %v10593_v60 = vor.u32 %v13090_v48, %v10590_v0  ;;  %v14857_v55 = vperm.slane %v10228_v27, 1  ;;  %v13073_v0 = vld [vmem:[%s18837_s4 + $0x164] sm:$0xf0]  ;;  %v1680_v48 = vadd.f32 %v1670_v34, %v1624_v22  ;;  %v10580_v27 = vld [vmem:[%s18837_s4 + $0x1e0] sm:$0xf]  ;;  %v10176_v22 = vld [vmem:[%s13896_s22 + $0xb0] sm:$0xff] }
 0x12b   : > { %v14786_v13 = vpop.permute.xlu0 %1759  ;;  %3274 = vmatpush.bf16.msrb.mxu0 %v10525_v18  ;;  %3297 = vmatpush.bf16.msrb.mxu1 %v10589_v31  ;;  %v10240_v18 = vld [vmem:[%s18835_s2 + $0x6] ss:$8 sm:$0x3]  ;;  %v1783_v40 = vmul.f32 %v14840_v49, %v14656_v43 }
 0x12c   : > { %3320 = vmatpush.bf16.msrb.mxu2 %v10529_v17  ;;  %v13072_v34 = vld [vmem:[%s18837_s4 + $0x164] sm:$0xf]  ;;  %v10518_v31 = vld [vmem:[%s18837_s4 + $0x168] sm:$0xf0]  ;;  %v1736_v17 = vadd.f32 %v1726_v23, %v1680_v48  ;;  %3343 = vmatpush.bf16.msrb.mxu3 %v10593_v60  ;;  %v1840_v23 = vmul.f32 %v14857_v55, %v14675_v30  ;;  %v1617_v48 = vmul.f32 %v14750_v45, %v14677_v16  ;;  %v10508_v60 = vld [vmem:[%s18837_s4 + $0x150] sm:$0xf] }
 0x12e   : > { %v1793_v21 = vadd.f32 %v1783_v40, %v1736_v17  ;;  %v14939_v40 = vperm.slane %v10240_v18, 1 }
 0x130   : > { %1273 = vperm.xlu2 %13690, %v10170_v58   ;;  %1226 = vperm.xlu1 %13689, %v10166_v5   ;;  %v1679_v58 = vadd.f32 %v1669_v29, %v1623_v47  ;;  %v1782_v5 = vmul.f32 %v14800_v57, %v14656_v43  ;;  %v14882_v47 = vperm.slane %v10234_v54, 0  ;;  %v10171_v29 = vld [vmem:[%s13896_s22 + $0x80] sm:$0xff]  ;;  %v10172_v43 = vld [vmem:[%s13896_s22 + $0x88] sm:$0xff] }
 0x131   : > { %1221 = vperm.xlu0 %13688, %v10165_v41   ;;  %2950 = vmatmul.bf16.gmra.mxu0 %v2762_v38  ;;  %v13089_v41 = vld [vmem:[%s18837_s4 + $0x1e4] sm:$0xf0] }
 0x132   : > { %v14859_v39 = vpop.permute.xlu2 %1600  ;;  %v14861_v42 = vpop.permute.xlu1 %1821  ;;  %2973 = vmatmul.bf16.gmra.mxu1 %v2765_v59  ;;  %v1735_v15 = vadd.f32 %v1725_v51, %v1679_v58  ;;  %2996 = vmatmul.bf16.gmra.mxu2 %v2762_v38  ;;  %v1839_v51 = vmul.f32 %v14848_v62, %v14675_v30  ;;  %v14894_v58 = vperm.slane %v10234_v54, 1  ;;  %v10517_v38 = vor.u32 %v13073_v0, %v10516_v25  ;;  %v13071_v25 = vld [vmem:[%s18837_s4 + $0x154] sm:$0xf0]  ;;  %v10572_v0 = vld [vmem:[%s18837_s4 + $0x1d0] sm:$0xf] }
 0x133   : > { %v14872_v26 = vpop.permute.xlu0 %1816  ;;  %3019 = vmatmul.bf16.gmra.mxu3 %v2765_v59  ;;  %v13088_v59 = vld [vmem:[%s18837_s4 + $0x1e4] sm:$0xf]  ;;  %v10581_v54 = vor.u32 %v13089_v41, %v10580_v27  ;;  %v10521_v30 = vor.u32 %v13072_v34, %v10518_v31  ;;  %v10509_v61 = vor.u32 %v13071_v25, %v10508_v60  ;;  %v13087_v27 = vld [vmem:[%s18837_s4 + $0x1d4] sm:$0xf0]  ;;  %v13070_v41 = vld [vmem:[%s18837_s4 + $0x154] sm:$0xf]  ;;  %v1616_v31 = vmul.f32 %v14752_v20, %v14687_v32 }
 0x134   : > { %v1792_v50 = vadd.f32 %v1782_v5, %v1735_v15  ;;  %v1618_v5 = vmul.f32 %v14752_v20, %v14677_v16  ;;  %3275 = vmatpush.bf16.msrb.mxu0 %v10517_v38  ;;  %v10585_v15 = vor.u32 %v13088_v59, %v10582_v36  ;;  %v1615_v16 = vmul.f32 %v14750_v45, %v14687_v32  ;;  %v13086_v36 = vld [vmem:[%s18837_s4 + $0x1d4] sm:$0xf]  ;;  %v10574_v34 = vld [vmem:[%s18837_s4 + $0x1d8] sm:$0xf0]  ;;  %v10500_v32 = vld [vmem:[%s18837_s4 + $0x140] sm:$0xf] }
 0x135   : > { %v14929_v38 = vperm.slane %v10240_v18, 0  ;;  %3298 = vmatpush.bf16.msrb.mxu1 %v10581_v54  ;;  %v10573_v17 = vor.u32 %v13087_v27, %v10572_v0  ;;  %3321 = vmatpush.bf16.msrb.mxu2 %v10521_v30  ;;  %v10513_v25 = vor.u32 %v13070_v41, %v10510_v9  ;;  %v10577_v56 = vor.u32 %v13086_v36, %v10574_v34  ;;  %v10564_v18 = vld [vmem:[%s18837_s4 + $0x1c0] sm:$0xf]  ;;  %v13085_v30 = vld [vmem:[%s18837_s4 + $0x1c4] sm:$0xf0] }
 0x136   : > { %v1849_v59 = vadd.f32 %v1839_v51, %v1792_v50  ;;  %3344 = vmatpush.bf16.msrb.mxu3 %v10585_v15  ;;  %v13069_v50 = vld [vmem:[%s18837_s4 + $0x144] sm:$0xf0]  ;;  %v1627_v51 = vadd.f32 %v1617_v48, %v18942_v52  ;;  %v1628_v9 = vadd.f32 %v1618_v5, %v14052_v33  ;;  %v1897_v54 = vmul.f32 %v14894_v58, %v14692_v7  ;;  %v13068_v15 = vld [vmem:[%s18837_s4 + $0x144] sm:$0xf]  ;;  %v10177_v5 = vld [vmem:[%s13896_s22 + $0xb8] sm:$0xff] }
 0x137   : > { %v10246_v48 = vld [vmem:[%s18835_s2 + $0x7] ss:$8 sm:$0x3]  ;;  %v10501_v41 = vor.u32 %v13069_v50, %v10500_v32  ;;  %v1625_v36 = vadd.f32 %v1615_v16, %v18942_v52  ;;  %v1626_v34 = vadd.f32 %v1616_v31, %v14052_v33  ;;  %v10569_v31 = vor.u32 %v13084_v10, %v10566_v12  ;;  %v10556_v32 = vld [vmem:[%s18837_s4 + $0x1b0] sm:$0xf] }
 0x138   : > { %1329 = vperm.xlu2 %13690, %v10176_v22   ;;  %1283 = vperm.xlu1 %13689, %v10172_v43   ;;  %v1896_v22 = vmul.f32 %v14882_v47, %v14692_v7  ;;  %v1672_v7 = vmul.f32 %v14782_v53, %v14696_v63  ;;  %v10182_v27 = vld [vmem:[%s13896_s22 + $0x120] sm:$0xff]  ;;  %v1728_v12 = vmul.f32 %v14788_v3, %v14739_v37 }
 0x139   : > { %1278 = vperm.xlu0 %13688, %v10171_v29   ;;  %v1850_v29 = vadd.f32 %v1840_v23, %v1793_v21  ;;  %3276 = vmatpush.bf16.msrb.mxu0 %v10509_v61  ;;  %v10502_v21 = vld [vmem:[%s18837_s4 + $0x148] sm:$0xf0]  ;;  %v1671_v23 = vmul.f32 %v14771_v11, %v14696_v63  ;;  %v1673_v61 = vmul.f32 %v14771_v11, %v14694_v19  ;;  %v10492_v19 = vld [vmem:[%s18837_s4 + $0x130] sm:$0xf] }
 0x13a   : > { %v14943_v43 = vpop.permute.xlu2 %2041  ;;  %v14945_v60 = vpop.permute.xlu1 %1878  ;;  %3299 = vmatpush.bf16.msrb.mxu1 %v10573_v17  ;;  %v10565_v63 = vor.u32 %v13085_v30, %v10564_v18  ;;  %v14993_v28 = vadd.f32 %v1896_v22, %v1849_v59  ;;  %3322 = vmatpush.bf16.msrb.mxu2 %v10513_v25  ;;  %v10505_v16 = vor.u32 %v13068_v15, %v10502_v21  ;;  %v13067_v17 = vld [vmem:[%s18837_s4 + $0x134] sm:$0xf0]  ;;  %v13066_v22 = vld [vmem:[%s18837_s4 + $0x134] sm:$0xf]  ;;  %v10494_v25 = vld [vmem:[%s18837_s4 + $0x138] sm:$0xf0] }
 0x13b   : > { %v14960_v0 = vpop.permute.xlu0 %1873  ;;  %3345 = vmatpush.bf16.msrb.mxu3 %v10577_v56  ;;  %v15004_v50 = vadd.f32 %v1897_v54, %v1850_v29  ;;  %v1727_v59 = vmul.f32 %v14784_v14, %v14739_v37  ;;  %v10493_v10 = vor.u32 %v13067_v17, %v10492_v19  ;;  %v13083_v56 = vld [vmem:[%s18837_s4 + $0x1b4] sm:$0xf0]  ;;  %v1681_v18 = vadd.f32 %v1671_v23, %v1625_v36  ;;  %v13082_v37 = vld [vmem:[%s18837_s4 + $0x1b4] sm:$0xf]  ;;  %v10558_v15 = vld [vmem:[%s18837_s4 + $0x1b8] sm:$0xf0] }
 0x13c   : > { %v1682_v29 = vadd.f32 %v1672_v7, %v1626_v34  ;;  %v15019_v54 = vadd.f32 %v1673_v61, %v1627_v51  ;;  %v15021_v30 = vperm.slane %v10246_v48, 0  ;;  %v1784_v21 = vmul.f32 %v14800_v57, %v14786_v13  ;;  %v13081_v19 = vld [vmem:[%s18837_s4 + $0x1a4] sm:$0xf0]  ;;  %v13064_v17 = vld [vmem:[%s18837_s4 + $0x124] sm:$0xf] }
 0x13d   : > { %3277 = vmatpush.bf16.msrb.mxu0 %v10501_v41  ;;  %v1785_v23 = vmul.f32 %v14840_v49, %v14786_v13  ;;  %v15033_v51 = vperm.slane %v10246_v48, 1  ;;  %v10557_v7 = vor.u32 %v13083_v56, %v10556_v32  ;;  %v15040_v61 = vadd.f32 %v1674_v44, %v1628_v9  ;;  %v10484_v48 = vld [vmem:[%s18837_s4 + $0x120] sm:$0xf]  ;;  %v10486_v32 = vld [vmem:[%s18837_s4 + $0x128] sm:$0xf0]  ;;  %v10188_v56 = vld [vmem:[%s13896_s22 + $0x158] sm:$0xff] }
 0x13e   : > { %3300 = vmatpush.bf16.msrb.mxu1 %v10565_v63  ;;  %3323 = vmatpush.bf16.msrb.mxu2 %v10505_v16  ;;  %v10497_v36 = vor.u32 %v13066_v22, %v10494_v25  ;;  %v10561_v13 = vor.u32 %v13082_v37, %v10558_v15  ;;  %v10548_v44 = vld [vmem:[%s18837_s4 + $0x1a0] sm:$0xf]  ;;  %v1737_v9 = vadd.f32 %v1727_v59, %v1681_v18  ;;  %v10184_v37 = vld [vmem:[%s13896_s22 + $0x130] sm:$0xff] }
 0x13f   : > { %3346 = vmatpush.bf16.msrb.mxu3 %v10569_v31  ;;  %v1738_v34 = vadd.f32 %v1728_v12, %v1682_v29  ;;  %v1952_v63 = vmul.f32 %v14929_v38, %v14729_v35  ;;  %v1841_v16 = vmul.f32 %v14848_v62, %v14872_v26  ;;  %v1953_v59 = vmul.f32 %v14939_v40, %v14729_v35  ;;  %v13080_v35 = vld [vmem:[%s18837_s4 + $0x1a4] sm:$0xf] }
 0x140   : > { %1385 = vperm.xlu2 %13690, %v10182_v27   ;;  %1339 = vperm.xlu1 %13689, %v10178_v2   ;;  %v15038_v2 = vld [vmem:[%s18835_s2 + $0x10] ss:$8 sm:$0x3]  ;;  %v15072_v12 = vmul.f32 %v14784_v14, %v14731_v8  ;;  %v1794_v25 = vadd.f32 %v1784_v21, %v1737_v9  ;;  %v1898_v29 = vmul.f32 %v14882_v47, %v14960_v0 }
 0x141   : > { %1334 = vperm.xlu0 %13688, %v10177_v5   ;;  %v13065_v5 = vld [vmem:[%s18837_s4 + $0x124] sm:$0xf0]  ;;  %3278 = vmatpush.bf16.msrb.mxu0 %v10493_v10  ;;  %v1842_v10 = vmul.f32 %v14857_v55, %v14872_v26  ;;  %v1795_v18 = vadd.f32 %v1785_v23, %v1738_v34  ;;  %v10549_v15 = vor.u32 %v13081_v19, %v10548_v44  ;;  %v15089_v21 = vperm.slane %v15038_v2, 0  ;;  %v13063_v44 = vld [vmem:[%s18837_s4 + $0x114] sm:$0xf0] }
 0x142   : > { %v15042_v27 = vpop.permute.xlu2 %1661  ;;  %v15044_v41 = vpop.permute.xlu1 %1934  ;;  %v10485_v22 = vor.u32 %v13065_v5, %v10484_v48  ;;  %3301 = vmatpush.bf16.msrb.mxu1 %v10557_v7  ;;  %v1899_v26 = vmul.f32 %v14894_v58, %v14960_v0  ;;  %v10183_v23 = vld [vmem:[%s13896_s22 + $0x128] sm:$0xff]  ;;  %3324 = vmatpush.bf16.msrb.mxu2 %v10497_v36  ;;  %v10489_v48 = vor.u32 %v13064_v17, %v10486_v32  ;;  %v10476_v5 = vld [vmem:[%s18837_s4 + $0x110] sm:$0xf]  ;;  %v13079_v36 = vld [vmem:[%s18837_s4 + $0x194] sm:$0xf0] }
 0x143   : > { %v1930_v31 = vpop.permute.xlu0 %1929  ;;  %3347 = vmatpush.bf16.msrb.mxu3 %v10561_v13  ;;  %v10553_v7 = vor.u32 %v13080_v35, %v10550_v4  ;;  %v1730_v9 = vmul.f32 %v14788_v3, %v14731_v8  ;;  %v1851_v0 = vadd.f32 %v1841_v16, %v1794_v25  ;;  %v10477_v19 = vor.u32 %v13063_v44, %v10476_v5  ;;  %v10540_v4 = vld [vmem:[%s18837_s4 + $0x190] sm:$0xf]  ;;  %v13062_v13 = vld [vmem:[%s18837_s4 + $0x114] sm:$0xf]  ;;  %v10478_v32 = vld [vmem:[%s18837_s4 + $0x118] sm:$0xf0] }
 0x144   : > { %v1954_v34 = vmul.f32 %v14929_v38, %v1930_v31  ;;  %v1962_v17 = vadd.f32 %v1952_v63, %v14993_v28  ;;  %v1852_v8 = vadd.f32 %v1842_v10, %v1795_v18  ;;  %v1955_v16 = vmul.f32 %v14939_v40, %v1930_v31  ;;  %v10542_v25 = vld [vmem:[%s18837_s4 + $0x198] sm:$0xf0]  ;;  %v13060_v44 = vld [vmem:[%s18837_s4 + $0x104] sm:$0xf] }
 0x145   : > { %3279 = vmatpush.bf16.msrb.mxu0 %v10485_v22  ;;  %v13078_v22 = vld [vmem:[%s18837_s4 + $0x194] sm:$0xf]  ;;  %v15122_v35 = vadd.f32 %v1953_v59, %v15004_v50  ;;  %v1908_v28 = vadd.f32 %v1898_v29, %v1851_v0  ;;  %v15125_v63 = vperm.slane %v15038_v2, 1  ;;  %v10541_v31 = vor.u32 %v13079_v36, %v10540_v4  ;;  %v10468_v50 = vld [vmem:[%s18837_s4 + $0x100] sm:$0xf] }
 0x146   : > { %3302 = vmatpush.bf16.msrb.mxu1 %v10549_v15  ;;  %v1909_v10 = vadd.f32 %v1899_v26, %v1852_v8  ;;  %3325 = vmatpush.bf16.msrb.mxu2 %v10489_v48  ;;  %v10545_v5 = vor.u32 %v13078_v22, %v10542_v25  ;;  %v13061_v2 = vld [vmem:[%s18837_s4 + $0x104] sm:$0xf0]  ;;  %v10532_v59 = vld [vmem:[%s18837_s4 + $0x180] sm:$0xf]  ;;  %v2008_v29 = vmul.f32 %v15021_v30, %v14776_v1  ;;  %v10470_v0 = vld [vmem:[%s18837_s4 + $0x108] sm:$0xf0] }
 0x147   : > { %3348 = vmatpush.bf16.msrb.mxu3 %v10553_v7  ;;  %v1786_v15 = vmul.f32 %v14800_v57, %v14778_v46  ;;  %v1787_v26 = vmul.f32 %v14840_v49, %v14778_v46  ;;  %v13077_v7 = vld [vmem:[%s18837_s4 + $0x184] sm:$0xf0]  ;;  %v10469_v36 = vor.u32 %v13061_v2, %v10468_v50  ;;  %v2066_v8 = vmul.f32 %v15089_v21, %v14943_v43  ;;  %v10189_v2 = vld [vmem:[%s13896_s22 + $0x160] sm:$0xff] }
 0x148   : > { %1442 = vperm.xlu2 %13690, %v10188_v56   ;;  %1395 = vperm.xlu1 %13689, %v10184_v37   ;;  %v10481_v37 = vor.u32 %v13062_v13, %v10478_v32  ;;  %v1965_v4 = vadd.f32 %v1955_v16, %v1909_v10  ;;  %v10534_v13 = vld [vmem:[%s18837_s4 + $0x188] sm:$0xf0]  ;;  %v2067_v32 = vmul.f32 %v15125_v63, %v14943_v43  ;;  %v10150_v16 = vld [vmem:[%s13896_s22 + $0x2f2] sm:$0xff] }
 0x149   : > { %1390 = vperm.xlu0 %13688, %v10183_v23   ;;  %v1964_v23 = vadd.f32 %v1954_v34, %v1908_v28  ;;  %3280 = vmatpush.bf16.msrb.mxu0 %v10477_v19  ;;  %v13076_v19 = vld [vmem:[%s18837_s4 + $0x184] sm:$0xf]  ;;  %v10190_v22 = vld [vmem:[%s13896_s22 + $0x168] sm:$0xff]  ;;  %v10533_v25 = vor.u32 %v13077_v7, %v10532_v59  ;;  %v10473_v28 = vor.u32 %v13060_v44, %v10470_v0 }
 0x14a   : > { %v15127_v56 = vpop.permute.xlu2 %1769  ;;  %v15129_v18 = vpop.permute.xlu1 %1990  ;;  %3303 = vmatpush.bf16.msrb.mxu1 %v10541_v31  ;;  %3326 = vmatpush.bf16.msrb.mxu2 %v10481_v37  ;;  %v1740_v49 = vadd.f32 %v1730_v9, %v15040_v61  ;;  %v2009_v57 = vmul.f32 %v15033_v51, %v14776_v1  ;;  %v1843_v43 = vmul.f32 %v14848_v62, %v14861_v42 }
 0x14b   : > { %18977 = vst [vmem:[#allocation38_spill] sm:$0xff] %v15127_v56  ;;  %v1986_v48 = vpop.permute.xlu0 %1985  ;;  %3349 = vmatpush.bf16.msrb.mxu3 %v10545_v5  ;;  %v1739_v56 = vadd.f32 %v15072_v12, %v15019_v54  ;;  %v1844_v31 = vmul.f32 %v14857_v55, %v14861_v42  ;;  %v2018_v37 = vadd.f32 %v2008_v29, %v1962_v17 }
 0x14c   : > { %v2010_v46 = vmul.f32 %v15021_v30, %v1986_v48  ;;  %v2011_v34 = vmul.f32 %v15033_v51, %v1986_v48  ;;  %v10537_v48 = vor.u32 %v13076_v19, %v10534_v13  ;;  %v1797_v7 = vadd.f32 %v1787_v26, %v1740_v49 }
 0x14d   : > { %3281 = vmatpush.bf16.msrb.mxu0 %v10469_v36  ;;  %v1796_v5 = vadd.f32 %v1786_v15, %v1739_v56  ;;  %v1900_v54 = vmul.f32 %v14882_v47, %v14945_v60  ;;  %v1901_v1 = vmul.f32 %v14894_v58, %v14945_v60  ;;  %v2019_v17 = vadd.f32 %v2009_v57, %v15122_v35  ;;  %v10194_v36 = vld [vmem:[%s13896_s22 + $0x190] sm:$0xff] }
 0x14e   : > { %v2020_v10 = vadd.f32 %v2010_v46, %v1964_v23  ;;  %v2021_v50 = vadd.f32 %v2011_v34, %v1965_v4  ;;  %3304 = vmatpush.bf16.msrb.mxu1 %v10533_v25  ;;  %3327 = vmatpush.bf16.msrb.mxu2 %v10473_v28  ;;  %v1854_v60 = vadd.f32 %v1844_v31, %v1797_v7  ;;  %v10195_v34 = vld [vmem:[%s13896_s22 + $0x198] sm:$0xff] }
 0x14f   : > { %3350 = vmatpush.bf16.msrb.mxu3 %v10537_v48  ;;  %v1853_v49 = vadd.f32 %v1843_v43, %v1796_v5  ;;  %v1956_v26 = vmul.f32 %v14929_v38, %v15044_v41  ;;  %v1957_v57 = vmul.f32 %v14939_v40, %v15044_v41 }
 0x150   : > { %v2076_v59 = vadd.f32 %v2066_v8, %v2020_v10  ;;  %v2077_v23 = vadd.f32 %v2067_v32, %v2021_v50  ;;  %1062 = vperm.xlu2 %13690, %v10150_v16   ;;  %1452 = vperm.xlu1 %13689, %v10190_v22   ;;  %v1911_v13 = vadd.f32 %v1901_v1, %v1854_v60  ;;  %v10151_v8 = vld [vmem:[%s13896_s22 + $0x2fa] sm:$0xff]  ;;  %v10156_v1 = vld [vmem:[%s13896_s22 + $0x332] sm:$0xff] }
 0x151   : > { %1447 = vperm.xlu0 %13688, %v10189_v2   ;;  %v1910_v19 = vadd.f32 %v1900_v54, %v1853_v49  ;;  %v2012_v32 = vmul.f32 %v15021_v30, %v15129_v18  ;;  %v2013_v16 = vmul.f32 %v15033_v51, %v15129_v18  ;;  %v10196_v49 = vld [vmem:[%s13896_s22 + $0x1a0] sm:$0xff] }
 0x152   : > { %v2086_v61 = vmax.f32 %v2076_v59, 0.0  ;;  %v2087_v12 = vmax.f32 %v2077_v23, 0.0  ;;  %v15183_v9 = vpop.permute.xlu2 %1831  ;;  %v2037_v42 = vpop.permute.xlu1 %2036  ;;  %v1967_v41 = vadd.f32 %v1957_v57, %v1911_v13 }
 0x153   : > { %v15186_v56 = vpop.permute.xlu0 %1605  ;;  %v2064_v29 = vmul.f32 %v15089_v21, %v2037_v42  ;;  %v2065_v15 = vmul.f32 %v15125_v63, %v2037_v42  ;;  %v1966_v28 = vadd.f32 %v1956_v26, %v1910_v19 }
 0x154   : > { %v2096_v44 = vsel %vm1015_vm7, %v2086_v61, 0.0  ;;  %v2097_v0 = vsel %vm1015_vm7, %v2087_v12, 0.0  ;;  %v2023_v31 = vadd.f32 %v2013_v16, %v1967_v41  ;;  %v10155_v61 = vld [vmem:[%s13896_s22 + $0x32a] sm:$0xff] }
 0x155   : > { %v2105_v35 = vpack.c.bf16 %v2097_v0, %v2096_v44  ;;  %v2074_v4 = vadd.f32 %v2064_v29, %v2018_v37  ;;  %v2075_v46 = vadd.f32 %v2065_v15, %v2019_v17  ;;  %v2022_v43 = vadd.f32 %v2012_v32, %v1966_v28  ;;  %v3034_v15 = vld [vmem:[#allocation2 + $0x70] sm:$0xee]  ;;  %v11062_v0 = vld [vmem:[%s18837_s4 + $0x4c8] sm:$0xf0] }
 0x156   : > { %v10162_v32 = vld [vmem:[%s13896_s22 + $0x36a] sm:$0xff] }
 0x157   : > { %v2084_v22 = vmax.f32 %v2074_v4, 0.0  ;;  %v2085_v25 = vmax.f32 %v2075_v46, 0.0  ;;  %v3083_v23 = vunpack.c.l.b16 %v2105_v35  ;;  %v3084_v12 = vunpack.c.h.b16 %v2105_v35 }
 0x158   : > { %1503 = vperm.xlu2 %13690, %v10195_v34   ;;  %1498 = vperm.xlu1 %13689, %v10194_v36   ;;  %v3079_v34 = vunpack.c.l.b16 %v3034_v15  ;;  %v3080_v36 = vunpack.c.h.b16 %v3034_v15  ;;  %v10168_v15 = vld [vmem:[%s13896_s22 + $0x60] sm:$0xff] }
 0x159   : > { %v2094_v10 = vsel %vm1014_vm6, %v2084_v22, 0.0  ;;  %v2095_v50 = vsel %vm1014_vm6, %v2085_v25, 0.0  ;;  %1067 = vperm.xlu0 %13688, %v10151_v8   ;;  %v10167_v8 = vld [vmem:[%s13896_s22 + $0x58] sm:$0xff]  ;;  %v10161_v25 = vld [vmem:[%s13896_s22 + $0x362] sm:$0xff] }
 0x15a   : > { %v2104_v2 = vpack.c.bf16 %v2095_v50, %v2094_v10  ;;  %v15209_v48 = vpop.permute.xlu2 %1939  ;;  %v15211_v18 = vpop.permute.xlu1 %1656 }
 0x15b   : > { %v2047_v59 = vpop.permute.xlu0 %2046 }
 0x15c   : > { %v2068_v37 = vmul.f32 %v15089_v21, %v2047_v59  ;;  %v2069_v5 = vmul.f32 %v15125_v63, %v2047_v59  ;;  %v3081_v7 = vunpack.c.l.b16 %v2104_v2  ;;  %v3082_v54 = vunpack.c.h.b16 %v2104_v2 }
 0x15e   : > { %v2078_v42 = vadd.f32 %v2068_v37, %v2022_v43  ;;  %v2079_v17 = vadd.f32 %v2069_v5, %v2023_v31  ;;  %v15218_v29 = vpack.c.b16 %v3083_v23, %v3081_v7  ;;  %v15220_v60 = vpack.c.b16 %v3084_v12, %v3082_v54 }
 0x15f   : > { %v3091_v28 = vpack.c.b16 %v3081_v7, %v3079_v34  ;;  %v3092_v41 = vpack.c.b16 %v3082_v54, %v3080_v36  ;;  %v1619_v5 = vmul.f32 %v14750_v45, %v14859_v39  ;;  %v1621_v7 = vmul.f32 %v14750_v45, %v15186_v56 }
 0x160   : > { %18978 = vst [vmem:[#allocation39_spill] sm:$0xff] %v15218_v29  ;;  %v2088_v26 = vmax.f32 %v2078_v42, 0.0  ;;  %v2089_v44 = vmax.f32 %v2079_v17, 0.0  ;;  %1124 = vperm.xlu2 %13690, %v10156_v1   ;;  %1119 = vperm.xlu1 %13689, %v10155_v61   ;;  %v1622_v54 = vmul.f32 %v14752_v20, %v15186_v56  ;;  %v10174_v42 = vld [vmem:[%s13896_s22 + $0x98] sm:$0xff]  ;;  %v10173_v17 = vld [vmem:[%s13896_s22 + $0x90] sm:$0xff]  ;;  %v1675_v45 = vmul.f32 %v14771_v11, %v15211_v18 }
 0x161   : > { %18979 = vst [vmem:[#allocation40_spill] sm:$0xff] %v15220_v60  ;;  %1508 = vperm.xlu0 %13688, %v10196_v49   ;;  %v3098_v37 = vrot.slane %v3091_v28, 1  ;;  %v1620_v49 = vmul.f32 %v14752_v20, %v14859_v39  ;;  %v1676_v34 = vmul.f32 %v14782_v53, %v15211_v18  ;;  %v1677_v36 = vmul.f32 %v14771_v11, %v15042_v27 }
 0x162   : > { %v2098_v57 = vsel %vm1016_vm5, %v2088_v26, 0.0  ;;  %v2099_v35 = vsel %vm1016_vm5, %v2089_v44, 0.0  ;;  %v15226_v4 = vpop.permute.xlu2 %2000  ;;  %v1718_v46 = vpop.permute.xlu1 %1717  ;;  %v1629_v26 = vadd.f32 %v1619_v5, %v18942_v52  ;;  %v1631_v44 = vadd.f32 %v1621_v7, %v18942_v52  ;;  %v18982_v7 = vld [vmem:[#allocation35_spill] sm:$0xff] }
 0x163   : > { %v15228_v19 = vpack.c.bf16 %v2099_v35, %v2098_v57  ;;  %v1713_v13 = vpop.permute.xlu0 %1712  ;;  %v1632_v57 = vadd.f32 %v1622_v54, %v14052_v33  ;;  %v1630_v18 = vadd.f32 %v1620_v49, %v14052_v33  ;;  %v10180_v49 = vld [vmem:[%s13896_s22 + $0xd0] sm:$0xff] }
 0x164   : > { %v1731_v20 = vmul.f32 %v14784_v14, %v1713_v13  ;;  %v1685_v28 = vadd.f32 %v1675_v45, %v1629_v26  ;;  %v1687_v11 = vadd.f32 %v1677_v36, %v1631_v44  ;;  %v10179_v26 = vld [vmem:[%s13896_s22 + $0xc8] sm:$0xff] }
 0x165   : > { %v3085_v16 = vunpack.c.l.b16 %v15228_v19  ;;  %v3086_v22 = vunpack.c.h.b16 %v15228_v19  ;;  %v10718_v19 = vld [vmem:[%s18837_s4 + $0x2b8] sm:$0xf0] }
 0x167   : > { %v15237_v10 = vpack.c.b16 %v3085_v16, %v3083_v23  ;;  %v15241_v50 = vpack.c.b16 %v3086_v22, %v3084_v12  ;;  %v3101_v23 = vrot.slane %v3092_v41, 1  ;;  %v1732_v41 = vmul.f32 %v14788_v3, %v1713_v13 }
 0x168   : > { %1231 = vperm.xlu2 %13690, %v10167_v8   ;;  %1180 = vperm.xlu1 %13689, %v10162_v32   ;;  %v1678_v8 = vmul.f32 %v14782_v53, %v15042_v27  ;;  %v1733_v32 = vmul.f32 %v14784_v14, %v1718_v46  ;;  %v18983_v27 = vld [vmem:[#allocation37_spill] sm:$0xff] }
 0x169   : > { %1175 = vperm.xlu0 %13688, %v10161_v25   ;;  %v3099_v2 = vrot.slane %v15237_v10, 1  ;;  %v3102_v43 = vrot.slane %v15241_v50, 1  ;;  %v1734_v25 = vmul.f32 %v14788_v3, %v1718_v46  ;;  %v1686_v46 = vadd.f32 %v1676_v34, %v1630_v18  ;;  %v1044_v10 = vld [vmem:[%s18835_s2] ss:$8 sm:$0x3] }
 0x16a   : > { %v15245_v31 = vpop.permute.xlu2 %1047  ;;  %v1827_v59 = vpop.permute.xlu1 %1826  ;;  %v1688_v5 = vadd.f32 %v1678_v8, %v1632_v57 }
 0x16b   : > { %v1775_v1 = vpop.permute.xlu0 %1774  ;;  %v3100_v61 = vsel %vm3097_vm9, %v3098_v37, %v3099_v2  ;;  %v3103_v12 = vsel %vm3097_vm9, %v3101_v23, %v3102_v43  ;;  %v1742_v13 = vadd.f32 %v1732_v41, %v1686_v46  ;;  %v1846_v36 = vmul.f32 %v14857_v55, %v1827_v59 }
 0x16c   : > { %3282 = vmatmul.bf16.vlgmr.msrb.gmra.mxu0 %v3100_v61  ;;  %3305 = vmatmul.bf16.vlgmr.msrb.gmra.mxu1 %v3103_v12  ;;  %v1790_v53 = vmul.f32 %v18982_v7, %v1775_v1  ;;  %v1791_v14 = vmul.f32 %v18983_v27, %v1775_v1 }
 0x16d   : > { %3328 = vmatmul.bf16.vlgmr.msrb.gmra.mxu2 %v3100_v61  ;;  %3351 = vmatmul.bf16.vlgmr.msrb.gmra.mxu3 %v3103_v12  ;;  %v1741_v61 = vadd.f32 %v1731_v20, %v1685_v28  ;;  %v1743_v12 = vadd.f32 %v1733_v32, %v1687_v11  ;;  %v1847_v32 = vmul.f32 %v14848_v62, %v15183_v9 }
 0x16e   : > { %v2941_v56 = vpop.f32.mrf.mxu0 }
 0x16f   : > { %v2964_v35 = vpop.f32.mrf.mxu1  ;;  %v1800_v1 = vadd.f32 %v1790_v53, %v1743_v12  ;;  %v10191_v12 = vld [vmem:[%s13896_s22 + $0x170] sm:$0xff] }
 0x170   : > { %1293 = vperm.xlu2 %13690, %v10174_v42   ;;  %1288 = vperm.xlu1 %13689, %v10173_v17   ;;  %v15272_v39 = vadd.f32 %v2964_v35, %v2941_v56  ;;  %v1744_v42 = vadd.f32 %v1734_v25, %v1688_v5  ;;  %v10185_v17 = vld [vmem:[%s13896_s22 + $0x138] sm:$0xff]  ;;  %v1845_v56 = vmul.f32 %v14848_v62, %v1827_v59 }
 0x171   : > { %1236 = vperm.xlu0 %13688, %v10168_v15   ;;  %v18984_v15 = vld [vmem:[#allocation38_spill] sm:$0xff]  ;;  %v1848_v25 = vmul.f32 %v14857_v55, %v15183_v9  ;;  %v1857_v53 = vadd.f32 %v1847_v32, %v1800_v1  ;;  %v10686_v1 = vld [vmem:[%s18837_s4 + $0x278] sm:$0xf0] }
 0x172   : > { %18981 = vst [vmem:[#allocation41_spill] sm:$0xff] %v15272_v39  ;;  %v15282_v37 = vpop.permute.xlu2 %1104  ;;  %v1889_v23 = vpop.permute.xlu1 %1888  ;;  %v1788_v3 = vmul.f32 %v18982_v7, %v18984_v15  ;;  %v1789_v57 = vmul.f32 %v18983_v27, %v18984_v15  ;;  %v1801_v35 = vadd.f32 %v1791_v14, %v1744_v42  ;;  %v13107_v15 = vld [vmem:[%s18837_s4 + $0x274] sm:$0xf0] }
 0x173   : > { %v1884_v54 = vpop.permute.xlu0 %1883  ;;  %v1904_v18 = vmul.f32 %v14882_v47, %v1889_v23  ;;  %v1905_v28 = vmul.f32 %v14894_v58, %v1889_v23 }
 0x174   : > { %v1798_v20 = vadd.f32 %v1788_v3, %v1741_v61  ;;  %v1902_v8 = vmul.f32 %v14882_v47, %v1884_v54  ;;  %v1799_v41 = vadd.f32 %v1789_v57, %v1742_v13  ;;  %v1903_v59 = vmul.f32 %v14894_v58, %v1884_v54  ;;  %v10192_v61 = vld [vmem:[%s13896_s22 + $0x178] sm:$0xff] }
 0x175   : > { %v2987_v45 = vpop.f32.mrf.mxu2  ;;  %v1858_v62 = vadd.f32 %v1848_v25, %v1801_v35  ;;  %v1914_v23 = vadd.f32 %v1904_v18, %v1857_v53  ;;  %v1958_v58 = vmul.f32 %v14929_v38, %v15209_v48  ;;  %v1959_v54 = vmul.f32 %v14939_v40, %v15209_v48  ;;  %v13123_v48 = vld [vmem:[%s18837_s4 + $0x2f4] sm:$0xf0]  ;;  %v13122_v35 = vld [vmem:[%s18837_s4 + $0x2f4] sm:$0xf] }
 0x176   : > { %v3010_v44 = vpop.f32.mrf.mxu3  ;;  %v1855_v11 = vadd.f32 %v1845_v56, %v1798_v20  ;;  %v1856_v14 = vadd.f32 %v1846_v36, %v1799_v41  ;;  %v2016_v3 = vmul.f32 %v15021_v30, %v15226_v4  ;;  %v10750_v20 = vld [vmem:[%s18837_s4 + $0x2f8] sm:$0xf0]  ;;  %v2017_v36 = vmul.f32 %v15033_v51, %v15226_v4 }
 0x177   : > { %v15294_v34 = vadd.f32 %v3010_v44, %v2987_v45  ;;  %v1915_v46 = vadd.f32 %v1905_v28, %v1858_v62  ;;  %v10684_v45 = vld [vmem:[%s18837_s4 + $0x270] sm:$0xf]  ;;  %v10753_v32 = vor.u32 %v13122_v35, %v10750_v20 }
 0x178   : > { %1400 = vperm.xlu2 %13690, %v10185_v17   ;;  %1349 = vperm.xlu1 %13689, %v10180_v49   ;;  %v1912_v55 = vadd.f32 %v1902_v8, %v1855_v11  ;;  %v1913_v42 = vadd.f32 %v1903_v59, %v1856_v14  ;;  %v10186_v49 = vld [vmem:[%s13896_s22 + $0x140] sm:$0xff]  ;;  %v10685_v56 = vor.u32 %v13107_v15, %v10684_v45  ;;  %v13105_v59 = vld [vmem:[%s18837_s4 + $0x264] sm:$0xf0] }
 0x179   : > { %18985 = vst [vmem:[#allocation35_spill] sm:$0xff] %v15294_v34  ;;  %1344 = vperm.xlu0 %13688, %v10179_v26   ;;  %v13106_v26 = vld [vmem:[%s18837_s4 + $0x274] sm:$0xf]  ;;  %v10676_v11 = vld [vmem:[%s18837_s4 + $0x260] sm:$0xf]  ;;  %3660 = vmatpush.bf16.msra.mxu3 %v10753_v32  ;;  %v10197_v45 = vld [vmem:[%s13896_s22 + $0x1a8] sm:$0xff] }
 0x17a   : > { %v15305_v5 = vpop.permute.xlu2 %1160  ;;  %v1996_v7 = vpop.permute.xlu1 %1995  ;;  %v1968_v44 = vadd.f32 %v1958_v58, %v1912_v55  ;;  %3591 = vmatpush.bf16.msra.mxu0 %v10685_v56  ;;  %v10689_v8 = vor.u32 %v13106_v26, %v10686_v1  ;;  %v1969_v25 = vadd.f32 %v1959_v54, %v1913_v42  ;;  %v10740_v14 = vld [vmem:[%s18837_s4 + $0x2e0] sm:$0xf]  ;;  %v10198_v42 = vld [vmem:[%s13896_s22 + $0x1b0] sm:$0xff] }
 0x17b   : > { %v1945_v27 = vpop.permute.xlu0 %1944  ;;  %v2014_v17 = vmul.f32 %v15021_v30, %v1996_v7  ;;  %v2015_v57 = vmul.f32 %v15033_v51, %v1996_v7 }
 0x17c   : > { %v1960_v47 = vmul.f32 %v14929_v38, %v1945_v27  ;;  %v1961_v9 = vmul.f32 %v14939_v40, %v1945_v27  ;;  %v10748_v40 = vld [vmem:[%s18837_s4 + $0x2f0] sm:$0xf]  ;;  %3637 = vmatpush.bf16.msra.mxu2 %v10689_v8  ;;  %v13102_v8 = vld [vmem:[%s18837_s4 + $0x254] sm:$0xf] }
 0x17d   : > { %v10749_v30 = vor.u32 %v13123_v48, %v10748_v40  ;;  %v2024_v18 = vadd.f32 %v2014_v17, %v1968_v44  ;;  %v10099_v27 = vld [vmem:[%s13896_s22 + $0x349] sm:$0xff]  ;;  %v2025_v55 = vadd.f32 %v2015_v57, %v1969_v25  ;;  %v13103_v48 = vld [vmem:[%s18837_s4 + $0x254] sm:$0xf0] }
 0x17e   : > { %v1970_v13 = vadd.f32 %v1960_v47, %v1914_v23  ;;  %v1971_v38 = vadd.f32 %v1961_v9, %v1915_v46  ;;  %v10677_v23 = vor.u32 %v13105_v59, %v10676_v11  ;;  %v13121_v46 = vld [vmem:[%s18837_s4 + $0x2e4] sm:$0xf0] }
 0x17f   : > { %3614 = vmatpush.bf16.msra.mxu1 %v10749_v30  ;;  %v10741_v15 = vor.u32 %v13121_v46, %v10740_v14  ;;  %v10732_v30 = vld [vmem:[%s18837_s4 + $0x2d0] sm:$0xf]  ;;  %v10104_v46 = vld [vmem:[%s13896_s22 + $0x2a2] sm:$0xff] }
 0x180   : > { %1462 = vperm.xlu2 %13690, %v10192_v61   ;;  %1457 = vperm.xlu1 %13689, %v10191_v12   ;;  %v2026_v4 = vadd.f32 %v2016_v3, %v1970_v13  ;;  %v2027_v7 = vadd.f32 %v2017_v36, %v1971_v38  ;;  %v13104_v61 = vld [vmem:[%s18837_s4 + $0x264] sm:$0xf]  ;;  %v10678_v12 = vld [vmem:[%s18837_s4 + $0x268] sm:$0xf0]  ;;  %v10668_v13 = vld [vmem:[%s18837_s4 + $0x250] sm:$0xf] }
 0x181   : > { %1405 = vperm.xlu0 %13688, %v10186_v49   ;;  %3592 = vmatpush.bf16.msra.mxu0 %v10677_v23  ;;  %v10681_v3 = vor.u32 %v13104_v61, %v10678_v12  ;;  %v10669_v57 = vor.u32 %v13103_v48, %v10668_v13  ;;  %v13119_v36 = vld [vmem:[%s18837_s4 + $0x2d4] sm:$0xf0]  ;;  %v13101_v23 = vld [vmem:[%s18837_s4 + $0x244] sm:$0xf0]  ;;  %v10724_v12 = vld [vmem:[%s18837_s4 + $0x2c0] sm:$0xf] }
 0x182   : > { %v15346_v28 = vpop.permute.xlu2 %1216  ;;  %v2057_v41 = vpop.permute.xlu1 %2056  ;;  %v10100_v14 = vld [vmem:[%s13896_s22 + $0x351] sm:$0xff] }
 0x183   : > { %v2052_v51 = vpop.permute.xlu0 %2051  ;;  %v2072_v53 = vmul.f32 %v15089_v21, %v2057_v41  ;;  %v2073_v62 = vmul.f32 %v15125_v63, %v2057_v41  ;;  %3615 = vmatpush.bf16.msra.mxu1 %v10741_v15  ;;  %3638 = vmatpush.bf16.msra.mxu2 %v10681_v3  ;;  %v10726_v3 = vld [vmem:[%s18837_s4 + $0x2c8] sm:$0xf0]  ;;  %v10652_v13 = vld [vmem:[%s18837_s4 + $0x230] sm:$0xf]  ;;  %v13098_v48 = vld [vmem:[%s18837_s4 + $0x234] sm:$0xf] }
 0x184   : > { %v2070_v47 = vmul.f32 %v15089_v21, %v2052_v51  ;;  %v2071_v9 = vmul.f32 %v15125_v63, %v2052_v51  ;;  %v13120_v21 = vld [vmem:[%s18837_s4 + $0x2e4] sm:$0xf]  ;;  %v10742_v63 = vld [vmem:[%s18837_s4 + $0x2e8] sm:$0xf0]  ;;  %v10733_v51 = vor.u32 %v13119_v36, %v10732_v30  ;;  %v13114_v36 = vld [vmem:[%s18837_s4 + $0x2b4] sm:$0xf] }
 0x185   : > { %v2082_v58 = vadd.f32 %v2072_v53, %v2026_v4  ;;  %v2083_v54 = vadd.f32 %v2073_v62, %v2027_v7  ;;  %v10745_v40 = vor.u32 %v13120_v21, %v10742_v63  ;;  %v10670_v4 = vld [vmem:[%s18837_s4 + $0x258] sm:$0xf0]  ;;  %3593 = vmatpush.bf16.msra.mxu0 %v10669_v57  ;;  %v13118_v62 = vld [vmem:[%s18837_s4 + $0x2d4] sm:$0xf]  ;;  %v10662_v21 = vld [vmem:[%s18837_s4 + $0x248] sm:$0xf0] }
 0x186   : > { %v2080_v17 = vadd.f32 %v2070_v47, %v2024_v18  ;;  %v2081_v49 = vadd.f32 %v2071_v9, %v2025_v55  ;;  %v10105_v55 = vld [vmem:[%s13896_s22 + $0x2aa] sm:$0xff]  ;;  %v10673_v47 = vor.u32 %v13102_v8, %v10670_v4  ;;  %v10660_v9 = vld [vmem:[%s18837_s4 + $0x240] sm:$0xf]  ;;  %v13116_v63 = vld [vmem:[%s18837_s4 + $0x2c4] sm:$0xf] }
 0x187   : > { %v2092_v38 = vmax.f32 %v2082_v58, 0.0  ;;  %v2093_v56 = vmax.f32 %v2083_v54, 0.0  ;;  %3661 = vmatpush.bf16.msra.mxu3 %v10745_v40  ;;  %3616 = vmatpush.bf16.msra.mxu1 %v10733_v51  ;;  %v13117_v58 = vld [vmem:[%s18837_s4 + $0x2c4] sm:$0xf0]  ;;  %v13115_v40 = vld [vmem:[%s18837_s4 + $0x2b4] sm:$0xf0] }
 0x188   : > { %v2090_v26 = vmax.f32 %v2080_v17, 0.0  ;;  %v2091_v44 = vmax.f32 %v2081_v49, 0.0  ;;  %473 = vperm.xlu2 %13690, %v10099_v27   ;;  %1518 = vperm.xlu1 %13689, %v10198_v42   ;;  %v10734_v27 = vld [vmem:[%s18837_s4 + $0x2d8] sm:$0xf0]  ;;  %v13100_v42 = vld [vmem:[%s18837_s4 + $0x244] sm:$0xf]  ;;  %v10661_v49 = vor.u32 %v13101_v23, %v10660_v9 }
 0x189   : > { %v2102_v35 = vsel %vm1018_vm11, %v2092_v38, 0.0  ;;  %v2103_v20 = vsel %vm1018_vm11, %v2093_v56, 0.0  ;;  %1513 = vperm.xlu0 %13688, %v10197_v45   ;;  %3639 = vmatpush.bf16.msra.mxu2 %v10673_v47  ;;  %v10737_v17 = vor.u32 %v13118_v62, %v10734_v27  ;;  %v10725_v45 = vor.u32 %v13117_v58, %v10724_v12  ;;  %v13099_v38 = vld [vmem:[%s18837_s4 + $0x234] sm:$0xf0]  ;;  %v10716_v56 = vld [vmem:[%s18837_s4 + $0x2b0] sm:$0xf] }
 0x18a   : > { %v2100_v25 = vsel %vm1017_vm12, %v2090_v26, 0.0  ;;  %v2101_v18 = vsel %vm1017_vm12, %v2091_v44, 0.0  ;;  %v2108_v41 = vpack.c.bf16 %v2103_v20, %v2102_v35  ;;  %v15402_v11 = vpop.permute.xlu2 %1273  ;;  %v15404_v59 = vpop.permute.xlu1 %1057  ;;  %v10665_v15 = vor.u32 %v13100_v42, %v10662_v21  ;;  %v10654_v57 = vld [vmem:[%s18837_s4 + $0x238] sm:$0xf0]  ;;  %3594 = vmatpush.bf16.msra.mxu0 %v10661_v49  ;;  %v10644_v4 = vld [vmem:[%s18837_s4 + $0x220] sm:$0xf] }
 0x18b   : > { %v2107_v7 = vpack.c.bf16 %v2101_v18, %v2100_v25  ;;  %v15409_v53 = vpop.permute.xlu0 %1052  ;;  %3662 = vmatpush.bf16.msra.mxu3 %v10737_v17  ;;  %v10729_v44 = vor.u32 %v13116_v63, %v10726_v3  ;;  %3617 = vmatpush.bf16.msra.mxu1 %v10725_v45  ;;  %v10717_v25 = vor.u32 %v13115_v40, %v10716_v56  ;;  %v10110_v62 = vld [vmem:[%s13896_s22 + $0x2da] sm:$0xff]  ;;  %v10116_v27 = vld [vmem:[%s13896_s22 + $0xaf] sm:$0xff]  ;;  %v13096_v12 = vld [vmem:[%s18837_s4 + $0x224] sm:$0xf]  ;;  %v15509_v21 = vpop.f32.mrf.mxu0 }
 0x18c   : > { %2114 = vst [vmem:[#allocation2 + $0x98] sm:$0xff] %v2108_v41  ;;  %v10657_v18 = vor.u32 %v13098_v48, %v10654_v57  ;;  %v10708_v23 = vld [vmem:[%s18837_s4 + $0x2a0] sm:$0xf]  ;;  %v10710_v42 = vld [vmem:[%s18837_s4 + $0x2a8] sm:$0xf0]  ;;  %v15511_v63 = vpop.f32.mrf.mxu1 }
 0x18d   : > { %v3087_v61 = vunpack.c.l.b16 %v2107_v7  ;;  %v3088_v54 = vunpack.c.h.b16 %v2107_v7  ;;  %3640 = vmatpush.bf16.msra.mxu2 %v10665_v15  ;;  %v13097_v7 = vld [vmem:[%s18837_s4 + $0x224] sm:$0xf0]  ;;  %18990 = vst [vmem:[#allocation42_spill] sm:$0xff] %v15509_v21  ;;  %v10636_v45 = vld [vmem:[%s18837_s4 + $0x210] sm:$0xf] }
 0x18e   : > { %v10645_v58 = vor.u32 %v13097_v7, %v10644_v4  ;;  %18991 = vst [vmem:[#allocation43_spill] sm:$0xff] %v15511_v63  ;;  %v13095_v15 = vld [vmem:[%s18837_s4 + $0x214] sm:$0xf0]  ;;  %v10157_v4 = vld [vmem:[%s18835_s2 + $0x1] ss:$8 sm:$0x3] }
 0x18f   : > { %v15461_v26 = vpack.c.b16 %v3087_v61, %v3085_v16  ;;  %v15468_v30 = vpack.c.b16 %v3088_v54, %v3086_v22  ;;  %v10653_v16 = vor.u32 %v13099_v38, %v10652_v13  ;;  %3663 = vmatpush.bf16.msra.mxu3 %v10729_v44  ;;  %3618 = vmatpush.bf16.msra.mxu1 %v10717_v25  ;;  %v10700_v44 = vld [vmem:[%s18837_s4 + $0x290] sm:$0xf]  ;;  %v10702_v25 = vld [vmem:[%s18837_s4 + $0x298] sm:$0xf0] }
 0x190   : > { %536 = vperm.xlu2 %13690, %v10105_v55   ;;  %531 = vperm.xlu1 %13689, %v10104_v46   ;;  %v10721_v55 = vor.u32 %v13114_v36, %v10718_v19  ;;  %v13113_v46 = vld [vmem:[%s18837_s4 + $0x2a4] sm:$0xf0]  ;;  %v10638_v36 = vld [vmem:[%s18837_s4 + $0x218] sm:$0xf0]  ;;  %v696_v19 = vld [vmem:[%s13896_s22 + $0x10] sm:$0xff] }
 0x191   : > { %18988 = vst [vmem:[#allocation37_spill] sm:$0xff] %v15461_v26  ;;  %478 = vperm.xlu0 %13688, %v10100_v14   ;;  %v10111_v14 = vld [vmem:[%s13896_s22 + $0x2e2] sm:$0xff]  ;;  %3595 = vmatpush.bf16.msra.mxu0 %v10653_v16  ;;  %v10709_v40 = vor.u32 %v13113_v46, %v10708_v23  ;;  %v13094_v16 = vld [vmem:[%s18837_s4 + $0x214] sm:$0xf] }
 0x192   : > { %18989 = vst [vmem:[#allocation38_spill] sm:$0xff] %v15468_v30  ;;  %v15470_v35 = vpop.permute.xlu2 %1329  ;;  %v15472_v20 = vpop.permute.xlu1 %1114  ;;  %3641 = vmatpush.bf16.msra.mxu2 %v10657_v18  ;;  %v695_v18 = vld [vmem:[%s13896_s22 + $0x8] sm:$0xff]  ;;  %v10117_v7 = vld [vmem:[%s13896_s22 + $0xb7] sm:$0xff]  ;;  %v13092_v46 = vld [vmem:[%s18837_s4 + $0x204] sm:$0xf] }
 0x193   : > { %v15480_v22 = vpop.permute.xlu0 %1109  ;;  %v3039_v8 = vld [vmem:[#allocation2 + $0x98] sm:$0x11]  ;;  %3664 = vmatpush.bf16.msra.mxu3 %v10721_v55  ;;  %3619 = vmatpush.bf16.msra.mxu1 %v10709_v40  ;;  %v15573_v55 = vpop.f32.mrf.mxu2  ;;  %v13109_v23 = vld [vmem:[%s18837_s4 + $0x284] sm:$0xf0] }
 0x194   : > { %v3089_v41 = vunpack.c.l.b16 %v3039_v8  ;;  %v3090_v51 = vunpack.c.h.b16 %v3039_v8  ;;  %v13110_v8 = vld [vmem:[%s18837_s4 + $0x294] sm:$0xf]  ;;  %18992 = vst [vmem:[#allocation44_spill] sm:$0xff] %v15573_v55 }
 0x195   : > { %3596 = vmatpush.bf16.msra.mxu0 %v10645_v58  ;;  %v15586_v58 = vperm.slane %v1044_v10, 0 }
 0x196   : > { %v3095_v47 = vpack.c.b16 %v3089_v41, %v3087_v61  ;;  %v3096_v9 = vpack.c.b16 %v3090_v51, %v3088_v54  ;;  %v10646_v61 = vld [vmem:[%s18837_s4 + $0x228] sm:$0xf0]  ;;  %v13112_v54 = vld [vmem:[%s18837_s4 + $0x2a4] sm:$0xf]  ;;  %v10628_v41 = vld [vmem:[%s18837_s4 + $0x200] sm:$0xf] }
 0x197   : > { %v10649_v48 = vor.u32 %v13096_v12, %v10646_v61  ;;  %v10713_v50 = vor.u32 %v13112_v54, %v10710_v42  ;;  %v13093_v51 = vld [vmem:[%s18837_s4 + $0x204] sm:$0xf0]  ;;  %v10630_v12 = vld [vmem:[%s18837_s4 + $0x208] sm:$0xf0] }
 0x198   : > { %647 = vperm.xlu2 %13690, %v10116_v27   ;;  %594 = vperm.xlu1 %13689, %v10111_v14   ;;  %v15513_v17 = vrot.slane %v3095_v47, 1  ;;  %v15515_v49 = vrot.slane %v3096_v9, 1  ;;  %v10641_v27 = vor.u32 %v13094_v16, %v10638_v36  ;;  %v10692_v14 = vld [vmem:[%s18837_s4 + $0x280] sm:$0xf]  ;;  %v15575_v47 = vpop.f32.mrf.mxu3  ;;  %v10705_v9 = vor.u32 %v13110_v8, %v10702_v25 }
 0x199   : > { %589 = vperm.xlu0 %13688, %v10110_v62   ;;  %3642 = vmatpush.bf16.msra.mxu2 %v10649_v48  ;;  %18993 = vst [vmem:[#allocation45_spill] sm:$0xff] %v15575_v47  ;;  %v10629_v42 = vor.u32 %v13093_v51, %v10628_v41  ;;  %v15601_v48 = vperm.slane %v10157_v4, 0  ;;  %v10169_v16 = vld [vmem:[%s18835_s2 + $0x3] ss:$8 sm:$0x3]  ;;  %v1075_v8 = vmul.f32 %v15586_v58, %v15245_v31 }
 0x19a   : > { %v15523_v3 = vpop.permute.xlu2 %1385  ;;  %v15525_v13 = vpop.permute.xlu1 %1170  ;;  %v3105_v38 = vsel %vm3097_vm9, %v3099_v2, %v15513_v17  ;;  %v3107_v56 = vsel %vm3097_vm9, %v3102_v43, %v15515_v49  ;;  %v10637_v2 = vor.u32 %v13095_v15, %v10636_v45  ;;  %v13111_v43 = vld [vmem:[%s18837_s4 + $0x294] sm:$0xf0]  ;;  %3665 = vmatpush.bf16.msra.mxu3 %v10713_v50  ;;  %v13108_v45 = vld [vmem:[%s18837_s4 + $0x284] sm:$0xf]  ;;  %v10694_v15 = vld [vmem:[%s18837_s4 + $0x288] sm:$0xf0] }
 0x19b   : > { %v15541_v57 = vpop.permute.xlu0 %1165  ;;  %3287 = vmatmul.bf16.gmra.mxu0 %v3105_v38  ;;  %3310 = vmatmul.bf16.gmra.mxu1 %v3107_v56  ;;  %v10701_v62 = vor.u32 %v13111_v43, %v10700_v44  ;;  %v15607_v43 = vperm.slane %v10157_v4, 1  ;;  %v10175_v51 = vld [vmem:[%s18835_s2 + $0x4] ss:$8 sm:$0x3]  ;;  %v10129_v4 = vld [vmem:[%s13896_s22 + $0x18f] sm:$0xff] }
 0x19c   : > { %3333 = vmatmul.bf16.gmra.mxu2 %v3105_v38  ;;  %3356 = vmatmul.bf16.gmra.mxu3 %v3107_v56  ;;  %v15594_v38 = vperm.slane %v1044_v10, 1  ;;  %v10163_v56 = vld [vmem:[%s18835_s2 + $0x2] ss:$8 sm:$0x3]  ;;  %v10633_v10 = vor.u32 %v13092_v46, %v10630_v12  ;;  %v1085_v12 = vadd.f32 %v1075_v8, %v18942_v52 }
 0x19d   : > { %3597 = vmatpush.bf16.msra.mxu0 %v10637_v2  ;;  %3620 = vmatpush.bf16.msra.mxu1 %v10701_v62  ;;  %v10693_v2 = vor.u32 %v13109_v23, %v10692_v14  ;;  %v15616_v25 = vperm.slane %v10163_v56, 0  ;;  %v15620_v41 = vperm.slane %v10163_v56, 1  ;;  %v1132_v62 = vmul.f32 %v15601_v48, %v15282_v37  ;;  %v10123_v14 = vld [vmem:[%s13896_s22 + $0x40] sm:$0xff] }
 0x19e   : > { %v2946_v61 = vpop.f32.mrf.mxu0  ;;  %3643 = vmatpush.bf16.msra.mxu2 %v10641_v27  ;;  %3666 = vmatpush.bf16.msra.mxu3 %v10705_v9  ;;  %v15629_v27 = vperm.slane %v10169_v16, 0  ;;  %v1133_v9 = vmul.f32 %v15607_v43, %v15282_v37  ;;  %v10187_v8 = vld [vmem:[%s18835_s2 + $0x6] ss:$8 sm:$0x3]  ;;  %v1080_v47 = vmul.f32 %v15594_v38, %v15404_v59 }
 0x19f   : > { %v2969_v54 = vpop.f32.mrf.mxu1 }
 0x1a0   : > { %709 = vperm.xlu2 %13690, %v696_v19   ;;  %704 = vperm.xlu1 %13689, %v695_v18   ;;  %v15599_v40 = vadd.f32 %v2969_v54, %v2946_v61  ;;  %v10697_v19 = vor.u32 %v13108_v45, %v10694_v15  ;;  %v1076_v18 = vmul.f32 %v15594_v38, %v15245_v31  ;;  %v15634_v31 = vperm.slane %v10169_v16, 1 }
 0x1a1   : > { %652 = vperm.xlu0 %13688, %v10117_v7   ;;  %3598 = vmatpush.bf16.msra.mxu0 %v10629_v42  ;;  %v10124_v7 = vld [vmem:[%s13896_s22 + $0x48] sm:$0xff]  ;;  %v1188_v61 = vmul.f32 %v15616_v25, %v15305_v5  ;;  %v15639_v54 = vperm.slane %v10175_v51, 0  ;;  %v1142_v16 = vadd.f32 %v1132_v62, %v1085_v12  ;;  %v1079_v12 = vmul.f32 %v15586_v58, %v15404_v59 }
 0x1a2   : > { %18994 = vst [vmem:[#allocation46_spill] sm:$0xff] %v15599_v40  ;;  %v15603_v44 = vpop.permute.xlu2 %1442  ;;  %v15605_v50 = vpop.permute.xlu1 %1226  ;;  %3621 = vmatpush.bf16.msra.mxu1 %v10693_v2  ;;  %3644 = vmatpush.bf16.msra.mxu2 %v10633_v10  ;;  %v10181_v42 = vld [vmem:[%s18835_s2 + $0x5] ss:$8 sm:$0x3]  ;;  %v1086_v56 = vadd.f32 %v1076_v18, %v14052_v33  ;;  %v1189_v2 = vmul.f32 %v15620_v41, %v15305_v5  ;;  %v15653_v10 = vperm.slane %v10175_v51, 1 }
 0x1a3   : > { %v15612_v36 = vpop.permute.xlu0 %1221  ;;  %3667 = vmatpush.bf16.msra.mxu3 %v10697_v19  ;;  %18995 = vst [vmem:[#allocation47_spill] sm:$0xff] %v15639_v54  ;;  %v1244_v19 = vmul.f32 %v15629_v27, %v15346_v28  ;;  %v1245_v5 = vmul.f32 %v15634_v31, %v15346_v28  ;;  %v15666_v18 = vperm.slane %v10181_v42, 0  ;;  %v15668_v51 = vperm.slane %v10181_v42, 1 }
 0x1a4   : > { %18999 = vst [vmem:[#allocation51_spill] sm:$0xff] %v15653_v10  ;;  %v1302_v28 = vmul.f32 %v15653_v10, %v15402_v11  ;;  %v15681_v42 = vperm.slane %v10187_v8, 0  ;;  %v1089_v30 = vadd.f32 %v1079_v12, %v18942_v52  ;;  %v10908_v12 = vld [vmem:[%s18837_s4 + $0x3f0] sm:$0xf] }
 0x1a5   : > { %v2992_v23 = vpop.f32.mrf.mxu2  ;;  %19000 = vst [vmem:[#allocation52_spill] sm:$0xff] %v15666_v18  ;;  %v1357_v55 = vmul.f32 %v15666_v18, %v15470_v35 }
 0x1a6   : > { %v3015_v46 = vpop.f32.mrf.mxu3  ;;  %v15646_v15 = vpop.f32.mrf.mxu0 }
 0x1a7   : > { %v15644_v45 = vadd.f32 %v3015_v46, %v2992_v23  ;;  %18997 = vst [vmem:[#allocation49_spill] sm:$0xff] %v15646_v15  ;;  %v15648_v37 = vpop.f32.mrf.mxu1  ;;  %v1301_v46 = vmul.f32 %v15639_v54, %v15402_v11  ;;  %v1078_v11 = vmul.f32 %v15594_v38, %v15409_v53 }
 0x1a8   : > { %18998 = vst [vmem:[#allocation50_spill] sm:$0xff] %v15648_v37  ;;  %820 = vperm.xlu2 %13690, %v10129_v4   ;;  %767 = vperm.xlu1 %13689, %v10124_v7   ;;  %v1143_v7 = vadd.f32 %v1133_v9, %v1086_v56  ;;  %v10136_v56 = vld [vmem:[%s13896_s22 + $0xf0] sm:$0xff] }
 0x1a9   : > { %18996 = vst [vmem:[#allocation48_spill] sm:$0xff] %v15644_v45  ;;  %762 = vperm.xlu0 %13688, %v10123_v14   ;;  %v1198_v14 = vadd.f32 %v1188_v61, %v1142_v16  ;;  %v10193_v61 = vld [vmem:[%s18835_s2 + $0x7] ss:$8 sm:$0x3] }
 0x1aa   : > { %v15660_v23 = vpop.permute.xlu2 %1062  ;;  %v15662_v4 = vpop.permute.xlu1 %1283  ;;  %v1199_v9 = vadd.f32 %v1189_v2, %v1143_v7  ;;  %v10135_v16 = vld [vmem:[%s13896_s22 + $0xe8] sm:$0xff]  ;;  %v15693_v2 = vperm.slane %v10187_v8, 1  ;;  %v10130_v7 = vld [vmem:[%s13896_s22 + $0x197] sm:$0xff]  ;;  %v15708_v8 = vperm.slane %v10193_v61, 0 }
 0x1ab   : > { %v15670_v62 = vpop.permute.xlu0 %1278  ;;  %3292 = vmatmul.bf16.gmra.mxu0 %v15513_v17  ;;  %3315 = vmatmul.bf16.gmra.mxu1 %v15515_v49  ;;  %v1254_v37 = vadd.f32 %v1244_v19, %v1198_v14  ;;  %v10102_v45 = vld [vmem:[%s13896_s22 + $0x361] sm:$0xff] }
 0x1ac   : > { %3338 = vmatmul.bf16.gmra.mxu2 %v15513_v17  ;;  %3361 = vmatmul.bf16.gmra.mxu3 %v15515_v49  ;;  %v1077_v17 = vmul.f32 %v15586_v58, %v15409_v53  ;;  %v1255_v15 = vadd.f32 %v1245_v5, %v1199_v9  ;;  %v1358_v49 = vmul.f32 %v15668_v51, %v15470_v35  ;;  %v15710_v5 = vperm.slane %v10193_v61, 1 }
 0x1ad   : > { %v15702_v19 = vpop.f32.mrf.mxu2  ;;  %v1311_v63 = vadd.f32 %v1301_v46, %v1254_v37  ;;  %v1136_v53 = vmul.f32 %v15601_v48, %v15472_v20  ;;  %v1137_v35 = vmul.f32 %v15607_v43, %v15472_v20  ;;  %v1088_v46 = vadd.f32 %v1078_v11, %v14052_v33  ;;  %v10844_v20 = vld [vmem:[%s18837_s4 + $0x370] sm:$0xf] }
 0x1ae   : > { %19001 = vst [vmem:[#allocation53_spill] sm:$0xff] %v15702_v19  ;;  %v15704_v14 = vpop.f32.mrf.mxu3  ;;  %v2951_v9 = vpop.f32.mrf.mxu0  ;;  %v1312_v21 = vadd.f32 %v1302_v28, %v1255_v15  ;;  %v1087_v37 = vadd.f32 %v1077_v17, %v18942_v52  ;;  %v1134_v61 = vmul.f32 %v15601_v48, %v15480_v22  ;;  %v13139_v28 = vld [vmem:[%s18837_s4 + $0x374] sm:$0xf0] }
 0x1af   : > { %19002 = vst [vmem:[#allocation54_spill] sm:$0xff] %v15704_v14  ;;  %v2974_v59 = vpop.f32.mrf.mxu1  ;;  %v1367_v17 = vadd.f32 %v1357_v55, %v1311_v63  ;;  %v13138_v14 = vld [vmem:[%s18837_s4 + $0x374] sm:$0xf]  ;;  %v1146_v26 = vadd.f32 %v1136_v53, %v1089_v30  ;;  %v1192_v63 = vmul.f32 %v15616_v25, %v15525_v13  ;;  %v10101_v55 = vld [vmem:[%s13896_s22 + $0x359] sm:$0xff]  ;;  %v10845_v60 = vor.u32 %v13139_v28, %v10844_v20 }
 0x1b0   : > { %883 = vperm.xlu2 %13690, %v10136_v56   ;;  %878 = vperm.xlu1 %13689, %v10135_v16   ;;  %v15715_v19 = vadd.f32 %v2974_v59, %v2951_v9  ;;  %v1135_v56 = vmul.f32 %v15607_v43, %v15480_v22  ;;  %v1090_v22 = vadd.f32 %v1080_v47, %v14052_v33  ;;  %v13155_v59 = vld [vmem:[%s18837_s4 + $0x3f4] sm:$0xf0]  ;;  %v10846_v47 = vld [vmem:[%s18837_s4 + $0x378] sm:$0xf0]  ;;  %v13154_v30 = vld [vmem:[%s18837_s4 + $0x3f4] sm:$0xf] }
 0x1b1   : > { %825 = vperm.xlu0 %13688, %v10130_v7   ;;  %v1368_v11 = vadd.f32 %v1358_v49, %v1312_v21  ;;  %v1413_v7 = vmul.f32 %v15681_v42, %v15523_v3  ;;  %v1414_v21 = vmul.f32 %v15693_v2, %v15523_v3  ;;  %v10141_v49 = vld [vmem:[%s13896_s22 + $0x120] sm:$0xff]  ;;  %v10909_v40 = vor.u32 %v13155_v59, %v10908_v12  ;;  %v10910_v3 = vld [vmem:[%s18837_s4 + $0x3f8] sm:$0xf0]  ;;  %v13153_v12 = vld [vmem:[%s18837_s4 + $0x3e4] sm:$0xf0] }
 0x1b2   : > { %19003 = vst [vmem:[#allocation55_spill] sm:$0xff] %v15715_v19  ;;  %v15723_v16 = vpop.permute.xlu2 %1503  ;;  %v15725_v15 = vpop.permute.xlu1 %1339  ;;  %v1147_v29 = vadd.f32 %v1137_v35, %v1090_v22  ;;  %v1193_v19 = vmul.f32 %v15620_v41, %v15525_v13  ;;  %v10849_v32 = vor.u32 %v13138_v14, %v10846_v47  ;;  %v1144_v53 = vadd.f32 %v1134_v61, %v1087_v37  ;;  %v10836_v13 = vld [vmem:[%s18837_s4 + $0x360] sm:$0xf]  ;;  %v13137_v14 = vld [vmem:[%s18837_s4 + $0x364] sm:$0xf0] }
 0x1b3   : > { %v15739_v9 = vpop.permute.xlu0 %1334  ;;  %v1145_v1 = vadd.f32 %v1135_v56, %v1088_v46  ;;  %v1190_v20 = vmul.f32 %v15616_v25, %v15541_v57  ;;  %3975 = vmatpush.bf16.msrb.mxu0 %v10845_v60  ;;  %v10913_v35 = vor.u32 %v13154_v30, %v10910_v3  ;;  %v10900_v28 = vld [vmem:[%s18837_s4 + $0x3e0] sm:$0xf]  ;;  %v1191_v37 = vmul.f32 %v15620_v41, %v15541_v57  ;;  %v13136_v22 = vld [vmem:[%s18837_s4 + $0x364] sm:$0xf]  ;;  %v10838_v59 = vld [vmem:[%s18837_s4 + $0x368] sm:$0xf0] }
 0x1b4   : > { %v15778_v46 = vadd.f32 %v1413_v7, %v1367_v17  ;;  %3998 = vmatpush.bf16.msrb.mxu1 %v10909_v40  ;;  %4021 = vmatpush.bf16.msrb.mxu2 %v10849_v32  ;;  %v10837_v56 = vor.u32 %v13137_v14, %v10836_v13  ;;  %v15789_v57 = vadd.f32 %v1414_v21, %v1368_v11  ;;  %v13152_v47 = vld [vmem:[%s18837_s4 + $0x3e4] sm:$0xf]  ;;  %v10902_v30 = vld [vmem:[%s18837_s4 + $0x3e8] sm:$0xf0]  ;;  %v10828_v14 = vld [vmem:[%s18837_s4 + $0x350] sm:$0xf] }
 0x1b5   : > { %v2997_v61 = vpop.f32.mrf.mxu2  ;;  %v15791_v17 = vadd.f32 %v1192_v63, %v1146_v26  ;;  %v15801_v3 = vadd.f32 %v1193_v19, %v1147_v29  ;;  %v1246_v26 = vmul.f32 %v15629_v27, %v15612_v36  ;;  %v15808_v11 = vld [vmem:[%s18835_s2 + $0x10] ss:$8 sm:$0x3]  ;;  %4044 = vmatpush.bf16.msrb.mxu3 %v10913_v35  ;;  %v1200_v21 = vadd.f32 %v1190_v20, %v1144_v53 }
 0x1b6   : > { %v3020_v60 = vpop.f32.mrf.mxu3  ;;  %v2953_v32 = vpop.f32.mrf.mxu0  ;;  %v1247_v63 = vmul.f32 %v15634_v31, %v15612_v36  ;;  %v10841_v29 = vor.u32 %v13136_v22, %v10838_v59  ;;  %v10905_v19 = vor.u32 %v13152_v47, %v10902_v30  ;;  %v10892_v53 = vld [vmem:[%s18837_s4 + $0x3d0] sm:$0xf]  ;;  %v1201_v36 = vadd.f32 %v1191_v37, %v1145_v1  ;;  %v13151_v1 = vld [vmem:[%s18837_s4 + $0x3d4] sm:$0xf0]  ;;  %v13134_v37 = vld [vmem:[%s18837_s4 + $0x354] sm:$0xf] }
 0x1b7   : > { %v15793_v7 = vadd.f32 %v3020_v60, %v2997_v61  ;;  %v2976_v40 = vpop.f32.mrf.mxu1  ;;  %3976 = vmatpush.bf16.msrb.mxu0 %v10837_v56  ;;  %v15827_v20 = vmul.f32 %v15708_v8, %v15603_v44  ;;  %v15831_v35 = vmul.f32 %v15710_v5, %v15603_v44  ;;  %v19005_v60 = vld [vmem:[#allocation20_spill] sm:$0xff]  ;;  %v10830_v44 = vld [vmem:[%s18837_s4 + $0x358] sm:$0xf0]  ;;  %v1248_v56 = vmul.f32 %v15629_v27, %v15605_v50  ;;  %v19006_v22 = vld [vmem:[#allocation15_spill] sm:$0xff] }
 0x1b8   : > { %936 = vperm.xlu2 %13690, %v10141_v49   ;;  %488 = vperm.xlu1 %13689, %v10102_v45   ;;  %v10901_v45 = vor.u32 %v13153_v12, %v10900_v28  ;;  %v1303_v28 = vmul.f32 %v15639_v54, %v15670_v62  ;;  %v1304_v12 = vmul.f32 %v15653_v10, %v15670_v62  ;;  %v13150_v32 = vld [vmem:[%s18837_s4 + $0x3d4] sm:$0xf]  ;;  %v10894_v40 = vld [vmem:[%s18837_s4 + $0x3d8] sm:$0xf0]  ;;  %v10142_v62 = vld [vmem:[%s13896_s22 + $0x128] sm:$0xff] }
 0x1b9   : > { %19004 = vst [vmem:[#allocation56_spill] sm:$0xff] %v15793_v7  ;;  %483 = vperm.xlu0 %13688, %v10101_v55   ;;  %v13135_v55 = vld [vmem:[%s18837_s4 + $0x354] sm:$0xf0]  ;;  %v1256_v47 = vadd.f32 %v1246_v26, %v1200_v21  ;;  %v1359_v30 = vmul.f32 %v15666_v18, %v15739_v9  ;;  %v15860_v7 = vperm.slane %v15808_v11, 0  ;;  %v1257_v34 = vadd.f32 %v1247_v63, %v1201_v36  ;;  %v10820_v21 = vld [vmem:[%s18837_s4 + $0x340] sm:$0xf] }
 0x1ba   : > { %v15812_v49 = vpop.permute.xlu2 %1124  ;;  %v15814_v13 = vpop.permute.xlu1 %1395  ;;  %v10829_v59 = vor.u32 %v13135_v55, %v10828_v14  ;;  %v10106_v14 = vld [vmem:[%s13896_s22 + $0x2b2] sm:$0xff]  ;;  %3999 = vmatpush.bf16.msrb.mxu1 %v10901_v45  ;;  %v10893_v55 = vor.u32 %v13151_v1, %v10892_v53  ;;  %v1360_v39 = vmul.f32 %v15668_v51, %v15739_v9  ;;  %4022 = vmatpush.bf16.msrb.mxu2 %v10841_v29  ;;  %v10884_v45 = vld [vmem:[%s18837_s4 + $0x3c0] sm:$0xf]  ;;  %v13149_v1 = vld [vmem:[%s18837_s4 + $0x3c4] sm:$0xf0] }
 0x1bb   : > { %v1391_v61 = vpop.permute.xlu0 %1390  ;;  %3599 = vmatmul.bf16.vlgmr.msra.gmra.mxu0 %v19005_v60  ;;  %3622 = vmatmul.bf16.vlgmr.msra.gmra.mxu1 %v19006_v22  ;;  %v10833_v26 = vor.u32 %v13134_v37, %v10830_v44  ;;  %v1313_v53 = vadd.f32 %v1303_v28, %v1256_v47  ;;  %v10897_v29 = vor.u32 %v13150_v32, %v10894_v40  ;;  %v13132_v37 = vld [vmem:[%s18837_s4 + $0x344] sm:$0xf]  ;;  %v10822_v44 = vld [vmem:[%s18837_s4 + $0x348] sm:$0xf0] }
 0x1bc   : > { %3645 = vmatmul.bf16.vlgmr.msra.gmra.mxu2 %v19005_v60  ;;  %3668 = vmatmul.bf16.vlgmr.msra.gmra.mxu3 %v19006_v22  ;;  %v10107_v60 = vld [vmem:[%s13896_s22 + $0x2ba] sm:$0xff]  ;;  %v13133_v22 = vld [vmem:[%s18837_s4 + $0x344] sm:$0xf0]  ;;  %v1415_v63 = vmul.f32 %v15681_v42, %v1391_v61  ;;  %v1249_v28 = vmul.f32 %v15634_v31, %v15605_v50  ;;  %v1314_v47 = vadd.f32 %v1304_v12, %v1257_v34  ;;  %v13148_v32 = vld [vmem:[%s18837_s4 + $0x3c4] sm:$0xf] }
 0x1bd   : > { %4045 = vmatpush.bf16.msrb.mxu3 %v10905_v19  ;;  %v2999_v36 = vpop.f32.mrf.mxu2  ;;  %3977 = vmatpush.bf16.msrb.mxu0 %v10829_v59  ;;  %v10821_v19 = vor.u32 %v13133_v22, %v10820_v21  ;;  %v1416_v59 = vmul.f32 %v15693_v2, %v1391_v61  ;;  %v10886_v40 = vld [vmem:[%s18837_s4 + $0x3c8] sm:$0xf0]  ;;  %v1258_v21 = vadd.f32 %v1248_v56, %v15791_v17  ;;  %v10812_v50 = vld [vmem:[%s18837_s4 + $0x330] sm:$0xf] }
 0x1be   : > { %v3022_v9 = vpop.f32.mrf.mxu3  ;;  %v1369_v22 = vadd.f32 %v1359_v30, %v1313_v53  ;;  %v15898_v36 = vperm.slane %v15808_v11, 1  ;;  %4000 = vmatpush.bf16.msrb.mxu1 %v10893_v55  ;;  %v10885_v34 = vor.u32 %v13149_v1, %v10884_v45  ;;  %v1370_v61 = vadd.f32 %v1360_v39, %v1314_v47  ;;  %4023 = vmatpush.bf16.msrb.mxu2 %v10833_v26  ;;  %v13131_v11 = vld [vmem:[%s18837_s4 + $0x334] sm:$0xf0]  ;;  %v10876_v56 = vld [vmem:[%s18837_s4 + $0x3b0] sm:$0xf] }
 0x1bf   : > { %v10889_v17 = vor.u32 %v13148_v32, %v10886_v40  ;;  %v13147_v39 = vld [vmem:[%s18837_s4 + $0x3b4] sm:$0xf0]  ;;  %v1305_v30 = vmul.f32 %v15639_v54, %v15662_v4  ;;  %v1528_v55 = vmul.f32 %v15860_v7, %v15723_v16  ;;  %v13130_v53 = vld [vmem:[%s18837_s4 + $0x334] sm:$0xf]  ;;  %v10814_v9 = vld [vmem:[%s18837_s4 + $0x338] sm:$0xf0]  ;;  %v1361_v47 = vmul.f32 %v15666_v18, %v15725_v15 }
 0x1c0   : > { %546 = vperm.xlu2 %13690, %v10107_v60   ;;  %541 = vperm.xlu1 %13689, %v10106_v14   ;;  %v10825_v14 = vor.u32 %v13132_v37, %v10822_v44  ;;  %v1425_v26 = vadd.f32 %v1415_v63, %v1369_v22  ;;  %v10813_v37 = vor.u32 %v13131_v11, %v10812_v50  ;;  %v10118_v32 = vld [vmem:[%s13896_s22 + $0xbf] sm:$0xff]  ;;  %v10113_v40 = vld [vmem:[%s13896_s22 + $0x2f2] sm:$0xff]  ;;  %v10112_v54 = vld [vmem:[%s13896_s22 + $0x2ea] sm:$0xff] }
 0x1c1   : > { %941 = vperm.xlu0 %13688, %v10142_v62   ;;  %4046 = vmatpush.bf16.msrb.mxu3 %v10897_v29  ;;  %v1306_v62 = vmul.f32 %v15653_v10, %v15662_v4  ;;  %v13146_v4 = vld [vmem:[%s18837_s4 + $0x3b4] sm:$0xf]  ;;  %v1426_v29 = vadd.f32 %v1416_v59, %v1370_v61  ;;  %v1529_v44 = vmul.f32 %v15898_v36, %v15723_v16  ;;  %v10804_v11 = vld [vmem:[%s18837_s4 + $0x320] sm:$0xf] }
 0x1c2   : > { %v15903_v12 = vpop.permute.xlu2 %1231  ;;  %v15905_v60 = vpop.permute.xlu1 %1452  ;;  %3978 = vmatpush.bf16.msrb.mxu0 %v10821_v19  ;;  %v10878_v19 = vld [vmem:[%s18837_s4 + $0x3b8] sm:$0xf0]  ;;  %4001 = vmatpush.bf16.msrb.mxu1 %v10885_v34  ;;  %v10877_v22 = vor.u32 %v13147_v39, %v10876_v56  ;;  %v10817_v59 = vor.u32 %v13130_v53, %v10814_v9  ;;  %v1480_v16 = vadd.f32 %v15827_v20, %v15778_v46  ;;  %v10806_v20 = vld [vmem:[%s18837_s4 + $0x328] sm:$0xf0] }
 0x1c3   : > { %v1448_v45 = vpop.permute.xlu0 %1447  ;;  %4024 = vmatpush.bf16.msrb.mxu2 %v10825_v14  ;;  %v10881_v50 = vor.u32 %v13146_v4, %v10878_v19  ;;  %v1315_v18 = vadd.f32 %v1305_v30, %v1258_v21  ;;  %v1362_v34 = vmul.f32 %v15668_v51, %v15725_v15  ;;  %v13129_v14 = vld [vmem:[%s18837_s4 + $0x324] sm:$0xf0]  ;;  %v1481_v56 = vadd.f32 %v15831_v35, %v15789_v57  ;;  %v10870_v35 = vld [vmem:[%s18837_s4 + $0x3a8] sm:$0xf0] }
 0x1c4   : > { %v1472_v1 = vmul.f32 %v15708_v8, %v1448_v45  ;;  %v1473_v63 = vmul.f32 %v15710_v5, %v1448_v45  ;;  %v1259_v45 = vadd.f32 %v1249_v28, %v15801_v3  ;;  %v13145_v15 = vld [vmem:[%s18837_s4 + $0x3a4] sm:$0xf0]  ;;  %v13128_v3 = vld [vmem:[%s18837_s4 + $0x324] sm:$0xf]  ;;  %v10805_v57 = vor.u32 %v13129_v14, %v10804_v11  ;;  %v13126_v11 = vld [vmem:[%s18837_s4 + $0x314] sm:$0xf] }
 0x1c5   : > { %4047 = vmatpush.bf16.msrb.mxu3 %v10889_v17  ;;  %v10868_v17 = vld [vmem:[%s18837_s4 + $0x3a0] sm:$0xf]  ;;  %v1371_v21 = vadd.f32 %v1361_v47, %v1315_v18  ;;  %v10860_v47 = vld [vmem:[%s18837_s4 + $0x390] sm:$0xf] }
 0x1c6   : > { %v1482_v61 = vadd.f32 %v1472_v1, %v1425_v26  ;;  %v1483_v10 = vadd.f32 %v1473_v63, %v1426_v29  ;;  %3979 = vmatpush.bf16.msrb.mxu0 %v10813_v37  ;;  %v1316_v28 = vadd.f32 %v1306_v62, %v1259_v45  ;;  %4002 = vmatpush.bf16.msrb.mxu1 %v10877_v22  ;;  %v10796_v62 = vld [vmem:[%s18837_s4 + $0x310] sm:$0xf]  ;;  %v19007_v63 = vld [vmem:[#allocation30_spill] sm:$0xff]  ;;  %v10798_v45 = vld [vmem:[%s18837_s4 + $0x318] sm:$0xf0] }
 0x1c7   : > { %4025 = vmatpush.bf16.msrb.mxu2 %v10817_v59  ;;  %v10869_v18 = vor.u32 %v13145_v15, %v10868_v17  ;;  %v698_v37 = vld [vmem:[%s13896_s22 + $0x20] sm:$0xff]  ;;  %v1418_v22 = vmul.f32 %v15693_v2, %v15814_v13  ;;  %v697_v17 = vld [vmem:[%s13896_s22 + $0x18] sm:$0xff]  ;;  %v1474_v15 = vmul.f32 %v15708_v8, %v15905_v60 }
 0x1c8   : > { %v1538_v39 = vadd.f32 %v1528_v55, %v1482_v61  ;;  %v1539_v46 = vadd.f32 %v1529_v44, %v1483_v10  ;;  %657 = vperm.xlu2 %13690, %v10118_v32   ;;  %604 = vperm.xlu1 %13689, %v10113_v40   ;;  %v13144_v10 = vld [vmem:[%s18837_s4 + $0x3a4] sm:$0xf]  ;;  %v1372_v9 = vadd.f32 %v1362_v34, %v1316_v28  ;;  %v13127_v44 = vld [vmem:[%s18837_s4 + $0x314] sm:$0xf0] }
 0x1c9   : > { %599 = vperm.xlu0 %13688, %v10112_v54   ;;  %4048 = vmatpush.bf16.msrb.mxu3 %v10881_v50  ;;  %v10809_v54 = vor.u32 %v13128_v3, %v10806_v20  ;;  %v10873_v19 = vor.u32 %v13144_v10, %v10870_v35  ;;  %v13143_v32 = vld [vmem:[%s18837_s4 + $0x394] sm:$0xf0]  ;;  %v1417_v40 = vmul.f32 %v15681_v42, %v15814_v13  ;;  %v19008_v50 = vld [vmem:[#allocation31_spill] sm:$0xff]  ;;  %v10788_v20 = vld [vmem:[%s18837_s4 + $0x300] sm:$0xf] }
 0x1ca   : > { %v1548_v30 = vmax.f32 %v1538_v39, 0.0  ;;  %v1549_v55 = vmax.f32 %v1539_v46, 0.0  ;;  %v15974_v26 = vpop.permute.xlu2 %1293  ;;  %v1499_v53 = vpop.permute.xlu1 %1498  ;;  %3980 = vmatpush.bf16.msrb.mxu0 %v10805_v57  ;;  %v13142_v39 = vld [vmem:[%s18837_s4 + $0x394] sm:$0xf]  ;;  %v10862_v46 = vld [vmem:[%s18837_s4 + $0x398] sm:$0xf0]  ;;  %v1475_v3 = vmul.f32 %v15710_v5, %v15905_v60  ;;  %4003 = vmatpush.bf16.msrb.mxu1 %v10869_v18  ;;  %v10861_v10 = vor.u32 %v13143_v32, %v10860_v47 }
 0x1cb   : > { %v15979_v4 = vpop.permute.xlu0 %1067  ;;  %v1526_v29 = vmul.f32 %v15860_v7, %v1499_v53  ;;  %v1527_v1 = vmul.f32 %v15898_v36, %v1499_v53  ;;  %3604 = vmatmul.bf16.gmra.mxu0 %v19007_v63  ;;  %3627 = vmatmul.bf16.gmra.mxu1 %v19008_v50  ;;  %v10801_v35 = vor.u32 %v13126_v11, %v10798_v45  ;;  %v10852_v53 = vld [vmem:[%s18837_s4 + $0x380] sm:$0xf]  ;;  %v13141_v18 = vld [vmem:[%s18837_s4 + $0x384] sm:$0xf0]  ;;  %v13140_v47 = vld [vmem:[%s18837_s4 + $0x384] sm:$0xf] }
 0x1cc   : > { %v1558_v59 = vsel %vm1015_vm7, %v1548_v30, 0.0  ;;  %v1559_v61 = vsel %vm1015_vm7, %v1549_v55, 0.0  ;;  %3650 = vmatmul.bf16.gmra.mxu2 %v19007_v63  ;;  %3673 = vmatmul.bf16.gmra.mxu3 %v19008_v50  ;;  %v13125_v30 = vld [vmem:[%s18837_s4 + $0x304] sm:$0xf0]  ;;  %v1427_v55 = vadd.f32 %v1417_v40, %v1371_v21  ;;  %v10865_v60 = vor.u32 %v13142_v39, %v10862_v46  ;;  %v10854_v32 = vld [vmem:[%s18837_s4 + $0x388] sm:$0xf0] }
 0x1cd   : > { %v16010_v13 = vpack.c.bf16 %v1559_v61, %v1558_v59  ;;  %v1536_v34 = vadd.f32 %v1526_v29, %v1480_v16  ;;  %v1537_v14 = vadd.f32 %v1527_v1, %v1481_v56  ;;  %v10119_v16 = vld [vmem:[%s13896_s22 + $0xc7] sm:$0xff]  ;;  %4026 = vmatpush.bf16.msrb.mxu2 %v10809_v54  ;;  %v10797_v56 = vor.u32 %v13127_v44, %v10796_v62 }
 0x1ce   : > { %4049 = vmatpush.bf16.msrb.mxu3 %v10873_v19  ;;  %v1428_v54 = vadd.f32 %v1418_v22, %v1372_v9  ;;  %v10789_v21 = vor.u32 %v13125_v30, %v10788_v20  ;;  %v13124_v1 = vld [vmem:[%s18837_s4 + $0x304] sm:$0xf]  ;;  %4004 = vmatpush.bf16.msrb.mxu1 %v10861_v10  ;;  %v10853_v9 = vor.u32 %v13141_v18, %v10852_v53  ;;  %v10790_v44 = vld [vmem:[%s18837_s4 + $0x308] sm:$0xf0]  ;;  %v10125_v20 = vld [vmem:[%s13896_s22 + $0x50] sm:$0xff] }
 0x1cf   : > { %v1546_v28 = vmax.f32 %v1536_v34, 0.0  ;;  %v1547_v57 = vmax.f32 %v1537_v14, 0.0  ;;  %3981 = vmatpush.bf16.msrb.mxu0 %v10797_v56  ;;  %v1484_v40 = vadd.f32 %v1474_v15, %v1427_v55  ;;  %v10793_v11 = vor.u32 %v13124_v1, %v10790_v44  ;;  %v3693_v34 = vld [vmem:[#allocation2 + $0x38] sm:$0x88] }
 0x1d0   : > { %719 = vperm.xlu2 %13690, %v698_v37   ;;  %714 = vperm.xlu1 %13689, %v697_v17   ;;  %v1485_v22 = vadd.f32 %v1475_v3, %v1428_v54  ;;  %v10857_v45 = vor.u32 %v13140_v47, %v10854_v32  ;;  %v10131_v14 = vld [vmem:[%s13896_s22 + $0x19f] sm:$0xff]  ;;  %v3742_v15 = vunpack.c.l.b16 %v16010_v13  ;;  %v3743_v3 = vunpack.c.h.b16 %v16010_v13  ;;  %v10132_v32 = vld [vmem:[%s13896_s22 + $0x1a7] sm:$0xff] }
 0x1d1   : > { %v1556_v62 = vsel %vm1014_vm6, %v1546_v28, 0.0  ;;  %v1557_v29 = vsel %vm1014_vm6, %v1547_v57, 0.0  ;;  %662 = vperm.xlu0 %13688, %v10119_v16   ;;  %4027 = vmatpush.bf16.msrb.mxu2 %v10801_v35  ;;  %v10126_v17 = vld [vmem:[%s13896_s22 + $0x58] sm:$0xff]  ;;  %v3738_v28 = vunpack.c.l.b16 %v3693_v34  ;;  %v3739_v18 = vunpack.c.h.b16 %v3693_v34 }
 0x1d2   : > { %v1566_v63 = vpack.c.bf16 %v1557_v29, %v1556_v62  ;;  %v16044_v37 = vpop.permute.xlu2 %1400  ;;  %v16046_v19 = vpop.permute.xlu1 %1119  ;;  %4050 = vmatpush.bf16.msrb.mxu3 %v10865_v60  ;;  %4005 = vmatpush.bf16.msrb.mxu1 %v10853_v9  ;;  %v19011_v29 = vld [vmem:[#allocation28_spill] sm:$0xff]  ;;  %v1083_v34 = vmul.f32 %v15586_v58, %v15979_v4 }
 0x1d3   : > { %v1509_v59 = vpop.permute.xlu0 %1508  ;;  %3982 = vmatpush.bf16.msrb.mxu0 %v10789_v21  ;;  %v19012_v21 = vld [vmem:[#allocation29_spill] sm:$0xff]  ;;  %v10103_v9 = vld [vmem:[%s13896_s22 + $0x369] sm:$0xff] }
 0x1d4   : > { %v1530_v61 = vmul.f32 %v15860_v7, %v1509_v59  ;;  %v1531_v50 = vmul.f32 %v15898_v36, %v1509_v59  ;;  %v3740_v39 = vunpack.c.l.b16 %v1566_v63  ;;  %v3741_v46 = vunpack.c.h.b16 %v1566_v63  ;;  %v10137_v63 = vld [vmem:[%s13896_s22 + $0xf8] sm:$0xff] }
 0x1d5   : > { %4028 = vmatpush.bf16.msrb.mxu2 %v10793_v11 }
 0x1d6   : > { %v1540_v16 = vadd.f32 %v1530_v61, %v1484_v40  ;;  %v1541_v56 = vadd.f32 %v1531_v50, %v1485_v22  ;;  %4051 = vmatpush.bf16.msrb.mxu3 %v10857_v45  ;;  %v16064_v35 = vpack.c.b16 %v3742_v15, %v3740_v39  ;;  %v16066_v30 = vpack.c.b16 %v3743_v3, %v3741_v46 }
 0x1d7   : > { %v3750_v1 = vpack.c.b16 %v3740_v39, %v3738_v28  ;;  %v3751_v40 = vpack.c.b16 %v3741_v46, %v3739_v18  ;;  %v1081_v61 = vmul.f32 %v15586_v58, %v15660_v23  ;;  %v1082_v45 = vmul.f32 %v15594_v38, %v15660_v23 }
 0x1d8   : > { %v1550_v57 = vmax.f32 %v1540_v16, 0.0  ;;  %v1551_v10 = vmax.f32 %v1541_v56, 0.0  ;;  %830 = vperm.xlu2 %13690, %v10131_v14   ;;  %777 = vperm.xlu1 %13689, %v10126_v17   ;;  %19009 = vst [vmem:[#allocation20_spill] sm:$0xff] %v16064_v35 }
 0x1d9   : > { %19010 = vst [vmem:[#allocation15_spill] sm:$0xff] %v16066_v30  ;;  %772 = vperm.xlu0 %13688, %v10125_v20   ;;  %v3758_v50 = vshrl.u32 %v3750_v1, 16  ;;  %v3761_v11 = vshll.u32 %v3750_v1, 16  ;;  %v3775_v16 = vshrl.u32 %v3751_v40, 16  ;;  %v3778_v56 = vshll.u32 %v3751_v40, 16  ;;  %v10108_v1 = vld [vmem:[%s13896_s22 + $0x2c2] sm:$0xff] }
 0x1da   : > { %v1560_v55 = vsel %vm1016_vm5, %v1550_v57, 0.0  ;;  %v1561_v13 = vsel %vm1016_vm5, %v1551_v10, 0.0  ;;  %v16072_v60 = vpop.permute.xlu2 %1462  ;;  %v1181_v53 = vpop.permute.xlu1 %1180  ;;  %v1092_v18 = vadd.f32 %v1082_v45, %v14052_v33  ;;  %v1140_v40 = vmul.f32 %v15601_v48, %v15812_v49 }
 0x1db   : > { %v16074_v54 = vpack.c.bf16 %v1561_v13, %v1560_v55  ;;  %v1176_v62 = vpop.permute.xlu0 %1175  ;;  %3609 = vmatmul.bf16.gmra.mxu0 %v19011_v29  ;;  %3632 = vmatmul.bf16.gmra.mxu1 %v19012_v21  ;;  %v3760_v28 = vrot.slane %v3758_v50, 3  ;;  %v3763_v58 = vrot.slane %v3761_v11, 4  ;;  %v2651_v55 = vld [vmem:[%s18838_s5] sm:$0x3]  ;;  %v1091_v13 = vadd.f32 %v1081_v61, %v18942_v52 }
 0x1dc   : > { %3655 = vmatmul.bf16.gmra.mxu2 %v19011_v29  ;;  %3678 = vmatmul.bf16.gmra.mxu3 %v19012_v21  ;;  %v1093_v29 = vadd.f32 %v1083_v34, %v18942_v52  ;;  %v10143_v21 = vld [vmem:[%s13896_s22 + $0x130] sm:$0xff]  ;;  %v16117_v50 = vperm.slane %v2651_v55, 0  ;;  %v1139_v11 = vmul.f32 %v15607_v43, %v16046_v19  ;;  %v1196_v45 = vmul.f32 %v15616_v25, %v1181_v53 }
 0x1dd   : > { %v3744_v44 = vunpack.c.l.b16 %v16074_v54  ;;  %v3745_v47 = vunpack.c.h.b16 %v16074_v54  ;;  %v3764_v34 = vor.u32 %v3763_v58, %v3760_v28 }
 0x1df   : > { %v3752_v22 = vpack.c.b16 %v3744_v44, %v3742_v15  ;;  %v3753_v59 = vpack.c.b16 %v3745_v47, %v3743_v3  ;;  %v1084_v15 = vmul.f32 %v15594_v38, %v15979_v4  ;;  %v3777_v4 = vrot.slane %v3775_v16, 3 }
 0x1e0   : > { %888 = vperm.xlu2 %13690, %v10137_v63   ;;  %493 = vperm.xlu1 %13689, %v10103_v9   ;;  %v10138_v63 = vld [vmem:[%s13896_s22 + $0x100] sm:$0xff]  ;;  %v3780_v9 = vrot.slane %v3778_v56, 4  ;;  %v1197_v16 = vmul.f32 %v15620_v41, %v1181_v53  ;;  %v1195_v56 = vmul.f32 %v15620_v41, %v1176_v62  ;;  %v19013_v41 = vld [vmem:[#allocation41_spill] sm:$0xff] }
 0x1e1   : > { %835 = vperm.xlu0 %13688, %v10132_v32   ;;  %v3766_v14 = vshrl.u32 %v3752_v22, 16  ;;  %v3769_v17 = vshll.u32 %v3752_v22, 16  ;;  %v3783_v20 = vshrl.u32 %v3753_v59, 16  ;;  %v3786_v3 = vshll.u32 %v3753_v59, 16 }
 0x1e2   : > { %v16095_v39 = vpop.permute.xlu2 %473  ;;  %v16097_v46 = vpop.permute.xlu1 %1288  ;;  %v1094_v22 = vadd.f32 %v1084_v15, %v14052_v33  ;;  %v1138_v59 = vmul.f32 %v15601_v48, %v16046_v19  ;;  %v3781_v28 = vor.u32 %v3780_v9, %v3777_v4  ;;  %v10120_v4 = vld [vmem:[%s13896_s22 + $0xcf] sm:$0xff] }
 0x1e3   : > { %v1237_v23 = vpop.permute.xlu0 %1236  ;;  %v3768_v57 = vrot.slane %v3766_v14, 3  ;;  %v3771_v10 = vrot.slane %v3769_v17, 4  ;;  %v3785_v32 = vrot.slane %v3783_v20, 3  ;;  %v3788_v61 = vrot.slane %v3786_v3, 4 }
 0x1e4   : > { %v1141_v14 = vmul.f32 %v15607_v43, %v15812_v49  ;;  %v1194_v17 = vmul.f32 %v15616_v25, %v1176_v62  ;;  %v1150_v20 = vadd.f32 %v1140_v40, %v1093_v29  ;;  %v1148_v58 = vadd.f32 %v1138_v59, %v1091_v13 }
 0x1e5   : > { %v16110_v38 = vor.u32 %v3771_v10, %v3768_v57  ;;  %v16126_v48 = vor.u32 %v3788_v61, %v3785_v32  ;;  %v1252_v43 = vmul.f32 %v15629_v27, %v1237_v23  ;;  %v1253_v25 = vmul.f32 %v15634_v31, %v1237_v23  ;;  %v10114_v23 = vld [vmem:[%s13896_s22 + $0x2fa] sm:$0xff] }
 0x1e6   : > { %v1151_v57 = vadd.f32 %v1141_v14, %v1094_v22  ;;  %v3024_v62 = vadd.f32 %v19013_v41, %v16117_v50  ;;  %v1149_v10 = vadd.f32 %v1139_v11, %v1092_v18  ;;  %v1206_v29 = vadd.f32 %v1196_v45, %v1150_v20  ;;  %v10144_v18 = vld [vmem:[%s13896_s22 + $0x138] sm:$0xff]  ;;  %v19014_v11 = vld [vmem:[#allocation47_spill] sm:$0xff]  ;;  %v19016_v20 = vld [vmem:[#allocation52_spill] sm:$0xff] }
 0x1e7   : > { %v3773_v3 = vsel %vm3756_vm10, %v3764_v34, %v16110_v38  ;;  %v16141_v32 = vperm.slane %v2651_v55, 1  ;;  %v1250_v40 = vmul.f32 %v15629_v27, %v15903_v12  ;;  %v1307_v45 = vmul.f32 %v19014_v11, %v16097_v46  ;;  %v19015_v55 = vld [vmem:[#allocation51_spill] sm:$0xff] }
 0x1e8   : > { %946 = vperm.xlu2 %13690, %v10143_v21   ;;  %551 = vperm.xlu1 %13689, %v10108_v1   ;;  %v3790_v21 = vsel %vm3756_vm10, %v3781_v28, %v16126_v48  ;;  %v1204_v1 = vadd.f32 %v1194_v17, %v1148_v58  ;;  %v1205_v22 = vadd.f32 %v1195_v56, %v1149_v10 }
 0x1e9   : > { %893 = vperm.xlu0 %13688, %v10138_v63   ;;  %v3283_v53 = vpop.f32.mrf.mxu0  ;;  %v3306_v13 = vpop.f32.mrf.mxu1  ;;  %v1207_v63 = vadd.f32 %v1197_v16, %v1151_v57  ;;  %v1262_v59 = vadd.f32 %v1252_v43, %v1206_v29  ;;  %v1251_v14 = vmul.f32 %v15634_v31, %v15903_v12  ;;  %v1309_v17 = vmul.f32 %v19014_v11, %v15974_v26 }
 0x1ea   : > { %v16129_v15 = vpop.permute.xlu2 %536  ;;  %v1350_v19 = vpop.permute.xlu1 %1349  ;;  %v3307_v9 = vadd.f32 %v3306_v13, %v3283_v53  ;;  %v1308_v16 = vmul.f32 %v19015_v55, %v16097_v46  ;;  %v1310_v27 = vmul.f32 %v19015_v55, %v15974_v26  ;;  %v1260_v56 = vadd.f32 %v1250_v40, %v1204_v1 }
 0x1eb   : > { %v1345_v49 = vpop.permute.xlu0 %1344  ;;  %3983 = vmatmul.bf16.vlgmr.msrb.gmra.mxu0 %v3773_v3  ;;  %4006 = vmatmul.bf16.vlgmr.msrb.gmra.mxu1 %v3790_v21  ;;  %v1263_v61 = vadd.f32 %v1253_v25, %v1207_v63  ;;  %v1366_v28 = vmul.f32 %v15668_v51, %v1350_v19  ;;  %v1261_v57 = vadd.f32 %v1251_v14, %v1205_v22  ;;  %v19017_v25 = vld [vmem:[#allocation35_spill] sm:$0xff] }
 0x1ec   : > { %4029 = vmatmul.bf16.vlgmr.msrb.gmra.mxu2 %v3773_v3  ;;  %4052 = vmatmul.bf16.vlgmr.msrb.gmra.mxu3 %v3790_v21  ;;  %v16148_v34 = vadd.f32 %v3307_v9, %v3024_v62  ;;  %v1365_v3 = vmul.f32 %v19016_v20, %v1350_v19  ;;  %v1363_v31 = vmul.f32 %v19016_v20, %v1345_v49  ;;  %v10133_v63 = vld [vmem:[%s13896_s22 + $0x1af] sm:$0xff] }
 0x1ed   : > { %v1364_v12 = vmul.f32 %v15668_v51, %v1345_v49  ;;  %v3025_v26 = vadd.f32 %v19017_v25, %v16141_v32  ;;  %v1317_v53 = vadd.f32 %v1307_v45, %v1260_v56  ;;  %v1319_v41 = vadd.f32 %v1309_v17, %v1262_v59  ;;  %v699_v22 = vld [vmem:[%s13896_s22 + $0x28] sm:$0xff] }
 0x1ee   : > { %v1320_v62 = vadd.f32 %v1310_v27, %v1263_v61  ;;  %v1318_v29 = vadd.f32 %v1308_v16, %v1261_v57  ;;  %v1420_v11 = vmul.f32 %v15693_v2, %v16044_v37  ;;  %v1478_v17 = vmul.f32 %v15708_v8, %v16072_v60 }
 0x1ef   : > { %v1375_v51 = vadd.f32 %v1365_v3, %v1319_v41  ;;  %v1479_v55 = vmul.f32 %v15710_v5, %v16072_v60 }
 0x1f0   : > { %667 = vperm.xlu2 %13690, %v10120_v4   ;;  %609 = vperm.xlu1 %13689, %v10114_v23   ;;  %v3329_v58 = vpop.f32.mrf.mxu2  ;;  %v3352_v10 = vpop.f32.mrf.mxu3  ;;  %v1376_v49 = vadd.f32 %v1366_v28, %v1320_v62  ;;  %v10127_v4 = vld [vmem:[%s13896_s22 + $0x60] sm:$0xff]  ;;  %v1373_v23 = vadd.f32 %v1363_v31, %v1317_v53  ;;  %v1374_v9 = vadd.f32 %v1364_v12, %v1318_v29 }
 0x1f1   : > { %951 = vperm.xlu0 %13688, %v10144_v18   ;;  %v3353_v1 = vadd.f32 %v3352_v10, %v3329_v58  ;;  %v1419_v18 = vmul.f32 %v15681_v42, %v16044_v37  ;;  %v10145_v12 = vld [vmem:[%s13896_s22 + $0x140] sm:$0xff] }
 0x1f2   : > { %v16162_v46 = vpop.permute.xlu2 %647  ;;  %v1458_v43 = vpop.permute.xlu1 %1457  ;;  %v1430_v16 = vadd.f32 %v1420_v11, %v1374_v9  ;;  %v10121_v11 = vld [vmem:[%s18835_s2 + $0x3] ss:$8 sm:$0x3] }
 0x1f3   : > { %v1406_v19 = vpop.permute.xlu0 %1405  ;;  %v16170_v40 = vadd.f32 %v3353_v1, %v3025_v26  ;;  %v1476_v45 = vmul.f32 %v15708_v8, %v1458_v43  ;;  %v1477_v14 = vmul.f32 %v15710_v5, %v1458_v43  ;;  %v10139_v26 = vld [vmem:[%s13896_s22 + $0x108] sm:$0xff] }
 0x1f4   : > { %v1421_v21 = vmul.f32 %v15681_v42, %v1406_v19  ;;  %v1422_v13 = vmul.f32 %v15693_v2, %v1406_v19  ;;  %v1429_v42 = vadd.f32 %v1419_v18, %v1373_v23 }
 0x1f5   : > { %19018 = vst [vmem:[#allocation30_spill] sm:$0xff] %v16170_v40  ;;  %v1487_v8 = vadd.f32 %v1477_v14, %v1430_v16  ;;  %v10115_v16 = vld [vmem:[%s18835_s2 + $0x2] ss:$8 sm:$0x3] }
 0x1f6   : > { %v1431_v59 = vadd.f32 %v1421_v21, %v1375_v51  ;;  %v1432_v61 = vadd.f32 %v1422_v13, %v1376_v49  ;;  %v1486_v58 = vadd.f32 %v1476_v45, %v1429_v42  ;;  %v10122_v42 = vld [vmem:[%s18835_s2 + $0x4] ss:$8 sm:$0x3] }
 0x1f8   : > { %840 = vperm.xlu2 %13690, %v10133_v63   ;;  %782 = vperm.xlu1 %13689, %v10127_v4   ;;  %v1488_v56 = vadd.f32 %v1478_v17, %v1431_v59  ;;  %v1489_v20 = vadd.f32 %v1479_v55, %v1432_v61  ;;  %v470_v59 = vld [vmem:[%s18835_s2] ss:$8 sm:$0x3]  ;;  %v10109_v61 = vld [vmem:[%s18835_s2 + $0x1] ss:$8 sm:$0x3]  ;;  %v16393_v35 = vpop.f32.mrf.mxu3 }
 0x1f9   : > { %724 = vperm.xlu0 %13688, %v699_v22   ;;  %19030 = vst [vmem:[#allocation35_spill] sm:$0xff] %v16393_v35  ;;  %v13184_v35 = vld [vmem:[%s18837_s4 + $0x4c4] sm:$0xf] }
 0x1fa   : > { %v16183_v27 = vpop.permute.xlu2 %709  ;;  %v1519_v2 = vpop.permute.xlu1 %1518 }
 0x1fb   : > { %v1514_v37 = vpop.permute.xlu0 %1513  ;;  %v1534_v3 = vmul.f32 %v15860_v7, %v1519_v2  ;;  %v1535_v28 = vmul.f32 %v15898_v36, %v1519_v2 }
 0x1fc   : > { %v1532_v57 = vmul.f32 %v15860_v7, %v1514_v37  ;;  %v1533_v5 = vmul.f32 %v15898_v36, %v1514_v37 }
 0x1fd   : > { %v1544_v60 = vadd.f32 %v1534_v3, %v1488_v56  ;;  %v1545_v31 = vadd.f32 %v1535_v28, %v1489_v20  ;;  %v16232_v3 = vperm.slane %v470_v59, 0  ;;  %v16236_v28 = vperm.slane %v10109_v61, 0 }
 0x1fe   : > { %v1542_v43 = vadd.f32 %v1532_v57, %v1486_v58  ;;  %v1543_v25 = vadd.f32 %v1533_v5, %v1487_v8  ;;  %v16242_v58 = vperm.slane %v10109_v61, 1  ;;  %v16244_v8 = vperm.slane %v10121_v11, 0 }
 0x1ff   : > { %v1554_v53 = vmax.f32 %v1544_v60, 0.0  ;;  %v1555_v41 = vmax.f32 %v1545_v31, 0.0  ;;  %v16246_v57 = vperm.slane %v10121_v11, 1  ;;  %v16248_v5 = vperm.slane %v10122_v42, 0  ;;  %v11022_v11 = vld [vmem:[%s18837_s4 + $0x478] sm:$0xf0] }
 0x200   : > { %v1552_v62 = vmax.f32 %v1542_v43, 0.0  ;;  %v1553_v19 = vmax.f32 %v1543_v25, 0.0  ;;  %956 = vperm.xlu1 %13689, %v10145_v12   ;;  %v16250_v31 = vperm.slane %v10115_v16, 0  ;;  %v16252_v12 = vperm.slane %v10115_v16, 1  ;;  %v16293_v16 = vpop.f32.mrf.mxu0 }
 0x201   : > { %v1564_v29 = vsel %vm1018_vm11, %v1554_v53, 0.0  ;;  %v1565_v21 = vsel %vm1018_vm11, %v1555_v41, 0.0  ;;  %898 = vperm.xlu0 %13688, %v10139_v26   ;;  %v10134_v26 = vld [vmem:[%s18835_s2 + $0x6] ss:$8 sm:$0x3]  ;;  %19026 = vst [vmem:[#allocation47_spill] sm:$0xff] %v16293_v16 }
 0x202   : > { %v1562_v36 = vsel %vm1017_vm12, %v1552_v62, 0.0  ;;  %v1563_v13 = vsel %vm1017_vm12, %v1553_v19, 0.0  ;;  %v1570_v1 = vpack.c.bf16 %v1565_v21, %v1564_v29  ;;  %v16199_v51 = vpop.permute.xlu2 %820  ;;  %v532_v49 = vpop.permute.xlu1 %531  ;;  %v11020_v62 = vld [vmem:[%s18837_s4 + $0x470] sm:$0xf]  ;;  %v13175_v19 = vld [vmem:[%s18837_s4 + $0x474] sm:$0xf0]  ;;  %v501_v29 = vmul.f32 %v16232_v3, %v16095_v39 }
 0x203   : > { %v1569_v63 = vpack.c.bf16 %v1563_v13, %v1562_v36  ;;  %v16201_v4 = vpop.permute.xlu0 %478  ;;  %v11021_v13 = vor.u32 %v13175_v19, %v11020_v62  ;;  %v11004_v16 = vld [vmem:[%s18837_s4 + $0x450] sm:$0xf] }
 0x204   : > { %v16203_v23 = vunpack.c.l.b16 %v1570_v1  ;;  %v16205_v18 = vunpack.c.h.b16 %v1570_v1  ;;  %v11084_v1 = vld [vmem:[%s18837_s4 + $0x4f0] sm:$0xf] }
 0x205   : > { %v3746_v9 = vunpack.c.l.b16 %v1569_v63  ;;  %v3747_v22 = vunpack.c.h.b16 %v1569_v63  ;;  %v13191_v63 = vld [vmem:[%s18837_s4 + $0x4f4] sm:$0xf0]  ;;  %4302 = vmatpush.bf16.msra.mxu0 %v11021_v13  ;;  %v13189_v13 = vld [vmem:[%s18837_s4 + $0x4e4] sm:$0xf0] }
 0x206   : > { %19021 = vst [vmem:[#allocation31_spill] sm:$0xff] %v16203_v23  ;;  %v11085_v61 = vor.u32 %v13191_v63, %v11084_v1  ;;  %v13172_v1 = vld [vmem:[%s18837_s4 + $0x464] sm:$0xf]  ;;  %v11014_v63 = vld [vmem:[%s18837_s4 + $0x468] sm:$0xf0] }
 0x207   : > { %19022 = vst [vmem:[#allocation28_spill] sm:$0xff] %v16205_v18  ;;  %v3754_v45 = vpack.c.b16 %v16203_v23, %v3746_v9  ;;  %v3755_v14 = vpack.c.b16 %v16205_v18, %v3747_v22  ;;  %v16220_v17 = vpack.c.b16 %v3746_v9, %v3744_v44  ;;  %v16224_v55 = vpack.c.b16 %v3747_v22, %v3745_v47  ;;  %v13174_v9 = vld [vmem:[%s18837_s4 + $0x474] sm:$0xf]  ;;  %v19025_v22 = vld [vmem:[#allocation46_spill] sm:$0xff] }
 0x208   : > { %v16234_v44 = vperm.slane %v470_v59, 1  ;;  %v16280_v59 = vadd.f32 %v19025_v22, %v16117_v50  ;;  %4325 = vmatpush.bf16.msra.mxu1 %v11085_v61  ;;  %v19028_v18 = vld [vmem:[#allocation48_spill] sm:$0xff] }
 0x209   : > { %19023 = vst [vmem:[#allocation29_spill] sm:$0xff] %v16220_v17  ;;  %v3792_v2 = vshrl.u32 %v3754_v45, 16  ;;  %v3795_v37 = vshll.u32 %v3754_v45, 16  ;;  %v3801_v56 = vshrl.u32 %v3755_v14, 16  ;;  %v3804_v20 = vshll.u32 %v3755_v14, 16 }
 0x20a   : > { %19024 = vst [vmem:[#allocation41_spill] sm:$0xff] %v16224_v55  ;;  %v16238_v54 = vpop.permute.xlu2 %883  ;;  %v16240_v47 = vpop.permute.xlu1 %594  ;;  %v502_v21 = vmul.f32 %v16234_v44, %v16095_v39  ;;  %v13190_v45 = vld [vmem:[%s18837_s4 + $0x4f4] sm:$0xf]  ;;  %v11086_v14 = vld [vmem:[%s18837_s4 + $0x4f8] sm:$0xf0]  ;;  %v16357_v23 = vadd.f32 %v19028_v18, %v16141_v32  ;;  %v503_v18 = vmul.f32 %v16232_v3, %v16201_v4 }
 0x20b   : > { %v590_v60 = vpop.permute.xlu0 %589  ;;  %v3794_v43 = vrot.slane %v3792_v2, 3  ;;  %v3797_v25 = vrot.slane %v3795_v37, 4  ;;  %v3803_v53 = vrot.slane %v3801_v56, 3  ;;  %v3806_v41 = vrot.slane %v3804_v20, 4  ;;  %v11068_v61 = vld [vmem:[%s18837_s4 + $0x4d0] sm:$0xf] }
 0x20c   : > { %v559_v2 = vmul.f32 %v16236_v28, %v532_v49  ;;  %v560_v37 = vmul.f32 %v16242_v58, %v532_v49  ;;  %v11025_v20 = vor.u32 %v13174_v9, %v11022_v11  ;;  %v11089_v62 = vor.u32 %v13190_v45, %v11086_v14 }
 0x20d   : > { %v16267_v36 = vor.u32 %v3797_v25, %v3794_v43  ;;  %v16282_v39 = vor.u32 %v3806_v41, %v3803_v53  ;;  %v11012_v43 = vld [vmem:[%s18837_s4 + $0x460] sm:$0xf]  ;;  %v13173_v25 = vld [vmem:[%s18837_s4 + $0x464] sm:$0xf0]  ;;  %v16309_v41 = vpop.f32.mrf.mxu1  ;;  %v511_v9 = vadd.f32 %v501_v29, %v18942_v52  ;;  %v512_v22 = vadd.f32 %v502_v21, %v14052_v33 }
 0x20e   : > { %v11076_v53 = vld [vmem:[%s18837_s4 + $0x4e0] sm:$0xf]  ;;  %19027 = vst [vmem:[#allocation51_spill] sm:$0xff] %v16309_v41  ;;  %v11013_v19 = vor.u32 %v13173_v25, %v11012_v43  ;;  %v16330_v11 = vperm.slane %v10134_v26, 0  ;;  %v11078_v43 = vld [vmem:[%s18837_s4 + $0x4e8] sm:$0xf0]  ;;  %v618_v21 = vmul.f32 %v16252_v12, %v590_v60  ;;  %4348 = vmatpush.bf16.msra.mxu2 %v11025_v20  ;;  %4371 = vmatpush.bf16.msra.mxu3 %v11089_v62 }
 0x20f   : > { %v3799_v56 = vsel %vm3756_vm10, %v16110_v38, %v16267_v36  ;;  %v10140_v38 = vld [vmem:[%s18835_s2 + $0x7] ss:$8 sm:$0x3]  ;;  %v3808_v49 = vsel %vm3756_vm10, %v16126_v48, %v16282_v39  ;;  %v16328_v48 = vperm.slane %v10122_v42, 1  ;;  %v16340_v29 = vperm.slane %v10134_v26, 1 }
 0x210   : > { %3988 = vmatmul.bf16.gmra.mxu0 %v3799_v56  ;;  %4034 = vmatmul.bf16.gmra.mxu2 %v3799_v56  ;;  %v13188_v56 = vld [vmem:[%s18837_s4 + $0x4e4] sm:$0xf]  ;;  %v617_v42 = vmul.f32 %v16250_v31, %v590_v60  ;;  %v11077_v41 = vor.u32 %v13189_v13, %v11076_v53  ;;  %v13171_v26 = vld [vmem:[%s18837_s4 + $0x454] sm:$0xf0]  ;;  %v11017_v60 = vor.u32 %v13172_v1, %v11014_v63  ;;  %v13170_v13 = vld [vmem:[%s18837_s4 + $0x454] sm:$0xf] }
 0x211   : > { %4011 = vmatmul.bf16.gmra.mxu1 %v3808_v49  ;;  %4057 = vmatmul.bf16.gmra.mxu3 %v3808_v49  ;;  %v10128_v49 = vld [vmem:[%s18835_s2 + $0x5] ss:$8 sm:$0x3]  ;;  %v11081_v55 = vor.u32 %v13188_v56, %v11078_v43  ;;  %v13187_v53 = vld [vmem:[%s18837_s4 + $0x4d4] sm:$0xf0]  ;;  %v569_v17 = vadd.f32 %v559_v2, %v511_v9  ;;  %v570_v20 = vadd.f32 %v560_v37, %v512_v22  ;;  %v16387_v37 = vperm.slane %v10140_v38, 1 }
 0x212   : > { %v16332_v45 = vpop.permute.xlu2 %936  ;;  %v705_v14 = vpop.permute.xlu1 %704  ;;  %4303 = vmatpush.bf16.msra.mxu0 %v11013_v19  ;;  %v11005_v62 = vor.u32 %v13171_v26, %v11004_v16  ;;  %v11006_v1 = vld [vmem:[%s18837_s4 + $0x458] sm:$0xf0]  ;;  %v13186_v63 = vld [vmem:[%s18837_s4 + $0x4d4] sm:$0xf]  ;;  %v561_v43 = vmul.f32 %v16236_v28, %v16129_v15  ;;  %v16383_v2 = vmul.f32 %v16242_v58, %v16129_v15  ;;  %v16385_v16 = vperm.slane %v10140_v38, 0  ;;  %4326 = vmatpush.bf16.msra.mxu1 %v11077_v41 }
 0x213   : > { %v16344_v25 = vpop.permute.xlu0 %652  ;;  %v11070_v56 = vld [vmem:[%s18837_s4 + $0x4d8] sm:$0xf0]  ;;  %v16389_v19 = vpop.f32.mrf.mxu2  ;;  %v504_v9 = vmul.f32 %v16234_v44, %v16201_v4  ;;  %v627_v22 = vadd.f32 %v617_v42, %v569_v17  ;;  %v628_v26 = vadd.f32 %v618_v21, %v570_v20  ;;  %v11069_v30 = vor.u32 %v13187_v53, %v11068_v61  ;;  %v16398_v15 = vld [vmem:[%s18835_s2 + $0x10] ss:$8 sm:$0x3]  ;;  %4349 = vmatpush.bf16.msra.mxu2 %v11017_v60 }
 0x214   : > { %19029 = vst [vmem:[#allocation52_spill] sm:$0xff] %v16389_v19  ;;  %v16400_v7 = vperm.slane %v10128_v49, 0  ;;  %v16402_v38 = vperm.slane %v10128_v49, 1  ;;  %4372 = vmatpush.bf16.msra.mxu3 %v11081_v55  ;;  %v11009_v19 = vor.u32 %v13170_v13, %v11006_v1  ;;  %v11073_v4 = vor.u32 %v13186_v63, %v11070_v56  ;;  %v10996_v49 = vld [vmem:[%s18837_s4 + $0x440] sm:$0xf] }
 0x215   : > { %v675_v17 = vmul.f32 %v16244_v8, %v16162_v46  ;;  %v676_v41 = vmul.f32 %v16246_v57, %v16162_v46  ;;  %v513_v42 = vadd.f32 %v503_v18, %v18942_v52  ;;  %v732_v21 = vmul.f32 %v16248_v5, %v705_v14  ;;  %v13169_v55 = vld [vmem:[%s18837_s4 + $0x444] sm:$0xf0]  ;;  %v11060_v60 = vld [vmem:[%s18837_s4 + $0x4c0] sm:$0xf]  ;;  %v13168_v1 = vld [vmem:[%s18837_s4 + $0x444] sm:$0xf] }
 0x216   : > { %4304 = vmatpush.bf16.msra.mxu0 %v11005_v62  ;;  %v16421_v46 = vmul.f32 %v16330_v11, %v16199_v51  ;;  %v733_v53 = vmul.f32 %v16328_v48, %v705_v14  ;;  %v10997_v20 = vor.u32 %v13169_v55, %v10996_v49  ;;  %v13185_v62 = vld [vmem:[%s18837_s4 + $0x4c4] sm:$0xf0]  ;;  %v10998_v63 = vld [vmem:[%s18837_s4 + $0x448] sm:$0xf0]  ;;  %v514_v56 = vadd.f32 %v504_v9, %v14052_v33  ;;  %v10988_v33 = vld [vmem:[%s18837_s4 + $0x430] sm:$0xf] }
 0x217   : > { %v685_v14 = vadd.f32 %v675_v17, %v627_v22  ;;  %4327 = vmatpush.bf16.msra.mxu1 %v11069_v30  ;;  %v16447_v40 = vperm.slane %v16398_v15, 0  ;;  %4350 = vmatpush.bf16.msra.mxu2 %v11009_v19  ;;  %v571_v30 = vadd.f32 %v561_v43, %v513_v42  ;;  %v849_v19 = vmul.f32 %v16340_v29, %v16199_v51 }
 0x218   : > { %v3288_v10 = vpop.f32.mrf.mxu0  ;;  %v3311_v61 = vpop.f32.mrf.mxu1  ;;  %4373 = vmatpush.bf16.msra.mxu3 %v11073_v4  ;;  %v620_v43 = vmul.f32 %v16252_v12, %v16240_v47  ;;  %v11065_v42 = vor.u32 %v13184_v35, %v11062_v0  ;;  %v13182_v0 = vld [vmem:[%s18837_s4 + $0x4b4] sm:$0xf]  ;;  %v11054_v35 = vld [vmem:[%s18837_s4 + $0x4b8] sm:$0xf0] }
 0x219   : > { %v3312_v13 = vadd.f32 %v3311_v61, %v3288_v10  ;;  %v619_v10 = vmul.f32 %v16250_v31, %v16240_v47  ;;  %v686_v61 = vadd.f32 %v676_v41, %v628_v26  ;;  %v742_v17 = vadd.f32 %v732_v21, %v685_v14  ;;  %v13183_v21 = vld [vmem:[%s18837_s4 + $0x4b4] sm:$0xf0] }
 0x21a   : > { %v16424_v18 = vpop.permute.xlu1 %767  ;;  %v16438_v55 = vpop.permute.xlu2 %546  ;;  %4305 = vmatpush.bf16.msra.mxu0 %v10997_v20  ;;  %v11061_v41 = vor.u32 %v13185_v62, %v11060_v60  ;;  %v13166_v60 = vld [vmem:[%s18837_s4 + $0x434] sm:$0xf]  ;;  %v10990_v20 = vld [vmem:[%s18837_s4 + $0x438] sm:$0xf0]  ;;  %v572_v62 = vadd.f32 %v16383_v2, %v514_v56  ;;  %v16486_v14 = vperm.slane %v16398_v15, 1 }
 0x21b   : > { %v763_v49 = vpop.permute.xlu0 %762  ;;  %19031 = vst [vmem:[#allocation46_spill] sm:$0xff] %v16438_v55  ;;  %v16450_v9 = vadd.f32 %v3312_v13, %v16280_v59  ;;  %v11001_v55 = vor.u32 %v13168_v1, %v10998_v63  ;;  %v13167_v59 = vld [vmem:[%s18837_s4 + $0x434] sm:$0xf0]  ;;  %v11052_v13 = vld [vmem:[%s18837_s4 + $0x4b0] sm:$0xf]  ;;  %v743_v4 = vadd.f32 %v733_v53, %v686_v61  ;;  %v629_v51 = vadd.f32 %v619_v10, %v571_v30 }
 0x21c   : > { %v790_v22 = vmul.f32 %v16400_v7, %v763_v49  ;;  %v791_v26 = vmul.f32 %v16402_v38, %v763_v49  ;;  %4328 = vmatpush.bf16.msra.mxu1 %v11061_v41  ;;  %v10989_v47 = vor.u32 %v13167_v59, %v10988_v33  ;;  %v677_v53 = vmul.f32 %v16244_v8, %v16344_v25  ;;  %v10980_v61 = vld [vmem:[%s18837_s4 + $0x420] sm:$0xf]  ;;  %v13165_v49 = vld [vmem:[%s18837_s4 + $0x424] sm:$0xf0]  ;;  %v13164_v41 = vld [vmem:[%s18837_s4 + $0x424] sm:$0xf] }
 0x21d   : > { %4351 = vmatpush.bf16.msra.mxu2 %v11001_v55  ;;  %4374 = vmatpush.bf16.msra.mxu3 %v11065_v42  ;;  %v11053_v33 = vor.u32 %v13183_v21, %v11052_v13  ;;  %v10993_v15 = vor.u32 %v13166_v60, %v10990_v20  ;;  %v11044_v55 = vld [vmem:[%s18837_s4 + $0x4a0] sm:$0xf]  ;;  %v630_v59 = vadd.f32 %v620_v43, %v572_v62  ;;  %v10982_v42 = vld [vmem:[%s18837_s4 + $0x428] sm:$0xf0]  ;;  %v13180_v21 = vld [vmem:[%s18837_s4 + $0x4a4] sm:$0xf] }
 0x21e   : > { %v800_v1 = vadd.f32 %v790_v22, %v742_v17  ;;  %v801_v2 = vadd.f32 %v791_v26, %v743_v4  ;;  %v11057_v26 = vor.u32 %v13182_v0, %v11054_v35  ;;  %v13181_v17 = vld [vmem:[%s18837_s4 + $0x4a4] sm:$0xf0]  ;;  %v678_v13 = vmul.f32 %v16246_v57, %v16344_v25  ;;  %v11046_v25 = vld [vmem:[%s18837_s4 + $0x4a8] sm:$0xf0]  ;;  %4306 = vmatpush.bf16.msra.mxu0 %v10989_v47  ;;  %v13179_v47 = vld [vmem:[%s18837_s4 + $0x494] sm:$0xf0] }
 0x21f   : > { %v3334_v63 = vpop.f32.mrf.mxu2  ;;  %v3357_v56 = vpop.f32.mrf.mxu3  ;;  %v10981_v62 = vor.u32 %v13165_v49, %v10980_v61  ;;  %v10974_v61 = vld [vmem:[%s18837_s4 + $0x418] sm:$0xf0]  ;;  %v13178_v49 = vld [vmem:[%s18837_s4 + $0x494] sm:$0xf] }
 0x220   : > { %v16488_v10 = vpop.f32.mrf.mxu0  ;;  %v3358_v22 = vadd.f32 %v3357_v56, %v3334_v63  ;;  %v16496_v30 = vpop.f32.mrf.mxu1  ;;  %3993 = vmatmul.bf16.gmra.mxu0 %v16267_v36  ;;  %4039 = vmatmul.bf16.gmra.mxu2 %v16267_v36  ;;  %v964_v36 = vmul.f32 %v16447_v40, %v16332_v45  ;;  %v858_v20 = vadd.f32 %v16421_v46, %v800_v1 }
 0x221   : > { %19032 = vst [vmem:[#allocation48_spill] sm:$0xff] %v16496_v30  ;;  %4016 = vmatmul.bf16.gmra.mxu1 %v16282_v39  ;;  %4062 = vmatmul.bf16.gmra.mxu3 %v16282_v39  ;;  %v687_v63 = vadd.f32 %v677_v53, %v629_v51  ;;  %v859_v0 = vadd.f32 %v849_v19, %v801_v2  ;;  %v10972_v30 = vld [vmem:[%s18837_s4 + $0x410] sm:$0xf]  ;;  %v13162_v53 = vld [vmem:[%s18837_s4 + $0x414] sm:$0xf] }
 0x222   : > { %v879_v4 = vpop.permute.xlu1 %878  ;;  %v16525_v43 = vadd.f32 %v3358_v22, %v16357_v23  ;;  %4329 = vmatpush.bf16.msra.mxu1 %v11053_v33  ;;  %v11045_v56 = vor.u32 %v13181_v17, %v11044_v55  ;;  %v13163_v23 = vld [vmem:[%s18837_s4 + $0x414] sm:$0xf0]  ;;  %v16538_v22 = vpop.permute.xlu2 %657  ;;  %4352 = vmatpush.bf16.msra.mxu2 %v10993_v15  ;;  %v10985_v1 = vor.u32 %v13164_v41, %v10982_v42  ;;  %v11036_v19 = vld [vmem:[%s18837_s4 + $0x490] sm:$0xf]  ;;  %v11038_v15 = vld [vmem:[%s18837_s4 + $0x498] sm:$0xf0] }
 0x223   : > { %v16527_v60 = vpop.permute.xlu0 %825  ;;  %v906_v39 = vmul.f32 %v16385_v16, %v879_v4  ;;  %v907_v35 = vmul.f32 %v16387_v37, %v879_v4  ;;  %4375 = vmatpush.bf16.msra.mxu3 %v11057_v26  ;;  %v11049_v51 = vor.u32 %v13180_v21, %v11046_v25  ;;  %v965_v2 = vmul.f32 %v16486_v14, %v16332_v45  ;;  %v10964_v4 = vld [vmem:[%s18837_s4 + $0x400] sm:$0xf]  ;;  %v19033_v42 = vld [vmem:[#allocation55_spill] sm:$0xff] }
 0x224   : > { %v734_v26 = vmul.f32 %v16248_v5, %v16183_v27  ;;  %v688_v55 = vadd.f32 %v678_v13, %v630_v59  ;;  %4307 = vmatpush.bf16.msra.mxu0 %v10981_v62  ;;  %v10973_v45 = vor.u32 %v13163_v23, %v10972_v30  ;;  %v3032_v21 = vadd.f32 %v19033_v42, %v16117_v50  ;;  %v13161_v30 = vld [vmem:[%s18837_s4 + $0x404] sm:$0xf0]  ;;  %v11028_v13 = vld [vmem:[%s18837_s4 + $0x480] sm:$0xf] }
 0x225   : > { %v916_v46 = vadd.f32 %v906_v39, %v858_v20  ;;  %v917_v33 = vadd.f32 %v907_v35, %v859_v0  ;;  %v735_v25 = vmul.f32 %v16328_v48, %v16183_v27  ;;  %v11037_v59 = vor.u32 %v13179_v47, %v11036_v19  ;;  %v10966_v19 = vld [vmem:[%s18837_s4 + $0x408] sm:$0xf0] }
 0x226   : > { %4330 = vmatpush.bf16.msra.mxu1 %v11045_v56  ;;  %v744_v62 = vadd.f32 %v734_v26, %v687_v63  ;;  %4353 = vmatpush.bf16.msra.mxu2 %v10985_v1  ;;  %v10977_v23 = vor.u32 %v13162_v53, %v10974_v61  ;;  %v11041_v56 = vor.u32 %v13178_v49, %v11038_v15  ;;  %v11030_v53 = vld [vmem:[%s18837_s4 + $0x488] sm:$0xf0] }
 0x227   : > { %v974_v17 = vadd.f32 %v964_v36, %v916_v46  ;;  %v16562_v41 = vpop.f32.mrf.mxu2  ;;  %v975_v20 = vadd.f32 %v965_v2, %v917_v33  ;;  %v16571_v39 = vpop.f32.mrf.mxu3  ;;  %v13177_v36 = vld [vmem:[%s18837_s4 + $0x484] sm:$0xf0]  ;;  %4376 = vmatpush.bf16.msra.mxu3 %v11049_v51  ;;  %v13160_v46 = vld [vmem:[%s18837_s4 + $0x404] sm:$0xf]  ;;  %v792_v47 = vmul.f32 %v16400_v7, %v16424_v18  ;;  %v793_v63 = vmul.f32 %v16402_v38, %v16424_v18 }
 0x228   : > { %19034 = vst [vmem:[#allocation55_spill] sm:$0xff] %v16571_v39  ;;  %v3293_v0 = vpop.f32.mrf.mxu0  ;;  %v3316_v35 = vpop.f32.mrf.mxu1  ;;  %v13176_v51 = vld [vmem:[%s18837_s4 + $0x484] sm:$0xf]  ;;  %v745_v61 = vadd.f32 %v735_v25, %v688_v55  ;;  %v850_v49 = vmul.f32 %v16330_v11, %v16527_v60  ;;  %4308 = vmatpush.bf16.msra.mxu0 %v10973_v45  ;;  %v10965_v26 = vor.u32 %v13161_v30, %v10964_v4 }
 0x229   : > { %v984_v27 = vmax.f32 %v974_v17, 0.0  ;;  %v985_v2 = vmax.f32 %v975_v20, 0.0  ;;  %v3317_v33 = vadd.f32 %v3316_v35, %v3293_v0  ;;  %v851_v17 = vmul.f32 %v16340_v29, %v16527_v60 }
 0x22a   : > { %v16592_v1 = vpop.permute.xlu1 %488  ;;  %4331 = vmatpush.bf16.msra.mxu1 %v11037_v59  ;;  %v11029_v0 = vor.u32 %v13177_v36, %v11028_v13  ;;  %4354 = vmatpush.bf16.msra.mxu2 %v10977_v23  ;;  %v10969_v25 = vor.u32 %v13160_v46, %v10966_v19  ;;  %v11033_v35 = vor.u32 %v13176_v51, %v11030_v53  ;;  %v16610_v45 = vpop.permute.xlu2 %719 }
 0x22b   : > { %v1019_v15 = vsel %vm1014_vm6, %v984_v27, 0.0  ;;  %v484_v18 = vpop.permute.xlu0 %483  ;;  %v1020_v42 = vsel %vm1014_vm6, %v985_v2, 0.0  ;;  %v16608_v20 = vadd.f32 %v3317_v33, %v3032_v21  ;;  %4377 = vmatpush.bf16.msra.mxu3 %v11041_v56  ;;  %v802_v39 = vadd.f32 %v792_v47, %v744_v62  ;;  %v19035_v21 = vld [vmem:[#allocation56_spill] sm:$0xff] }
 0x22c   : > { %v1029_v55 = vpack.c.bf16 %v1020_v42, %v1019_v15  ;;  %v803_v27 = vadd.f32 %v793_v63, %v745_v61  ;;  %4309 = vmatpush.bf16.msra.mxu0 %v10965_v26  ;;  %v3033_v59 = vadd.f32 %v19035_v21, %v16141_v32  ;;  %v908_v62 = vmul.f32 %v16385_v16, %v16238_v54 }
 0x22d   : > { %v860_v60 = vadd.f32 %v850_v49, %v802_v39  ;;  %v909_v23 = vmul.f32 %v16387_v37, %v16238_v54 }
 0x22e   : > { %1034 = vst [vmem:[#allocation2 + $0x8] sm:$0xff] %v1029_v55  ;;  %v861_v30 = vadd.f32 %v851_v17, %v803_v27  ;;  %4332 = vmatpush.bf16.msra.mxu1 %v11029_v0  ;;  %4355 = vmatpush.bf16.msra.mxu2 %v10969_v25 }
 0x22f   : > { %v3339_v4 = vpop.f32.mrf.mxu2  ;;  %v3362_v6 = vpop.f32.mrf.mxu3  ;;  %4378 = vmatpush.bf16.msra.mxu3 %v11033_v35  ;;  %v918_v19 = vadd.f32 %v908_v62, %v860_v60  ;;  %v505_v60 = vmul.f32 %v16232_v3, %v484_v18 }
 0x230   : > { %v3295_v2 = vpop.f32.mrf.mxu0  ;;  %v3363_v13 = vadd.f32 %v3362_v6, %v3339_v4  ;;  %v3318_v36 = vpop.f32.mrf.mxu1  ;;  %v919_v47 = vadd.f32 %v909_v23, %v861_v30  ;;  %v506_v30 = vmul.f32 %v16234_v44, %v484_v18 }
 0x231   : > { %v515_v62 = vadd.f32 %v505_v60, %v18942_v52  ;;  %v507_v60 = vmul.f32 %v16232_v3, %v16592_v1 }
 0x232   : > { %v542_v56 = vpop.permute.xlu1 %541  ;;  %v16618_v46 = vadd.f32 %v3363_v13, %v3033_v59  ;;  %v16626_v0 = vpop.permute.xlu2 %830 }
 0x233   : > { %v942_v39 = vpop.permute.xlu0 %941  ;;  %v563_v2 = vmul.f32 %v16236_v28, %v542_v56  ;;  %v564_v59 = vmul.f32 %v16242_v58, %v542_v56 }
 0x234   : > { %v966_v63 = vmul.f32 %v16447_v40, %v942_v39  ;;  %v967_v33 = vmul.f32 %v16486_v14, %v942_v39 }
 0x236   : > { %v976_v6 = vadd.f32 %v966_v63, %v918_v19  ;;  %v977_v51 = vadd.f32 %v967_v33, %v919_v47  ;;  %v19037_v19 = vld [vmem:[#allocation18_spill] sm:$0xff]  ;;  %v573_v33 = vadd.f32 %v563_v2, %v515_v62 }
 0x237   : > { %v3341_v53 = vpop.f32.mrf.mxu2  ;;  %v3364_v15 = vpop.f32.mrf.mxu3  ;;  %v516_v47 = vadd.f32 %v506_v30, %v19037_v19 }
 0x238   : > { %v986_v61 = vmax.f32 %v976_v6, 0.0  ;;  %v987_v49 = vmax.f32 %v977_v51, 0.0  ;;  %v3600_v26 = vpop.f32.mrf.mxu0  ;;  %v3623_v17 = vpop.f32.mrf.mxu1  ;;  %v19038_v6 = vld [vmem:[#allocation30_spill] sm:$0xff]  ;;  %v10948_v53 = vld [vmem:[#allocation2 + $0x8] sm:$0xf] }
 0x239   : > { %v3624_v55 = vadd.f32 %v3623_v17, %v3600_v26  ;;  %v13156_v26 = vld [vmem:[#allocation2 + $0xc] sm:$0xf] }
 0x23a   : > { %v1021_v54 = vsel %vm1015_vm7, %v986_v61, 0.0  ;;  %v1022_v42 = vsel %vm1015_vm7, %v987_v49, 0.0  ;;  %v16628_v25 = vpop.permute.xlu1 %604  ;;  %v574_v61 = vadd.f32 %v564_v59, %v516_v47  ;;  %v889_v49 = vpop.permute.xlu2 %888 }
 0x23b   : > { %v1030_v35 = vpack.c.bf16 %v1022_v42, %v1021_v54  ;;  %v600_v27 = vpop.permute.xlu0 %599  ;;  %v16631_v4 = vadd.f32 %v3624_v55, %v16148_v34 }
 0x23c   : > { %v621_v23 = vmul.f32 %v16250_v31, %v600_v27  ;;  %v622_v63 = vmul.f32 %v16252_v12, %v600_v27  ;;  %v679_v27 = vmul.f32 %v16244_v8, %v16538_v22 }
 0x23d   : > { %1035 = vst [vmem:[#allocation2 + $0x10] sm:$0xff] %v1030_v35 }
 0x23e   : > { %v631_v54 = vadd.f32 %v621_v23, %v573_v33  ;;  %v632_v35 = vadd.f32 %v622_v63, %v574_v61  ;;  %v508_v23 = vmul.f32 %v16234_v44, %v16592_v1 }
 0x23f   : > { %v3646_v21 = vpop.f32.mrf.mxu2  ;;  %v3669_v13 = vpop.f32.mrf.mxu3 }
 0x240   : > { %v16637_v36 = vpop.f32.mrf.mxu0  ;;  %v3670_v39 = vadd.f32 %v3669_v13, %v3646_v21  ;;  %v16641_v34 = vpop.f32.mrf.mxu1  ;;  %v680_v21 = vmul.f32 %v16246_v57, %v16538_v22 }
 0x241   : > { %19036 = vst [vmem:[#allocation56_spill] sm:$0xff] %v16641_v34 }
 0x242   : > { %v715_v18 = vpop.permute.xlu1 %714  ;;  %v16646_v51 = vadd.f32 %v3670_v39, %v19038_v6  ;;  %v689_v39 = vadd.f32 %v679_v27, %v631_v54  ;;  %v690_v63 = vadd.f32 %v680_v21, %v632_v35  ;;  %v852_v35 = vmul.f32 %v16330_v11, %v16626_v0  ;;  %v13206_v21 = vld [vmem:[%s18837_s4 + $0x574] sm:$0xf] }
 0x243   : > { %v16648_v56 = vpop.permute.xlu0 %662  ;;  %v736_v30 = vmul.f32 %v16248_v5, %v715_v18  ;;  %v737_v59 = vmul.f32 %v16328_v48, %v715_v18  ;;  %v853_v27 = vmul.f32 %v16340_v29, %v16626_v0 }
 0x244   : > { %v13157_v15 = vld [vmem:[#allocation2 + $0xc] sm:$0xf0]  ;;  %v10950_v17 = vld [vmem:[#allocation2 + $0x10] sm:$0xf0] }
 0x245   : > { %v10949_v42 = vor.u32 %v13157_v15, %v10948_v53  ;;  %v10953_v55 = vor.u32 %v13156_v26, %v10950_v17  ;;  %v517_v53 = vadd.f32 %v507_v60, %v18942_v52  ;;  %v746_v61 = vadd.f32 %v736_v30, %v689_v39 }
 0x246   : > { %v747_v15 = vadd.f32 %v737_v59, %v690_v63  ;;  %v11182_v59 = vld [vmem:[%s18837_s4 + $0x578] sm:$0xf0]  ;;  %v911_v39 = vmul.f32 %v16387_v37, %v889_v49 }
 0x247   : > { %v16655_v2 = vpop.f32.mrf.mxu2  ;;  %4310 = vmatmul.bf16.vlgmr.msra.gmra.mxu0 %v10949_v42  ;;  %4333 = vmatmul.bf16.vlgmr.msra.gmra.mxu1 %v10953_v55  ;;  %v16660_v13 = vpop.f32.mrf.mxu3  ;;  %v11185_v63 = vor.u32 %v13206_v21, %v11182_v59  ;;  %v13223_v59 = vld [vmem:[%s18837_s4 + $0x5f4] sm:$0xf0] }
 0x248   : > { %19039 = vst [vmem:[#allocation18_spill] sm:$0xff] %v16655_v2  ;;  %4356 = vmatmul.bf16.vlgmr.msra.gmra.mxu2 %v10949_v42  ;;  %4379 = vmatmul.bf16.vlgmr.msra.gmra.mxu3 %v10953_v55  ;;  %v3605_v62 = vpop.f32.mrf.mxu0  ;;  %v3628_v47 = vpop.f32.mrf.mxu1  ;;  %v19041_v42 = vld [vmem:[#allocation46_spill] sm:$0xff]  ;;  %v518_v55 = vadd.f32 %v508_v23, %v19037_v19  ;;  %v910_v23 = vmul.f32 %v16385_v16, %v889_v49  ;;  %v11180_v49 = vld [vmem:[%s18837_s4 + $0x570] sm:$0xf] }
 0x249   : > { %19040 = vst [vmem:[#allocation30_spill] sm:$0xff] %v16660_v13  ;;  %v3629_v33 = vadd.f32 %v3628_v47, %v3605_v62  ;;  %v565_v1 = vmul.f32 %v16236_v28, %v19041_v42  ;;  %v566_v54 = vmul.f32 %v16242_v58, %v19041_v42  ;;  %v13222_v62 = vld [vmem:[%s18837_s4 + $0x5f4] sm:$0xf]  ;;  %4655 = vmatpush.bf16.msrb.mxu2 %v11185_v63 }
 0x24a   : > { %v16664_v6 = vpop.permute.xlu1 %777 }
 0x24b   : > { %v773_v22 = vpop.permute.xlu0 %772  ;;  %v16668_v18 = vadd.f32 %v3629_v33, %v16450_v9  ;;  %v947_v9 = vpop.permute.xlu2 %946  ;;  %v575_v0 = vadd.f32 %v565_v1, %v517_v53  ;;  %v11246_v33 = vld [vmem:[%s18837_s4 + $0x5f8] sm:$0xf0]  ;;  %v13207_v53 = vld [vmem:[%s18837_s4 + $0x574] sm:$0xf0]  ;;  %v11244_v1 = vld [vmem:[%s18837_s4 + $0x5f0] sm:$0xf]  ;;  %v576_v63 = vadd.f32 %v566_v54, %v518_v55 }
 0x24c   : > { %v794_v26 = vmul.f32 %v16400_v7, %v773_v22  ;;  %v795_v17 = vmul.f32 %v16402_v38, %v773_v22  ;;  %v11249_v42 = vor.u32 %v13222_v62, %v11246_v33  ;;  %v11181_v21 = vor.u32 %v13207_v53, %v11180_v49 }
 0x24d   : > { %v969_v62 = vmul.f32 %v16486_v14, %v947_v9  ;;  %v11245_v13 = vor.u32 %v13223_v59, %v11244_v1 }
 0x24e   : > { %v804_v60 = vadd.f32 %v794_v26, %v746_v61  ;;  %v805_v30 = vadd.f32 %v795_v17, %v747_v15  ;;  %v623_v61 = vmul.f32 %v16250_v31, %v16628_v25  ;;  %4678 = vmatpush.bf16.msrb.mxu3 %v11249_v42  ;;  %4609 = vmatpush.bf16.msrb.mxu0 %v11181_v21 }
 0x24f   : > { %v3651_v47 = vpop.f32.mrf.mxu2  ;;  %v3674_v26 = vpop.f32.mrf.mxu3  ;;  %4632 = vmatpush.bf16.msrb.mxu1 %v11245_v13  ;;  %v738_v13 = vmul.f32 %v16248_v5, %v16610_v45 }
 0x250   : > { %v862_v22 = vadd.f32 %v852_v35, %v804_v60  ;;  %v863_v15 = vadd.f32 %v853_v27, %v805_v30  ;;  %v16697_v17 = vpop.f32.mrf.mxu0  ;;  %v624_v35 = vmul.f32 %v16252_v12, %v16628_v25  ;;  %v968_v27 = vmul.f32 %v16447_v40, %v947_v9  ;;  %v16711_v30 = vpop.f32.mrf.mxu1  ;;  %v13204_v25 = vld [vmem:[%s18837_s4 + $0x564] sm:$0xf] }
 0x251   : > { %19042 = vst [vmem:[#allocation46_spill] sm:$0xff] %v16697_v17  ;;  %v3675_v60 = vadd.f32 %v3674_v26, %v3651_v47  ;;  %v11174_v47 = vld [vmem:[%s18837_s4 + $0x568] sm:$0xf0]  ;;  %v681_v26 = vmul.f32 %v16244_v8, %v16648_v56  ;;  %v682_v9 = vmul.f32 %v16246_v57, %v16648_v56  ;;  %v633_v42 = vadd.f32 %v623_v61, %v575_v0 }
 0x252   : > { %19043 = vst [vmem:[#allocation57_spill] sm:$0xff] %v16711_v30  ;;  %v920_v33 = vadd.f32 %v910_v23, %v862_v22  ;;  %v921_v24 = vadd.f32 %v911_v39, %v863_v15  ;;  %v494_v17 = vpop.permute.xlu1 %493  ;;  %v13220_v22 = vld [vmem:[%s18837_s4 + $0x5e4] sm:$0xf]  ;;  %v11238_v15 = vld [vmem:[%s18837_s4 + $0x5e8] sm:$0xf0]  ;;  %v634_v49 = vadd.f32 %v624_v35, %v576_v63  ;;  %v11177_v53 = vor.u32 %v13204_v25, %v11174_v47 }
 0x253   : > { %v16728_v23 = vadd.f32 %v3675_v60, %v16525_v43  ;;  %v836_v39 = vpop.permute.xlu0 %835  ;;  %v11241_v43 = vor.u32 %v13220_v22, %v11238_v15  ;;  %v691_v60 = vadd.f32 %v681_v26, %v633_v42  ;;  %v739_v0 = vmul.f32 %v16328_v48, %v16610_v45  ;;  %v13326_v30 = vld [vmem:[#allocation6 + $0x30] sm:$0xff] }
 0x254   : > { %v978_v54 = vadd.f32 %v968_v27, %v920_v33  ;;  %v979_v55 = vadd.f32 %v969_v62, %v921_v24  ;;  %v692_v59 = vadd.f32 %v682_v9, %v634_v49  ;;  %4656 = vmatpush.bf16.msrb.mxu2 %v11177_v53  ;;  %v796_v35 = vmul.f32 %v16400_v7, %v16664_v6 }
 0x255   : > { %4679 = vmatpush.bf16.msrb.mxu3 %v11241_v43  ;;  %v797_v33 = vmul.f32 %v16402_v38, %v16664_v6  ;;  %v748_v63 = vadd.f32 %v738_v13, %v691_v60  ;;  %v509_v9 = vmul.f32 %v16232_v3, %v494_v17  ;;  %v854_v15 = vmul.f32 %v16330_v11, %v836_v39  ;;  %v13221_v60 = vld [vmem:[%s18837_s4 + $0x5e4] sm:$0xf0] }
 0x256   : > { %v988_v56 = vmax.f32 %v978_v54, 0.0  ;;  %v989_v1 = vmax.f32 %v979_v55, 0.0  ;;  %v749_v26 = vadd.f32 %v739_v0, %v692_v59  ;;  %v855_v45 = vmul.f32 %v16340_v29, %v836_v39  ;;  %v13202_v59 = vld [vmem:[%s18837_s4 + $0x554] sm:$0xf] }
 0x257   : > { %v16736_v21 = vpop.f32.mrf.mxu2  ;;  %v16742_v27 = vpop.f32.mrf.mxu3  ;;  %v806_v54 = vadd.f32 %v796_v35, %v748_v63  ;;  %v519_v53 = vadd.f32 %v509_v9, %v18942_v52 }
 0x258   : > { %v1023_v2 = vsel %vm1016_vm5, %v988_v56, 0.0  ;;  %v1024_v34 = vsel %vm1016_vm5, %v989_v1, 0.0  ;;  %v3610_v24 = vpop.f32.mrf.mxu0  ;;  %v3633_v62 = vpop.f32.mrf.mxu1  ;;  %v807_v55 = vadd.f32 %v797_v33, %v749_v26  ;;  %v11230_v33 = vld [vmem:[%s18837_s4 + $0x5d8] sm:$0xf0] }
 0x259   : > { %v1031_v61 = vpack.c.bf16 %v1024_v34, %v1023_v2  ;;  %v3634_v25 = vadd.f32 %v3633_v62, %v3610_v24  ;;  %v510_v34 = vmul.f32 %v16234_v44, %v494_v17  ;;  %v11172_v44 = vld [vmem:[%s18837_s4 + $0x560] sm:$0xf]  ;;  %v864_v17 = vadd.f32 %v854_v15, %v806_v54  ;;  %v11166_v24 = vld [vmem:[%s18837_s4 + $0x558] sm:$0xf0]  ;;  %v13218_v62 = vld [vmem:[%s18837_s4 + $0x5d4] sm:$0xf] }
 0x25a   : > { %v552_v47 = vpop.permute.xlu1 %551  ;;  %v865_v39 = vadd.f32 %v855_v45, %v807_v55  ;;  %v13203_v15 = vld [vmem:[%s18837_s4 + $0x554] sm:$0xf0]  ;;  %v11228_v55 = vld [vmem:[%s18837_s4 + $0x5d0] sm:$0xf] }
 0x25b   : > { %1036 = vst [vmem:[#allocation2 + $0x18] sm:$0xff] %v1031_v61  ;;  %v894_v22 = vpop.permute.xlu0 %893  ;;  %v16757_v2 = vadd.f32 %v3634_v25, %v16608_v20  ;;  %v567_v6 = vmul.f32 %v16236_v28, %v552_v47  ;;  %v568_v3 = vmul.f32 %v16242_v58, %v552_v47  ;;  %v13205_v20 = vld [vmem:[%s18837_s4 + $0x564] sm:$0xf0]  ;;  %v11236_v28 = vld [vmem:[%s18837_s4 + $0x5e0] sm:$0xf]  ;;  %v520_v1 = vadd.f32 %v510_v34, %v19037_v19 }
 0x25c   : > { %v912_v42 = vmul.f32 %v16385_v16, %v894_v22  ;;  %v913_v49 = vmul.f32 %v16387_v37, %v894_v22  ;;  %v11173_v52 = vor.u32 %v13205_v20, %v11172_v44  ;;  %v11237_v35 = vor.u32 %v13221_v60, %v11236_v28  ;;  %v11164_v25 = vld [vmem:[%s18837_s4 + $0x550] sm:$0xf]  ;;  %v13216_v44 = vld [vmem:[%s18837_s4 + $0x5c4] sm:$0xf]  ;;  %v11222_v20 = vld [vmem:[%s18837_s4 + $0x5c8] sm:$0xf0] }
 0x25d   : > { %v577_v13 = vadd.f32 %v567_v6, %v519_v53  ;;  %v11169_v19 = vor.u32 %v13202_v59, %v11166_v24  ;;  %v578_v26 = vadd.f32 %v568_v3, %v520_v1  ;;  %v11233_v22 = vor.u32 %v13218_v62, %v11230_v33  ;;  %v11156_v1 = vld [vmem:[%s18837_s4 + $0x540] sm:$0xf] }
 0x25e   : > { %v922_v47 = vadd.f32 %v912_v42, %v864_v17  ;;  %v923_v63 = vadd.f32 %v913_v49, %v865_v39  ;;  %4610 = vmatpush.bf16.msrb.mxu0 %v11173_v52  ;;  %4633 = vmatpush.bf16.msrb.mxu1 %v11237_v35  ;;  %v13219_v42 = vld [vmem:[%s18837_s4 + $0x5d4] sm:$0xf0]  ;;  %v668_v49 = vpop.permute.xlu2 %667  ;;  %v11225_v39 = vor.u32 %v13216_v44, %v11222_v20  ;;  %v13212_v20 = vld [vmem:[%s18837_s4 + $0x5a4] sm:$0xf] }
 0x25f   : > { %v3656_v56 = vpop.f32.mrf.mxu2  ;;  %v3679_v58 = vpop.f32.mrf.mxu3  ;;  %4657 = vmatpush.bf16.msrb.mxu2 %v11169_v19  ;;  %4680 = vmatpush.bf16.msrb.mxu3 %v11233_v22  ;;  %v11229_v53 = vor.u32 %v13219_v42, %v11228_v55  ;;  %v683_v35 = vmul.f32 %v16244_v8, %v668_v49  ;;  %v684_v19 = vmul.f32 %v16246_v57, %v668_v49  ;;  %v13215_v55 = vld [vmem:[%s18837_s4 + $0x5b4] sm:$0xf0]  ;;  %v13196_v42 = vld [vmem:[%s18837_s4 + $0x524] sm:$0xf] }
 0x260   : > { %v3612_v43 = vpop.f32.mrf.mxu0  ;;  %v3680_v0 = vadd.f32 %v3679_v58, %v3656_v56  ;;  %v3635_v61 = vpop.f32.mrf.mxu1  ;;  %v11158_v56 = vld [vmem:[%s18837_s4 + $0x548] sm:$0xf0]  ;;  %v13201_v58 = vld [vmem:[%s18837_s4 + $0x544] sm:$0xf0] }
 0x261   : > { %v11220_v43 = vld [vmem:[%s18837_s4 + $0x5c0] sm:$0xf]  ;;  %v11157_v24 = vor.u32 %v13201_v58, %v11156_v1  ;;  %v11150_v61 = vld [vmem:[%s18837_s4 + $0x538] sm:$0xf0] }
 0x262   : > { %v610_v9 = vpop.permute.xlu1 %609  ;;  %v16796_v45 = vadd.f32 %v3680_v0, %v16618_v46  ;;  %v13200_v46 = vld [vmem:[%s18837_s4 + $0x544] sm:$0xf]  ;;  %v13198_v0 = vld [vmem:[%s18837_s4 + $0x534] sm:$0xf]  ;;  %4634 = vmatpush.bf16.msrb.mxu1 %v11229_v53 }
 0x263   : > { %v952_v34 = vpop.permute.xlu0 %951  ;;  %v625_v54 = vmul.f32 %v16250_v31, %v610_v9  ;;  %v626_v6 = vmul.f32 %v16252_v12, %v610_v9  ;;  %v11165_v12 = vor.u32 %v13203_v15, %v11164_v25  ;;  %v11161_v17 = vor.u32 %v13200_v46, %v11158_v56  ;;  %v13214_v25 = vld [vmem:[%s18837_s4 + $0x5b4] sm:$0xf]  ;;  %4681 = vmatpush.bf16.msrb.mxu3 %v11225_v39  ;;  %v11142_v46 = vld [vmem:[%s18837_s4 + $0x528] sm:$0xf0] }
 0x264   : > { %v970_v3 = vmul.f32 %v16447_v40, %v952_v34  ;;  %v971_v31 = vmul.f32 %v16486_v14, %v952_v34  ;;  %v11153_v22 = vor.u32 %v13198_v0, %v11150_v61  ;;  %v13199_v34 = vld [vmem:[%s18837_s4 + $0x534] sm:$0xf0]  ;;  %v13213_v61 = vld [vmem:[%s18837_s4 + $0x5a4] sm:$0xf0] }
 0x265   : > { %v635_v28 = vadd.f32 %v625_v54, %v577_v13  ;;  %v636_v59 = vadd.f32 %v626_v6, %v578_v26  ;;  %4611 = vmatpush.bf16.msrb.mxu0 %v11165_v12  ;;  %v13217_v13 = vld [vmem:[%s18837_s4 + $0x5c4] sm:$0xf0]  ;;  %4658 = vmatpush.bf16.msrb.mxu2 %v11161_v17  ;;  %v11212_v54 = vld [vmem:[%s18837_s4 + $0x5b0] sm:$0xf] }
 0x266   : > { %v980_v52 = vadd.f32 %v970_v3, %v922_v47  ;;  %v981_v60 = vadd.f32 %v971_v31, %v923_v63  ;;  %v11221_v33 = vor.u32 %v13217_v13, %v11220_v43  ;;  %v11214_v47 = vld [vmem:[%s18837_s4 + $0x5b8] sm:$0xf0]  ;;  %v11148_v63 = vld [vmem:[%s18837_s4 + $0x530] sm:$0xf]  ;;  %v11213_v58 = vor.u32 %v13215_v55, %v11212_v54  ;;  %v13211_v55 = vld [vmem:[%s18837_s4 + $0x594] sm:$0xf0] }
 0x267   : > { %v3658_v62 = vpop.f32.mrf.mxu2  ;;  %v3681_v9 = vpop.f32.mrf.mxu3  ;;  %v11217_v15 = vor.u32 %v13214_v25, %v11214_v47  ;;  %v693_v6 = vadd.f32 %v683_v35, %v635_v28  ;;  %v694_v12 = vadd.f32 %v684_v19, %v636_v59  ;;  %v11149_v44 = vor.u32 %v13199_v34, %v11148_v63  ;;  %v11206_v28 = vld [vmem:[%s18837_s4 + $0x5a8] sm:$0xf0]  ;;  %v11204_v59 = vld [vmem:[%s18837_s4 + $0x5a0] sm:$0xf]  ;;  %v13194_v35 = vld [vmem:[%s18837_s4 + $0x514] sm:$0xf] }
 0x268   : > { %v990_v26 = vmax.f32 %v980_v52, 0.0  ;;  %v991_v8 = vmax.f32 %v981_v60, 0.0  ;;  %v3984_v57 = vpop.f32.mrf.mxu0  ;;  %v4007_v56 = vpop.f32.mrf.mxu1  ;;  %4635 = vmatpush.bf16.msrb.mxu1 %v11221_v33  ;;  %v11145_v43 = vor.u32 %v13196_v42, %v11142_v46  ;;  %v11140_v52 = vld [vmem:[%s18837_s4 + $0x520] sm:$0xf]  ;;  %v13197_v60 = vld [vmem:[%s18837_s4 + $0x524] sm:$0xf0]  ;;  %v11209_v0 = vor.u32 %v13212_v20, %v11206_v28 }
 0x269   : > { %4612 = vmatpush.bf16.msrb.mxu0 %v11157_v24  ;;  %v4008_v1 = vadd.f32 %v4007_v56, %v3984_v57  ;;  %4659 = vmatpush.bf16.msrb.mxu2 %v11153_v22  ;;  %v11134_v19 = vld [vmem:[%s18837_s4 + $0x518] sm:$0xf0]  ;;  %v13210_v62 = vld [vmem:[%s18837_s4 + $0x594] sm:$0xf]  ;;  %v841_v25 = vpop.permute.xlu2 %840  ;;  %v11132_v57 = vld [vmem:[%s18837_s4 + $0x510] sm:$0xf] }
 0x26a   : > { %v1025_v3 = vsel %vm1017_vm12, %v990_v26, 0.0  ;;  %v1026_v31 = vsel %vm1017_vm12, %v991_v8, 0.0  ;;  %v783_v53 = vpop.permute.xlu1 %782  ;;  %4682 = vmatpush.bf16.msrb.mxu3 %v11217_v15  ;;  %v11198_v33 = vld [vmem:[%s18837_s4 + $0x598] sm:$0xf0]  ;;  %v11141_v8 = vor.u32 %v13197_v60, %v11140_v52  ;;  %v13195_v22 = vld [vmem:[%s18837_s4 + $0x514] sm:$0xf0]  ;;  %v856_v42 = vmul.f32 %v16330_v11, %v841_v25 }
 0x26b   : > { %v1032_v17 = vpack.c.bf16 %v1026_v31, %v1025_v3  ;;  %v725_v39 = vpop.permute.xlu0 %724  ;;  %v799_v26 = vmul.f32 %v16402_v38, %v783_v53  ;;  %v11201_v38 = vor.u32 %v13210_v62, %v11198_v33  ;;  %v857_v46 = vmul.f32 %v16340_v29, %v841_v25  ;;  %v13192_v56 = vld [vmem:[%s18837_s4 + $0x504] sm:$0xf] }
 0x26c   : > { %v740_v24 = vmul.f32 %v16248_v5, %v725_v39  ;;  %v741_v13 = vmul.f32 %v16328_v48, %v725_v39  ;;  %v798_v5 = vmul.f32 %v16400_v7, %v783_v53  ;;  %v16896_v48 = vadd.f32 %v4008_v1, %v16631_v4  ;;  %4636 = vmatpush.bf16.msrb.mxu1 %v11213_v58  ;;  %v13208_v20 = vld [vmem:[%s18837_s4 + $0x584] sm:$0xf]  ;;  %v11190_v1 = vld [vmem:[%s18837_s4 + $0x588] sm:$0xf0]  ;;  %v11124_v58 = vld [vmem:[%s18837_s4 + $0x500] sm:$0xf] }
 0x26d   : > { %1037 = vst [vmem:[#allocation2 + $0x20] sm:$0xff] %v1032_v17  ;;  %4613 = vmatpush.bf16.msrb.mxu0 %v11149_v44  ;;  %v11205_v7 = vor.u32 %v13213_v61, %v11204_v59  ;;  %v11137_v4 = vor.u32 %v13194_v35, %v11134_v19  ;;  %4660 = vmatpush.bf16.msrb.mxu2 %v11145_v43  ;;  %v11126_v44 = vld [vmem:[%s18837_s4 + $0x508] sm:$0xf0]  ;;  %v13193_v43 = vld [vmem:[%s18837_s4 + $0x504] sm:$0xf0] }
 0x26e   : > { %v750_v47 = vadd.f32 %v740_v24, %v693_v6  ;;  %v751_v63 = vadd.f32 %v741_v13, %v694_v12  ;;  %4683 = vmatpush.bf16.msrb.mxu3 %v11209_v0  ;;  %v11196_v6 = vld [vmem:[%s18837_s4 + $0x590] sm:$0xf]  ;;  %v10956_v12 = vld [vmem:[#allocation2 + $0x18] sm:$0xf]  ;;  %v11133_v53 = vor.u32 %v13195_v22, %v11132_v57  ;;  %v13158_v24 = vld [vmem:[#allocation2 + $0x1c] sm:$0xf]  ;;  %v11129_v19 = vor.u32 %v13192_v56, %v11126_v44 }
 0x26f   : > { %v4030_v9 = vpop.f32.mrf.mxu2  ;;  %v4053_v54 = vpop.f32.mrf.mxu3  ;;  %v11197_v39 = vor.u32 %v13211_v55, %v11196_v6  ;;  %v11193_v33 = vor.u32 %v13208_v20, %v11190_v1  ;;  %v11125_v25 = vor.u32 %v13193_v43, %v11124_v58  ;;  %v13255_v6 = vld [vmem:[%s18837_s4 + $0x6f4] sm:$0xf0]  ;;  %v13236_v55 = vld [vmem:[%s18837_s4 + $0x664] sm:$0xf]  ;;  %v11398_v20 = vld [vmem:[%s18837_s4 + $0x6e8] sm:$0xf0] }
 0x270   : > { %v808_v15 = vadd.f32 %v798_v5, %v750_v47  ;;  %v809_v34 = vadd.f32 %v799_v26, %v751_v63  ;;  %v4054_v3 = vadd.f32 %v4053_v54, %v4030_v9  ;;  %4637 = vmatpush.bf16.msrb.mxu1 %v11205_v7  ;;  %v13238_v47 = vld [vmem:[%s18837_s4 + $0x674] sm:$0xf]  ;;  %v11342_v63 = vld [vmem:[%s18837_s4 + $0x678] sm:$0xf0]  ;;  %v13237_v1 = vld [vmem:[%s18837_s4 + $0x664] sm:$0xf0] }
 0x271   : > { %4614 = vmatpush.bf16.msrb.mxu0 %v11141_v8  ;;  %4661 = vmatpush.bf16.msrb.mxu2 %v11137_v4  ;;  %v13254_v26 = vld [vmem:[%s18837_s4 + $0x6f4] sm:$0xf]  ;;  %v11345_v9 = vor.u32 %v13238_v47, %v11342_v63  ;;  %v11406_v7 = vld [vmem:[%s18837_s4 + $0x6f8] sm:$0xf0]  ;;  %v11396_v58 = vld [vmem:[%s18837_s4 + $0x6e0] sm:$0xf] }
 0x272   : > { %v957_v31 = vpop.permute.xlu1 %956  ;;  %v866_v28 = vadd.f32 %v856_v42, %v808_v15  ;;  %v867_v29 = vadd.f32 %v857_v46, %v809_v34  ;;  %v16929_v17 = vadd.f32 %v4054_v3, %v16646_v51  ;;  %4684 = vmatpush.bf16.msrb.mxu3 %v11201_v38  ;;  %v11409_v22 = vor.u32 %v13254_v26, %v11406_v7  ;;  %v11340_v15 = vld [vmem:[%s18837_s4 + $0x670] sm:$0xf]  ;;  %v13239_v34 = vld [vmem:[%s18837_s4 + $0x674] sm:$0xf0]  ;;  %v11318_v47 = vld [vmem:[%s18837_s4 + $0x648] sm:$0xf0] }
 0x273   : > { %v899_v11 = vpop.permute.xlu0 %898  ;;  %v972_v51 = vmul.f32 %v16447_v40, %v957_v31  ;;  %v973_v0 = vmul.f32 %v16486_v14, %v957_v31  ;;  %v13209_v40 = vld [vmem:[%s18837_s4 + $0x584] sm:$0xf0]  ;;  %v11341_v54 = vor.u32 %v13239_v34, %v11340_v15  ;;  %v11404_v38 = vld [vmem:[%s18837_s4 + $0x6f0] sm:$0xf]  ;;  %v11380_v34 = vld [vmem:[%s18837_s4 + $0x6c0] sm:$0xf] }
 0x274   : > { %v914_v52 = vmul.f32 %v16385_v16, %v899_v11  ;;  %v915_v60 = vmul.f32 %v16387_v37, %v899_v11  ;;  %v13159_v59 = vld [vmem:[#allocation2 + $0x1c] sm:$0xf0]  ;;  %v10958_v13 = vld [vmem:[#allocation2 + $0x20] sm:$0xf0]  ;;  %4638 = vmatpush.bf16.msrb.mxu1 %v11197_v39  ;;  %v11405_v31 = vor.u32 %v13255_v6, %v11404_v38  ;;  %v13233_v15 = vld [vmem:[%s18837_s4 + $0x644] sm:$0xf0] }
 0x275   : > { %v10957_v61 = vor.u32 %v13159_v59, %v10956_v12  ;;  %v10961_v35 = vor.u32 %v13158_v24, %v10958_v13  ;;  %4615 = vmatpush.bf16.msrb.mxu0 %v11133_v53  ;;  %v11188_v16 = vld [vmem:[%s18837_s4 + $0x580] sm:$0xf]  ;;  %4662 = vmatpush.bf16.msrb.mxu2 %v11129_v19  ;;  %v11334_v12 = vld [vmem:[%s18837_s4 + $0x668] sm:$0xf0]  ;;  %v13252_v53 = vld [vmem:[%s18837_s4 + $0x6e4] sm:$0xf] }
 0x276   : > { %v924_v5 = vadd.f32 %v914_v52, %v866_v28  ;;  %v925_v62 = vadd.f32 %v915_v60, %v867_v29  ;;  %v11189_v8 = vor.u32 %v13209_v40, %v11188_v16  ;;  %4685 = vmatpush.bf16.msrb.mxu3 %v11193_v33  ;;  %v11337_v44 = vor.u32 %v13236_v55, %v11334_v12  ;;  %v11332_v39 = vld [vmem:[%s18837_s4 + $0x660] sm:$0xf]  ;;  %v13253_v52 = vld [vmem:[%s18837_s4 + $0x6e4] sm:$0xf0]  ;;  %v13234_v60 = vld [vmem:[%s18837_s4 + $0x654] sm:$0xf] }
 0x277   : > { %4315 = vmatmul.bf16.gmra.mxu0 %v10957_v61  ;;  %4338 = vmatmul.bf16.gmra.mxu1 %v10961_v35  ;;  %v11401_v11 = vor.u32 %v13252_v53, %v11398_v20  ;;  %v11333_v43 = vor.u32 %v13237_v1, %v11332_v39  ;;  %v11397_v59 = vor.u32 %v13253_v52, %v11396_v58  ;;  %v13250_v13 = vld [vmem:[%s18837_s4 + $0x6d4] sm:$0xf]  ;;  %v11324_v33 = vld [vmem:[%s18837_s4 + $0x650] sm:$0xf]  ;;  %v13249_v6 = vld [vmem:[%s18837_s4 + $0x6c4] sm:$0xf0] }
 0x278   : > { %v982_v37 = vadd.f32 %v972_v51, %v924_v5  ;;  %v983_v14 = vadd.f32 %v973_v0, %v925_v62  ;;  %4361 = vmatmul.bf16.gmra.mxu2 %v10957_v61  ;;  %4384 = vmatmul.bf16.gmra.mxu3 %v10961_v35  ;;  %v11326_v51 = vld [vmem:[%s18837_s4 + $0x658] sm:$0xf0]  ;;  %v17014_v5 = vpop.f32.mrf.mxu0  ;;  %v17016_v62 = vpop.f32.mrf.mxu1  ;;  %v11388_v16 = vld [vmem:[%s18837_s4 + $0x6d0] sm:$0xf]  ;;  %v13230_v55 = vld [vmem:[%s18837_s4 + $0x634] sm:$0xf] }
 0x279   : > { %4616 = vmatpush.bf16.msrb.mxu0 %v11125_v25  ;;  %5010 = vmatpush.bf16.msra.mxu2 %v11345_v9  ;;  %v11329_v24 = vor.u32 %v13234_v60, %v11326_v51  ;;  %v11390_v0 = vld [vmem:[%s18837_s4 + $0x6d8] sm:$0xf0]  ;;  %v13235_v25 = vld [vmem:[%s18837_s4 + $0x654] sm:$0xf0]  ;;  %v11382_v9 = vld [vmem:[%s18837_s4 + $0x6c8] sm:$0xf0] }
 0x27a   : > { %v992_v4 = vmax.f32 %v982_v37, 0.0  ;;  %v993_v57 = vmax.f32 %v983_v14, 0.0  ;;  %5033 = vmatpush.bf16.msra.mxu3 %v11409_v22  ;;  %4639 = vmatpush.bf16.msrb.mxu1 %v11189_v8  ;;  %v11393_v19 = vor.u32 %v13250_v13, %v11390_v0  ;;  %v11325_v40 = vor.u32 %v13235_v25, %v11324_v33  ;;  %v13251_v37 = vld [vmem:[%s18837_s4 + $0x6d4] sm:$0xf0]  ;;  %v13232_v14 = vld [vmem:[%s18837_s4 + $0x644] sm:$0xf] }
 0x27b   : > { %v11389_v63 = vor.u32 %v13251_v37, %v11388_v16  ;;  %v11321_v26 = vor.u32 %v13232_v14, %v11318_v47  ;;  %v13248_v8 = vld [vmem:[%s18837_s4 + $0x6c4] sm:$0xf]  ;;  %v11316_v22 = vld [vmem:[%s18837_s4 + $0x640] sm:$0xf]  ;;  %v13246_v53 = vld [vmem:[%s18837_s4 + $0x6b4] sm:$0xf] }
 0x27c   : > { %v1027_v46 = vsel %vm1018_vm11, %v992_v4, 0.0  ;;  %v1028_v3 = vsel %vm1018_vm11, %v993_v57, 0.0  ;;  %v11385_v7 = vor.u32 %v13248_v8, %v11382_v9  ;;  %v17042_v4 = vpop.f32.mrf.mxu2  ;;  %v17044_v57 = vpop.f32.mrf.mxu3  ;;  %v11317_v38 = vor.u32 %v13233_v15, %v11316_v22  ;;  %v13247_v39 = vld [vmem:[%s18837_s4 + $0x6b4] sm:$0xf0]  ;;  %v11302_v52 = vld [vmem:[%s18837_s4 + $0x628] sm:$0xf0] }
 0x27d   : > { %v1033_v56 = vpack.c.bf16 %v1028_v3, %v1027_v46  ;;  %4964 = vmatpush.bf16.msra.mxu0 %v11341_v54  ;;  %5011 = vmatpush.bf16.msra.mxu2 %v11337_v44  ;;  %v11310_v46 = vld [vmem:[%s18837_s4 + $0x638] sm:$0xf0]  ;;  %v11308_v44 = vld [vmem:[%s18837_s4 + $0x630] sm:$0xf]  ;;  %v13244_v60 = vld [vmem:[%s18837_s4 + $0x6a4] sm:$0xf] }
 0x27e   : > { %4987 = vmatpush.bf16.msra.mxu1 %v11405_v31  ;;  %5034 = vmatpush.bf16.msra.mxu3 %v11401_v11  ;;  %v11381_v31 = vor.u32 %v13249_v6, %v11380_v34  ;;  %v11313_v12 = vor.u32 %v13230_v55, %v11310_v46  ;;  %v19047_v33 = vld [vmem:[#allocation20_spill] sm:$0xff]  ;;  %v13229_v37 = vld [vmem:[%s18837_s4 + $0x624] sm:$0xf0]  ;;  %v11364_v14 = vld [vmem:[%s18837_s4 + $0x6a0] sm:$0xf] }
 0x27f   : > { %v4128_v28 = vunpack.c.l.b16 %v1033_v56  ;;  %v4129_v29 = vunpack.c.h.b16 %v1033_v56  ;;  %v11374_v56 = vld [vmem:[%s18837_s4 + $0x6b8] sm:$0xf0] }
 0x280   : > { %v11377_v11 = vor.u32 %v13246_v53, %v11374_v56  ;;  %v11358_v22 = vld [vmem:[%s18837_s4 + $0x698] sm:$0xf0]  ;;  %v13227_v53 = vld [vmem:[%s18837_s4 + $0x614] sm:$0xf0]  ;;  %v11356_v56 = vld [vmem:[%s18837_s4 + $0x690] sm:$0xf] }
 0x281   : > { %v4134_v61 = vpack.c.b16 %v4128_v28, %v4128_v28  ;;  %v4135_v35 = vpack.c.b16 %v4129_v29, %v4129_v29  ;;  %4965 = vmatpush.bf16.msra.mxu0 %v11333_v43  ;;  %5012 = vmatpush.bf16.msra.mxu2 %v11329_v24  ;;  %v13231_v28 = vld [vmem:[%s18837_s4 + $0x634] sm:$0xf0]  ;;  %v11372_v29 = vld [vmem:[%s18837_s4 + $0x6b0] sm:$0xf]  ;;  %v13228_v43 = vld [vmem:[%s18837_s4 + $0x624] sm:$0xf] }
 0x282   : > { %4988 = vmatpush.bf16.msra.mxu1 %v11397_v59  ;;  %5035 = vmatpush.bf16.msra.mxu3 %v11393_v19  ;;  %v11309_v1 = vor.u32 %v13231_v28, %v11308_v44  ;;  %v11373_v58 = vor.u32 %v13247_v39, %v11372_v29  ;;  %v11305_v59 = vor.u32 %v13228_v43, %v11302_v52  ;;  %v11366_v24 = vld [vmem:[%s18837_s4 + $0x6a8] sm:$0xf0]  ;;  %v19049_v28 = vld [vmem:[#allocation29_spill] sm:$0xff]  ;;  %v13240_v52 = vld [vmem:[%s18837_s4 + $0x684] sm:$0xf] }
 0x283   : > { %v11369_v13 = vor.u32 %v13244_v60, %v11366_v24  ;;  %v19050_v29 = vld [vmem:[#allocation41_spill] sm:$0xff]  ;;  %v11286_v43 = vld [vmem:[%s18837_s4 + $0x608] sm:$0xf0] }
 0x284   : > { %v11350_v24 = vld [vmem:[%s18837_s4 + $0x688] sm:$0xf0] }
 0x285   : > { %4966 = vmatpush.bf16.msra.mxu0 %v11325_v40  ;;  %5013 = vmatpush.bf16.msra.mxu2 %v11321_v26  ;;  %v11300_v40 = vld [vmem:[%s18837_s4 + $0x620] sm:$0xf]  ;;  %v11294_v26 = vld [vmem:[%s18837_s4 + $0x618] sm:$0xf0] }
 0x286   : > { %4989 = vmatpush.bf16.msra.mxu1 %v11389_v63  ;;  %5036 = vmatpush.bf16.msra.mxu3 %v11385_v7  ;;  %v11301_v47 = vor.u32 %v13229_v37, %v11300_v40  ;;  %v13226_v63 = vld [vmem:[%s18837_s4 + $0x614] sm:$0xf] }
 0x287   : > { %4320 = vmatmul.bf16.gmra.mxu0 %v4134_v61  ;;  %4343 = vmatmul.bf16.gmra.mxu1 %v4135_v35  ;;  %v11297_v9 = vor.u32 %v13226_v63, %v11294_v26  ;;  %v13242_v7 = vld [vmem:[%s18837_s4 + $0x694] sm:$0xf]  ;;  %v11566_v26 = vld [vmem:[%s18837_s4 + $0x7f8] sm:$0xf0] }
 0x288   : > { %4366 = vmatmul.bf16.gmra.mxu2 %v4134_v61  ;;  %4389 = vmatmul.bf16.gmra.mxu3 %v4135_v35  ;;  %v11361_v15 = vor.u32 %v13242_v7, %v11358_v22 }
 0x289   : > { %4967 = vmatpush.bf16.msra.mxu0 %v11317_v38  ;;  %5014 = vmatpush.bf16.msra.mxu2 %v11313_v12  ;;  %v11292_v12 = vld [vmem:[%s18837_s4 + $0x610] sm:$0xf] }
 0x28a   : > { %4990 = vmatpush.bf16.msra.mxu1 %v11381_v31  ;;  %5037 = vmatpush.bf16.msra.mxu3 %v11377_v11  ;;  %v11293_v11 = vor.u32 %v13227_v53, %v11292_v12  ;;  %v11558_v12 = vld [vmem:[%s18837_s4 + $0x7e8] sm:$0xf0] }
 0x28d   : > { %v3989_v54 = vpop.f32.mrf.mxu0  ;;  %4968 = vmatpush.bf16.msra.mxu0 %v11309_v1  ;;  %5015 = vmatpush.bf16.msra.mxu2 %v11305_v59 }
 0x28e   : > { %v4012_v3 = vpop.f32.mrf.mxu1  ;;  %4991 = vmatpush.bf16.msra.mxu1 %v11373_v58  ;;  %5038 = vmatpush.bf16.msra.mxu3 %v11369_v13  ;;  %v13224_v58 = vld [vmem:[%s18837_s4 + $0x604] sm:$0xf]  ;;  %v11284_v13 = vld [vmem:[%s18837_s4 + $0x600] sm:$0xf] }
 0x28f   : > { %v4013_v20 = vadd.f32 %v4012_v3, %v3989_v54  ;;  %v11289_v59 = vor.u32 %v13224_v58, %v11286_v43  ;;  %v13285_v58 = vld [vmem:[%s18837_s4 + $0x7e4] sm:$0xf0]  ;;  %v13266_v43 = vld [vmem:[%s18837_s4 + $0x754] sm:$0xf] }
 0x291   : > { %v17092_v51 = vadd.f32 %v4013_v20, %v16668_v18  ;;  %v19048_v18 = vld [vmem:[#allocation15_spill] sm:$0xff]  ;;  %4969 = vmatpush.bf16.msra.mxu0 %v11301_v47  ;;  %5016 = vmatpush.bf16.msra.mxu2 %v11297_v9  ;;  %v11502_v47 = vld [vmem:[%s18837_s4 + $0x778] sm:$0xf0]  ;;  %v13271_v9 = vld [vmem:[%s18837_s4 + $0x774] sm:$0xf0] }
 0x292   : > { %5039 = vmatpush.bf16.msra.mxu3 %v11361_v15  ;;  %v11564_v15 = vld [vmem:[%s18837_s4 + $0x7f0] sm:$0xf] }
 0x293   : > { %v4035_v0 = vpop.f32.mrf.mxu2 }
 0x294   : > { %v4058_v61 = vpop.f32.mrf.mxu3 }
 0x295   : > { %v4059_v35 = vadd.f32 %v4058_v61, %v4035_v0  ;;  %v17097_v19 = vpop.f32.mrf.mxu0  ;;  %v13225_v0 = vld [vmem:[%s18837_s4 + $0x604] sm:$0xf0]  ;;  %4970 = vmatpush.bf16.msra.mxu0 %v11293_v11  ;;  %5017 = vmatpush.bf16.msra.mxu2 %v11289_v59  ;;  %v19052_v11 = vld [vmem:[#allocation28_spill] sm:$0xff] }
 0x296   : > { %v17101_v25 = vpop.f32.mrf.mxu1  ;;  %v11285_v61 = vor.u32 %v13225_v0, %v11284_v13  ;;  %v13282_v13 = vld [vmem:[%s18837_s4 + $0x7d4] sm:$0xf]  ;;  %v11550_v0 = vld [vmem:[%s18837_s4 + $0x7d8] sm:$0xf0] }
 0x297   : > { %4617 = vmatmul.bf16.vlgmr.msrb.gmra.mxu0 %v19047_v33  ;;  %4640 = vmatmul.bf16.vlgmr.msrb.gmra.mxu1 %v19048_v18  ;;  %v17104_v16 = vadd.f32 %v4059_v35, %v16728_v23  ;;  %v13245_v23 = vld [vmem:[%s18837_s4 + $0x6a4] sm:$0xf0]  ;;  %v11348_v35 = vld [vmem:[%s18837_s4 + $0x680] sm:$0xf] }
 0x298   : > { %4663 = vmatmul.bf16.vlgmr.msrb.gmra.mxu2 %v19047_v33  ;;  %4686 = vmatmul.bf16.vlgmr.msrb.gmra.mxu3 %v19048_v18  ;;  %v11365_v8 = vor.u32 %v13245_v23, %v11364_v14  ;;  %v13241_v33 = vld [vmem:[%s18837_s4 + $0x684] sm:$0xf0]  ;;  %v13270_v14 = vld [vmem:[%s18837_s4 + $0x774] sm:$0xf] }
 0x299   : > { %v11349_v18 = vor.u32 %v13241_v33, %v11348_v35  ;;  %4971 = vmatpush.bf16.msra.mxu0 %v11285_v61  ;;  %v13286_v23 = vld [vmem:[%s18837_s4 + $0x7f4] sm:$0xf]  ;;  %v11505_v63 = vor.u32 %v13270_v14, %v11502_v47  ;;  %v11553_v61 = vor.u32 %v13282_v13, %v11550_v0  ;;  %v13267_v35 = vld [vmem:[%s18837_s4 + $0x754] sm:$0xf0]  ;;  %v11548_v33 = vld [vmem:[%s18837_s4 + $0x7d0] sm:$0xf] }
 0x29a   : > { %4992 = vmatpush.bf16.msra.mxu1 %v11365_v8  ;;  %v11500_v8 = vld [vmem:[%s18837_s4 + $0x770] sm:$0xf]  ;;  %v11569_v7 = vor.u32 %v13286_v23, %v11566_v26  ;;  %v13264_v14 = vld [vmem:[%s18837_s4 + $0x744] sm:$0xf]  ;;  %v11478_v47 = vld [vmem:[%s18837_s4 + $0x748] sm:$0xf0] }
 0x29b   : > { %v17132_v34 = vpop.f32.mrf.mxu2  ;;  %v11501_v22 = vor.u32 %v13271_v9, %v11500_v8  ;;  %5321 = vmatpush.bf16.msrb.mxu2 %v11505_v63  ;;  %v13280_v23 = vld [vmem:[%s18837_s4 + $0x7c4] sm:$0xf]  ;;  %v11481_v63 = vor.u32 %v13264_v14, %v11478_v47  ;;  %v11542_v26 = vld [vmem:[%s18837_s4 + $0x7c8] sm:$0xf0]  ;;  %v11476_v8 = vld [vmem:[%s18837_s4 + $0x740] sm:$0xf] }
 0x29c   : > { %v17134_v54 = vpop.f32.mrf.mxu3  ;;  %v13265_v9 = vld [vmem:[%s18837_s4 + $0x744] sm:$0xf0]  ;;  %v13258_v14 = vld [vmem:[%s18837_s4 + $0x714] sm:$0xf]  ;;  %v11454_v47 = vld [vmem:[%s18837_s4 + $0x718] sm:$0xf0] }
 0x29d   : > { %v3994_v38 = vpop.f32.mrf.mxu0  ;;  %5275 = vmatpush.bf16.msrb.mxu0 %v11501_v22  ;;  %v11540_v22 = vld [vmem:[%s18837_s4 + $0x7c0] sm:$0xf] }
 0x29e   : > { %v4017_v6 = vpop.f32.mrf.mxu1 }
 0x29f   : > { %v4018_v55 = vadd.f32 %v4017_v6, %v3994_v38  ;;  %v13287_v38 = vld [vmem:[%s18837_s4 + $0x7f4] sm:$0xf0]  ;;  %v13268_v6 = vld [vmem:[%s18837_s4 + $0x764] sm:$0xf] }
 0x2a1   : > { %v17137_v46 = vadd.f32 %v4018_v55, %v16757_v2  ;;  %v13243_v2 = vld [vmem:[%s18837_s4 + $0x694] sm:$0xf0]  ;;  %v11565_v55 = vor.u32 %v13287_v38, %v11564_v15  ;;  %v13281_v15 = vld [vmem:[%s18837_s4 + $0x7c4] sm:$0xf0]  ;;  %v13262_v38 = vld [vmem:[%s18837_s4 + $0x734] sm:$0xf] }
 0x2a2   : > { %v11357_v1 = vor.u32 %v13243_v2, %v11356_v56  ;;  %v4442_v2 = vpack.c.b16 %v19052_v11, %v19052_v11 }
 0x2a3   : > { %v4040_v3 = vpop.f32.mrf.mxu2 }
 0x2a4   : > { %v4063_v31 = vpop.f32.mrf.mxu3  ;;  %4993 = vmatpush.bf16.msra.mxu1 %v11357_v1 }
 0x2a5   : > { %v4064_v44 = vadd.f32 %v4063_v31, %v4040_v3  ;;  %v3996_v20 = vpop.f32.mrf.mxu0  ;;  %v11494_v3 = vld [vmem:[%s18837_s4 + $0x768] sm:$0xf0]  ;;  %v13284_v31 = vld [vmem:[%s18837_s4 + $0x7e4] sm:$0xf] }
 0x2a6   : > { %v4019_v39 = vpop.f32.mrf.mxu1  ;;  %v11497_v53 = vor.u32 %v13268_v6, %v11494_v3  ;;  %v11561_v56 = vor.u32 %v13284_v31, %v11558_v12  ;;  %v11477_v6 = vor.u32 %v13265_v9, %v11476_v8  ;;  %v13278_v3 = vld [vmem:[%s18837_s4 + $0x7b4] sm:$0xf]  ;;  %v11534_v31 = vld [vmem:[%s18837_s4 + $0x7b8] sm:$0xf0]  ;;  %v11541_v12 = vor.u32 %v13281_v15, %v11540_v22 }
 0x2a7   : > { %4622 = vmatmul.bf16.gmra.mxu0 %v19049_v28  ;;  %4645 = vmatmul.bf16.gmra.mxu1 %v19050_v29  ;;  %v17163_v60 = vadd.f32 %v4064_v44, %v16796_v45  ;;  %v11353_v45 = vor.u32 %v13240_v52, %v11350_v24  ;;  %v19051_v44 = vld [vmem:[#allocation31_spill] sm:$0xff]  ;;  %v11556_v39 = vld [vmem:[%s18837_s4 + $0x7e0] sm:$0xf]  ;;  %v11486_v52 = vld [vmem:[%s18837_s4 + $0x758] sm:$0xf0]  ;;  %v11537_v11 = vor.u32 %v13278_v3, %v11534_v31 }
 0x2a8   : > { %4668 = vmatmul.bf16.gmra.mxu2 %v19049_v28  ;;  %4691 = vmatmul.bf16.gmra.mxu3 %v19050_v29  ;;  %v4441_v20 = vpack.c.b16 %v19051_v44, %v19051_v44  ;;  %v11492_v28 = vld [vmem:[%s18837_s4 + $0x760] sm:$0xf]  ;;  %v13269_v29 = vld [vmem:[%s18837_s4 + $0x764] sm:$0xf0]  ;;  %v11557_v59 = vor.u32 %v13285_v58, %v11556_v39  ;;  %v11489_v24 = vor.u32 %v13266_v43, %v11486_v52  ;;  %v13263_v44 = vld [vmem:[%s18837_s4 + $0x734] sm:$0xf0] }
 0x2a9   : > { %5040 = vmatpush.bf16.msra.mxu3 %v11353_v45  ;;  %4994 = vmatpush.bf16.msra.mxu1 %v11349_v18  ;;  %v11493_v1 = vor.u32 %v13269_v29, %v11492_v28  ;;  %v11484_v45 = vld [vmem:[%s18837_s4 + $0x750] sm:$0xf]  ;;  %v13283_v18 = vld [vmem:[%s18837_s4 + $0x7d4] sm:$0xf0]  ;;  %v13260_v28 = vld [vmem:[%s18837_s4 + $0x724] sm:$0xf] }
 0x2aa   : > { %5322 = vmatpush.bf16.msrb.mxu2 %v11497_v53  ;;  %v11462_v29 = vld [vmem:[%s18837_s4 + $0x728] sm:$0xf0]  ;;  %v13276_v43 = vld [vmem:[%s18837_s4 + $0x7a4] sm:$0xf]  ;;  %v11518_v8 = vld [vmem:[%s18837_s4 + $0x798] sm:$0xf0] }
 0x2ab   : > { %v4042_v40 = vpop.f32.mrf.mxu2  ;;  %5276 = vmatpush.bf16.msrb.mxu0 %v11493_v1  ;;  %v11465_v58 = vor.u32 %v13260_v28, %v11462_v29  ;;  %v11526_v52 = vld [vmem:[%s18837_s4 + $0x7a8] sm:$0xf0]  ;;  %v11452_v3 = vld [vmem:[%s18837_s4 + $0x710] sm:$0xf]  ;;  %v13259_v31 = vld [vmem:[%s18837_s4 + $0x714] sm:$0xf0] }
 0x2ac   : > { %v4065_v37 = vpop.f32.mrf.mxu3  ;;  %v11485_v40 = vor.u32 %v13267_v35, %v11484_v45  ;;  %v11529_v0 = vor.u32 %v13276_v43, %v11526_v52  ;;  %v19054_v35 = vld [vmem:[#allocation13_spill] sm:$0xff]  ;;  %v11510_v28 = vld [vmem:[%s18837_s4 + $0x788] sm:$0xf0]  ;;  %v11444_v29 = vld [vmem:[%s18837_s4 + $0x700] sm:$0xf] }
 0x2ad   : > { %5344 = vmatpush.bf16.msrb.mxu3 %v11569_v7  ;;  %5298 = vmatpush.bf16.msrb.mxu1 %v11565_v55  ;;  %v11549_v37 = vor.u32 %v13283_v18, %v11548_v33  ;;  %v11545_v7 = vor.u32 %v13280_v23, %v11542_v26  ;;  %v11470_v55 = vld [vmem:[%s18837_s4 + $0x738] sm:$0xf0]  ;;  %v11460_v33 = vld [vmem:[%s18837_s4 + $0x720] sm:$0xf]  ;;  %v13261_v18 = vld [vmem:[%s18837_s4 + $0x724] sm:$0xf0] }
 0x2ae   : > { %5323 = vmatpush.bf16.msrb.mxu2 %v11489_v24  ;;  %v11473_v53 = vor.u32 %v13262_v38, %v11470_v55  ;;  %v13274_v26 = vld [vmem:[%s18837_s4 + $0x794] sm:$0xf]  ;;  %v13273_v43 = vld [vmem:[%s18837_s4 + $0x784] sm:$0xf0] }
 0x2af   : > { %5277 = vmatpush.bf16.msrb.mxu0 %v11485_v40  ;;  %v11461_v40 = vor.u32 %v13261_v18, %v11460_v33  ;;  %v11521_v22 = vor.u32 %v13274_v26, %v11518_v8  ;;  %v19056_v55 = vld [vmem:[#allocation36_spill] sm:$0xff]  ;;  %v13303_v18 = vld [vmem:[%s18837_s4 + $0x874] sm:$0xf0]  ;;  %v13316_v26 = vld [vmem:[%s18837_s4 + $0x8e4] sm:$0xf] }
 0x2b0   : > { %v11660_v33 = vld [vmem:[%s18837_s4 + $0x870] sm:$0xf]  ;;  %v11718_v8 = vld [vmem:[%s18837_s4 + $0x8e8] sm:$0xf0] }
 0x2b1   : > { %5345 = vmatpush.bf16.msrb.mxu3 %v11561_v56  ;;  %5299 = vmatpush.bf16.msrb.mxu1 %v11557_v59  ;;  %v11468_v56 = vld [vmem:[%s18837_s4 + $0x730] sm:$0xf] }
 0x2b2   : > { %5324 = vmatpush.bf16.msrb.mxu2 %v11481_v63  ;;  %v11469_v39 = vor.u32 %v13263_v44, %v11468_v56  ;;  %v11457_v63 = vor.u32 %v13258_v14, %v11454_v47  ;;  %v13256_v56 = vld [vmem:[%s18837_s4 + $0x704] sm:$0xf]  ;;  %v11446_v44 = vld [vmem:[%s18837_s4 + $0x708] sm:$0xf0]  ;;  %v13319_v14 = vld [vmem:[%s18837_s4 + $0x8f4] sm:$0xf0] }
 0x2b3   : > { %5278 = vmatpush.bf16.msrb.mxu0 %v11477_v6  ;;  %v19055_v6 = vld [vmem:[#allocation33_spill] sm:$0xff]  ;;  %v13300_v47 = vld [vmem:[%s18837_s4 + $0x864] sm:$0xf] }
 0x2b5   : > { %5346 = vmatpush.bf16.msrb.mxu3 %v11553_v61  ;;  %5300 = vmatpush.bf16.msrb.mxu1 %v11549_v37  ;;  %v19053_v61 = vld [vmem:[#allocation12_spill] sm:$0xff]  ;;  %v13277_v37 = vld [vmem:[%s18837_s4 + $0x7a4] sm:$0xf0] }
 0x2b6   : > { %5325 = vmatpush.bf16.msrb.mxu2 %v11473_v53  ;;  %v13275_v53 = vld [vmem:[%s18837_s4 + $0x794] sm:$0xf0] }
 0x2b7   : > { %4627 = vmatmul.bf16.gmra.mxu0 %v4441_v20  ;;  %4650 = vmatmul.bf16.gmra.mxu1 %v4442_v2 }
 0x2b8   : > { %4673 = vmatmul.bf16.gmra.mxu2 %v4441_v20  ;;  %4696 = vmatmul.bf16.gmra.mxu3 %v4442_v2  ;;  %v11532_v20 = vld [vmem:[%s18837_s4 + $0x7b0] sm:$0xf]  ;;  %v13279_v2 = vld [vmem:[%s18837_s4 + $0x7b4] sm:$0xf0] }
 0x2b9   : > { %5347 = vmatpush.bf16.msrb.mxu3 %v11545_v7  ;;  %5301 = vmatpush.bf16.msrb.mxu1 %v11541_v12  ;;  %v11533_v1 = vor.u32 %v13279_v2, %v11532_v20  ;;  %v11516_v12 = vld [vmem:[%s18837_s4 + $0x790] sm:$0xf]  ;;  %v13272_v2 = vld [vmem:[%s18837_s4 + $0x784] sm:$0xf] }
 0x2ba   : > { %5279 = vmatpush.bf16.msrb.mxu0 %v11469_v39  ;;  %5326 = vmatpush.bf16.msrb.mxu2 %v11465_v58  ;;  %v11517_v20 = vor.u32 %v13275_v53, %v11516_v12  ;;  %v11513_v39 = vor.u32 %v13272_v2, %v11510_v28  ;;  %v11508_v58 = vld [vmem:[%s18837_s4 + $0x780] sm:$0xf]  ;;  %v13317_v12 = vld [vmem:[%s18837_s4 + $0x8e4] sm:$0xf0]  ;;  %v11646_v53 = vld [vmem:[%s18837_s4 + $0x858] sm:$0xf0] }
 0x2bb   : > { %v11644_v2 = vld [vmem:[%s18837_s4 + $0x850] sm:$0xf] }
 0x2bd   : > { %5348 = vmatpush.bf16.msrb.mxu3 %v11537_v11  ;;  %5302 = vmatpush.bf16.msrb.mxu1 %v11533_v1  ;;  %v11449_v11 = vor.u32 %v13256_v56, %v11446_v44  ;;  %v13257_v1 = vld [vmem:[%s18837_s4 + $0x704] sm:$0xf0] }
 0x2be   : > { %5280 = vmatpush.bf16.msrb.mxu0 %v11461_v40  ;;  %5327 = vmatpush.bf16.msrb.mxu2 %v11457_v63  ;;  %v11445_v52 = vor.u32 %v13257_v1, %v11444_v29  ;;  %v11661_v40 = vor.u32 %v13303_v18, %v11660_v33  ;;  %v11654_v63 = vld [vmem:[%s18837_s4 + $0x868] sm:$0xf0]  ;;  %v13299_v29 = vld [vmem:[%s18837_s4 + $0x854] sm:$0xf0]  ;;  %v11636_v18 = vld [vmem:[%s18837_s4 + $0x840] sm:$0xf] }
 0x2bf   : > { %v13315_v1 = vld [vmem:[%s18837_s4 + $0x8d4] sm:$0xf0] }
 0x2c1   : > { %5349 = vmatpush.bf16.msrb.mxu3 %v11529_v0  ;;  %v13318_v0 = vld [vmem:[%s18837_s4 + $0x8f4] sm:$0xf] }
 0x2c2   : > { %5328 = vmatpush.bf16.msrb.mxu2 %v11449_v11  ;;  %v11710_v11 = vld [vmem:[%s18837_s4 + $0x8d8] sm:$0xf0] }
 0x2c4   : > { %v4311_v59 = vpop.f32.mrf.mxu0  ;;  %v4334_v24 = vpop.f32.mrf.mxu1 }
 0x2c5   : > { %v4335_v13 = vadd.f32 %v4334_v24, %v4311_v59  ;;  %5350 = vmatpush.bf16.msrb.mxu3 %v11521_v22  ;;  %v11509_v59 = vor.u32 %v13273_v43, %v11508_v58  ;;  %v13302_v24 = vld [vmem:[%s18837_s4 + $0x874] sm:$0xf]  ;;  %v11652_v22 = vld [vmem:[%s18837_s4 + $0x860] sm:$0xf]  ;;  %v11645_v58 = vor.u32 %v13299_v29, %v11644_v2  ;;  %v11622_v2 = vld [vmem:[%s18837_s4 + $0x828] sm:$0xf0] }
 0x2c7   : > { %v17319_v45 = vadd.f32 %v4335_v13, %v16896_v48  ;;  %4972 = vmatmul.bf16.vlgmr.msra.gmra.mxu0 %v19053_v61  ;;  %4995 = vmatmul.bf16.vlgmr.msra.gmra.mxu1 %v19054_v35  ;;  %v11524_v48 = vld [vmem:[%s18837_s4 + $0x7a0] sm:$0xf]  ;;  %v11662_v13 = vld [vmem:[%s18837_s4 + $0x878] sm:$0xf0] }
 0x2c8   : > { %5018 = vmatmul.bf16.vlgmr.msra.gmra.mxu2 %v19053_v61  ;;  %5041 = vmatmul.bf16.vlgmr.msra.gmra.mxu3 %v19054_v35  ;;  %v11525_v23 = vor.u32 %v13277_v37, %v11524_v48  ;;  %v11665_v61 = vor.u32 %v13302_v24, %v11662_v13  ;;  %v11726_v35 = vld [vmem:[%s18837_s4 + $0x8f8] sm:$0xf0]  ;;  %v11724_v37 = vld [vmem:[%s18837_s4 + $0x8f0] sm:$0xf]  ;;  %v13312_v24 = vld [vmem:[%s18837_s4 + $0x8c4] sm:$0xf] }
 0x2c9   : > { %5351 = vmatpush.bf16.msrb.mxu3 %v11513_v39  ;;  %v11729_v48 = vor.u32 %v13318_v0, %v11726_v35  ;;  %v11708_v39 = vld [vmem:[%s18837_s4 + $0x8d0] sm:$0xf]  ;;  %v11702_v0 = vld [vmem:[%s18837_s4 + $0x8c8] sm:$0xf0] }
 0x2ca   : > { %5303 = vmatpush.bf16.msrb.mxu1 %v11525_v23  ;;  %5628 = vmatpush.bf16.msra.mxu2 %v11665_v61  ;;  %v11725_v23 = vor.u32 %v13319_v14, %v11724_v37  ;;  %v11709_v43 = vor.u32 %v13315_v1, %v11708_v39  ;;  %v11705_v33 = vor.u32 %v13312_v24, %v11702_v0  ;;  %v13313_v14 = vld [vmem:[%s18837_s4 + $0x8c4] sm:$0xf0]  ;;  %v13308_v39 = vld [vmem:[%s18837_s4 + $0x8a4] sm:$0xf]  ;;  %v11686_v1 = vld [vmem:[%s18837_s4 + $0x8a8] sm:$0xf0] }
 0x2cb   : > { %v4357_v9 = vpop.f32.mrf.mxu2  ;;  %v4380_v7 = vpop.f32.mrf.mxu3 }
 0x2cc   : > { %v4381_v15 = vadd.f32 %v4380_v7, %v4357_v9  ;;  %v11657_v9 = vor.u32 %v13300_v47, %v11654_v63  ;;  %v11721_v7 = vor.u32 %v13316_v26, %v11718_v8  ;;  %v17480_v61 = vpop.f32.mrf.mxu0  ;;  %v17482_v35 = vpop.f32.mrf.mxu1  ;;  %v13294_v47 = vld [vmem:[%s18837_s4 + $0x834] sm:$0xf] }
 0x2cd   : > { %5651 = vmatpush.bf16.msra.mxu3 %v11729_v48  ;;  %v13297_v48 = vld [vmem:[%s18837_s4 + $0x844] sm:$0xf0]  ;;  %v13310_v8 = vld [vmem:[%s18837_s4 + $0x8b4] sm:$0xf] }
 0x2ce   : > { %v17350_v38 = vadd.f32 %v4381_v15, %v16929_v17  ;;  %v11453_v17 = vor.u32 %v13259_v31, %v11452_v3  ;;  %5304 = vmatpush.bf16.msrb.mxu1 %v11517_v20  ;;  %5629 = vmatpush.bf16.msra.mxu2 %v11657_v9  ;;  %v13301_v15 = vld [vmem:[%s18837_s4 + $0x864] sm:$0xf0]  ;;  %v19058_v3 = vld [vmem:[#allocation34_spill] sm:$0xff]  ;;  %v13314_v20 = vld [vmem:[%s18837_s4 + $0x8d4] sm:$0xf]  ;;  %v11637_v37 = vor.u32 %v13297_v48, %v11636_v18 }
 0x2cf   : > { %v11653_v31 = vor.u32 %v13301_v15, %v11652_v22  ;;  %v11713_v28 = vor.u32 %v13314_v20, %v11710_v11  ;;  %v11694_v9 = vld [vmem:[%s18837_s4 + $0x8b8] sm:$0xf0]  ;;  %v13311_v20 = vld [vmem:[%s18837_s4 + $0x8b4] sm:$0xf0]  ;;  %v13292_v11 = vld [vmem:[%s18837_s4 + $0x824] sm:$0xf] }
 0x2d0   : > { %5281 = vmatpush.bf16.msrb.mxu0 %v11453_v17  ;;  %v13298_v17 = vld [vmem:[%s18837_s4 + $0x854] sm:$0xf]  ;;  %v11625_v29 = vor.u32 %v13292_v11, %v11622_v2  ;;  %v11620_v18 = vld [vmem:[%s18837_s4 + $0x820] sm:$0xf]  ;;  %v13293_v48 = vld [vmem:[%s18837_s4 + $0x824] sm:$0xf0] }
 0x2d1   : > { %5652 = vmatpush.bf16.msra.mxu3 %v11721_v7  ;;  %v11649_v44 = vor.u32 %v13298_v17, %v11646_v53  ;;  %v11697_v7 = vor.u32 %v13310_v8, %v11694_v9  ;;  %v19060_v17 = vld [vmem:[#allocation40_spill] sm:$0xff]  ;;  %v11678_v8 = vld [vmem:[%s18837_s4 + $0x898] sm:$0xf0]  ;;  %v11670_v2 = vld [vmem:[%s18837_s4 + $0x888] sm:$0xf0] }
 0x2d2   : > { %5305 = vmatpush.bf16.msrb.mxu1 %v11509_v59  ;;  %v11638_v59 = vld [vmem:[%s18837_s4 + $0x848] sm:$0xf0]  ;;  %v11628_v53 = vld [vmem:[%s18837_s4 + $0x830] sm:$0xf] }
 0x2d3   : > { %5630 = vmatpush.bf16.msra.mxu2 %v11649_v44  ;;  %v17508_v22 = vpop.f32.mrf.mxu2  ;;  %v17510_v15 = vpop.f32.mrf.mxu3  ;;  %v11692_v44 = vld [vmem:[%s18837_s4 + $0x8b0] sm:$0xf] }
 0x2d4   : > { %5282 = vmatpush.bf16.msrb.mxu0 %v11445_v52  ;;  %v13296_v52 = vld [vmem:[%s18837_s4 + $0x844] sm:$0xf]  ;;  %v11612_v9 = vld [vmem:[%s18837_s4 + $0x810] sm:$0xf] }
 0x2d5   : > { %5653 = vmatpush.bf16.msra.mxu3 %v11713_v28  ;;  %v11641_v13 = vor.u32 %v13296_v52, %v11638_v59  ;;  %v11693_v28 = vor.u32 %v13311_v20, %v11692_v44  ;;  %v13304_v44 = vld [vmem:[%s18837_s4 + $0x884] sm:$0xf] }
 0x2d6   : > { %5605 = vmatpush.bf16.msra.mxu1 %v11725_v23  ;;  %v11630_v23 = vld [vmem:[%s18837_s4 + $0x838] sm:$0xf0] }
 0x2d7   : > { %4977 = vmatmul.bf16.gmra.mxu0 %v19055_v6  ;;  %5000 = vmatmul.bf16.gmra.mxu1 %v19056_v55  ;;  %v11633_v26 = vor.u32 %v13294_v47, %v11630_v23  ;;  %v11614_v47 = vld [vmem:[%s18837_s4 + $0x818] sm:$0xf0] }
 0x2d8   : > { %5023 = vmatmul.bf16.gmra.mxu2 %v19055_v6  ;;  %5046 = vmatmul.bf16.gmra.mxu3 %v19056_v55  ;;  %v11716_v6 = vld [vmem:[%s18837_s4 + $0x8e0] sm:$0xf]  ;;  %v19057_v55 = vld [vmem:[#allocation32_spill] sm:$0xff] }
 0x2d9   : > { %5582 = vmatpush.bf16.msra.mxu0 %v11661_v40  ;;  %v11717_v56 = vor.u32 %v13317_v12, %v11716_v6  ;;  %5631 = vmatpush.bf16.msra.mxu2 %v11641_v13  ;;  %v11700_v40 = vld [vmem:[%s18837_s4 + $0x8c0] sm:$0xf]  ;;  %v19059_v12 = vld [vmem:[#allocation39_spill] sm:$0xff] }
 0x2da   : > { %5654 = vmatpush.bf16.msra.mxu3 %v11705_v33  ;;  %v11701_v63 = vor.u32 %v13313_v14, %v11700_v40  ;;  %v11684_v40 = vld [vmem:[%s18837_s4 + $0x8a0] sm:$0xf]  ;;  %v13309_v14 = vld [vmem:[%s18837_s4 + $0x8a4] sm:$0xf0] }
 0x2db   : > { %5606 = vmatpush.bf16.msra.mxu1 %v11717_v56  ;;  %v13295_v56 = vld [vmem:[%s18837_s4 + $0x834] sm:$0xf0]  ;;  %v11685_v23 = vor.u32 %v13309_v14, %v11684_v40 }
 0x2dd   : > { %5583 = vmatpush.bf16.msra.mxu0 %v11653_v31  ;;  %5632 = vmatpush.bf16.msra.mxu2 %v11633_v26  ;;  %v13306_v26 = vld [vmem:[%s18837_s4 + $0x894] sm:$0xf] }
 0x2de   : > { %5655 = vmatpush.bf16.msra.mxu3 %v11697_v7  ;;  %v11681_v7 = vor.u32 %v13306_v26, %v11678_v8  ;;  %v5066_v26 = vld [vmem:[#allocation2 + $0x98] sm:$0xff] }
 0x2df   : > { %5607 = vmatpush.bf16.msra.mxu1 %v11709_v43  ;;  %v5101_v8 = vunpack.c.l.b16 %v5066_v26 }
 0x2e1   : > { %5584 = vmatpush.bf16.msra.mxu0 %v11645_v58  ;;  %v11689_v58 = vor.u32 %v13308_v39, %v11686_v1  ;;  %5633 = vmatpush.bf16.msra.mxu2 %v11625_v29 }
 0x2e3   : > { %5608 = vmatpush.bf16.msra.mxu1 %v11701_v63  ;;  %5656 = vmatpush.bf16.msra.mxu3 %v11689_v58  ;;  %v11673_v58 = vor.u32 %v13304_v44, %v11670_v2 }
 0x2e5   : > { %5585 = vmatpush.bf16.msra.mxu0 %v11637_v37  ;;  %v11621_v37 = vor.u32 %v13293_v48, %v11620_v18  ;;  %v11668_v18 = vld [vmem:[%s18837_s4 + $0x880] sm:$0xf]  ;;  %v13305_v48 = vld [vmem:[%s18837_s4 + $0x884] sm:$0xf0] }
 0x2e6   : > { %v11669_v40 = vor.u32 %v13305_v48, %v11668_v18 }
 0x2e7   : > { %4982 = vmatmul.bf16.gmra.mxu0 %v19057_v55  ;;  %5005 = vmatmul.bf16.gmra.mxu1 %v19058_v3 }
 0x2e8   : > { %5028 = vmatmul.bf16.gmra.mxu2 %v19057_v55  ;;  %5051 = vmatmul.bf16.gmra.mxu3 %v19058_v3 }
 0x2e9   : > { %5609 = vmatpush.bf16.msra.mxu1 %v11693_v28  ;;  %5657 = vmatpush.bf16.msra.mxu3 %v11681_v7 }
 0x2ed   : > { %5610 = vmatpush.bf16.msra.mxu1 %v11685_v23  ;;  %5658 = vmatpush.bf16.msra.mxu3 %v11673_v58 }
 0x2f4   : > { %v4316_v6 = vpop.f32.mrf.mxu0  ;;  %v4339_v55 = vpop.f32.mrf.mxu1 }
 0x2f5   : > { %v4340_v3 = vadd.f32 %v4339_v55, %v4316_v6  ;;  %v13291_v6 = vld [vmem:[%s18837_s4 + $0x814] sm:$0xf0]  ;;  %v11676_v55 = vld [vmem:[%s18837_s4 + $0x890] sm:$0xf] }
 0x2f7   : > { %v17513_v31 = vadd.f32 %v4340_v3, %v17092_v51  ;;  %5283 = vmatmul.bf16.vlgmr.msrb.gmra.mxu0 %v19059_v12  ;;  %5306 = vmatmul.bf16.vlgmr.msrb.gmra.mxu1 %v19060_v17  ;;  %v11629_v51 = vor.u32 %v13295_v56, %v11628_v53  ;;  %v13307_v3 = vld [vmem:[%s18837_s4 + $0x894] sm:$0xf0]  ;;  %v13288_v53 = vld [vmem:[%s18837_s4 + $0x804] sm:$0xf]  ;;  %v11606_v56 = vld [vmem:[%s18837_s4 + $0x808] sm:$0xf0] }
 0x2f8   : > { %5329 = vmatmul.bf16.vlgmr.msrb.gmra.mxu2 %v19059_v12  ;;  %5352 = vmatmul.bf16.vlgmr.msrb.gmra.mxu3 %v19060_v17  ;;  %v11613_v12 = vor.u32 %v13291_v6, %v11612_v9  ;;  %v11677_v17 = vor.u32 %v13307_v3, %v11676_v55  ;;  %v11609_v11 = vor.u32 %v13288_v53, %v11606_v56  ;;  %v5102_v9 = vunpack.c.h.b16 %v5066_v26  ;;  %v19065_v26 = vld [vmem:[#allocation24_spill] sm:$0xff] }
 0x2f9   : > { %5586 = vmatpush.bf16.msra.mxu0 %v11629_v51 }
 0x2fa   : > { %5611 = vmatpush.bf16.msra.mxu1 %v11677_v17  ;;  %v5107_v17 = vpack.c.b16 %v5101_v8, %v5101_v8  ;;  %v5108_v53 = vpack.c.b16 %v5102_v9, %v5102_v9  ;;  %v19066_v8 = vld [vmem:[#allocation25_spill] sm:$0xff] }
 0x2fb   : > { %v4362_v43 = vpop.f32.mrf.mxu2  ;;  %v4385_v52 = vpop.f32.mrf.mxu3 }
 0x2fc   : > { %v4386_v59 = vadd.f32 %v4385_v52, %v4362_v43  ;;  %v4318_v24 = vpop.f32.mrf.mxu0  ;;  %v4341_v13 = vpop.f32.mrf.mxu1  ;;  %v19061_v52 = vld [vmem:[#allocation37_spill] sm:$0xff] }
 0x2fd   : > { %v17543_v0 = vadd.f32 %v4341_v13, %v4318_v24  ;;  %5587 = vmatpush.bf16.msra.mxu0 %v11621_v37  ;;  %v11604_v24 = vld [vmem:[%s18837_s4 + $0x800] sm:$0xf]  ;;  %v13289_v13 = vld [vmem:[%s18837_s4 + $0x804] sm:$0xf0] }
 0x2fe   : > { %v17546_v33 = vadd.f32 %v4386_v59, %v17104_v16  ;;  %v13290_v16 = vld [vmem:[%s18837_s4 + $0x814] sm:$0xf]  ;;  %v19062_v59 = vld [vmem:[#allocation38_spill] sm:$0xff]  ;;  %5612 = vmatpush.bf16.msra.mxu1 %v11669_v40 }
 0x2ff   : > { %v11617_v63 = vor.u32 %v13290_v16, %v11614_v47 }
 0x301   : > { %5634 = vmatpush.bf16.msra.mxu2 %v11617_v63  ;;  %5588 = vmatpush.bf16.msra.mxu0 %v11613_v12 }
 0x303   : > { %v4364_v51 = vpop.f32.mrf.mxu2  ;;  %v4387_v20 = vpop.f32.mrf.mxu3 }
 0x304   : > { %v17596_v28 = vadd.f32 %v4387_v20, %v4364_v51  ;;  %v4321_v29 = vpop.f32.mrf.mxu0  ;;  %v4344_v39 = vpop.f32.mrf.mxu1 }
 0x305   : > { %v4345_v1 = vadd.f32 %v4344_v39, %v4321_v29  ;;  %5635 = vmatpush.bf16.msra.mxu2 %v11609_v11 }
 0x307   : > { %v4402_v43 = vadd.f32 %v4345_v1, %v17137_v46  ;;  %5288 = vmatmul.bf16.gmra.mxu0 %v19061_v52  ;;  %5311 = vmatmul.bf16.gmra.mxu1 %v19062_v59  ;;  %v11605_v46 = vor.u32 %v13289_v13, %v11604_v24  ;;  %v19064_v24 = vld [vmem:[#allocation16_spill] sm:$0xff] }
 0x308   : > { %5334 = vmatmul.bf16.gmra.mxu2 %v19061_v52  ;;  %5357 = vmatmul.bf16.gmra.mxu3 %v19062_v59  ;;  %v19063_v59 = vld [vmem:[#allocation17_spill] sm:$0xff] }
 0x309   : > { %5589 = vmatpush.bf16.msra.mxu0 %v11605_v46 }
 0x30b   : > { %v4367_v37 = vpop.f32.mrf.mxu2  ;;  %v4390_v14 = vpop.f32.mrf.mxu3 }
 0x30c   : > { %v4391_v16 = vadd.f32 %v4390_v14, %v4367_v37  ;;  %v4323_v47 = vpop.f32.mrf.mxu0  ;;  %v4346_v23 = vpop.f32.mrf.mxu1 }
 0x30e   : > { %v4403_v63 = vadd.f32 %v4391_v16, %v17163_v60 }
 0x313   : > { %v4369_v7 = vpop.f32.mrf.mxu2  ;;  %v4392_v6 = vpop.f32.mrf.mxu3 }
 0x314   : > { %v4618_v55 = vpop.f32.mrf.mxu0  ;;  %v4641_v3 = vpop.f32.mrf.mxu1 }
 0x315   : > { %v4642_v12 = vadd.f32 %v4641_v3, %v4618_v55 }
 0x317   : > { %v4701_v56 = vadd.f32 %v4642_v12, %v17319_v45  ;;  %5293 = vmatmul.bf16.gmra.mxu0 %v5107_v17  ;;  %5316 = vmatmul.bf16.gmra.mxu1 %v5108_v53 }
 0x318   : > { %5339 = vmatmul.bf16.gmra.mxu2 %v5107_v17  ;;  %5362 = vmatmul.bf16.gmra.mxu3 %v5108_v53 }
 0x31b   : > { %v4664_v44 = vpop.f32.mrf.mxu2  ;;  %v4687_v51 = vpop.f32.mrf.mxu3 }
 0x31c   : > { %v4688_v20 = vadd.f32 %v4687_v51, %v4664_v44  ;;  %v17617_v60 = vpop.f32.mrf.mxu0  ;;  %v17619_v11 = vpop.f32.mrf.mxu1 }
 0x31e   : > { %v4702_v2 = vadd.f32 %v4688_v20, %v17350_v38 }
 0x323   : > { %v17622_v29 = vpop.f32.mrf.mxu2  ;;  %v17624_v39 = vpop.f32.mrf.mxu3 }
 0x324   : > { %v4623_v1 = vpop.f32.mrf.mxu0  ;;  %v4646_v58 = vpop.f32.mrf.mxu1 }
 0x325   : > { %v4647_v45 = vadd.f32 %v4646_v58, %v4623_v1  ;;  %v19068_v1 = vld [vmem:[#allocation27_spill] sm:$0xff] }
 0x326   : > { %v5415_v58 = vpack.c.b16 %v19068_v1, %v19068_v1 }
 0x327   : > { %v4705_v52 = vadd.f32 %v4647_v45, %v17513_v31  ;;  %5590 = vmatmul.bf16.vlgmr.msra.gmra.mxu0 %v19063_v59  ;;  %5613 = vmatmul.bf16.vlgmr.msra.gmra.mxu1 %v19064_v24 }
 0x328   : > { %5636 = vmatmul.bf16.vlgmr.msra.gmra.mxu2 %v19063_v59  ;;  %5659 = vmatmul.bf16.vlgmr.msra.gmra.mxu3 %v19064_v24 }
 0x32b   : > { %v4669_v13 = vpop.f32.mrf.mxu2  ;;  %v4692_v18 = vpop.f32.mrf.mxu3 }
 0x32c   : > { %v4693_v38 = vadd.f32 %v4692_v18, %v4669_v13  ;;  %v17631_v46 = vpop.f32.mrf.mxu0  ;;  %v17633_v48 = vpop.f32.mrf.mxu1 }
 0x32e   : > { %v4706_v40 = vadd.f32 %v4693_v38, %v17546_v33 }
 0x333   : > { %v17636_v37 = vpop.f32.mrf.mxu2  ;;  %v17638_v31 = vpop.f32.mrf.mxu3 }
 0x334   : > { %v4628_v14 = vpop.f32.mrf.mxu0  ;;  %v4651_v16 = vpop.f32.mrf.mxu1 }
 0x335   : > { %v4652_v47 = vadd.f32 %v4651_v16, %v4628_v14 }
 0x337   : > { %v4709_v23 = vadd.f32 %v4652_v47, %v4402_v43  ;;  %5595 = vmatmul.bf16.gmra.mxu0 %v19065_v26  ;;  %5618 = vmatmul.bf16.gmra.mxu1 %v19066_v8  ;;  %v19067_v43 = vld [vmem:[#allocation26_spill] sm:$0xff] }
 0x338   : > { %5641 = vmatmul.bf16.gmra.mxu2 %v19065_v26  ;;  %5664 = vmatmul.bf16.gmra.mxu3 %v19066_v8  ;;  %v5414_v20 = vpack.c.b16 %v19067_v43, %v19067_v43 }
 0x33b   : > { %v4674_v9 = vpop.f32.mrf.mxu2  ;;  %v4697_v7 = vpop.f32.mrf.mxu3 }
 0x33c   : > { %v4698_v6 = vadd.f32 %v4697_v7, %v4674_v9  ;;  %v4630_v33 = vpop.f32.mrf.mxu0  ;;  %v4653_v55 = vpop.f32.mrf.mxu1 }
 0x33e   : > { %v4710_v3 = vadd.f32 %v4698_v6, %v4403_v63 }
 0x343   : > { %v4676_v12 = vpop.f32.mrf.mxu2  ;;  %v4699_v17 = vpop.f32.mrf.mxu3 }
 0x344   : > { %v4973_v53 = vpop.f32.mrf.mxu0  ;;  %v4996_v44 = vpop.f32.mrf.mxu1 }
 0x345   : > { %v4997_v51 = vadd.f32 %v4996_v44, %v4973_v53 }
 0x347   : > { %v17648_v45 = vadd.f32 %v4997_v51, %v4701_v56  ;;  %5600 = vmatmul.bf16.gmra.mxu0 %v5414_v20  ;;  %5623 = vmatmul.bf16.gmra.mxu1 %v5415_v58 }
 0x348   : > { %5646 = vmatmul.bf16.gmra.mxu2 %v5414_v20  ;;  %5669 = vmatmul.bf16.gmra.mxu3 %v5415_v58 }
 0x34b   : > { %v5019_v59 = vpop.f32.mrf.mxu2  ;;  %v5042_v24 = vpop.f32.mrf.mxu3 }
 0x34c   : > { %v5043_v63 = vadd.f32 %v5042_v24, %v5019_v59  ;;  %v17650_v13 = vpop.f32.mrf.mxu0  ;;  %v17652_v18 = vpop.f32.mrf.mxu1 }
 0x34e   : > { %v17654_v38 = vadd.f32 %v5043_v63, %v4702_v2 }
 0x353   : > { %v17656_v14 = vpop.f32.mrf.mxu2  ;;  %v17658_v16 = vpop.f32.mrf.mxu3 }
 0x354   : > { %19069 = vst [vmem:[#allocation20_spill] sm:$0xff] %v17656_v14  ;;  %v4978_v47 = vpop.f32.mrf.mxu0  ;;  %v5001_v56 = vpop.f32.mrf.mxu1  ;;  %v19111_v14 = vld [vmem:[#allocation57_spill] sm:$0xff] }
 0x355   : > { %19070 = vst [vmem:[#allocation15_spill] sm:$0xff] %v17658_v16  ;;  %v5002_v26 = vadd.f32 %v5001_v56, %v4978_v47  ;;  %v19110_v16 = vld [vmem:[#allocation46_spill] sm:$0xff] }
 0x357   : > { %v17660_v8 = vadd.f32 %v5002_v26, %v4705_v52 }
 0x359   : > { %19071 = vst [vmem:[#allocation29_spill] sm:$0xff] %v17660_v8  ;;  %v19091_v8 = vld [vmem:[#allocation42_spill] sm:$0xff] }
 0x35b   : > { %v5024_v9 = vpop.f32.mrf.mxu2  ;;  %v5047_v7 = vpop.f32.mrf.mxu3 }
 0x35c   : > { %v5048_v6 = vadd.f32 %v5047_v7, %v5024_v9  ;;  %v17662_v33 = vpop.f32.mrf.mxu0  ;;  %v17664_v55 = vpop.f32.mrf.mxu1 }
 0x35d   : > { %19072 = vst [vmem:[#allocation41_spill] sm:$0xff] %v17662_v33 }
 0x35e   : > { %19073 = vst [vmem:[#allocation31_spill] sm:$0xff] %v17664_v55  ;;  %v17666_v12 = vadd.f32 %v5048_v6, %v4706_v40  ;;  %v13332_v55 = vld [vmem:[#allocation6 + $0x60] sm:$0xff] }
 0x360   : > { %19074 = vst [vmem:[#allocation28_spill] sm:$0xff] %v17666_v12  ;;  %v13333_v12 = vld [vmem:[#allocation6 + $0x68] sm:$0xff] }
 0x363   : > { %v17668_v2 = vpop.f32.mrf.mxu2  ;;  %v17670_v17 = vpop.f32.mrf.mxu3 }
 0x364   : > { %19075 = vst [vmem:[#allocation12_spill] sm:$0xff] %v17668_v2  ;;  %v4983_v53 = vpop.f32.mrf.mxu0  ;;  %v5006_v44 = vpop.f32.mrf.mxu1 }
 0x365   : > { %19076 = vst [vmem:[#allocation13_spill] sm:$0xff] %v17670_v17  ;;  %v5007_v51 = vadd.f32 %v5006_v44, %v4983_v53  ;;  %v19100_v17 = vld [vmem:[#allocation54_spill] sm:$0xff] }
 0x367   : > { %v17672_v43 = vadd.f32 %v5007_v51, %v4709_v23 }
 0x369   : > { %19077 = vst [vmem:[#allocation33_spill] sm:$0xff] %v17672_v43  ;;  %v13325_v43 = vld [vmem:[#allocation6 + $0x28] sm:$0xff] }
 0x36b   : > { %v5029_v52 = vpop.f32.mrf.mxu2  ;;  %v5052_v20 = vpop.f32.mrf.mxu3 }
 0x36c   : > { %v5053_v1 = vadd.f32 %v5052_v20, %v5029_v52  ;;  %v4985_v58 = vpop.f32.mrf.mxu0  ;;  %v5008_v59 = vpop.f32.mrf.mxu1  ;;  %v13327_v20 = vld [vmem:[#allocation6 + $0x38] sm:$0xff] }
 0x36d   : > { %5928 = vmatpush.bf16.msrb.mxu0 %v13327_v20 }
 0x36e   : > { %v17674_v24 = vadd.f32 %v5053_v1, %v4710_v3  ;;  %v13335_v1 = vld [vmem:[#allocation6 + $0x78] sm:$0xff] }
 0x36f   : > { %5951 = vmatpush.bf16.msrb.mxu1 %v13335_v1  ;;  %v19095_v1 = vld [vmem:[#allocation44_spill] sm:$0xff] }
 0x370   : > { %19078 = vst [vmem:[#allocation36_spill] sm:$0xff] %v17674_v24  ;;  %v13334_v24 = vld [vmem:[#allocation6 + $0x70] sm:$0xff] }
 0x371   : > { %5929 = vmatpush.bf16.msrb.mxu0 %v13326_v30 }
 0x373   : > { %v5031_v63 = vpop.f32.mrf.mxu2  ;;  %v5054_v47 = vpop.f32.mrf.mxu3  ;;  %5952 = vmatpush.bf16.msrb.mxu1 %v13334_v24  ;;  %v13343_v24 = vld [vmem:[#allocation6 + $0xb8] sm:$0xff] }
 0x374   : > { %v17676_v40 = vpop.f32.mrf.mxu0  ;;  %v17678_v56 = vpop.f32.mrf.mxu1  ;;  %6130 = vmatpush.bf16.msrb.mxu2 %v13343_v24  ;;  %v19109_v24 = vld [vmem:[#allocation30_spill] sm:$0xff] }
 0x375   : > { %5930 = vmatpush.bf16.msrb.mxu0 %v13325_v43  ;;  %v19104_v43 = vld [vmem:[#allocation35_spill] sm:$0xff] }
 0x377   : > { %5953 = vmatpush.bf16.msrb.mxu1 %v13333_v12 }
 0x37b   : > { %v17680_v26 = vpop.f32.mrf.mxu2  ;;  %v17682_v9 = vpop.f32.mrf.mxu3  ;;  %5954 = vmatpush.bf16.msrb.mxu1 %v13332_v55  ;;  %v4010_v55 = vadd.f32 %v17016_v62, %v17014_v5  ;;  %v13341_v5 = vld [vmem:[#allocation6 + $0xa8] sm:$0xff] }
 0x37c   : > { %v17684_v7 = vpop.f32.mrf.mxu0  ;;  %v17686_v23 = vpop.f32.mrf.mxu1  ;;  %v13349_v62 = vld [vmem:[#allocation6 + $0xe8] sm:$0xff] }
 0x383   : > { %v17688_v6 = vpop.f32.mrf.mxu2  ;;  %v17690_v53 = vpop.f32.mrf.mxu3 }
 0x384   : > { %19079 = vst [vmem:[#allocation32_spill] sm:$0xff] %v17688_v6  ;;  %v17692_v3 = vpop.f32.mrf.mxu0  ;;  %v17694_v44 = vpop.f32.mrf.mxu1  ;;  %v19099_v6 = vld [vmem:[#allocation53_spill] sm:$0xff] }
 0x385   : > { %19080 = vst [vmem:[#allocation34_spill] sm:$0xff] %v17690_v53  ;;  %v13324_v53 = vld [vmem:[#allocation6 + $0x20] sm:$0xff] }
 0x386   : > { %19081 = vst [vmem:[#allocation39_spill] sm:$0xff] %v17692_v3  ;;  %v13351_v3 = vld [vmem:[#allocation6 + $0xf8] sm:$0xff]  ;;  %5931 = vmatpush.bf16.msrb.mxu0 %v13324_v53 }
 0x387   : > { %19082 = vst [vmem:[#allocation40_spill] sm:$0xff] %v17694_v44  ;;  %v19098_v44 = vld [vmem:[#allocation50_spill] sm:$0xff]  ;;  %6153 = vmatpush.bf16.msrb.mxu3 %v13351_v3 }
 0x38b   : > { %v17696_v51 = vpop.f32.mrf.mxu2  ;;  %v17698_v52 = vpop.f32.mrf.mxu3 }
 0x38c   : > { %19083 = vst [vmem:[#allocation37_spill] sm:$0xff] %v17696_v51  ;;  %v17700_v58 = vpop.f32.mrf.mxu0  ;;  %v17702_v59 = vpop.f32.mrf.mxu1  ;;  %v19097_v51 = vld [vmem:[#allocation49_spill] sm:$0xff] }
 0x38d   : > { %19084 = vst [vmem:[#allocation38_spill] sm:$0xff] %v17698_v52  ;;  %v2972_v30 = vadd.f32 %v19098_v44, %v19097_v51  ;;  %v19105_v51 = vld [vmem:[#allocation48_spill] sm:$0xff] }
 0x38e   : > { %19085 = vst [vmem:[#allocation17_spill] sm:$0xff] %v17700_v58  ;;  %v19092_v58 = vld [vmem:[#allocation43_spill] sm:$0xff] }
 0x38f   : > { %19086 = vst [vmem:[#allocation16_spill] sm:$0xff] %v17702_v59  ;;  %v2967_v52 = vadd.f32 %v19092_v58, %v19091_v8  ;;  %v3018_v8 = vadd.f32 %v19100_v17, %v19099_v6  ;;  %v19101_v58 = vld [vmem:[#allocation47_spill] sm:$0xff] }
 0x390   : > { %v19106_v17 = vld [vmem:[#allocation55_spill] sm:$0xff] }
 0x391   : > { %v3360_v6 = vadd.f32 %v19106_v17, %v16562_v41  ;;  %v3677_v41 = vadd.f32 %v16742_v27, %v16736_v21  ;;  %v4015_v21 = vadd.f32 %v17101_v25, %v17097_v19  ;;  %v4061_v27 = vadd.f32 %v17134_v54, %v17132_v34  ;;  %v13340_v19 = vld [vmem:[#allocation6 + $0xa0] sm:$0xff] }
 0x392   : > { %v13348_v25 = vld [vmem:[#allocation6 + $0xe0] sm:$0xff]  ;;  %v4644_v34 = vadd.f32 %v17619_v11, %v17617_v60  ;;  %v4690_v60 = vadd.f32 %v17624_v39, %v17622_v29  ;;  %v4649_v11 = vadd.f32 %v17633_v48, %v17631_v46  ;;  %v4695_v29 = vadd.f32 %v17638_v31, %v17636_v37  ;;  %v19113_v46 = vld [vmem:[#allocation15_spill] sm:$0xff]  ;;  %v13321_v37 = vld [vmem:[#allocation6 + $0x8] sm:$0xff] }
 0x393   : > { %v17704_v63 = vpop.f32.mrf.mxu2  ;;  %v17706_v47 = vpop.f32.mrf.mxu3  ;;  %v19112_v39 = vld [vmem:[#allocation20_spill] sm:$0xff]  ;;  %v13329_v31 = vld [vmem:[#allocation6 + $0x48] sm:$0xff] }
 0x394   : > { %19087 = vst [vmem:[#allocation24_spill] sm:$0xff] %v17704_v63  ;;  %v17708_v42 = vpop.f32.mrf.mxu0  ;;  %v17710_v49 = vpop.f32.mrf.mxu1  ;;  %v5045_v48 = vadd.f32 %v19113_v46, %v19112_v39 }
 0x395   : > { %19088 = vst [vmem:[#allocation25_spill] sm:$0xff] %v17706_v47  ;;  %v19096_v47 = vld [vmem:[#allocation45_spill] sm:$0xff] }
 0x396   : > { %19089 = vst [vmem:[#allocation26_spill] sm:$0xff] %v17708_v42  ;;  %v3013_v42 = vadd.f32 %v19096_v47, %v19095_v1  ;;  %v3026_v47 = vadd.f32 %v2967_v52, %v16117_v50  ;;  %v3314_v1 = vadd.f32 %v19105_v51, %v16488_v10  ;;  %v19108_v52 = vld [vmem:[#allocation18_spill] sm:$0xff]  ;;  %v3631_v10 = vadd.f32 %v19111_v14, %v19110_v16 }
 0x397   : > { %19090 = vst [vmem:[#allocation27_spill] sm:$0xff] %v17710_v49  ;;  %v3672_v3 = vadd.f32 %v19109_v24, %v19108_v52  ;;  %v19114_v52 = vld [vmem:[#allocation41_spill] sm:$0xff]  ;;  %v19115_v24 = vld [vmem:[#allocation31_spill] sm:$0xff] }
 0x398   : > { %v3027_v44 = vadd.f32 %v3013_v42, %v16141_v32 }
 0x39b   : > { %v17714_v59 = vpop.f32.mrf.mxu2  ;;  %v17716_v20 = vpop.f32.mrf.mxu3 }
 0x39c   : > { %19093 = vst [vmem:[#allocation42_spill] sm:$0xff] %v17714_v59  ;;  %v5296_v63 = vpop.f32.mrf.mxu0  ;;  %v5319_v49 = vpop.f32.mrf.mxu1  ;;  %v19102_v59 = vld [vmem:[#allocation51_spill] sm:$0xff] }
 0x39d   : > { %19094 = vst [vmem:[#allocation43_spill] sm:$0xff] %v17716_v20  ;;  %v3309_v2 = vadd.f32 %v19102_v59, %v19101_v58  ;;  %v19103_v20 = vld [vmem:[#allocation52_spill] sm:$0xff]  ;;  %v13342_v49 = vld [vmem:[#allocation6 + $0xb0] sm:$0xff]  ;;  %v3030_v59 = vadd.f32 %v2972_v30, %v16117_v50  ;;  %v4056_v50 = vadd.f32 %v17044_v57, %v17042_v4  ;;  %v13323_v4 = vld [vmem:[#allocation6 + $0x18] sm:$0xff] }
 0x39e   : > { %v3355_v12 = vadd.f32 %v19104_v43, %v19103_v20  ;;  %v13350_v63 = vld [vmem:[#allocation6 + $0xf0] sm:$0xff]  ;;  %v19107_v20 = vld [vmem:[#allocation56_spill] sm:$0xff]  ;;  %v3031_v43 = vadd.f32 %v3018_v8, %v16141_v32  ;;  %6131 = vmatpush.bf16.msrb.mxu2 %v13342_v49  ;;  %v13331_v49 = vld [vmem:[#allocation6 + $0x58] sm:$0xff]  ;;  %5932 = vmatpush.bf16.msrb.mxu0 %v13323_v4 }
 0x39f   : > { %v3626_v58 = vadd.f32 %v19107_v20, %v16637_v36  ;;  %v3368_v33 = vadd.f32 %v3309_v2, %v3026_v47  ;;  %6154 = vmatpush.bf16.msrb.mxu3 %v13350_v63  ;;  %v3372_v30 = vadd.f32 %v3314_v1, %v3030_v59  ;;  %v5308_v2 = vadd.f32 %v17678_v56, %v17676_v40  ;;  %v5718_v4 = vld [vmem:[#allocation3] sm:$0xff] }
 0x3a0   : > { %v3369_v42 = vadd.f32 %v3355_v12, %v3027_v44  ;;  %v3373_v32 = vadd.f32 %v3360_v6, %v3031_v43  ;;  %v4337_v47 = vadd.f32 %v17482_v35, %v17480_v61  ;;  %v4383_v40 = vadd.f32 %v17510_v15, %v17508_v22  ;;  %5955 = vmatpush.bf16.msrb.mxu1 %v13331_v49  ;;  %v13322_v43 = vld [vmem:[#allocation6 + $0x10] sm:$0xff] }
 0x3a1   : > { %v3685_v16 = vadd.f32 %v3626_v58, %v3368_v33  ;;  %v3689_v57 = vadd.f32 %v3631_v10, %v3372_v30  ;;  %v5367_v54 = vadd.f32 %v5308_v2, %v17648_v45  ;;  %v5354_v61 = vadd.f32 %v17682_v9, %v17680_v26  ;;  %v19118_v2 = vld [vmem:[#allocation32_spill] sm:$0xff]  ;;  %v19123_v49 = vld [vmem:[#allocation38_spill] sm:$0xff] }
 0x3a2   : > { %v3686_v12 = vadd.f32 %v3672_v3, %v3369_v42  ;;  %v3690_v33 = vadd.f32 %v3677_v41, %v3373_v32  ;;  %6132 = vmatpush.bf16.msrb.mxu2 %v13341_v5  ;;  %v4999_v1 = vadd.f32 %v17652_v18, %v17650_v13  ;;  %v5310_v20 = vadd.f32 %v17686_v23, %v17684_v7  ;;  %v13330_v42 = vld [vmem:[#allocation6 + $0x50] sm:$0xff] }
 0x3a3   : > { %v5342_v36 = vpop.f32.mrf.mxu2  ;;  %v5365_v53 = vpop.f32.mrf.mxu3  ;;  %v4069_v63 = vadd.f32 %v4010_v55, %v3685_v16  ;;  %6155 = vmatpush.bf16.msrb.mxu3 %v13349_v62  ;;  %v4073_v35 = vadd.f32 %v4015_v21, %v3689_v57  ;;  %v5368_v59 = vadd.f32 %v5354_v61, %v17654_v38  ;;  %v5004_v3 = vadd.f32 %v19115_v24, %v19114_v52  ;;  %v13339_v38 = vld [vmem:[#allocation6 + $0x98] sm:$0xff]  ;;  %v13338_v5 = vld [vmem:[#allocation6 + $0x90] sm:$0xff]  ;;  %v19125_v61 = vld [vmem:[#allocation17_spill] sm:$0xff] }
 0x3a4   : > { %v5591_v8 = vpop.f32.mrf.mxu0  ;;  %v5614_v14 = vpop.f32.mrf.mxu1  ;;  %v4070_v44 = vadd.f32 %v4056_v50, %v3686_v12  ;;  %v4074_v22 = vadd.f32 %v4061_v27, %v3690_v33  ;;  %v13347_v55 = vld [vmem:[#allocation6 + $0xd8] sm:$0xff]  ;;  %v19117_v53 = vld [vmem:[#allocation13_spill] sm:$0xff]  ;;  %5933 = vmatpush.bf16.msrb.mxu0 %v13322_v43  ;;  %5956 = vmatpush.bf16.msrb.mxu1 %v13330_v42  ;;  %v19121_v12 = vld [vmem:[#allocation40_spill] sm:$0xff] }
 0x3a5   : > { %v5615_v56 = vadd.f32 %v5614_v14, %v5591_v8  ;;  %v4396_v15 = vadd.f32 %v4337_v47, %v4069_v63  ;;  %v4400_v6 = vadd.f32 %v17543_v0, %v4073_v35  ;;  %v19119_v8 = vld [vmem:[#allocation34_spill] sm:$0xff]  ;;  %v19120_v16 = vld [vmem:[#allocation39_spill] sm:$0xff]  ;;  %v19126_v35 = vld [vmem:[#allocation16_spill] sm:$0xff] }
 0x3a6   : > { %v4397_v51 = vadd.f32 %v4383_v40, %v4070_v44  ;;  %6133 = vmatpush.bf16.msrb.mxu2 %v13340_v19  ;;  %v4401_v0 = vadd.f32 %v17596_v28, %v4074_v22  ;;  %v19116_v28 = vld [vmem:[#allocation12_spill] sm:$0xff]  ;;  %v5356_v14 = vadd.f32 %v19119_v8, %v19118_v2  ;;  %v5313_v21 = vadd.f32 %v19121_v12, %v19120_v16  ;;  %v13346_v62 = vld [vmem:[#allocation6 + $0xd0] sm:$0xff]  ;;  %v19134_v16 = vld [vmem:[#allocation43_spill] sm:$0xff] }
 0x3a7   : > { %v5674_v17 = vadd.f32 %v5615_v56, %v5367_v54  ;;  %6156 = vmatpush.bf16.msrb.mxu3 %v13348_v25  ;;  %v4703_v9 = vadd.f32 %v4644_v34, %v4396_v15  ;;  %v4707_v36 = vadd.f32 %v4649_v11, %v4400_v6  ;;  %v5050_v30 = vadd.f32 %v19117_v53, %v19116_v28  ;;  %v19122_v56 = vld [vmem:[#allocation37_spill] sm:$0xff]  ;;  %v17792_v34 = vld [vmem:[#allocation3] sm:$0x88]  ;;  %v13328_v43 = vld [vmem:[#allocation6 + $0x40] sm:$0xff] }
 0x3a8   : > { %v4704_v50 = vadd.f32 %v4690_v60, %v4397_v51  ;;  %v4708_v57 = vadd.f32 %v4695_v29, %v4401_v0  ;;  %v5359_v33 = vadd.f32 %v19123_v49, %v19122_v56  ;;  %v5315_v22 = vadd.f32 %v19126_v35, %v19125_v61  ;;  %5934 = vmatpush.bf16.msrb.mxu0 %v13321_v37  ;;  %v19127_v11 = vld [vmem:[#allocation29_spill] sm:$0xff]  ;;  %v13320_v0 = vld [vmem:[#allocation6] sm:$0xff]  ;;  %v19131_v28 = vld [vmem:[#allocation26_spill] sm:$0xff] }
 0x3a9   : > { %v5058_v10 = vadd.f32 %v4999_v1, %v4703_v9  ;;  %v5684_v41 = vmax.f32 %v5674_v17, 0.0  ;;  %v5062_v40 = vadd.f32 %v5004_v3, %v4707_v36  ;;  %5957 = vmatpush.bf16.msrb.mxu1 %v13329_v31  ;;  %v5979_v17 = vld [vmem:[#allocation3] sm:$0xee]  ;;  %v5762_v6 = vunpack.c.l.b16 %v5718_v4  ;;  %v13367_v36 = vld [vmem:[#allocation6 + $0x178] sm:$0xff]  ;;  %v13336_v31 = vld [vmem:[#allocation6 + $0x80] sm:$0xff] }
 0x3aa   : > { %6134 = vmatpush.bf16.msrb.mxu2 %v13339_v38  ;;  %v5059_v47 = vadd.f32 %v5045_v48, %v4704_v50  ;;  %v5063_v54 = vadd.f32 %v5050_v30, %v4708_v57  ;;  %v6453_v46 = vunpack.c.l.b16 %v17792_v34  ;;  %v19128_v48 = vld [vmem:[#allocation28_spill] sm:$0xff]  ;;  %v6014_v42 = vunpack.c.l.b16 %v5979_v17  ;;  %v13359_v50 = vld [vmem:[#allocation6 + $0x138] sm:$0xff]  ;;  %v13366_v56 = vld [vmem:[#allocation6 + $0x170] sm:$0xff] }
 0x3ab   : > { %v5637_v45 = vpop.f32.mrf.mxu2  ;;  %v5660_v26 = vpop.f32.mrf.mxu3  ;;  %v5369_v32 = vadd.f32 %v5310_v20, %v5058_v10  ;;  %6157 = vmatpush.bf16.msrb.mxu3 %v13347_v55  ;;  %v5694_v44 = vsel %vm1014_vm6, %v5684_v41, 0.0  ;;  %v5763_v20 = vunpack.c.h.b16 %v5718_v4  ;;  %v5372_v52 = vadd.f32 %v5359_v33, %v19128_v48  ;;  %v19129_v10 = vld [vmem:[#allocation24_spill] sm:$0xff]  ;;  %v19130_v41 = vld [vmem:[#allocation25_spill] sm:$0xff]  ;;  %v19132_v53 = vld [vmem:[#allocation27_spill] sm:$0xff] }
 0x3ac   : > { %v5661_v13 = vadd.f32 %v5660_v26, %v5637_v45  ;;  %v5593_v18 = vpop.f32.mrf.mxu0  ;;  %v5616_v58 = vpop.f32.mrf.mxu1  ;;  %v5370_v60 = vadd.f32 %v5356_v14, %v5059_v47  ;;  %v5371_v45 = vadd.f32 %v5313_v21, %v19127_v11  ;;  %v5373_v38 = vadd.f32 %v5315_v22, %v5062_v40  ;;  %5935 = vmatpush.bf16.msrb.mxu0 %v13320_v0  ;;  %v19133_v14 = vld [vmem:[#allocation42_spill] sm:$0xff]  ;;  %v19136_v61 = vld [vmem:[#allocation33_spill] sm:$0xff] }
 0x3ad   : > { %v5617_v23 = vadd.f32 %v5616_v58, %v5593_v18  ;;  %v13337_v18 = vld [vmem:[#allocation6 + $0x88] sm:$0xff]  ;;  %v5318_v30 = vadd.f32 %v19132_v53, %v19131_v28  ;;  %v6454_v8 = vunpack.c.h.b16 %v17792_v34  ;;  %v5364_v12 = vadd.f32 %v19134_v16, %v19133_v14  ;;  %5958 = vmatpush.bf16.msrb.mxu1 %v13328_v43  ;;  %v13375_v16 = vld [vmem:[#allocation6 + $0x1b8] sm:$0xff] }
 0x3ae   : > { %v5675_v7 = vadd.f32 %v5661_v13, %v5368_v59  ;;  %6135 = vmatpush.bf16.msrb.mxu2 %v13338_v5  ;;  %v13345_v58 = vld [vmem:[#allocation6 + $0xc8] sm:$0xff] }
 0x3af   : > { %v5676_v25 = vadd.f32 %v5617_v23, %v5369_v32  ;;  %6158 = vmatpush.bf16.msrb.mxu3 %v13346_v62  ;;  %v6015_v23 = vunpack.c.h.b16 %v5979_v17  ;;  %v13344_v32 = vld [vmem:[#allocation6 + $0xc0] sm:$0xff]  ;;  %v17831_v35 = vadd.f32 %v5318_v30, %v19136_v61 }
 0x3b0   : > { %v5685_v27 = vmax.f32 %v5675_v7, 0.0  ;;  %v5361_v7 = vadd.f32 %v19130_v41, %v19129_v10  ;;  %6365 = vmatpush.bf16.msra.mxu0 %v13359_v50 }
 0x3b1   : > { %v5686_v24 = vmax.f32 %v5676_v25, 0.0  ;;  %6388 = vmatpush.bf16.msra.mxu1 %v13367_v36 }
 0x3b2   : > { %v5695_v19 = vsel %vm1014_vm6, %v5685_v27, 0.0  ;;  %6136 = vmatpush.bf16.msrb.mxu2 %v13337_v18  ;;  %v13358_v27 = vld [vmem:[#allocation6 + $0x130] sm:$0xff]  ;;  %v17823_v49 = vadd.f32 %v5361_v7, %v5063_v54 }
 0x3b3   : > { %v5704_v15 = vpack.c.bf16 %v5695_v19, %v5694_v44  ;;  %v5639_v51 = vpop.f32.mrf.mxu2  ;;  %v5662_v1 = vpop.f32.mrf.mxu3  ;;  %6159 = vmatpush.bf16.msrb.mxu3 %v13345_v58  ;;  %v5696_v4 = vsel %vm1015_vm7, %v5686_v24, 0.0 }
 0x3b4   : > { %v5663_v26 = vadd.f32 %v5662_v1, %v5639_v51  ;;  %v5596_v9 = vpop.f32.mrf.mxu0  ;;  %v5619_v59 = vpop.f32.mrf.mxu1  ;;  %6366 = vmatpush.bf16.msra.mxu0 %v13358_v27 }
 0x3b5   : > { %5709 = vst [vmem:[#allocation3 + $0x8] sm:$0xff] %v5704_v15  ;;  %v5620_v13 = vadd.f32 %v5619_v59, %v5596_v9  ;;  %v17797_v29 = vunpack.c.l.b16 %v5704_v15  ;;  %v17799_v39 = vunpack.c.h.b16 %v5704_v15  ;;  %6389 = vmatpush.bf16.msra.mxu1 %v13366_v56 }
 0x3b6   : > { %v5677_v3 = vadd.f32 %v5663_v26, %v5370_v60  ;;  %6137 = vmatpush.bf16.msrb.mxu2 %v13336_v31 }
 0x3b7   : > { %v17806_v55 = vpack.c.b16 %v17797_v29, %v5762_v6  ;;  %v5775_v2 = vpack.c.b16 %v17799_v39, %v5763_v20  ;;  %v5678_v21 = vadd.f32 %v5620_v13, %v5371_v45  ;;  %v6457_v5 = vpack.c.b16 %v17797_v29, %v6453_v46  ;;  %6160 = vmatpush.bf16.msrb.mxu3 %v13344_v32  ;;  %v13357_v6 = vld [vmem:[#allocation6 + $0x128] sm:$0xff]  ;;  %v19137_v45 = vld [vmem:[#allocation36_spill] sm:$0xff] }
 0x3b8   : > { %v5687_v37 = vmax.f32 %v5677_v3, 0.0  ;;  %v17820_v47 = vpack.c.b16 %v17797_v29, %v6014_v42  ;;  %v17828_v25 = vpack.c.b16 %v17799_v39, %v6015_v23  ;;  %v6458_v1 = vpack.c.b16 %v17799_v39, %v6454_v8  ;;  %v13365_v13 = vld [vmem:[#allocation6 + $0x168] sm:$0xff]  ;;  %6367 = vmatpush.bf16.msra.mxu0 %v13357_v6 }
 0x3b9   : > { %v5783_v40 = vshll.u32 %v17806_v55, 16  ;;  %v5795_v34 = vshll.u32 %v5775_v2, 16  ;;  %v5688_v54 = vmax.f32 %v5678_v21, 0.0  ;;  %v6462_v60 = vshrl.u32 %v6457_v5, 16  ;;  %6390 = vmatpush.bf16.msra.mxu1 %v13365_v13 }
 0x3ba   : > { %v5697_v57 = vsel %vm1015_vm7, %v5687_v37, 0.0  ;;  %v6465_v11 = vshll.u32 %v6457_v5, 16  ;;  %v17836_v26 = vadd.f32 %v5364_v12, %v19137_v45  ;;  %v6018_v59 = vrot.slane %v17820_v47, 1  ;;  %v13383_v12 = vld [vmem:[#allocation6 + $0x1f8] sm:$0xff]  ;;  %6605 = vmatpush.bf16.msra.mxu2 %v13375_v16  ;;  %v13372_v16 = vld [vmem:[#allocation6 + $0x1a0] sm:$0xff] }
 0x3bb   : > { %v17825_v33 = vpack.c.bf16 %v5697_v57, %v5696_v4  ;;  %v5642_v44 = vpop.f32.mrf.mxu2  ;;  %v5665_v19 = vpop.f32.mrf.mxu3  ;;  %v5785_v20 = vrot.slane %v5783_v40, 1  ;;  %v6021_v18 = vrot.slane %v17828_v25, 1  ;;  %v5781_v58 = vshrl.u32 %v17806_v55, 16  ;;  %6628 = vmatpush.bf16.msra.mxu3 %v13383_v12 }
 0x3bc   : > { %v5666_v22 = vadd.f32 %v5665_v19, %v5642_v44  ;;  %v5598_v15 = vpop.f32.mrf.mxu0  ;;  %v5621_v51 = vpop.f32.mrf.mxu1  ;;  %v5793_v0 = vshrl.u32 %v5775_v2, 16  ;;  %v5797_v46 = vrot.slane %v5795_v34, 1  ;;  %v6474_v3 = vshrl.u32 %v6458_v1, 16  ;;  %v13364_v44 = vld [vmem:[#allocation6 + $0x160] sm:$0xff]  ;;  %v13374_v19 = vld [vmem:[#allocation6 + $0x1b0] sm:$0xff] }
 0x3bd   : > { %5710 = vst [vmem:[#allocation3 + $0x10] sm:$0xff] %v17825_v33  ;;  %v5622_v17 = vadd.f32 %v5621_v51, %v5598_v15  ;;  %v6477_v43 = vshll.u32 %v6458_v1, 16  ;;  %v5698_v10 = vsel %vm1016_vm5, %v5688_v54, 0.0  ;;  %v17844_v41 = vrot.slane %v6462_v60, 3  ;;  %6391 = vmatpush.bf16.msra.mxu1 %v13364_v44  ;;  %v13380_v44 = vld [vmem:[#allocation6 + $0x1e0] sm:$0xff] }
 0x3be   : > { %v5679_v9 = vadd.f32 %v5666_v22, %v5372_v52  ;;  %v5766_v52 = vunpack.c.l.b16 %v17825_v33  ;;  %v17846_v7 = vrot.slane %v6465_v11, 4  ;;  %v5767_v55 = vunpack.c.h.b16 %v17825_v33  ;;  %v13356_v33 = vld [vmem:[#allocation6 + $0x120] sm:$0xff]  ;;  %6606 = vmatpush.bf16.msra.mxu2 %v13374_v19 }
 0x3bf   : > { %v5680_v24 = vadd.f32 %v5622_v17, %v5373_v38  ;;  %v17851_v50 = vor.u32 %v5785_v20, %v5781_v58  ;;  %v6222_v38 = vshrl.u32 %v17820_v47, 16  ;;  %v17856_v30 = vor.u32 %v5797_v46, %v5793_v0  ;;  %6368 = vmatpush.bf16.msra.mxu0 %v13356_v33  ;;  %v13355_v58 = vld [vmem:[#allocation6 + $0x118] sm:$0xff] }
 0x3c0   : > { %v5689_v48 = vmax.f32 %v5679_v9, 0.0  ;;  %v6225_v37 = vshll.u32 %v17820_v47, 16  ;;  %v6234_v31 = vshrl.u32 %v17828_v25, 16  ;;  %v17860_v21 = vrot.slane %v6474_v3, 3  ;;  %v13363_v0 = vld [vmem:[#allocation6 + $0x158] sm:$0xff] }
 0x3c1   : > { %v5690_v32 = vmax.f32 %v5680_v24, 0.0  ;;  %v17862_v27 = vrot.slane %v6477_v43, 4  ;;  %v6468_v40 = vor.u32 %v17846_v7, %v17844_v41  ;;  %v17870_v34 = vrot.slane %v6222_v38, 1  ;;  %v13373_v24 = vld [vmem:[#allocation6 + $0x1a8] sm:$0xff]  ;;  %6392 = vmatpush.bf16.msra.mxu1 %v13363_v0  ;;  %v13354_v7 = vld [vmem:[#allocation6 + $0x110] sm:$0xff] }
 0x3c2   : > { %v5699_v23 = vsel %vm1016_vm5, %v5689_v48, 0.0  ;;  %v6237_v61 = vshll.u32 %v17828_v25, 16  ;;  %v17874_v22 = vpack.c.b16 %v5766_v52, %v17797_v29  ;;  %v17884_v1 = vrot.slane %v6225_v37, 2  ;;  %6607 = vmatpush.bf16.msra.mxu2 %v13373_v24 }
 0x3c3   : > { %v17854_v36 = vpack.c.bf16 %v5699_v23, %v5698_v10  ;;  %v5644_v28 = vpop.f32.mrf.mxu2  ;;  %v5667_v53 = vpop.f32.mrf.mxu3  ;;  %v17886_v54 = vrot.slane %v6234_v31, 1  ;;  %v5700_v6 = vsel %vm1017_vm12, %v5690_v32, 0.0  ;;  %v6480_v29 = vor.u32 %v17862_v27, %v17860_v21  ;;  %v13381_v32 = vld [vmem:[#allocation6 + $0x1e8] sm:$0xff]  ;;  %6369 = vmatpush.bf16.msra.mxu0 %v13355_v58 }
 0x3c4   : > { %v5668_v2 = vadd.f32 %v5667_v53, %v5644_v28  ;;  %v5601_v8 = vpop.f32.mrf.mxu0  ;;  %v5624_v14 = vpop.f32.mrf.mxu1  ;;  %v17893_v11 = vpack.c.b16 %v5767_v55, %v17799_v39  ;;  %v6228_v12 = vor.u32 %v17884_v1, %v17870_v34  ;;  %v13469_v34 = vld [vmem:[#allocation8 + $0x18] sm:$0xff] }
 0x3c5   : > { %5711 = vst [vmem:[#allocation3 + $0x18] sm:$0xff] %v17854_v36  ;;  %v5625_v5 = vadd.f32 %v5624_v14, %v5601_v8  ;;  %v5768_v4 = vunpack.c.l.b16 %v17854_v36  ;;  %v5769_v57 = vunpack.c.h.b16 %v17854_v36  ;;  %v13352_v36 = vld [vmem:[#allocation6 + $0x100] sm:$0xff] }
 0x3c6   : > { %v5681_v56 = vadd.f32 %v5668_v2, %v17823_v49  ;;  %v13382_v49 = vld [vmem:[#allocation6 + $0x1f0] sm:$0xff]  ;;  %6608 = vmatpush.bf16.msra.mxu2 %v13372_v16 }
 0x3c7   : > { %v17878_v15 = vpack.c.b16 %v5768_v4, %v5766_v52  ;;  %v17882_v51 = vpack.c.b16 %v5769_v57, %v5767_v55  ;;  %v5682_v45 = vadd.f32 %v5625_v5, %v17831_v35  ;;  %6629 = vmatpush.bf16.msra.mxu3 %v13382_v49  ;;  %v6239_v55 = vrot.slane %v6237_v61, 2  ;;  %6370 = vmatpush.bf16.msra.mxu0 %v13354_v7 }
 0x3c8   : > { %v5691_v60 = vmax.f32 %v5681_v56, 0.0 }
 0x3c9   : > { %v6019_v9 = vrot.slane %v17878_v15, 1  ;;  %v6022_v20 = vrot.slane %v17882_v51, 1  ;;  %v17899_v13 = vshll.u32 %v17878_v15, 16  ;;  %v17904_v48 = vshll.u32 %v17882_v51, 16 }
 0x3ca   : > { %v5701_v46 = vsel %vm1017_vm12, %v5691_v60, 0.0  ;;  %v17907_v39 = vshrl.u32 %v17878_v15, 16  ;;  %v17910_v35 = vshrl.u32 %v17882_v51, 16  ;;  %v13391_v15 = vld [vmem:[#allocation6 + $0x238] sm:$0xff] }
 0x3cb   : > { %v5707_v3 = vpack.c.bf16 %v5701_v46, %v5700_v6  ;;  %v5647_v43 = vpop.f32.mrf.mxu2  ;;  %v5670_v10 = vpop.f32.mrf.mxu3  ;;  %v6020_v52 = vsel %vm3097_vm9, %v6018_v59, %v6019_v9  ;;  %v6023_v23 = vsel %vm3097_vm9, %v6021_v18, %v6022_v20  ;;  %v5790_v37 = vrot.slane %v17899_v13, 1  ;;  %6630 = vmatpush.bf16.msra.mxu3 %v13381_v32  ;;  %v13399_v51 = vld [vmem:[#allocation6 + $0x278] sm:$0xff] }
 0x3cc   : > { %v5671_v38 = vadd.f32 %v5670_v10, %v5647_v43  ;;  %v5603_v28 = vpop.f32.mrf.mxu0  ;;  %v5626_v53 = vpop.f32.mrf.mxu1  ;;  %6138 = vmatmul.bf16.vlgmr.msrb.gmra.mxu2 %v6020_v52  ;;  %6161 = vmatmul.bf16.vlgmr.msrb.gmra.mxu3 %v6023_v23  ;;  %v5802_v31 = vrot.slane %v17904_v48, 1  ;;  %v6469_v47 = vrot.slane %v17907_v39, 3  ;;  %v5692_v59 = vmax.f32 %v5682_v45, 0.0  ;;  %v13379_v23 = vld [vmem:[#allocation6 + $0x1d8] sm:$0xff] }
 0x3cd   : > { %5712 = vst [vmem:[#allocation3 + $0x20] sm:$0xff] %v5707_v3  ;;  %v6470_v25 = vrot.slane %v17899_v13, 4  ;;  %v6481_v18 = vrot.slane %v17910_v35, 3  ;;  %v5791_v8 = vsel %vm2719_vm8, %v17851_v50, %v5790_v37  ;;  %v6229_v56 = vrot.slane %v17907_v39, 1  ;;  %v13370_v28 = vld [vmem:[#allocation6 + $0x190] sm:$0xff]  ;;  %v13361_v53 = vld [vmem:[#allocation6 + $0x148] sm:$0xff] }
 0x3ce   : > { %v5683_v2 = vadd.f32 %v5671_v38, %v17836_v26  ;;  %v5803_v14 = vsel %vm2719_vm8, %v17856_v30, %v5802_v31  ;;  %5936 = vmatmul.bf16.vlgmr.msrb.gmra.mxu0 %v5791_v8  ;;  %v6482_v26 = vrot.slane %v17904_v48, 4  ;;  %v6240_v50 = vor.u32 %v6239_v55, %v17886_v54  ;;  %v13369_v8 = vld [vmem:[#allocation6 + $0x188] sm:$0xff] }
 0x3cf   : > { %5959 = vmatmul.bf16.vlgmr.msrb.gmra.mxu1 %v5803_v14  ;;  %v17938_v5 = vor.u32 %v6470_v25, %v6469_v47  ;;  %v6230_v30 = vrot.slane %v17899_v13, 2  ;;  %v6241_v19 = vrot.slane %v17910_v35, 1  ;;  %v6242_v61 = vrot.slane %v17904_v48, 2  ;;  %6631 = vmatpush.bf16.msra.mxu3 %v13380_v44 }
 0x3d0   : > { %v5693_v33 = vmax.f32 %v5683_v2, 0.0  ;;  %v5702_v49 = vsel %vm1018_vm11, %v5692_v59, 0.0  ;;  %v17948_v1 = vunpack.c.l.b16 %v5707_v3  ;;  %v17957_v6 = vor.u32 %v6482_v26, %v6481_v18 }
 0x3d1   : > { %v17955_v54 = vsel %vm3756_vm10, %v6468_v40, %v17938_v5  ;;  %v17961_v45 = vunpack.c.h.b16 %v5707_v3  ;;  %v17963_v58 = vor.u32 %v6230_v30, %v6229_v56  ;;  %v17965_v0 = vor.u32 %v6242_v61, %v6241_v19  ;;  %v13362_v40 = vld [vmem:[#allocation6 + $0x150] sm:$0xff]  ;;  %v13371_v3 = vld [vmem:[#allocation6 + $0x198] sm:$0xff] }
 0x3d2   : > { %v5703_v60 = vsel %vm1018_vm11, %v5693_v33, 0.0  ;;  %v17972_v41 = vsel %vm3756_vm10, %v6480_v29, %v17957_v6  ;;  %v17989_v27 = vpack.c.b16 %v17948_v1, %v5768_v4  ;;  %6393 = vmatpush.bf16.msra.mxu1 %v13362_v40  ;;  %v13353_v29 = vld [vmem:[#allocation6 + $0x108] sm:$0xff]  ;;  %6609 = vmatpush.bf16.msra.mxu2 %v13371_v3  ;;  %v13378_v4 = vld [vmem:[#allocation6 + $0x1d0] sm:$0xff] }
 0x3d3   : > { %v5708_v46 = vpack.c.bf16 %v5703_v60, %v5702_v49  ;;  %v5649_v24 = vpop.f32.mrf.mxu2  ;;  %v5672_v43 = vpop.f32.mrf.mxu3  ;;  %v17976_v10 = vsel %vm6220_vm13, %v6228_v12, %v17963_v58  ;;  %v17980_v52 = vsel %vm6220_vm13, %v6240_v50, %v17965_v0  ;;  %v17994_v38 = vpack.c.b16 %v17961_v45, %v5769_v57  ;;  %6632 = vmatpush.bf16.msra.mxu3 %v13379_v23  ;;  %v13360_v57 = vld [vmem:[#allocation6 + $0x140] sm:$0xff]  ;;  %v13377_v50 = vld [vmem:[#allocation6 + $0x1c8] sm:$0xff] }
 0x3d4   : > { %6371 = vmatpush.bf16.msra.mxu0 %v13353_v29  ;;  %v13368_v43 = vld [vmem:[#allocation6 + $0x180] sm:$0xff] }
 0x3d5   : > { %5713 = vst [vmem:[#allocation3 + $0x28] sm:$0xff] %v5708_v46  ;;  %v17982_v55 = vunpack.c.l.b16 %v5708_v46  ;;  %v17984_v21 = vunpack.c.h.b16 %v5708_v46 }
 0x3d6   : > { %6394 = vmatpush.bf16.msra.mxu1 %v13361_v53  ;;  %6610 = vmatpush.bf16.msra.mxu2 %v13370_v28 }
 0x3d7   : > { %v6459_v32 = vpack.c.b16 %v17982_v55, %v17948_v1  ;;  %v6460_v47 = vpack.c.b16 %v17984_v21, %v17961_v45  ;;  %6633 = vmatpush.bf16.msra.mxu3 %v13378_v4 }
 0x3d8   : > { %6372 = vmatpush.bf16.msra.mxu0 %v13352_v36  ;;  %v13390_v36 = vld [vmem:[#allocation6 + $0x230] sm:$0xff] }
 0x3d9   : > { %v6486_v59 = vshrl.u32 %v6459_v32, 16  ;;  %v6489_v25 = vshll.u32 %v6459_v32, 16  ;;  %v6495_v18 = vshrl.u32 %v6460_v47, 16  ;;  %v6498_v2 = vshll.u32 %v6460_v47, 16 }
 0x3da   : > { %6395 = vmatpush.bf16.msra.mxu1 %v13360_v57  ;;  %6611 = vmatpush.bf16.msra.mxu2 %v13369_v8  ;;  %v5806_v47 = vor.u32 %v17907_v39, %v5790_v37  ;;  %v13398_v57 = vld [vmem:[#allocation6 + $0x270] sm:$0xff] }
 0x3db   : > { %v6488_v14 = vrot.slane %v6486_v59, 3  ;;  %v6491_v16 = vrot.slane %v6489_v25, 4  ;;  %v6497_v12 = vrot.slane %v6495_v18, 3  ;;  %v6500_v26 = vrot.slane %v6498_v2, 4  ;;  %6634 = vmatpush.bf16.msra.mxu3 %v13377_v50  ;;  %v12052_v50 = vld [vmem:[#allocation3 + $0x18] sm:$0xf] }
 0x3dc   : > { %v5723_v56 = vld [vmem:[#allocation3 + $0x28] sm:$0x11]  ;;  %6797 = vmatpush.bf16.msrb.mxu0 %v13391_v15 }
 0x3dd   : > { %v6181_v33 = vld [vmem:[#allocation3 + $0x28] sm:$0x33]  ;;  %v5772_v44 = vunpack.c.l.b16 %v5723_v56  ;;  %v5773_v30 = vunpack.c.h.b16 %v5723_v56  ;;  %v18000_v19 = vor.u32 %v6491_v16, %v6488_v14  ;;  %v18002_v61 = vor.u32 %v6500_v26, %v6497_v12  ;;  %v13401_v12 = vld [vmem:[#allocation3 + $0x1c] sm:$0xf0]  ;;  %v13389_v26 = vld [vmem:[#allocation6 + $0x228] sm:$0xff] }
 0x3de   : > { %v6216_v49 = vunpack.c.l.b16 %v6181_v33  ;;  %v6217_v60 = vunpack.c.h.b16 %v6181_v33  ;;  %6612 = vmatpush.bf16.msra.mxu2 %v13368_v43  ;;  %6820 = vmatpush.bf16.msrb.mxu1 %v13399_v51  ;;  %v13397_v56 = vld [vmem:[#allocation6 + $0x268] sm:$0xff]  ;;  %v18054_v33 = vor.u32 %v13401_v12, %v12052_v50  ;;  %v13406_v12 = vld [vmem:[#allocation6 + $0x2a0] sm:$0xff] }
 0x3df   : > { %v18005_v46 = vpack.c.b16 %v5772_v44, %v17948_v1  ;;  %v18008_v24 = vpack.c.b16 %v5773_v30, %v17961_v45  ;;  %v18013_v7 = vsel %vm3756_vm10, %v17938_v5, %v18000_v19  ;;  %v18018_v40 = vsel %vm3756_vm10, %v17957_v6, %v18002_v61  ;;  %v13376_v5 = vld [vmem:[#allocation6 + $0x1c0] sm:$0xff]  ;;  %v12054_v44 = vld [vmem:[#allocation3 + $0x20] sm:$0xf0]  ;;  %v13400_v30 = vld [vmem:[#allocation3 + $0x1c] sm:$0xf] }
 0x3e0   : > { %v6218_v3 = vpack.c.b16 %v6216_v49, %v17948_v1  ;;  %v6219_v23 = vpack.c.b16 %v6217_v60, %v17961_v45  ;;  %v5814_v6 = vor.u32 %v17910_v35, %v5802_v31  ;;  %6635 = vmatpush.bf16.msra.mxu3 %v13376_v5  ;;  %6798 = vmatpush.bf16.msrb.mxu0 %v13390_v36  ;;  %v18059_v49 = vshrl.u32 %v18054_v33, 16 }
 0x3e1   : > { %v6024_v29 = vrot.slane %v18005_v46, 1  ;;  %v6026_v28 = vrot.slane %v18008_v24, 1  ;;  %v5808_v53 = vshll.u32 %v18005_v46, 16  ;;  %v5816_v32 = vshll.u32 %v18008_v24, 16 }
 0x3e2   : > { %v6246_v1 = vshrl.u32 %v6218_v3, 16  ;;  %v6249_v4 = vshll.u32 %v6218_v3, 16  ;;  %v6255_v48 = vshrl.u32 %v6219_v23, 16  ;;  %v6258_v37 = vshll.u32 %v6219_v23, 16  ;;  %6821 = vmatpush.bf16.msrb.mxu1 %v13398_v57 }
 0x3e3   : > { %v6025_v45 = vsel %vm3097_vm9, %v6019_v9, %v6024_v29  ;;  %v6027_v59 = vsel %vm3097_vm9, %v6022_v20, %v6026_v28  ;;  %v5810_v25 = vrot.slane %v5808_v53, 1  ;;  %v5818_v18 = vrot.slane %v5816_v32, 1  ;;  %v13409_v53 = vld [vmem:[#allocation6 + $0x2b8] sm:$0xff] }
 0x3e4   : > { %6143 = vmatmul.bf16.gmra.mxu2 %v6025_v45  ;;  %6166 = vmatmul.bf16.gmra.mxu3 %v6027_v59  ;;  %v6248_v13 = vrot.slane %v6246_v1, 1  ;;  %v6251_v39 = vrot.slane %v6249_v4, 2  ;;  %v6257_v20 = vrot.slane %v6255_v48, 1  ;;  %v6260_v2 = vrot.slane %v6258_v37, 2  ;;  %v13417_v32 = vld [vmem:[#allocation6 + $0x2f8] sm:$0xff]  ;;  %v13416_v4 = vld [vmem:[#allocation6 + $0x2f0] sm:$0xff] }
 0x3e5   : > { %v5811_v35 = vsel %vm2719_vm8, %v5806_v47, %v5810_v25  ;;  %v5819_v31 = vsel %vm2719_vm8, %v5814_v6, %v5818_v18  ;;  %6799 = vmatpush.bf16.msrb.mxu0 %v13389_v26  ;;  %v5823_v60 = vshrl.u32 %v18008_v24, 16  ;;  %v18064_v43 = vshll.u32 %v18054_v33, 16  ;;  %v13396_v24 = vld [vmem:[#allocation6 + $0x260] sm:$0xff]  ;;  %7059 = vmatpush.bf16.msrb.mxu2 %v13409_v53  ;;  %v13387_v45 = vld [vmem:[#allocation6 + $0x218] sm:$0xff]  ;;  %v13394_v53 = vld [vmem:[#allocation6 + $0x250] sm:$0xff] }
 0x3e6   : > { %5941 = vmatmul.bf16.gmra.mxu0 %v5811_v35  ;;  %5964 = vmatmul.bf16.gmra.mxu1 %v5819_v31  ;;  %v18040_v9 = vor.u32 %v6251_v39, %v6248_v13  ;;  %v18047_v14 = vor.u32 %v6260_v2, %v6257_v20  ;;  %v7601_v6 = vrot.slane %v18059_v49, 3  ;;  %v13395_v59 = vld [vmem:[#allocation6 + $0x258] sm:$0xff]  ;;  %v13407_v35 = vld [vmem:[#allocation6 + $0x2a8] sm:$0xff]  ;;  %v13414_v26 = vld [vmem:[#allocation6 + $0x2e0] sm:$0xff] }
 0x3e7   : > { %6822 = vmatpush.bf16.msrb.mxu1 %v13397_v56  ;;  %v5825_v23 = vor.u32 %v5823_v60, %v5818_v18  ;;  %v7602_v1 = vrot.slane %v18064_v43, 4  ;;  %7082 = vmatpush.bf16.msrb.mxu3 %v13417_v32  ;;  %v13415_v31 = vld [vmem:[#allocation6 + $0x2e8] sm:$0xff]  ;;  %v13405_v32 = vld [vmem:[#allocation6 + $0x298] sm:$0xff] }
 0x3e8   : > { %v18045_v8 = vsel %vm6220_vm13, %v17963_v58, %v18040_v9  ;;  %v18052_v16 = vsel %vm6220_vm13, %v17965_v0, %v18047_v14  ;;  %v18056_v58 = vor.u32 %v13400_v30, %v12054_v44  ;;  %v5820_v0 = vshrl.u32 %v18005_v46, 16  ;;  %v13388_v46 = vld [vmem:[#allocation6 + $0x220] sm:$0xff] }
 0x3e9   : > { %6800 = vmatpush.bf16.msrb.mxu0 %v13388_v46  ;;  %v13413_v46 = vld [vmem:[#allocation6 + $0x2d8] sm:$0xff] }
 0x3ea   : > { %v5822_v3 = vor.u32 %v5820_v0, %v5810_v25  ;;  %v18067_v5 = vshll.u32 %v18056_v58, 16  ;;  %v18070_v47 = vshrl.u32 %v18056_v58, 16  ;;  %v18074_v25 = vor.u32 %v7602_v1, %v7601_v6  ;;  %v13393_v1 = vld [vmem:[#allocation6 + $0x248] sm:$0xff] }
 0x3eb   : > { %6823 = vmatpush.bf16.msrb.mxu1 %v13396_v24  ;;  %7083 = vmatpush.bf16.msrb.mxu3 %v13416_v4  ;;  %v13385_v24 = vld [vmem:[#allocation6 + $0x208] sm:$0xff] }
 0x3ec   : > { %v7613_v18 = vrot.slane %v18070_v47, 3  ;;  %v7614_v13 = vrot.slane %v18067_v5, 4  ;;  %v13403_v4 = vld [vmem:[#allocation6 + $0x288] sm:$0xff] }
 0x3ed   : > { %6801 = vmatpush.bf16.msrb.mxu0 %v13387_v45  ;;  %v13411_v45 = vld [vmem:[#allocation6 + $0x2c8] sm:$0xff] }
 0x3ee   : > { %v18078_v48 = vor.u32 %v7614_v13, %v7613_v18  ;;  %v13433_v18 = vld [vmem:[#allocation6 + $0x378] sm:$0xff]  ;;  %v13424_v13 = vld [vmem:[#allocation6 + $0x330] sm:$0xff] }
 0x3ef   : > { %6824 = vmatpush.bf16.msrb.mxu1 %v13395_v59  ;;  %7084 = vmatpush.bf16.msrb.mxu3 %v13415_v31  ;;  %v13425_v59 = vld [vmem:[#allocation6 + $0x338] sm:$0xff]  ;;  %v6849_v31 = vld [vmem:[#allocation3 + $0x10] sm:$0xff] }
 0x3f3   : > { %7085 = vmatpush.bf16.msrb.mxu3 %v13414_v26  ;;  %6825 = vmatpush.bf16.msrb.mxu1 %v13394_v53  ;;  %v13440_v26 = vld [vmem:[#allocation6 + $0x3b0] sm:$0xff] }
 0x3f4   : > { %6148 = vmatmul.bf16.gmra.mxu2 %v6024_v29  ;;  %6171 = vmatmul.bf16.gmra.mxu3 %v6026_v28  ;;  %v7554_v29 = vld [vmem:[#allocation3 + $0x30] sm:$0xff]  ;;  %v13408_v28 = vld [vmem:[#allocation6 + $0x2b0] sm:$0xff] }
 0x3f5   : > { %v7589_v39 = vunpack.c.l.b16 %v7554_v29  ;;  %v7590_v37 = vunpack.c.h.b16 %v7554_v29  ;;  %7060 = vmatpush.bf16.msrb.mxu2 %v13408_v28  ;;  %v13384_v29 = vld [vmem:[#allocation6 + $0x200] sm:$0xff] }
 0x3f6   : > { %5946 = vmatmul.bf16.gmra.mxu0 %v5822_v3  ;;  %5969 = vmatmul.bf16.gmra.mxu1 %v5825_v23  ;;  %v13386_v23 = vld [vmem:[#allocation6 + $0x210] sm:$0xff]  ;;  %v13392_v28 = vld [vmem:[#allocation6 + $0x240] sm:$0xff] }
 0x3f7   : > { %v7591_v15 = vpack.c.b16 %v7589_v39, %v17982_v55  ;;  %v7592_v51 = vpack.c.b16 %v7590_v37, %v17984_v21  ;;  %6802 = vmatpush.bf16.msrb.mxu0 %v13386_v23  ;;  %7086 = vmatpush.bf16.msrb.mxu3 %v13413_v46  ;;  %v13432_v39 = vld [vmem:[#allocation6 + $0x370] sm:$0xff]  ;;  %v13423_v37 = vld [vmem:[#allocation6 + $0x328] sm:$0xff] }
 0x3f8   : > { %6826 = vmatpush.bf16.msrb.mxu1 %v13393_v1  ;;  %v13447_v23 = vld [vmem:[#allocation6 + $0x3e8] sm:$0xff]  ;;  %v13438_v1 = vld [vmem:[#allocation6 + $0x3a0] sm:$0xff] }
 0x3f9   : > { %v7618_v20 = vshrl.u32 %v7591_v15, 16  ;;  %v7621_v2 = vshll.u32 %v7591_v15, 16  ;;  %v7627_v36 = vshrl.u32 %v7592_v51, 16  ;;  %v7630_v57 = vshll.u32 %v7592_v51, 16  ;;  %7061 = vmatpush.bf16.msrb.mxu2 %v13407_v35  ;;  %v13431_v35 = vld [vmem:[#allocation6 + $0x368] sm:$0xff]  ;;  %v13441_v51 = vld [vmem:[#allocation6 + $0x3b8] sm:$0xff] }
 0x3fa   : > { %v18106_v15 = vunpack.c.h.b16 %v6849_v31 }
 0x3fb   : > { %v7620_v56 = vrot.slane %v7618_v20, 3  ;;  %v7623_v50 = vrot.slane %v7621_v2, 4  ;;  %v7629_v44 = vrot.slane %v7627_v36, 3  ;;  %v7632_v30 = vrot.slane %v7630_v57, 4  ;;  %6803 = vmatpush.bf16.msrb.mxu0 %v13385_v24  ;;  %v13449_v20 = vld [vmem:[#allocation6 + $0x3f8] sm:$0xff]  ;;  %v13422_v57 = vld [vmem:[#allocation6 + $0x320] sm:$0xff] }
 0x3fc   : > { %6827 = vmatpush.bf16.msrb.mxu1 %v13392_v28  ;;  %v6933_v24 = vrot.slane %v18067_v5, 1 }
 0x3fd   : > { %v18082_v0 = vor.u32 %v7623_v50, %v7620_v56  ;;  %v18084_v60 = vor.u32 %v7632_v30, %v7629_v44  ;;  %7062 = vmatpush.bf16.msrb.mxu2 %v13406_v12  ;;  %v13430_v12 = vld [vmem:[#allocation6 + $0x360] sm:$0xff]  ;;  %v13448_v56 = vld [vmem:[#allocation6 + $0x3f0] sm:$0xff]  ;;  %v13439_v30 = vld [vmem:[#allocation6 + $0x3a8] sm:$0xff] }
 0x3ff   : > { %v18089_v3 = vsel %vm3756_vm10, %v18074_v25, %v18082_v0  ;;  %v18096_v6 = vsel %vm3756_vm10, %v18078_v48, %v18084_v60  ;;  %6804 = vmatpush.bf16.msrb.mxu0 %v13384_v29 }
 0x401   : > { %7063 = vmatpush.bf16.msrb.mxu2 %v13405_v32  ;;  %v6921_v32 = vrot.slane %v18064_v43, 1 }
 0x404   : > { %6613 = vmatmul.bf16.vlgmr.msra.gmra.mxu2 %v17955_v54  ;;  %6636 = vmatmul.bf16.vlgmr.msra.gmra.mxu3 %v17972_v41  ;;  %v13404_v54 = vld [vmem:[#allocation6 + $0x290] sm:$0xff] }
 0x405   : > { %v13412_v41 = vld [vmem:[#allocation6 + $0x2d0] sm:$0xff]  ;;  %7064 = vmatpush.bf16.msrb.mxu2 %v13404_v54  ;;  %v13446_v54 = vld [vmem:[#allocation6 + $0x3e0] sm:$0xff] }
 0x406   : > { %6373 = vmatmul.bf16.vlgmr.msra.gmra.mxu0 %v17976_v10  ;;  %6396 = vmatmul.bf16.vlgmr.msra.gmra.mxu1 %v17980_v52  ;;  %v13402_v10 = vld [vmem:[#allocation6 + $0x280] sm:$0xff] }
 0x407   : > { %7087 = vmatpush.bf16.msrb.mxu3 %v13412_v41  ;;  %v13410_v52 = vld [vmem:[#allocation6 + $0x2c0] sm:$0xff]  ;;  %7300 = vmatpush.bf16.msra.mxu0 %v13425_v59  ;;  %v13420_v59 = vld [vmem:[#allocation6 + $0x310] sm:$0xff] }
 0x408   : > { %7323 = vmatpush.bf16.msra.mxu1 %v13433_v18  ;;  %v6853_v41 = vld [vmem:[#allocation3 + $0x30] sm:$0x11]  ;;  %v13428_v18 = vld [vmem:[#allocation6 + $0x350] sm:$0xff] }
 0x409   : > { %7065 = vmatpush.bf16.msrb.mxu2 %v13403_v4 }
 0x40b   : > { %7088 = vmatpush.bf16.msrb.mxu3 %v13411_v45  ;;  %7301 = vmatpush.bf16.msra.mxu0 %v13424_v13  ;;  %v13437_v13 = vld [vmem:[#allocation6 + $0x398] sm:$0xff] }
 0x40c   : > { %7324 = vmatpush.bf16.msra.mxu1 %v13432_v39  ;;  %v13445_v39 = vld [vmem:[#allocation6 + $0x3d8] sm:$0xff] }
 0x40d   : > { %7066 = vmatpush.bf16.msrb.mxu2 %v13402_v10  ;;  %v6903_v10 = vunpack.c.l.b16 %v6853_v41 }
 0x40f   : > { %7089 = vmatpush.bf16.msrb.mxu3 %v13410_v52  ;;  %7302 = vmatpush.bf16.msra.mxu0 %v13423_v37  ;;  %v6904_v52 = vunpack.c.h.b16 %v6853_v41  ;;  %v6909_v37 = vpack.c.b16 %v6903_v10, %v17982_v55  ;;  %v7110_v10 = vld [vmem:[#allocation3 + $0x8] sm:$0xcc] }
 0x410   : > { %7325 = vmatpush.bf16.msra.mxu1 %v13431_v35 }
 0x411   : > { %7503 = vmatpush.bf16.msra.mxu2 %v13441_v51  ;;  %v6910_v35 = vpack.c.b16 %v6904_v52, %v17984_v21  ;;  %v6939_v51 = vshll.u32 %v6909_v37, 16  ;;  %v6951_v41 = vshrl.u32 %v6909_v37, 16  ;;  %v13455_v52 = vld [vmem:[#allocation6 + $0x428] sm:$0xff]  ;;  %v7148_v37 = vunpack.c.h.b16 %v7110_v10 }
 0x413   : > { %7526 = vmatpush.bf16.msra.mxu3 %v13449_v20  ;;  %7303 = vmatpush.bf16.msra.mxu0 %v13422_v57  ;;  %v6947_v20 = vshll.u32 %v6910_v35, 16  ;;  %v6937_v57 = vor.u32 %v18059_v49, %v6921_v32 }
 0x414   : > { %6618 = vmatmul.bf16.gmra.mxu2 %v18013_v7  ;;  %6641 = vmatmul.bf16.gmra.mxu3 %v18018_v40  ;;  %v6848_v7 = vld [vmem:[#allocation3 + $0x8] sm:$0xff]  ;;  %v18104_v40 = vunpack.c.l.b16 %v6849_v31  ;;  %v13419_v31 = vld [vmem:[#allocation6 + $0x308] sm:$0xff] }
 0x415   : > { %7326 = vmatpush.bf16.msra.mxu1 %v13430_v12  ;;  %7504 = vmatpush.bf16.msra.mxu2 %v13440_v26  ;;  %v6941_v12 = vrot.slane %v6939_v51, 1  ;;  %v6945_v26 = vor.u32 %v18070_v47, %v6933_v24  ;;  %v13454_v51 = vld [vmem:[#allocation6 + $0x420] sm:$0xff] }
 0x416   : > { %6378 = vmatmul.bf16.gmra.mxu0 %v18045_v8  ;;  %6401 = vmatmul.bf16.gmra.mxu1 %v18052_v16  ;;  %v6893_v8 = vunpack.c.l.b16 %v6848_v7  ;;  %v6894_v16 = vunpack.c.h.b16 %v6848_v7  ;;  %v13427_v7 = vld [vmem:[#allocation6 + $0x348] sm:$0xff] }
 0x417   : > { %7527 = vmatpush.bf16.msra.mxu3 %v13448_v56  ;;  %v6949_v56 = vrot.slane %v6947_v20, 1  ;;  %v13462_v20 = vld [vmem:[#allocation6 + $0x460] sm:$0xff] }
 0x418   : > { %v6905_v2 = vpack.c.b16 %v18104_v40, %v6893_v8  ;;  %v6906_v36 = vpack.c.b16 %v18106_v15, %v6894_v16  ;;  %v13436_v8 = vld [vmem:[#allocation6 + $0x390] sm:$0xff] }
 0x419   : > { %7505 = vmatpush.bf16.msra.mxu2 %v13439_v30  ;;  %v13444_v16 = vld [vmem:[#allocation6 + $0x3d0] sm:$0xff]  ;;  %v13457_v30 = vld [vmem:[#allocation6 + $0x438] sm:$0xff] }
 0x41a   : > { %v6914_v50 = vshll.u32 %v6905_v2, 16  ;;  %v6926_v44 = vshll.u32 %v6906_v36, 16  ;;  %v6912_v53 = vshrl.u32 %v6905_v2, 16  ;;  %v6924_v46 = vshrl.u32 %v6906_v36, 16  ;;  %v13418_v2 = vld [vmem:[#allocation6 + $0x300] sm:$0xff]  ;;  %v13443_v36 = vld [vmem:[#allocation6 + $0x3c8] sm:$0xff] }
 0x41b   : > { %7528 = vmatpush.bf16.msra.mxu3 %v13447_v23  ;;  %v13465_v23 = vld [vmem:[#allocation6 + $0x478] sm:$0xff] }
 0x41d   : > { %7506 = vmatpush.bf16.msra.mxu2 %v13438_v1 }
 0x41f   : > { %7529 = vmatpush.bf16.msra.mxu3 %v13446_v54 }
 0x421   : > { %7507 = vmatpush.bf16.msra.mxu2 %v13437_v13  ;;  %v6694_v13 = vpack.c.b16 %v17984_v21, %v17984_v21 }
 0x423   : > { %7530 = vmatpush.bf16.msra.mxu3 %v13445_v39  ;;  %v7147_v39 = vunpack.c.l.b16 %v7110_v10 }
 0x424   : > { %6623 = vmatmul.bf16.gmra.mxu2 %v18000_v19  ;;  %6646 = vmatmul.bf16.gmra.mxu3 %v18002_v61  ;;  %v13421_v19 = vld [vmem:[#allocation6 + $0x318] sm:$0xff] }
 0x425   : > { %v13429_v61 = vld [vmem:[#allocation6 + $0x358] sm:$0xff]  ;;  %7304 = vmatpush.bf16.msra.mxu0 %v13421_v19  ;;  %7508 = vmatpush.bf16.msra.mxu2 %v13436_v8  ;;  %v13434_v19 = vld [vmem:[#allocation6 + $0x380] sm:$0xff] }
 0x426   : > { %6383 = vmatmul.bf16.gmra.mxu0 %v18040_v9  ;;  %6406 = vmatmul.bf16.gmra.mxu1 %v18047_v14  ;;  %v6916_v9 = vrot.slane %v6914_v50, 1  ;;  %v6928_v14 = vrot.slane %v6926_v44, 1  ;;  %v6942_v50 = vsel %vm2719_vm8, %v6937_v57, %v6941_v12  ;;  %v6950_v44 = vsel %vm2719_vm8, %v6945_v26, %v6949_v56 }
 0x427   : > { %7327 = vmatpush.bf16.msra.mxu1 %v13429_v61  ;;  %7531 = vmatpush.bf16.msra.mxu3 %v13444_v16  ;;  %v13442_v61 = vld [vmem:[#allocation6 + $0x3c0] sm:$0xff] }
 0x428   : > { %v6917_v29 = vor.u32 %v6916_v9, %v6912_v53  ;;  %v6929_v28 = vor.u32 %v6928_v14, %v6924_v46  ;;  %v18131_v14 = vld [vmem:[%s18840_s7] ss:$0 sm:$0xff] }
 0x429   : > { %7305 = vmatpush.bf16.msra.mxu0 %v13420_v59  ;;  %v13456_v46 = vld [vmem:[#allocation6 + $0x430] sm:$0xff]  ;;  %v13463_v59 = vld [vmem:[#allocation6 + $0x468] sm:$0xff] }
 0x42a   : > { %v6922_v4 = vsel %vm2719_vm8, %v6917_v29, %v6921_v32  ;;  %v6934_v45 = vsel %vm2719_vm8, %v6929_v28, %v6933_v24  ;;  %v13464_v24 = vld [vmem:[#allocation6 + $0x470] sm:$0xff]  ;;  %v6953_v28 = vor.u32 %v6951_v41, %v6941_v12 }
 0x42b   : > { %7328 = vmatpush.bf16.msra.mxu1 %v13428_v18  ;;  %7532 = vmatpush.bf16.msra.mxu3 %v13443_v36  ;;  %v6693_v18 = vpack.c.b16 %v17982_v55, %v17982_v55 }
 0x42d   : > { %7306 = vmatpush.bf16.msra.mxu0 %v13419_v31  ;;  %v7151_v31 = vpack.c.b16 %v18104_v40, %v7147_v39 }
 0x42f   : > { %7329 = vmatpush.bf16.msra.mxu1 %v13427_v7  ;;  %7533 = vmatpush.bf16.msra.mxu3 %v13442_v61  ;;  %v7152_v7 = vpack.c.b16 %v18106_v15, %v7148_v37  ;;  %v7160_v36 = vshll.u32 %v7151_v31, 16  ;;  %v13461_v61 = vld [vmem:[#allocation6 + $0x458] sm:$0xff] }
 0x431   : > { %7307 = vmatpush.bf16.msra.mxu0 %v13418_v2  ;;  %v7169_v57 = vshrl.u32 %v7152_v7, 16  ;;  %v7172_v12 = vshll.u32 %v7152_v7, 16 }
 0x434   : > { %7067 = vmatmul.bf16.vlgmr.msrb.gmra.mxu2 %v6922_v4  ;;  %7090 = vmatmul.bf16.vlgmr.msrb.gmra.mxu3 %v6934_v45 }
 0x436   : > { %6805 = vmatmul.bf16.vlgmr.msrb.gmra.mxu0 %v17874_v22  ;;  %6828 = vmatmul.bf16.vlgmr.msrb.gmra.mxu1 %v17893_v11  ;;  %v13426_v22 = vld [vmem:[#allocation6 + $0x340] sm:$0xff]  ;;  %v13435_v11 = vld [vmem:[#allocation6 + $0x388] sm:$0xff] }
 0x437   : > { %7330 = vmatpush.bf16.msra.mxu1 %v13426_v22  ;;  %7509 = vmatpush.bf16.msra.mxu2 %v13435_v11  ;;  %v7157_v11 = vshrl.u32 %v7151_v31, 16  ;;  %v13460_v31 = vld [vmem:[#allocation6 + $0x450] sm:$0xff] }
 0x438   : > { %7737 = vmatpush.bf16.msrb.mxu0 %v13457_v30  ;;  %v7176_v30 = vrot.slane %v18070_v47, 2 }
 0x43b   : > { %7510 = vmatpush.bf16.msra.mxu2 %v13434_v19  ;;  %7760 = vmatpush.bf16.msrb.mxu1 %v13465_v23  ;;  %v13453_v19 = vld [vmem:[#allocation6 + $0x418] sm:$0xff]  ;;  %v7177_v23 = vrot.slane %v18067_v5, 3 }
 0x43c   : > { %7738 = vmatpush.bf16.msrb.mxu0 %v13456_v46  ;;  %v7159_v46 = vrot.slane %v7157_v11, 2 }
 0x43d   : > { %v7178_v47 = vor.u32 %v7177_v23, %v7176_v30 }
 0x43f   : > { %7761 = vmatpush.bf16.msrb.mxu1 %v13464_v24  ;;  %v7162_v24 = vrot.slane %v7160_v36, 3 }
 0x440   : > { %7739 = vmatpush.bf16.msrb.mxu0 %v13455_v52 }
 0x441   : > { %v7163_v10 = vor.u32 %v7162_v24, %v7159_v46 }
 0x443   : > { %7762 = vmatpush.bf16.msrb.mxu1 %v13463_v59 }
 0x444   : > { %7072 = vmatmul.bf16.gmra.mxu2 %v6942_v50  ;;  %7095 = vmatmul.bf16.gmra.mxu3 %v6950_v44  ;;  %v7164_v50 = vrot.slane %v18059_v49, 2  ;;  %v7165_v44 = vrot.slane %v18064_v43, 3 }
 0x445   : > { %7740 = vmatpush.bf16.msrb.mxu0 %v13454_v51 }
 0x446   : > { %6810 = vmatmul.bf16.gmra.mxu0 %v17989_v27  ;;  %6833 = vmatmul.bf16.gmra.mxu1 %v17994_v38  ;;  %v6954_v38 = vshrl.u32 %v6910_v35, 16  ;;  %v7351_v35 = vld [vmem:[#allocation3 + $0x8] sm:$0x88]  ;;  %v7166_v5 = vor.u32 %v7165_v44, %v7164_v50 }
 0x447   : > { %v7386_v8 = vunpack.c.l.b16 %v7351_v35  ;;  %v7387_v16 = vunpack.c.h.b16 %v7351_v35  ;;  %7763 = vmatpush.bf16.msrb.mxu1 %v13462_v20  ;;  %v13452_v35 = vld [vmem:[#allocation6 + $0x410] sm:$0xff] }
 0x448   : > { %v6956_v4 = vor.u32 %v6954_v38, %v6949_v56 }
 0x449   : > { %v18147_v26 = vpack.c.b16 %v18104_v40, %v7386_v8  ;;  %v18150_v56 = vpack.c.b16 %v18106_v15, %v7387_v16  ;;  %v7395_v40 = vrot.slane %v18056_v58, 3  ;;  %7741 = vmatpush.bf16.msrb.mxu0 %v13453_v19  ;;  %v13459_v19 = vld [vmem:[#allocation6 + $0x448] sm:$0xff] }
 0x44b   : > { %v5937_v9 = vpop.f32.mrf.mxu0  ;;  %v7391_v49 = vrot.slane %v18147_v26, 3  ;;  %v7394_v43 = vrot.slane %v18150_v56, 3  ;;  %7764 = vmatpush.bf16.msrb.mxu1 %v13461_v61 }
 0x44c   : > { %v5960_v53 = vpop.f32.mrf.mxu1 }
 0x44d   : > { %v5961_v32 = vadd.f32 %v5960_v53, %v5937_v9  ;;  %v7392_v9 = vrot.slane %v18054_v33, 3  ;;  %v7111_v53 = vld [vmem:[#allocation3 + $0x30] sm:$0x77]  ;;  %7742 = vmatpush.bf16.msrb.mxu0 %v13452_v35 }
 0x44e   : > { %v7150_v41 = vunpack.c.h.b16 %v7111_v53 }
 0x44f   : > { %v6139_v1 = vpop.f32.mrf.mxu2  ;;  %v6162_v54 = vpop.f32.mrf.mxu3  ;;  %v5974_v27 = vadd.f32 %v18131_v14, %v5961_v32  ;;  %7765 = vmatpush.bf16.msrb.mxu1 %v13460_v31 }
 0x450   : > { %v6163_v29 = vadd.f32 %v6162_v54, %v6139_v1  ;;  %v7171_v1 = vrot.slane %v7169_v57, 2  ;;  %v7174_v54 = vrot.slane %v7172_v12, 3  ;;  %v7154_v37 = vpack.c.b16 %v7150_v41, %v17984_v21  ;;  %v13458_v41 = vld [vmem:[#allocation6 + $0x440] sm:$0xff] }
 0x452   : > { %v18134_v45 = vadd.f32 %v6163_v29, %v5974_v27  ;;  %v7149_v27 = vunpack.c.l.b16 %v7111_v53  ;;  %v7175_v52 = vor.u32 %v7174_v54, %v7171_v1  ;;  %v7190_v36 = vshrl.u32 %v7154_v37, 16 }
 0x453   : > { %v18142_v2 = vpop.f32.mrf.mxu0  ;;  %v7193_v57 = vshll.u32 %v7154_v37, 16  ;;  %7766 = vmatpush.bf16.msrb.mxu1 %v13459_v19  ;;  %v7399_v54 = vrot.slane %v7154_v37, 3  ;;  %v7606_v19 = vshrl.u32 %v18150_v56, 16 }
 0x454   : > { %7077 = vmatmul.bf16.gmra.mxu2 %v6953_v28  ;;  %7100 = vmatmul.bf16.gmra.mxu3 %v6956_v4  ;;  %v18144_v22 = vpop.f32.mrf.mxu1  ;;  %v7393_v28 = vsel %vm7390_vm14, %v7391_v49, %v7392_v9  ;;  %v7396_v4 = vsel %vm7390_vm14, %v7394_v43, %v7395_v40  ;;  %v7153_v39 = vpack.c.b16 %v7149_v27, %v17982_v55  ;;  %v13451_v55 = vld [vmem:[#allocation6 + $0x408] sm:$0xff]  ;;  %v7192_v23 = vrot.slane %v7190_v36, 2  ;;  %v13450_v27 = vld [vmem:[#allocation6 + $0x400] sm:$0xff] }
 0x455   : > { %7743 = vmatpush.bf16.msrb.mxu0 %v13451_v55  ;;  %v7195_v53 = vrot.slane %v7193_v57, 3  ;;  %v7594_v57 = vshrl.u32 %v18147_v26, 16  ;;  %v7597_v55 = vshll.u32 %v18147_v26, 16 }
 0x456   : > { %6815 = vmatmul.bf16.gmra.mxu0 %v6693_v18  ;;  %6838 = vmatmul.bf16.gmra.mxu1 %v6694_v13  ;;  %v7167_v18 = vsel %vm7155_vm15, %v7163_v10, %v7166_v5  ;;  %v7179_v13 = vsel %vm7155_vm15, %v7175_v52, %v7178_v47  ;;  %v7181_v20 = vshrl.u32 %v7153_v39, 16  ;;  %v7184_v11 = vshll.u32 %v7153_v39, 16 }
 0x457   : > { %v18158_v32 = vpop.f32.mrf.mxu2  ;;  %v18160_v15 = vpop.f32.mrf.mxu3  ;;  %v7397_v1 = vrot.slane %v7153_v39, 3  ;;  %v7196_v43 = vor.u32 %v7195_v53, %v7192_v23  ;;  %7767 = vmatpush.bf16.msrb.mxu1 %v13458_v41  ;;  %v7608_v23 = vrot.slane %v7606_v19, 3 }
 0x458   : > { %v7183_v44 = vrot.slane %v7181_v20, 2  ;;  %v7186_v30 = vrot.slane %v7184_v11, 3 }
 0x459   : > { %7744 = vmatpush.bf16.msrb.mxu0 %v13450_v27 }
 0x45a   : > { %v7187_v49 = vor.u32 %v7186_v30, %v7183_v44  ;;  %v7596_v44 = vrot.slane %v7594_v57, 3  ;;  %v7599_v30 = vrot.slane %v7597_v55, 4 }
 0x45c   : > { %v7188_v52 = vsel %vm7155_vm15, %v7166_v5, %v7187_v49 }
 0x463   : > { %v5942_v38 = vpop.f32.mrf.mxu0  ;;  %v5965_v29 = vpop.f32.mrf.mxu1 }
 0x464   : > { %v5966_v59 = vadd.f32 %v5965_v29, %v5942_v38  ;;  %7511 = vmatmul.bf16.vlgmr.msra.gmra.mxu2 %v7393_v28  ;;  %7534 = vmatmul.bf16.vlgmr.msra.gmra.mxu3 %v7396_v4  ;;  %v7398_v28 = vsel %vm7390_vm14, %v7392_v9, %v7397_v1  ;;  %v7400_v4 = vsel %vm7390_vm14, %v7395_v40, %v7399_v54 }
 0x466   : > { %7308 = vmatmul.bf16.vlgmr.msra.gmra.mxu0 %v7167_v18  ;;  %7331 = vmatmul.bf16.vlgmr.msra.gmra.mxu1 %v7179_v13  ;;  %v5976_v16 = vadd.f32 %v18131_v14, %v5966_v59  ;;  %v7197_v59 = vsel %vm7155_vm15, %v7178_v47, %v7196_v43 }
 0x467   : > { %v6144_v7 = vpop.f32.mrf.mxu2  ;;  %v6167_v8 = vpop.f32.mrf.mxu3 }
 0x468   : > { %v6168_v51 = vadd.f32 %v6167_v8, %v6144_v7 }
 0x46a   : > { %v18175_v12 = vadd.f32 %v6168_v51, %v5976_v16 }
 0x46b   : > { %v5944_v21 = vpop.f32.mrf.mxu0  ;;  %v5967_v61 = vpop.f32.mrf.mxu1 }
 0x46c   : > { %v18177_v50 = vadd.f32 %v5967_v61, %v5944_v21  ;;  %v7609_v21 = vshll.u32 %v18150_v56, 16 }
 0x46e   : > { %v7611_v53 = vrot.slane %v7609_v21, 4 }
 0x46f   : > { %v18179_v46 = vpop.f32.mrf.mxu2  ;;  %v18181_v24 = vpop.f32.mrf.mxu3 }
 0x473   : > { %v5947_v38 = vpop.f32.mrf.mxu0  ;;  %v5970_v29 = vpop.f32.mrf.mxu1 }
 0x474   : > { %v5971_v10 = vadd.f32 %v5970_v29, %v5947_v38  ;;  %7516 = vmatmul.bf16.gmra.mxu2 %v7398_v28  ;;  %7539 = vmatmul.bf16.gmra.mxu3 %v7400_v4 }
 0x476   : > { %7313 = vmatmul.bf16.gmra.mxu0 %v7188_v52  ;;  %7336 = vmatmul.bf16.gmra.mxu1 %v7197_v59  ;;  %v5978_v33 = vadd.f32 %v18131_v14, %v5971_v10 }
 0x477   : > { %v6149_v18 = vpop.f32.mrf.mxu2  ;;  %v6172_v13 = vpop.f32.mrf.mxu3 }
 0x478   : > { %v6173_v9 = vadd.f32 %v6172_v13, %v6149_v18 }
 0x47a   : > { %v6180_v39 = vadd.f32 %v6173_v9, %v5978_v33 }
 0x47b   : > { %v5949_v58 = vpop.f32.mrf.mxu0  ;;  %v5972_v37 = vpop.f32.mrf.mxu1 }
 0x47f   : > { %v6151_v40 = vpop.f32.mrf.mxu2  ;;  %v6174_v35 = vpop.f32.mrf.mxu3 }
 0x483   : > { %v6374_v31 = vpop.f32.mrf.mxu0  ;;  %v6397_v7 = vpop.f32.mrf.mxu1 }
 0x484   : > { %v6398_v8 = vadd.f32 %v6397_v7, %v6374_v31  ;;  %7521 = vmatmul.bf16.gmra.mxu2 %v7397_v1  ;;  %7544 = vmatmul.bf16.gmra.mxu3 %v7399_v54 }
 0x486   : > { %v6411_v5 = vadd.f32 %v6398_v8, %v18134_v45  ;;  %7318 = vmatmul.bf16.gmra.mxu0 %v7187_v49  ;;  %7341 = vmatmul.bf16.gmra.mxu1 %v7196_v43  ;;  %v7600_v49 = vor.u32 %v7599_v30, %v7596_v44  ;;  %v7612_v43 = vor.u32 %v7611_v53, %v7608_v23 }
 0x487   : > { %v6614_v47 = vpop.f32.mrf.mxu2  ;;  %v6637_v16 = vpop.f32.mrf.mxu3 }
 0x488   : > { %v6638_v51 = vadd.f32 %v6637_v16, %v6614_v47  ;;  %v7604_v26 = vsel %vm3756_vm10, %v7600_v49, %v18074_v25  ;;  %v7616_v41 = vsel %vm3756_vm10, %v7612_v43, %v18078_v48 }
 0x48a   : > { %v6651_v20 = vadd.f32 %v6638_v51, %v6411_v5 }
 0x48b   : > { %v18193_v11 = vpop.f32.mrf.mxu0  ;;  %v18195_v36 = vpop.f32.mrf.mxu1 }
 0x48f   : > { %v18201_v61 = vpop.f32.mrf.mxu2  ;;  %v18203_v45 = vpop.f32.mrf.mxu3 }
 0x493   : > { %v6379_v1 = vpop.f32.mrf.mxu0  ;;  %v6402_v54 = vpop.f32.mrf.mxu1 }
 0x494   : > { %v6403_v27 = vadd.f32 %v6402_v54, %v6379_v1 }
 0x496   : > { %v6413_v56 = vadd.f32 %v6403_v27, %v18175_v12  ;;  %7745 = vmatmul.bf16.vlgmr.msrb.gmra.mxu0 %v7604_v26  ;;  %7768 = vmatmul.bf16.vlgmr.msrb.gmra.mxu1 %v7616_v41 }
 0x497   : > { %v6619_v38 = vpop.f32.mrf.mxu2  ;;  %v6642_v29 = vpop.f32.mrf.mxu3 }
 0x498   : > { %v6643_v28 = vadd.f32 %v6642_v29, %v6619_v38 }
 0x49a   : > { %v6653_v4 = vadd.f32 %v6643_v28, %v6413_v56 }
 0x49b   : > { %v18210_v10 = vpop.f32.mrf.mxu0  ;;  %v18212_v52 = vpop.f32.mrf.mxu1 }
 0x49f   : > { %v18214_v59 = vpop.f32.mrf.mxu2  ;;  %v18216_v18 = vpop.f32.mrf.mxu3 }
 0x4a3   : > { %v6384_v25 = vpop.f32.mrf.mxu0  ;;  %v6407_v13 = vpop.f32.mrf.mxu1 }
 0x4a4   : > { %v6408_v33 = vadd.f32 %v6407_v13, %v6384_v25 }
 0x4a6   : > { %v6415_v48 = vadd.f32 %v6408_v33, %v6180_v39  ;;  %7750 = vmatmul.bf16.gmra.mxu0 %v18089_v3  ;;  %7773 = vmatmul.bf16.gmra.mxu1 %v18096_v6 }
 0x4a7   : > { %v6624_v12 = vpop.f32.mrf.mxu2  ;;  %v6647_v9 = vpop.f32.mrf.mxu3 }
 0x4a8   : > { %v6648_v58 = vadd.f32 %v6647_v9, %v6624_v12 }
 0x4aa   : > { %v6655_v37 = vadd.f32 %v6648_v58, %v6415_v48 }
 0x4ab   : > { %v6386_v40 = vpop.f32.mrf.mxu0  ;;  %v6409_v35 = vpop.f32.mrf.mxu1 }
 0x4af   : > { %v6626_v31 = vpop.f32.mrf.mxu2  ;;  %v6649_v7 = vpop.f32.mrf.mxu3 }
 0x4b3   : > { %v6806_v8 = vpop.f32.mrf.mxu0  ;;  %v6829_v5 = vpop.f32.mrf.mxu1 }
 0x4b4   : > { %v6830_v47 = vadd.f32 %v6829_v5, %v6806_v8  ;;  %v13473_v8 = vld [vmem:[#allocation8 + $0x38] sm:$0xff] }
 0x4b5   : > { %7923 = vmatpush.bf16.msrb.mxu2 %v13473_v8 }
 0x4b6   : > { %v6843_v16 = vadd.f32 %v6830_v47, %v6651_v20  ;;  %7755 = vmatmul.bf16.gmra.mxu0 %v18082_v0  ;;  %7778 = vmatmul.bf16.gmra.mxu1 %v18084_v60 }
 0x4b7   : > { %v7068_v39 = vpop.f32.mrf.mxu2  ;;  %v7091_v3 = vpop.f32.mrf.mxu3 }
 0x4b8   : > { %v7092_v51 = vadd.f32 %v7091_v3, %v7068_v39 }
 0x4ba   : > { %v18222_v6 = vadd.f32 %v7092_v51, %v6843_v16 }
 0x4bb   : > { %v18224_v57 = vpop.f32.mrf.mxu0  ;;  %v18226_v55 = vpop.f32.mrf.mxu1 }
 0x4bf   : > { %v18228_v19 = vpop.f32.mrf.mxu2  ;;  %v18230_v21 = vpop.f32.mrf.mxu3 }
 0x4c3   : > { %v6811_v44 = vpop.f32.mrf.mxu0  ;;  %v6834_v30 = vpop.f32.mrf.mxu1 }
 0x4c4   : > { %v6835_v20 = vadd.f32 %v6834_v30, %v6811_v44  ;;  %v13472_v30 = vld [vmem:[#allocation8 + $0x30] sm:$0xff] }
 0x4c5   : > { %7924 = vmatpush.bf16.msrb.mxu2 %v13472_v30  ;;  %v5963_v30 = vadd.f32 %v18144_v22, %v18142_v2  ;;  %v6400_v22 = vadd.f32 %v18195_v36, %v18193_v11  ;;  %v6832_v36 = vadd.f32 %v18226_v55, %v18224_v57 }
 0x4c6   : > { %v6845_v23 = vadd.f32 %v6835_v20, %v6653_v4  ;;  %v13481_v20 = vld [vmem:[#allocation8 + $0x78] sm:$0xff] }
 0x4c7   : > { %v7073_v0 = vpop.f32.mrf.mxu2  ;;  %v7096_v53 = vpop.f32.mrf.mxu3  ;;  %8028 = vmatpush.bf16.msrb.mxu3 %v13481_v20  ;;  %v13478_v20 = vld [vmem:[#allocation8 + $0x60] sm:$0xff]  ;;  %v5975_v2 = vadd.f32 %v18131_v14, %v5963_v30  ;;  %v13467_v30 = vld [vmem:[#allocation8 + $0x8] sm:$0xff] }
 0x4c8   : > { %v7097_v60 = vadd.f32 %v7096_v53, %v7073_v0  ;;  %v13471_v53 = vld [vmem:[#allocation8 + $0x28] sm:$0xff] }
 0x4c9   : > { %7925 = vmatpush.bf16.msrb.mxu2 %v13471_v53  ;;  %v13487_v53 = vld [vmem:[#allocation8 + $0xa8] sm:$0xff] }
 0x4ca   : > { %v18232_v1 = vadd.f32 %v7097_v60, %v6845_v23  ;;  %v13480_v60 = vld [vmem:[#allocation8 + $0x70] sm:$0xff] }
 0x4cb   : > { %v18234_v54 = vpop.f32.mrf.mxu0  ;;  %v18236_v49 = vpop.f32.mrf.mxu1  ;;  %8029 = vmatpush.bf16.msrb.mxu3 %v13480_v60  ;;  %v13495_v60 = vld [vmem:[#allocation8 + $0xe8] sm:$0xff] }
 0x4cf   : > { %v18238_v43 = vpop.f32.mrf.mxu2  ;;  %v18240_v27 = vpop.f32.mrf.mxu3 }
 0x4d3   : > { %v6816_v26 = vpop.f32.mrf.mxu0  ;;  %v6839_v41 = vpop.f32.mrf.mxu1 }
 0x4d4   : > { %v6840_v56 = vadd.f32 %v6839_v41, %v6816_v26  ;;  %v13489_v26 = vld [vmem:[#allocation8 + $0xb8] sm:$0xff] }
 0x4d5   : > { %v13497_v41 = vld [vmem:[#allocation8 + $0xf8] sm:$0xff]  ;;  %8149 = vmatpush.bf16.msra.mxu0 %v13489_v26 }
 0x4d6   : > { %v6847_v38 = vadd.f32 %v6840_v56, %v6655_v37  ;;  %8274 = vmatpush.bf16.msra.mxu1 %v13497_v41  ;;  %v6165_v41 = vadd.f32 %v18160_v15, %v18158_v32 }
 0x4d7   : > { %v7078_v29 = vpop.f32.mrf.mxu2  ;;  %v7101_v28 = vpop.f32.mrf.mxu3 }
 0x4d8   : > { %v7102_v4 = vadd.f32 %v7101_v28, %v7078_v29  ;;  %v13470_v29 = vld [vmem:[#allocation8 + $0x20] sm:$0xff]  ;;  %v13479_v28 = vld [vmem:[#allocation8 + $0x68] sm:$0xff] }
 0x4d9   : > { %7926 = vmatpush.bf16.msrb.mxu2 %v13470_v29  ;;  %8030 = vmatpush.bf16.msrb.mxu3 %v13479_v28  ;;  %v13477_v29 = vld [vmem:[#allocation8 + $0x58] sm:$0xff]  ;;  %v13486_v28 = vld [vmem:[#allocation8 + $0xa0] sm:$0xff] }
 0x4da   : > { %v18242_v25 = vadd.f32 %v7102_v4, %v6847_v38  ;;  %v13488_v4 = vld [vmem:[#allocation8 + $0xb0] sm:$0xff] }
 0x4db   : > { %v6818_v13 = vpop.f32.mrf.mxu0  ;;  %v6841_v33 = vpop.f32.mrf.mxu1  ;;  %8150 = vmatpush.bf16.msra.mxu0 %v13488_v4 }
 0x4dc   : > { %19141 = vst [vmem:[#allocation44_spill] sm:$0xff] %v18242_v25  ;;  %v13496_v13 = vld [vmem:[#allocation8 + $0xf0] sm:$0xff] }
 0x4dd   : > { %8275 = vmatpush.bf16.msra.mxu1 %v13496_v13  ;;  %8031 = vmatpush.bf16.msrb.mxu3 %v13478_v20  ;;  %v13494_v13 = vld [vmem:[#allocation8 + $0xe0] sm:$0xff] }
 0x4de   : > { %7927 = vmatpush.bf16.msrb.mxu2 %v13469_v34 }
 0x4df   : > { %v7080_v48 = vpop.f32.mrf.mxu2  ;;  %v7103_v12 = vpop.f32.mrf.mxu3  ;;  %8151 = vmatpush.bf16.msra.mxu0 %v13487_v53  ;;  %v13484_v53 = vld [vmem:[#allocation8 + $0x90] sm:$0xff] }
 0x4e1   : > { %8276 = vmatpush.bf16.msra.mxu1 %v13495_v60  ;;  %8032 = vmatpush.bf16.msrb.mxu3 %v13477_v29 }
 0x4e3   : > { %v7309_v9 = vpop.f32.mrf.mxu0  ;;  %v7332_v58 = vpop.f32.mrf.mxu1  ;;  %8152 = vmatpush.bf16.msra.mxu0 %v13486_v28 }
 0x4e4   : > { %v7333_v26 = vadd.f32 %v7332_v58, %v7309_v9  ;;  %v13468_v58 = vld [vmem:[#allocation8 + $0x10] sm:$0xff] }
 0x4e5   : > { %8277 = vmatpush.bf16.msra.mxu1 %v13494_v13  ;;  %7928 = vmatpush.bf16.msrb.mxu2 %v13468_v58  ;;  %v6170_v13 = vadd.f32 %v18181_v24, %v18179_v46  ;;  %v13482_v46 = vld [vmem:[#allocation8 + $0x80] sm:$0xff]  ;;  %v13505_v24 = vld [vmem:[#allocation8 + $0x138] sm:$0xff] }
 0x4e6   : > { %v7346_v9 = vadd.f32 %v7333_v26, %v18222_v6  ;;  %v13492_v26 = vld [vmem:[#allocation8 + $0xd0] sm:$0xff] }
 0x4e7   : > { %v7512_v40 = vpop.f32.mrf.mxu2  ;;  %v7535_v35 = vpop.f32.mrf.mxu3 }
 0x4e8   : > { %v7536_v4 = vadd.f32 %v7535_v35, %v7512_v40  ;;  %v13485_v40 = vld [vmem:[#allocation8 + $0x98] sm:$0xff] }
 0x4e9   : > { %8153 = vmatpush.bf16.msra.mxu0 %v13485_v40  ;;  %7929 = vmatpush.bf16.msrb.mxu2 %v13467_v30 }
 0x4ea   : > { %v7549_v34 = vadd.f32 %v7536_v4, %v7346_v9  ;;  %v13491_v9 = vld [vmem:[#allocation8 + $0xc8] sm:$0xff] }
 0x4eb   : > { %v18244_v31 = vpop.f32.mrf.mxu0  ;;  %v18246_v7 = vpop.f32.mrf.mxu1 }
 0x4ec   : > { %v7335_v29 = vadd.f32 %v18246_v7, %v18244_v31  ;;  %v13474_v31 = vld [vmem:[#allocation8 + $0x40] sm:$0xff]  ;;  %v13483_v7 = vld [vmem:[#allocation8 + $0x88] sm:$0xff] }
 0x4ed   : > { %8154 = vmatpush.bf16.msra.mxu0 %v13484_v53 }
 0x4ef   : > { %v18248_v37 = vpop.f32.mrf.mxu2  ;;  %v18250_v5 = vpop.f32.mrf.mxu3 }
 0x4f0   : > { %v7538_v28 = vadd.f32 %v18250_v5, %v18248_v37  ;;  %v5977_v37 = vadd.f32 %v18131_v14, %v18177_v50  ;;  %v6405_v5 = vadd.f32 %v18212_v52, %v18210_v10  ;;  %v6645_v14 = vadd.f32 %v18216_v18, %v18214_v59  ;;  %v13504_v10 = vld [vmem:[#allocation8 + $0x130] sm:$0xff] }
 0x4f1   : > { %8155 = vmatpush.bf16.msra.mxu0 %v13483_v7  ;;  %v7099_v59 = vadd.f32 %v18240_v27, %v18238_v43 }
 0x4f3   : > { %v18252_v47 = vpop.f32.mrf.mxu0  ;;  %v18254_v16 = vpop.f32.mrf.mxu1 }
 0x4f4   : > { %v7338_v58 = vadd.f32 %v18254_v16, %v18252_v47  ;;  %v8177_v47 = vld [vmem:[#allocation4] sm:$0x8]  ;;  %v6179_v16 = vadd.f32 %v6170_v13, %v5977_v37 }
 0x4f5   : > { %8156 = vmatpush.bf16.msra.mxu0 %v13482_v46 }
 0x4f6   : > { %v7348_v52 = vadd.f32 %v7338_v58, %v18232_v1  ;;  %v6414_v40 = vadd.f32 %v6405_v5, %v6179_v16  ;;  %v13503_v1 = vld [vmem:[#allocation8 + $0x128] sm:$0xff] }
 0x4f7   : > { %v18256_v39 = vpop.f32.mrf.mxu2  ;;  %v18258_v3 = vpop.f32.mrf.mxu3 }
 0x4fb   : > { %v18260_v51 = vpop.f32.mrf.mxu0  ;;  %v18262_v44 = vpop.f32.mrf.mxu1 }
 0x4ff   : > { %v18264_v23 = vpop.f32.mrf.mxu2  ;;  %v18266_v0 = vpop.f32.mrf.mxu3 }
 0x503   : > { %v18268_v56 = vpop.f32.mrf.mxu0  ;;  %v18270_v38 = vpop.f32.mrf.mxu1 }
 0x507   : > { %v18272_v33 = vpop.f32.mrf.mxu2  ;;  %v18274_v48 = vpop.f32.mrf.mxu3 }
 0x50b   : > { %v7321_v12 = vpop.f32.mrf.mxu0  ;;  %v7344_v8 = vpop.f32.mrf.mxu1 }
 0x50c   : > { %v6177_v12 = vadd.f32 %v6165_v41, %v5975_v2  ;;  %v13493_v8 = vld [vmem:[#allocation8 + $0xd8] sm:$0xff] }
 0x50d   : > { %8278 = vmatpush.bf16.msra.mxu1 %v13493_v8  ;;  %v8198_v8 = vunpack.c.l.b16 %v8177_v47 }
 0x50e   : > { %v6412_v11 = vadd.f32 %v6400_v22, %v6177_v12  ;;  %v13466_v12 = vld [vmem:[#allocation8] sm:$0xff] }
 0x50f   : > { %v7524_v17 = vpop.f32.mrf.mxu2  ;;  %v7547_v25 = vpop.f32.mrf.mxu3  ;;  %7930 = vmatpush.bf16.msrb.mxu2 %v13466_v12 }
 0x510   : > { %v6640_v17 = vadd.f32 %v18203_v45, %v18201_v61  ;;  %v13476_v25 = vld [vmem:[#allocation8 + $0x50] sm:$0xff]  ;;  %v7094_v61 = vadd.f32 %v18230_v21, %v18228_v19  ;;  %v13475_v45 = vld [vmem:[#allocation8 + $0x48] sm:$0xff] }
 0x511   : > { %8033 = vmatpush.bf16.msrb.mxu3 %v13476_v25  ;;  %8279 = vmatpush.bf16.msra.mxu1 %v13492_v26  ;;  %v13490_v25 = vld [vmem:[#allocation8 + $0xc0] sm:$0xff] }
 0x512   : > { %v6652_v20 = vadd.f32 %v6640_v17, %v6412_v11 }
 0x513   : > { %v7746_v32 = vpop.f32.mrf.mxu0  ;;  %v7769_v15 = vpop.f32.mrf.mxu1  ;;  %8373 = vmatpush.bf16.msra.mxu2 %v13505_v24 }
 0x514   : > { %v7770_v35 = vadd.f32 %v7769_v15, %v7746_v32  ;;  %v6844_v41 = vadd.f32 %v6832_v36, %v6652_v20  ;;  %v7541_v32 = vadd.f32 %v18258_v3, %v18256_v39  ;;  %v7951_v15 = vld [vmem:[#allocation4] sm:$0xe] }
 0x515   : > { %8034 = vmatpush.bf16.msrb.mxu3 %v13475_v45  ;;  %8280 = vmatpush.bf16.msra.mxu1 %v13491_v9  ;;  %v7970_v3 = vunpack.c.l.b16 %v7951_v15  ;;  %v7340_v45 = vadd.f32 %v18262_v44, %v18260_v51  ;;  %v7543_v51 = vadd.f32 %v18266_v0, %v18264_v23  ;;  %v13514_v9 = vld [vmem:[#allocation8 + $0x178] sm:$0xff] }
 0x516   : > { %v7783_v6 = vadd.f32 %v7770_v35, %v7549_v34  ;;  %v7106_v55 = vadd.f32 %v7094_v61, %v6844_v41  ;;  %v6837_v34 = vadd.f32 %v18236_v49, %v18234_v54  ;;  %v7551_v30 = vadd.f32 %v7541_v32, %v7348_v52  ;;  %v13502_v52 = vld [vmem:[#allocation8 + $0x120] sm:$0xff] }
 0x517   : > { %8374 = vmatpush.bf16.msra.mxu2 %v13504_v10 }
 0x518   : > { %v7788_v60 = vmax.f32 %v7783_v6, 0.0  ;;  %v7347_v2 = vadd.f32 %v7335_v29, %v7106_v55  ;;  %v6654_v6 = vadd.f32 %v6645_v14, %v6414_v40  ;;  %v13513_v40 = vld [vmem:[#allocation8 + $0x170] sm:$0xff] }
 0x519   : > { %8035 = vmatpush.bf16.msrb.mxu3 %v13474_v31  ;;  %8281 = vmatpush.bf16.msra.mxu1 %v13490_v25  ;;  %v7546_v25 = vadd.f32 %v18274_v48, %v18272_v33 }
 0x51a   : > { %v7793_v57 = vsel %vm1014_vm6, %v7788_v60, 0.0  ;;  %v7550_v17 = vadd.f32 %v7538_v28, %v7347_v2  ;;  %v6846_v49 = vadd.f32 %v6837_v34, %v6654_v6  ;;  %v7343_v2 = vadd.f32 %v18270_v38, %v18268_v56  ;;  %v13522_v34 = vld [vmem:[#allocation8 + $0x1b8] sm:$0xff]  ;;  %v13512_v6 = vld [vmem:[#allocation8 + $0x168] sm:$0xff] }
 0x51b   : > { %v7798_v19 = vpack.c.bf16 %v7793_v57, %v7793_v57  ;;  %v7748_v21 = vpop.f32.mrf.mxu0  ;;  %v7771_v4 = vpop.f32.mrf.mxu1  ;;  %8375 = vmatpush.bf16.msra.mxu2 %v13503_v1  ;;  %8638 = vmatpush.bf16.msrb.mxu0 %v13522_v34 }
 0x51c   : > { %v7772_v22 = vadd.f32 %v7771_v4, %v7748_v21  ;;  %v7108_v41 = vadd.f32 %v7099_v59, %v6846_v49  ;;  %v13501_v59 = vld [vmem:[#allocation8 + $0x118] sm:$0xff]  ;;  %v13521_v49 = vld [vmem:[#allocation8 + $0x1b0] sm:$0xff] }
 0x51d   : > { %7803 = vst [vmem:[#allocation4 + $0x4] sm:$0xf] %v7798_v19  ;;  %8513 = vmatpush.bf16.msra.mxu3 %v13514_v9  ;;  %v13518_v9 = vld [vmem:[#allocation8 + $0x198] sm:$0xff] }
 0x51e   : > { %v7784_v50 = vadd.f32 %v7772_v22, %v7550_v17  ;;  %v7349_v21 = vadd.f32 %v7340_v45, %v7108_v41  ;;  %v13528_v41 = vld [vmem:[#allocation8 + $0x1e8] sm:$0xff] }
 0x51f   : > { %8376 = vmatpush.bf16.msra.mxu2 %v13502_v52  ;;  %8639 = vmatpush.bf16.msrb.mxu0 %v13521_v49  ;;  %v13507_v52 = vld [vmem:[#allocation8 + $0x140] sm:$0xff] }
 0x520   : > { %v7789_v18 = vmax.f32 %v7784_v50, 0.0  ;;  %v7552_v15 = vadd.f32 %v7543_v51, %v7349_v21  ;;  %v13500_v51 = vld [vmem:[#allocation8 + $0x110] sm:$0xff] }
 0x521   : > { %8514 = vmatpush.bf16.msra.mxu3 %v13513_v40  ;;  %v13524_v40 = vld [vmem:[#allocation8 + $0x1c8] sm:$0xff] }
 0x522   : > { %v7794_v43 = vsel %vm1015_vm7, %v7789_v18, 0.0 }
 0x523   : > { %v7751_v35 = vpop.f32.mrf.mxu0  ;;  %v7774_v39 = vpop.f32.mrf.mxu1  ;;  %8377 = vmatpush.bf16.msra.mxu2 %v13501_v59 }
 0x524   : > { %v7775_v11 = vadd.f32 %v7774_v39, %v7751_v35  ;;  %v13623_v36 = vld [vmem:[#allocation4] sm:$0xff]   ;;  %v19142_v35 = vld [vmem:[#allocation44_spill] sm:$0xff] }
 0x525   : > { %v18313_v20 = vunpack.c.h.b16 %v13623_v36  ;;  %v7852_v54 = vshll.u32 %v13623_v36, 16  ;;  %v7850_v31 = vshrl.u32 %v13623_v36, 16  ;;  %v7350_v39 = vadd.f32 %v7343_v2, %v19142_v35  ;;  %8515 = vmatpush.bf16.msra.mxu3 %v13512_v6  ;;  %v13519_v2 = vld [vmem:[#allocation8 + $0x1a0] sm:$0xff] }
 0x526   : > { %v7785_v61 = vadd.f32 %v7775_v11, %v7551_v30 }
 0x527   : > { %v7971_v53 = vpack.c.b16 %v18313_v20, %v7970_v3  ;;  %v8200_v60 = vpack.c.b16 %v18313_v20, %v8198_v8  ;;  %v7854_v55 = vrot.slane %v7852_v54, 1  ;;  %v13530_v8 = vld [vmem:[#allocation8 + $0x1f8] sm:$0xff]  ;;  %v7553_v18 = vadd.f32 %v7546_v25, %v7350_v39  ;;  %v13529_v54 = vld [vmem:[#allocation8 + $0x1f0] sm:$0xff]  ;;  %8378 = vmatpush.bf16.msra.mxu2 %v13500_v51  ;;  %v13535_v51 = vld [vmem:[#allocation8 + $0x220] sm:$0xff] }
 0x528   : > { %v7790_v26 = vmax.f32 %v7785_v61, 0.0  ;;  %8743 = vmatpush.bf16.msrb.mxu1 %v13530_v8 }
 0x529   : > { %v8078_v27 = vshrl.u32 %v7971_v53, 16  ;;  %v8081_v29 = vshll.u32 %v7971_v53, 16  ;;  %v8203_v28 = vshrl.u32 %v8200_v60, 16  ;;  %v8206_v19 = vshll.u32 %v8200_v60, 16  ;;  %v13511_v60 = vld [vmem:[#allocation8 + $0x160] sm:$0xff] }
 0x52a   : > { %v7795_v57 = vsel %vm1016_vm5, %v7790_v26, 0.0  ;;  %v7972_v22 = vrot.slane %v7971_v53, 1  ;;  %v7855_v5 = vor.u32 %v7854_v55, %v7850_v31  ;;  %8516 = vmatpush.bf16.msra.mxu3 %v13511_v60  ;;  %v13537_v60 = vld [vmem:[#allocation8 + $0x230] sm:$0xff] }
 0x52b   : > { %v18325_v44 = vpack.c.bf16 %v7795_v57, %v7794_v43  ;;  %v7753_v4 = vpop.f32.mrf.mxu0  ;;  %v7776_v13 = vpop.f32.mrf.mxu1  ;;  %v8080_v7 = vrot.slane %v8078_v27, 1  ;;  %v8083_v0 = vrot.slane %v8081_v29, 2  ;;  %v8205_v17 = vrot.slane %v8203_v28, 3  ;;  %v13520_v43 = vld [vmem:[#allocation8 + $0x1a8] sm:$0xff] }
 0x52c   : > { %v7777_v37 = vadd.f32 %v7776_v13, %v7753_v4  ;;  %v8208_v46 = vrot.slane %v8206_v19, 4  ;;  %8744 = vmatpush.bf16.msrb.mxu1 %v13529_v54  ;;  %v13510_v4 = vld [vmem:[#allocation8 + $0x158] sm:$0xff]  ;;  %8640 = vmatpush.bf16.msrb.mxu0 %v13520_v43  ;;  %v13523_v54 = vld [vmem:[#allocation8 + $0x1c0] sm:$0xff] }
 0x52d   : > { %13648 = vst [vmem:[#allocation4 + $0x8] sm:$0xff] %v18325_v44   ;;  %v7973_v58 = vrot.slane %v18325_v44, 1  ;;  %v18332_v12 = vshll.u32 %v18325_v44, 16  ;;  %v18335_v23 = vshrl.u32 %v18325_v44, 16  ;;  %v8084_v50 = vor.u32 %v8083_v0, %v8080_v7  ;;  %v13509_v7 = vld [vmem:[#allocation8 + $0x150] sm:$0xff]  ;;  %v13526_v0 = vld [vmem:[#allocation8 + $0x1d8] sm:$0xff] }
 0x52e   : > { %v7786_v3 = vadd.f32 %v7777_v37, %v7552_v15  ;;  %v8209_v33 = vor.u32 %v8208_v46, %v8205_v17  ;;  %v13628_v13 = vunpack.c.l.b16 %v18325_v44  ;;  %8517 = vmatpush.bf16.msra.mxu3 %v13510_v4  ;;  %v13499_v37 = vld [vmem:[#allocation8 + $0x108] sm:$0xff]  ;;  %v13525_v17 = vld [vmem:[#allocation8 + $0x1d0] sm:$0xff]  ;;  %v13498_v46 = vld [vmem:[#allocation8 + $0x100] sm:$0xff] }
 0x52f   : > { %v7974_v56 = vsel %vm3097_vm9, %v7972_v22, %v7973_v58  ;;  %v7859_v38 = vrot.slane %v18332_v12, 1  ;;  %v8085_v24 = vrot.slane %v18335_v23, 1  ;;  %v8086_v32 = vrot.slane %v18332_v12, 2  ;;  %v13527_v22 = vld [vmem:[#allocation8 + $0x1e0] sm:$0xff]  ;;  %8379 = vmatpush.bf16.msra.mxu2 %v13499_v37 }
 0x530   : > { %8036 = vmatmul.bf16.vlgmr.msrb.gmra.mxu3 %v7974_v56  ;;  %v8210_v47 = vrot.slane %v18335_v23, 3  ;;  %v8211_v16 = vrot.slane %v18332_v12, 4  ;;  %v7791_v45 = vmax.f32 %v7786_v3, 0.0  ;;  %8745 = vmatpush.bf16.msrb.mxu1 %v13528_v41  ;;  %v18365_v31 = vpack.c.b16 %v13628_v13, %v18313_v20  ;;  %v13536_v41 = vld [vmem:[#allocation8 + $0x228] sm:$0xff] }
 0x531   : > { %v7860_v14 = vsel %vm2719_vm8, %v7855_v5, %v7859_v38  ;;  %v18350_v10 = vor.u32 %v8086_v32, %v8085_v24  ;;  %8641 = vmatpush.bf16.msrb.mxu0 %v13519_v2  ;;  %v13508_v5 = vld [vmem:[#allocation8 + $0x148] sm:$0xff]  ;;  %v7863_v8 = vor.u32 %v18335_v23, %v7859_v38  ;;  %v13515_v38 = vld [vmem:[#allocation8 + $0x180] sm:$0xff]  ;;  %v13534_v2 = vld [vmem:[#allocation8 + $0x218] sm:$0xff] }
 0x532   : > { %7931 = vmatmul.bf16.vlgmr.msrb.gmra.mxu2 %v7860_v14  ;;  %v18353_v48 = vor.u32 %v8211_v16, %v8210_v47  ;;  %v7796_v29 = vsel %vm1017_vm12, %v7791_v45, 0.0  ;;  %8518 = vmatpush.bf16.msra.mxu3 %v13509_v7  ;;  %v13517_v16 = vld [vmem:[#allocation8 + $0x190] sm:$0xff]  ;;  %v13538_v45 = vld [vmem:[#allocation8 + $0x238] sm:$0xff] }
 0x533   : > { %v7756_v30 = vpop.f32.mrf.mxu0  ;;  %v7779_v11 = vpop.f32.mrf.mxu1  ;;  %v8088_v36 = vsel %vm6220_vm13, %v8084_v50, %v18350_v10  ;;  %8380 = vmatpush.bf16.msra.mxu2 %v13498_v46 }
 0x534   : > { %v7780_v1 = vadd.f32 %v7779_v11, %v7756_v30  ;;  %8157 = vmatmul.bf16.vlgmr.msra.gmra.mxu0 %v8088_v36  ;;  %v8213_v61 = vsel %vm3756_vm10, %v8209_v33, %v18353_v48  ;;  %8746 = vmatpush.bf16.msrb.mxu1 %v13527_v22  ;;  %v13516_v33 = vld [vmem:[#allocation8 + $0x188] sm:$0xff] }
 0x535   : > { %8282 = vmatmul.bf16.vlgmr.msra.gmra.mxu1 %v8213_v61  ;;  %8642 = vmatpush.bf16.msrb.mxu0 %v13518_v9 }
 0x536   : > { %v7787_v53 = vadd.f32 %v7780_v1, %v7553_v18  ;;  %8519 = vmatpush.bf16.msra.mxu3 %v13508_v5 }
 0x537   : > { %8864 = vmatpush.bf16.msrb.mxu2 %v13538_v45 }
 0x538   : > { %v7792_v26 = vmax.f32 %v7787_v53, 0.0  ;;  %8747 = vmatpush.bf16.msrb.mxu1 %v13526_v0  ;;  %v8666_v0 = vld [vmem:[#allocation4 + $0x4] sm:$0x8] }
 0x539   : > { %8643 = vmatpush.bf16.msrb.mxu0 %v13517_v16  ;;  %v8542_v16 = vld [vmem:[#allocation4 + $0x18] sm:$0x7] }
 0x53a   : > { %v7797_v55 = vsel %vm1018_vm11, %v7792_v26, 0.0  ;;  %8520 = vmatpush.bf16.msra.mxu3 %v13507_v52  ;;  %v8401_v26 = vld [vmem:[#allocation4 + $0x4] sm:$0xff]  }
 0x53b   : > { %v13620_v28 = vpack.c.bf16 %v7797_v55, %v7796_v29  ;;  %v7758_v19 = vpop.f32.mrf.mxu0  ;;  %v7781_v21 = vpop.f32.mrf.mxu1  ;;  %8865 = vmatpush.bf16.msrb.mxu2 %v13537_v60  ;;  %v8431_v43 = vunpack.c.h.b16 %v8401_v26  ;;  %v8440_v37 = vshrl.u32 %v8401_v26, 16 }
 0x53c   : > { %8748 = vmatpush.bf16.msrb.mxu1 %v13525_v17 }
 0x53d   : > { %13649 = vst [vmem:[#allocation4 + $0x10] sm:$0xff] %v13620_v28   ;;  %8644 = vmatpush.bf16.msrb.mxu0 %v13516_v33  ;;  %v8541_v28 = vld [vmem:[#allocation4 + $0x4] sm:$0xc] }
 0x53e   : > { %v8562_v19 = vunpack.c.l.b16 %v8541_v28 }
 0x53f   : > { %8866 = vmatpush.bf16.msrb.mxu2 %v13536_v41 }
 0x540   : > { %8749 = vmatpush.bf16.msrb.mxu1 %v13524_v40  ;;  %v8564_v21 = vpack.c.b16 %v8431_v43, %v8562_v19 }
 0x541   : > { %8645 = vmatpush.bf16.msrb.mxu0 %v13515_v38 }
 0x542   : > { %v8567_v7 = vshrl.u32 %v8564_v21, 16  ;;  %v8570_v9 = vshll.u32 %v8564_v21, 16 }
 0x543   : > { %8867 = vmatpush.bf16.msrb.mxu2 %v13535_v51 }
 0x544   : > { %v18367_v56 = vld [vmem:[#allocation4 + $0x10] sm:$0xff]   ;;  %8750 = vmatpush.bf16.msrb.mxu1 %v13523_v54 }
 0x545   : > { %v7817_v24 = vld [vmem:[#allocation4 + $0x14] sm:$0x1]  ;;  %v18370_v20 = vunpack.c.l.b16 %v18367_v56  ;;  %v8199_v47 = vunpack.c.h.b16 %v18367_v56  ;;  %v8215_v30 = vshrl.u32 %v18367_v56, 16  ;;  %v8218_v11 = vshll.u32 %v18367_v56, 16 }
 0x546   : > { %v8056_v32 = vld [vmem:[#allocation4 + $0x14] sm:$0x3]  ;;  %v7845_v15 = vunpack.c.l.b16 %v7817_v24 }
 0x547   : > { %v8075_v25 = vunpack.c.l.b16 %v8056_v32  ;;  %v8217_v1 = vrot.slane %v8215_v30, 3  ;;  %v8220_v61 = vrot.slane %v8218_v11, 4  ;;  %8868 = vmatpush.bf16.msrb.mxu2 %v13534_v2  ;;  %v8685_v32 = vunpack.c.l.b16 %v8666_v0 }
 0x548   : > { %v7848_v14 = vpack.c.b16 %v7845_v15, %v18370_v20  ;;  %v18399_v15 = vld [vmem:[#allocation4 + $0x14] sm:$0xff]  }
 0x549   : > { %v8076_v50 = vpack.c.b16 %v8075_v25, %v18370_v20  ;;  %v8221_v49 = vor.u32 %v8220_v61, %v8217_v1  ;;  %v8406_v25 = vld [vmem:[#allocation4 + $0x18] sm:$0x1]  ;;  %v8686_v40 = vpack.c.b16 %v8431_v43, %v8685_v32  ;;  %v13532_v1 = vld [vmem:[#allocation8 + $0x208] sm:$0xff]  ;;  %v8805_v56 = vshrl.u32 %v18399_v15, 16 }
 0x54a   : > { %v7975_v34 = vrot.slane %v7848_v14, 1  ;;  %v7865_v35 = vshll.u32 %v7848_v14, 16  ;;  %v7869_v29 = vshrl.u32 %v7848_v14, 16  ;;  %v8569_v14 = vrot.slane %v8567_v7, 2 }
 0x54b   : > { %v8090_v39 = vshrl.u32 %v8076_v50, 16  ;;  %v8093_v3 = vshll.u32 %v8076_v50, 16  ;;  %v8222_v53 = vsel %vm3756_vm10, %v18353_v48, %v8221_v49  ;;  %v8442_v48 = vshll.u32 %v8401_v26, 16 }
 0x54c   : > { %v7976_v36 = vsel %vm3097_vm9, %v7973_v58, %v7975_v34  ;;  %v7867_v6 = vrot.slane %v7865_v35, 1  ;;  %8287 = vmatmul.bf16.gmra.mxu1 %v8222_v53  ;;  %v8572_v50 = vrot.slane %v8570_v9, 3  ;;  %v8434_v35 = vunpack.c.l.b16 %v18399_v15 }
 0x54d   : > { %v8092_v59 = vrot.slane %v8090_v39, 1  ;;  %v8095_v18 = vrot.slane %v8093_v3, 2  ;;  %8041 = vmatmul.bf16.gmra.mxu3 %v7976_v36  ;;  %v8444_v22 = vrot.slane %v8442_v48, 1  ;;  %v8435_v39 = vunpack.c.l.b16 %v8406_v25 }
 0x54e   : > { %v7868_v12 = vsel %vm2719_vm8, %v7863_v8, %v7867_v6  ;;  %v7871_v55 = vor.u32 %v7869_v29, %v7867_v6  ;;  %v8563_v3 = vunpack.c.l.b16 %v8542_v16  ;;  %v13533_v8 = vld [vmem:[#allocation8 + $0x210] sm:$0xff]  ;;  %v8573_v30 = vor.u32 %v8572_v50, %v8569_v14 }
 0x54f   : > { %v8096_v23 = vor.u32 %v8095_v18, %v8092_v59  ;;  %7936 = vmatmul.bf16.gmra.mxu2 %v7868_v12  ;;  %v8445_v24 = vor.u32 %v8444_v22, %v8440_v37  ;;  %v8687_v11 = vrot.slane %v8686_v40, 3  ;;  %v8438_v6 = vpack.c.b16 %v8435_v39, %v8434_v35 }
 0x550   : > { %v8565_v59 = vpack.c.b16 %v8563_v3, %v8434_v35  ;;  %8869 = vmatpush.bf16.msrb.mxu2 %v13533_v8  ;;  %v8807_v9 = vrot.slane %v8805_v56, 3  ;;  %v13546_v56 = vld [vmem:[%s18843_s10 + $0x38] sm:$0xff] }
 0x551   : > { %v8097_v58 = vsel %vm6220_vm13, %v18350_v10, %v8096_v23  ;;  %v18388_v10 = vld [vmem:[#allocation4 + $0xc] sm:$0xff]  ;;  %v8455_v61 = vshll.u32 %v8438_v6, 16  ;;  %9027 = vmatpush.bf16.msrb.mxu3 %v13546_v56 }
 0x552   : > { %8162 = vmatmul.bf16.gmra.mxu0 %v8097_v58  ;;  %v18391_v4 = vshll.u32 %v18388_v10, 16  ;;  %v18394_v13 = vshrl.u32 %v18388_v10, 16  ;;  %v8688_v33 = vrot.slane %v18388_v10, 3  ;;  %v8579_v54 = vshrl.u32 %v8565_v59, 16 }
 0x553   : > { %v8582_v12 = vshll.u32 %v8565_v59, 16  ;;  %v13629_v58 = vunpack.c.h.b16 %v18325_v44  ;;  %v8690_v41 = vrot.slane %v8565_v59, 3  ;;  %v8321_v44 = vpack.c.b16 %v8199_v47, %v8199_v47 }
 0x554   : > { %v8449_v5 = vrot.slane %v18391_v4, 1  ;;  %v8574_v17 = vrot.slane %v18394_v13, 2  ;;  %v8575_v46 = vrot.slane %v18391_v4, 3  ;;  %v8689_v18 = vsel %vm7390_vm14, %v8687_v11, %v8688_v33  ;;  %8870 = vmatpush.bf16.msrb.mxu2 %v13532_v1 }
 0x555   : > { %v8584_v45 = vrot.slane %v8582_v12, 3  ;;  %v8320_v26 = vpack.c.b16 %v18370_v20, %v13629_v58  ;;  %v8691_v29 = vsel %vm7390_vm14, %v8688_v33, %v8690_v41  ;;  %v8793_v10 = vshrl.u32 %v8686_v40, 16 }
 0x556   : > { %v8450_v52 = vsel %vm2719_vm8, %v8445_v24, %v8449_v5  ;;  %v8453_v38 = vor.u32 %v18394_v13, %v8449_v5  ;;  %v8796_v20 = vshll.u32 %v8686_v40, 16  ;;  %v8800_v19 = vrot.slane %v18394_v13, 3 }
 0x557   : > { %v8801_v48 = vrot.slane %v18391_v4, 4  ;;  %v8795_v21 = vrot.slane %v8793_v10, 3  ;;  %v8808_v47 = vshll.u32 %v18399_v15, 16  ;;  %v13692_v4 = vld [vmem:[%s18842_s9] ss:$0 sm:$0xff] }
 0x558   : > { %v8798_v51 = vrot.slane %v8796_v20, 4 }
 0x559   : > { %v8802_v2 = vor.u32 %v8801_v48, %v8800_v19  ;;  %v8810_v0 = vrot.slane %v8808_v47, 4  ;;  %v13545_v47 = vld [vmem:[%s18843_s10 + $0x30] sm:$0xff] }
 0x55a   : > { %v8799_v22 = vor.u32 %v8798_v51, %v8795_v21  ;;  %9028 = vmatpush.bf16.msrb.mxu3 %v13545_v47 }
 0x55b   : > { %v8811_v37 = vor.u32 %v8810_v0, %v8807_v9 }
 0x55c   : > { %8292 = vmatmul.bf16.gmra.mxu1 %v8221_v49  ;;  %v8457_v49 = vrot.slane %v8455_v61, 1  ;;  %v8803_v7 = vsel %vm3756_vm10, %v8799_v22, %v8802_v2 }
 0x55d   : > { %8046 = vmatmul.bf16.gmra.mxu3 %v7975_v34  ;;  %v8576_v34 = vor.u32 %v8575_v46, %v8574_v17  ;;  %v8812_v5 = vsel %vm3756_vm10, %v8802_v2, %v8811_v37 }
 0x55e   : > { %v8458_v53 = vsel %vm2719_vm8, %v8453_v38, %v8457_v49 }
 0x55f   : > { %7941 = vmatmul.bf16.gmra.mxu2 %v7871_v55  ;;  %v8577_v36 = vsel %vm7155_vm15, %v8573_v30, %v8576_v34  ;;  %v8459_v55 = vshrl.u32 %v8438_v6, 16 }
 0x561   : > { %v8461_v28 = vor.u32 %v8459_v55, %v8457_v49 }
 0x562   : > { %8167 = vmatmul.bf16.gmra.mxu0 %v8096_v23  ;;  %v13531_v23 = vld [vmem:[#allocation8 + $0x200] sm:$0xff] }
 0x563   : > { %8871 = vmatpush.bf16.msrb.mxu2 %v13531_v23 }
 0x56c   : > { %8751 = vmatmul.bf16.vlgmr.msrb.gmra.mxu1 %v8689_v18 }
 0x56d   : > { %8521 = vmatmul.bf16.vlgmr.msra.gmra.mxu3 %v8450_v52 }
 0x56f   : > { %8381 = vmatmul.bf16.vlgmr.msra.gmra.mxu2 %v18365_v31  ;;  %v8581_v31 = vrot.slane %v8579_v54, 2 }
 0x571   : > { %v8585_v60 = vor.u32 %v8584_v45, %v8581_v31 }
 0x572   : > { %8646 = vmatmul.bf16.vlgmr.msrb.gmra.mxu0 %v8577_v36 }
 0x573   : > { %v8586_v43 = vsel %vm7155_vm15, %v8576_v34, %v8585_v60 }
 0x57c   : > { %8756 = vmatmul.bf16.gmra.mxu1 %v8691_v29 }
 0x57d   : > { %8526 = vmatmul.bf16.gmra.mxu3 %v8458_v53 }
 0x57f   : > { %8386 = vmatmul.bf16.gmra.mxu2 %v8320_v26 }
 0x582   : > { %8651 = vmatmul.bf16.gmra.mxu0 %v8586_v43 }
 0x58c   : > { %8761 = vmatmul.bf16.gmra.mxu1 %v8690_v41 }
 0x58d   : > { %8531 = vmatmul.bf16.gmra.mxu3 %v8461_v28 }
 0x58f   : > { %8391 = vmatmul.bf16.gmra.mxu2 %v8321_v44 }
 0x592   : > { %8656 = vmatmul.bf16.gmra.mxu0 %v8585_v60 }
 0x59f   : > { %8872 = vmatmul.bf16.vlgmr.msrb.gmra.mxu2 %v8803_v7 }
 0x5af   : > { %8877 = vmatmul.bf16.gmra.mxu2 %v8812_v5 }
 0x5b1   : > { %v8158_v32 = vpop.f32.mrf.mxu0 }
 0x5b2   : > { %v8283_v25 = vpop.f32.mrf.mxu1 }
 0x5b3   : > { %v8037_v46 = vpop.f32.mrf.mxu3 }
 0x5b5   : > { %v7932_v13 = vpop.f32.mrf.mxu2 }
 0x5b6   : > { %v7946_v17 = vadd.f32 %v13692_v4, %v7932_v13 }
 0x5b8   : > { %v8051_v24 = vadd.f32 %v8037_v46, %v7946_v17 }
 0x5b9   : > { %v8160_v16 = vpop.f32.mrf.mxu0 }
 0x5ba   : > { %v8285_v14 = vpop.f32.mrf.mxu1  ;;  %v8172_v40 = vadd.f32 %v8158_v32, %v8051_v24  ;;  %v13554_v24 = vld [vmem:[%s18843_s10 + $0x78] sm:$0xff]  ;;  %v13544_v32 = vld [vmem:[%s18843_s10 + $0x28] sm:$0xff] }
 0x5bb   : > { %v8039_v50 = vpop.f32.mrf.mxu3  ;;  %9132 = vmatpush.bf16.msra.mxu0 %v13554_v24  ;;  %9029 = vmatpush.bf16.msrb.mxu3 %v13544_v32  ;;  %v13556_v24 = vld [vmem:[%s18843_s10 + $0x88] sm:$0xff] }
 0x5bc   : > { %v18425_v34 = vadd.f32 %v8283_v25, %v8172_v40  ;;  %v13543_v40 = vld [vmem:[%s18843_s10 + $0x20] sm:$0xff]  ;;  %v13564_v32 = vld [vmem:[%s18843_s10 + $0xc8] sm:$0xff] }
 0x5bd   : > { %v7934_v15 = vpop.f32.mrf.mxu2 }
 0x5be   : > { %v7947_v52 = vadd.f32 %v13692_v4, %v7934_v15  ;;  %v13562_v15 = vld [vmem:[%s18843_s10 + $0xb8] sm:$0xff] }
 0x5bf   : > { %8882 = vmatmul.bf16.gmra.mxu2 %v8811_v37  ;;  %9253 = vmatpush.bf16.msra.mxu1 %v13562_v15  ;;  %v13578_v15 = vld [vmem:[%s18843_s10 + $0x138] sm:$0xff] }
 0x5c0   : > { %v8052_v35 = vadd.f32 %v8039_v50, %v7947_v52  ;;  %v13570_v50 = vld [vmem:[%s18843_s10 + $0xf8] sm:$0xff]  ;;  %9030 = vmatpush.bf16.msrb.mxu3 %v13543_v40  ;;  %v9055_v40 = vld [vmem:[#allocation5] sm:$0xe] }
 0x5c1   : > { %9378 = vmatpush.bf16.msra.mxu2 %v13570_v50 }
 0x5c2   : > { %v8173_v30 = vadd.f32 %v8160_v16, %v8052_v35  ;;  %v13552_v35 = vld [vmem:[%s18843_s10 + $0x68] sm:$0xff] }
 0x5c4   : > { %v18427_v36 = vadd.f32 %v8285_v14, %v8173_v30  ;;  %v13553_v14 = vld [vmem:[%s18843_s10 + $0x70] sm:$0xff] }
 0x5c5   : > { %9133 = vmatpush.bf16.msra.mxu0 %v13553_v14  ;;  %v13555_v14 = vld [vmem:[%s18843_s10 + $0x80] sm:$0xff] }
 0x5c9   : > { %v8288_v3 = vpop.f32.mrf.mxu1  ;;  %9134 = vmatpush.bf16.msra.mxu0 %v13552_v35  ;;  %v13563_v35 = vld [vmem:[%s18843_s10 + $0xc0] sm:$0xff] }
 0x5cf   : > { %v8163_v39 = vpop.f32.mrf.mxu0 }
 0x5d0   : > { %v8042_v33 = vpop.f32.mrf.mxu3 }
 0x5d1   : > { %v8290_v18 = vpop.f32.mrf.mxu1 }
 0x5d2   : > { %v7937_v8 = vpop.f32.mrf.mxu2 }
 0x5d3   : > { %v7948_v11 = vadd.f32 %v13692_v4, %v7937_v8 }
 0x5d5   : > { %v8053_v6 = vadd.f32 %v8042_v33, %v7948_v11  ;;  %v13569_v33 = vld [vmem:[%s18843_s10 + $0xf0] sm:$0xff] }
 0x5d6   : > { %9379 = vmatpush.bf16.msra.mxu2 %v13569_v33  ;;  %v13577_v33 = vld [vmem:[%s18843_s10 + $0x130] sm:$0xff] }
 0x5d7   : > { %v8165_v59 = vpop.f32.mrf.mxu0  ;;  %v8174_v49 = vadd.f32 %v8163_v39, %v8053_v6  ;;  %v13561_v39 = vld [vmem:[%s18843_s10 + $0xb0] sm:$0xff] }
 0x5d8   : > { %v8044_v1 = vpop.f32.mrf.mxu3  ;;  %9254 = vmatpush.bf16.msra.mxu1 %v13561_v39 }
 0x5d9   : > { %v8293_v12 = vpop.f32.mrf.mxu1  ;;  %v18429_v45 = vadd.f32 %v8288_v3, %v8174_v49  ;;  %v13567_v49 = vld [vmem:[%s18843_s10 + $0xe0] sm:$0xff] }
 0x5da   : > { %v7939_v61 = vpop.f32.mrf.mxu2 }
 0x5db   : > { %v7949_v23 = vadd.f32 %v13692_v4, %v7939_v61  ;;  %v13560_v61 = vld [vmem:[%s18843_s10 + $0xa8] sm:$0xff] }
 0x5dc   : > { %9255 = vmatpush.bf16.msra.mxu1 %v13560_v61  ;;  %v13576_v61 = vld [vmem:[%s18843_s10 + $0x128] sm:$0xff] }
 0x5dd   : > { %v8054_v53 = vadd.f32 %v8044_v1, %v7949_v23  ;;  %v13551_v1 = vld [vmem:[%s18843_s10 + $0x60] sm:$0xff] }
 0x5de   : > { %9135 = vmatpush.bf16.msra.mxu0 %v13551_v1  ;;  %v13559_v23 = vld [vmem:[%s18843_s10 + $0xa0] sm:$0xff] }
 0x5df   : > { %v8168_v54 = vpop.f32.mrf.mxu0  ;;  %v8175_v29 = vadd.f32 %v8165_v59, %v8054_v53  ;;  %v13549_v53 = vld [vmem:[%s18843_s10 + $0x50] sm:$0xff] }
 0x5e0   : > { %v8047_v38 = vpop.f32.mrf.mxu3  ;;  %9256 = vmatpush.bf16.msra.mxu1 %v13559_v23 }
 0x5e1   : > { %v8295_v41 = vpop.f32.mrf.mxu1  ;;  %v18431_v28 = vadd.f32 %v8290_v18, %v8175_v29 }
 0x5e2   : > { %v7942_v31 = vpop.f32.mrf.mxu2  ;;  %v13566_v41 = vld [vmem:[%s18843_s10 + $0xd8] sm:$0xff] }
 0x5e3   : > { %v7950_v58 = vadd.f32 %v13692_v4, %v7942_v31  ;;  %v13541_v31 = vld [vmem:[%s18843_s10 + $0x10] sm:$0xff] }
 0x5e5   : > { %v8055_v60 = vadd.f32 %v8047_v38, %v7950_v58 }
 0x5e7   : > { %v8170_v26 = vpop.f32.mrf.mxu0  ;;  %v8176_v19 = vadd.f32 %v8168_v54, %v8055_v60  ;;  %v13542_v54 = vld [vmem:[%s18843_s10 + $0x18] sm:$0xff] }
 0x5e8   : > { %v8049_v43 = vpop.f32.mrf.mxu3  ;;  %9031 = vmatpush.bf16.msrb.mxu3 %v13542_v54  ;;  %v13558_v60 = vld [vmem:[%s18843_s10 + $0x98] sm:$0xff] }
 0x5e9   : > { %v18433_v10 = vpop.f32.mrf.mxu1  ;;  %v18435_v21 = vadd.f32 %v8293_v12, %v8176_v19  ;;  %v13550_v12 = vld [vmem:[%s18843_s10 + $0x58] sm:$0xff]  ;;  %9257 = vmatpush.bf16.msra.mxu1 %v13558_v60 }
 0x5ea   : > { %v7944_v55 = vpop.f32.mrf.mxu2  ;;  %9136 = vmatpush.bf16.msra.mxu0 %v13550_v12 }
 0x5ec   : > { %9032 = vmatpush.bf16.msrb.mxu3 %v13541_v31 }
 0x5ee   : > { %9137 = vmatpush.bf16.msra.mxu0 %v13549_v53 }
 0x5ef   : > { %v8647_v44 = vpop.f32.mrf.mxu0 }
 0x5f0   : > { %v8522_v20 = vpop.f32.mrf.mxu3 }
 0x5f1   : > { %v18439_v2 = vpop.f32.mrf.mxu1 }
 0x5f2   : > { %v8382_v48 = vpop.f32.mrf.mxu2 }
 0x5f3   : > { %v8396_v8 = vadd.f32 %v8382_v48, %v18425_v34  ;;  %v13568_v34 = vld [vmem:[%s18843_s10 + $0xe8] sm:$0xff]  ;;  %v13565_v48 = vld [vmem:[%s18843_s10 + $0xd0] sm:$0xff] }
 0x5f4   : > { %9380 = vmatpush.bf16.msra.mxu2 %v13568_v34 }
 0x5f5   : > { %v8536_v59 = vadd.f32 %v8522_v20, %v8396_v8  ;;  %v9074_v8 = vunpack.c.l.b16 %v9055_v40 }
 0x5f7   : > { %v18437_v51 = vpop.f32.mrf.mxu0  ;;  %v8661_v38 = vadd.f32 %v8647_v44, %v8536_v59  ;;  %v13548_v44 = vld [vmem:[%s18843_s10 + $0x48] sm:$0xff] }
 0x5f8   : > { %v18441_v22 = vpop.f32.mrf.mxu3  ;;  %9381 = vmatpush.bf16.msra.mxu2 %v13567_v49  ;;  %9138 = vmatpush.bf16.msra.mxu0 %v13548_v44 }
 0x5f9   : > { %v18451_v0 = vpop.f32.mrf.mxu1  ;;  %v8766_v26 = vadd.f32 %v18433_v10, %v8661_v38  ;;  %v13557_v10 = vld [vmem:[%s18843_s10 + $0x90] sm:$0xff] }
 0x5fa   : > { %v8384_v7 = vpop.f32.mrf.mxu2  ;;  %9258 = vmatpush.bf16.msra.mxu1 %v13557_v10 }
 0x5fb   : > { %v8397_v58 = vadd.f32 %v8384_v7, %v18427_v36  ;;  %v13540_v36 = vld [vmem:[%s18843_s10 + $0x8] sm:$0xff] }
 0x5fc   : > { %9382 = vmatpush.bf16.msra.mxu2 %v13566_v41  ;;  %9033 = vmatpush.bf16.msrb.mxu3 %v13540_v36 }
 0x5fd   : > { %v8537_v55 = vadd.f32 %v18441_v22, %v8397_v58 }
 0x5fe   : > { %9259 = vmatpush.bf16.msra.mxu1 %v13556_v24 }
 0x5ff   : > { %v18449_v9 = vpop.f32.mrf.mxu0  ;;  %v8662_v56 = vadd.f32 %v18437_v51, %v8537_v55  ;;  %v13539_v51 = vld [vmem:[%s18843_s10] sm:$0xff] }
 0x600   : > { %v18453_v37 = vpop.f32.mrf.mxu3  ;;  %9383 = vmatpush.bf16.msra.mxu2 %v13565_v48  ;;  %9034 = vmatpush.bf16.msrb.mxu3 %v13539_v51 }
 0x601   : > { %v18459_v13 = vpop.f32.mrf.mxu1 }
 0x602   : > { %v18455_v5 = vpop.f32.mrf.mxu2  ;;  %9260 = vmatpush.bf16.msra.mxu1 %v13555_v14 }
 0x603   : > { %v8398_v20 = vadd.f32 %v18455_v5, %v18429_v45  ;;  %v13547_v5 = vld [vmem:[%s18843_s10 + $0x40] sm:$0xff] }
 0x604   : > { %9139 = vmatpush.bf16.msra.mxu0 %v13547_v5  ;;  %9384 = vmatpush.bf16.msra.mxu2 %v13564_v32 }
 0x605   : > { %v8538_v47 = vadd.f32 %v18453_v37, %v8398_v20  ;;  %v8767_v37 = vadd.f32 %v18439_v2, %v8662_v56  ;;  %v9281_v2 = vld [vmem:[#allocation5] sm:$0x8]  ;;  %9477 = vmatpush.bf16.msra.mxu3 %v13578_v15  ;;  %v13575_v15 = vld [vmem:[%s18843_s10 + $0x120] sm:$0xff] }
 0x607   : > { %v18457_v4 = vpop.f32.mrf.mxu0  ;;  %v8663_v50 = vadd.f32 %v18449_v9, %v8538_v47 }
 0x608   : > { %v18461_v17 = vpop.f32.mrf.mxu3  ;;  %9385 = vmatpush.bf16.msra.mxu2 %v13563_v35 }
 0x609   : > { %v18473_v16 = vpop.f32.mrf.mxu1  ;;  %9478 = vmatpush.bf16.msra.mxu3 %v13577_v33  ;;  %v13585_v33 = vld [vmem:[%s18843_s10 + $0x168] sm:$0xff] }
 0x60a   : > { %v18463_v46 = vpop.f32.mrf.mxu2 }
 0x60b   : > { %v8399_v9 = vadd.f32 %v18463_v46, %v18431_v28 }
 0x60d   : > { %v8539_v46 = vadd.f32 %v18461_v17, %v8399_v9  ;;  %9479 = vmatpush.bf16.msra.mxu3 %v13576_v61 }
 0x60f   : > { %v18471_v25 = vpop.f32.mrf.mxu0  ;;  %v8664_v41 = vadd.f32 %v18457_v4, %v8539_v46 }
 0x610   : > { %v18484_v52 = vpop.f32.mrf.mxu3 }
 0x611   : > { %v8764_v11 = vpop.f32.mrf.mxu1  ;;  %9480 = vmatpush.bf16.msra.mxu3 %v13575_v15 }
 0x612   : > { %v18495_v3 = vpop.f32.mrf.mxu2  ;;  %v8768_v11 = vadd.f32 %v18451_v0, %v8663_v50 }
 0x613   : > { %v8400_v12 = vadd.f32 %v18495_v3, %v18435_v21 }
 0x615   : > { %v8540_v21 = vadd.f32 %v18484_v52, %v8400_v12  ;;  %v13593_v12 = vld [vmem:[%s18843_s10 + $0x1a8] sm:$0xff] }
 0x617   : > { %v8659_v30 = vpop.f32.mrf.mxu0  ;;  %v8665_v5 = vadd.f32 %v18471_v25, %v8540_v21  ;;  %v13595_v25 = vld [vmem:[%s18843_s10 + $0x1b8] sm:$0xff] }
 0x618   : > { %v8534_v6 = vpop.f32.mrf.mxu3  ;;  %v9302_v30 = vunpack.c.l.b16 %v9281_v2  ;;  %v13603_v2 = vld [vmem:[%s18843_s10 + $0x1f8] sm:$0xff]  ;;  %9742 = vmatpush.bf16.msrb.mxu1 %v13595_v25 }
 0x619   : > { %9847 = vmatpush.bf16.msrb.mxu2 %v13603_v2  ;;  %v13591_v21 = vld [vmem:[%s18843_s10 + $0x198] sm:$0xff] }
 0x61a   : > { %v8394_v18 = vpop.f32.mrf.mxu2 }
 0x622   : > { %v8873_v43 = vpop.f32.mrf.mxu2 }
 0x623   : > { %v8887_v29 = vadd.f32 %v8873_v43, %v8766_v26 }
 0x625   : > { %v8892_v19 = vmax.f32 %v8887_v29, 0.0  ;;  %v13587_v29 = vld [vmem:[%s18843_s10 + $0x178] sm:$0xff] }
 0x626   : > { %9617 = vmatpush.bf16.msrb.mxu0 %v13587_v29 }
 0x627   : > { %v8897_v22 = vsel %vm1014_vm6, %v8892_v19, 0.0 }
 0x628   : > { %v8902_v7 = vpack.c.bf16 %v8897_v22, %v8897_v22 }
 0x62a   : > { %8907 = vst [vmem:[#allocation5 + $0x4] sm:$0xf] %v8902_v7  ;;  %v8875_v45 = vpop.f32.mrf.mxu2 }
 0x62b   : > { %v8888_v39 = vadd.f32 %v8875_v45, %v8767_v37  ;;  %v8769_v45 = vadd.f32 %v18459_v13, %v8664_v41  ;;  %v13586_v13 = vld [vmem:[%s18843_s10 + $0x170] sm:$0xff]  ;;  %v13599_v41 = vld [vmem:[%s18843_s10 + $0x1d8] sm:$0xff] }
 0x62c   : > { %9618 = vmatpush.bf16.msrb.mxu0 %v13586_v13  ;;  %v13589_v13 = vld [vmem:[%s18843_s10 + $0x188] sm:$0xff] }
 0x62d   : > { %v8893_v59 = vmax.f32 %v8888_v39, 0.0 }
 0x62f   : > { %v8898_v38 = vsel %vm1015_vm7, %v8893_v59, 0.0  ;;  %v13594_v59 = vld [vmem:[%s18843_s10 + $0x1b0] sm:$0xff] }
 0x630   : > { %9619 = vmatpush.bf16.msrb.mxu0 %v13585_v33  ;;  %9743 = vmatpush.bf16.msrb.mxu1 %v13594_v59 }
 0x631   : > { %v13641_v6 = vld [vmem:[#allocation5] sm:$0xff]  }
 0x632   : > { %v8878_v18 = vpop.f32.mrf.mxu2  ;;  %v18584_v1 = vunpack.c.h.b16 %v13641_v6  ;;  %v8956_v54 = vshll.u32 %v13641_v6, 16  ;;  %v8954_v36 = vshrl.u32 %v13641_v6, 16 }
 0x633   : > { %v8889_v34 = vadd.f32 %v8878_v18, %v8768_v11  ;;  %v13602_v11 = vld [vmem:[%s18843_s10 + $0x1f0] sm:$0xff] }
 0x634   : > { %v9075_v28 = vpack.c.b16 %v18584_v1, %v9074_v8  ;;  %v9304_v0 = vpack.c.b16 %v18584_v1, %v9302_v30  ;;  %v8958_v53 = vrot.slane %v8956_v54, 1  ;;  %v13574_v8 = vld [vmem:[%s18843_s10 + $0x118] sm:$0xff]  ;;  %v8770_v30 = vadd.f32 %v18473_v16, %v8665_v5  ;;  %v13584_v16 = vld [vmem:[%s18843_s10 + $0x160] sm:$0xff]  ;;  %9848 = vmatpush.bf16.msrb.mxu2 %v13602_v11  ;;  %v13601_v54 = vld [vmem:[%s18843_s10 + $0x1e8] sm:$0xff]  ;;  %9744 = vmatpush.bf16.msrb.mxu1 %v13593_v12 }
 0x635   : > { %v8894_v23 = vmax.f32 %v8889_v34, 0.0  ;;  %9481 = vmatpush.bf16.msra.mxu3 %v13574_v8  ;;  %9620 = vmatpush.bf16.msrb.mxu0 %v13584_v16  ;;  %v13580_v5 = vld [vmem:[%s18843_s10 + $0x140] sm:$0xff] }
 0x636   : > { %v9182_v49 = vshrl.u32 %v9075_v28, 16  ;;  %v9185_v31 = vshll.u32 %v9075_v28, 16  ;;  %v9307_v60 = vshrl.u32 %v9304_v0, 16  ;;  %v9310_v26 = vshll.u32 %v9304_v0, 16 }
 0x637   : > { %v8899_v58 = vsel %vm1016_vm5, %v8894_v23, 0.0  ;;  %v9076_v17 = vrot.slane %v9075_v28, 1  ;;  %v8959_v4 = vor.u32 %v8958_v53, %v8954_v36  ;;  %v13573_v23 = vld [vmem:[%s18843_s10 + $0x110] sm:$0xff]  ;;  %v13600_v53 = vld [vmem:[%s18843_s10 + $0x1e0] sm:$0xff] }
 0x638   : > { %v18599_v3 = vpack.c.bf16 %v8899_v58, %v8898_v38  ;;  %v9184_v43 = vrot.slane %v9182_v49, 1  ;;  %v9187_v20 = vrot.slane %v9185_v31, 2  ;;  %v9309_v19 = vrot.slane %v9307_v60, 3  ;;  %9849 = vmatpush.bf16.msrb.mxu2 %v13601_v54  ;;  %v13583_v38 = vld [vmem:[%s18843_s10 + $0x158] sm:$0xff]  ;;  %v13592_v58 = vld [vmem:[%s18843_s10 + $0x1a0] sm:$0xff]  ;;  %v13598_v36 = vld [vmem:[%s18843_s10 + $0x1d0] sm:$0xff] }
 0x639   : > { %v9312_v48 = vrot.slane %v9310_v26, 4  ;;  %9482 = vmatpush.bf16.msra.mxu3 %v13573_v23  ;;  %9621 = vmatpush.bf16.msrb.mxu0 %v13583_v38  ;;  %v13582_v26 = vld [vmem:[%s18843_s10 + $0x150] sm:$0xff]  ;;  %v13608_v38 = vld [vmem:[%s18843_s10 + $0x220] sm:$0xff] }
 0x63a   : > { %13651 = vst [vmem:[#allocation5 + $0x8] sm:$0xff] %v18599_v3   ;;  %v8880_v55 = vpop.f32.mrf.mxu2  ;;  %v9077_v44 = vrot.slane %v18599_v3, 1  ;;  %v18608_v10 = vshll.u32 %v18599_v3, 16  ;;  %v18611_v52 = vshrl.u32 %v18599_v3, 16  ;;  %v9188_v37 = vor.u32 %v9187_v20, %v9184_v43  ;;  %9745 = vmatpush.bf16.msrb.mxu1 %v13592_v58  ;;  %v13571_v43 = vld [vmem:[%s18843_s10 + $0x100] sm:$0xff]  ;;  %v13607_v58 = vld [vmem:[%s18843_s10 + $0x218] sm:$0xff] }
 0x63b   : > { %v8890_v50 = vadd.f32 %v8880_v55, %v8769_v45  ;;  %v9313_v40 = vor.u32 %v9312_v48, %v9309_v19  ;;  %v13646_v49 = vunpack.c.l.b16 %v18599_v3 }
 0x63c   : > { %v9078_v22 = vsel %vm3097_vm9, %v9076_v17, %v9077_v44  ;;  %v8963_v7 = vrot.slane %v18608_v10, 1  ;;  %v9189_v56 = vrot.slane %v18611_v52, 1  ;;  %v9190_v47 = vrot.slane %v18608_v10, 2  ;;  %9850 = vmatpush.bf16.msrb.mxu2 %v13600_v53  ;;  %v13581_v17 = vld [vmem:[%s18843_s10 + $0x148] sm:$0xff] }
 0x63d   : > { %9140 = vmatmul.bf16.vlgmr.msra.gmra.mxu0 %v9078_v22  ;;  %v9314_v24 = vrot.slane %v18611_v52, 3  ;;  %v9315_v32 = vrot.slane %v18608_v10, 4  ;;  %v8895_v18 = vmax.f32 %v8890_v50, 0.0  ;;  %v18686_v60 = vpack.c.b16 %v13646_v49, %v18584_v1  ;;  %v13572_v1 = vld [vmem:[%s18843_s10 + $0x108] sm:$0xff]  ;;  %v13596_v10 = vld [vmem:[%s18843_s10 + $0x1c0] sm:$0xff] }
 0x63e   : > { %v8964_v51 = vsel %vm2719_vm8, %v8959_v4, %v8963_v7  ;;  %v18626_v14 = vor.u32 %v9190_v47, %v9189_v56  ;;  %9622 = vmatpush.bf16.msrb.mxu0 %v13582_v26  ;;  %9483 = vmatpush.bf16.msra.mxu3 %v13572_v1  ;;  %v13590_v56 = vld [vmem:[%s18843_s10 + $0x190] sm:$0xff]  ;;  %v8967_v25 = vor.u32 %v18611_v52, %v8963_v7 }
 0x63f   : > { %9035 = vmatmul.bf16.vlgmr.msrb.gmra.mxu3 %v8964_v51  ;;  %v18637_v35 = vor.u32 %v9315_v32, %v9314_v24  ;;  %v8900_v28 = vsel %vm1017_vm12, %v8895_v18, 0.0  ;;  %9746 = vmatpush.bf16.msrb.mxu1 %v13591_v21  ;;  %v13597_v24 = vld [vmem:[%s18843_s10 + $0x1c8] sm:$0xff] }
 0x640   : > { %v9192_v39 = vsel %vm6220_vm13, %v9188_v37, %v18626_v14  ;;  %9851 = vmatpush.bf16.msrb.mxu2 %v13599_v41  ;;  %v9770_v41 = vld [vmem:[#allocation5 + $0x4] sm:$0x8] }
 0x641   : > { %9261 = vmatmul.bf16.vlgmr.msra.gmra.mxu1 %v9192_v39  ;;  %v9317_v9 = vsel %vm3756_vm10, %v9313_v40, %v18637_v35  ;;  %v9505_v16 = vld [vmem:[#allocation5 + $0x4] sm:$0xff]  }
 0x642   : > { %v8883_v6 = vpop.f32.mrf.mxu2  ;;  %9386 = vmatmul.bf16.vlgmr.msra.gmra.mxu2 %v9317_v9  ;;  %9623 = vmatpush.bf16.msrb.mxu0 %v13581_v17  ;;  %v9535_v54 = vunpack.c.h.b16 %v9505_v16  ;;  %v9544_v1 = vshrl.u32 %v9505_v16, 16 }
 0x643   : > { %v8891_v61 = vadd.f32 %v8883_v6, %v8770_v30  ;;  %9484 = vmatpush.bf16.msra.mxu3 %v13571_v43  ;;  %9747 = vmatpush.bf16.msrb.mxu1 %v13590_v56  ;;  %v13611_v6 = vld [vmem:[%s18843_s10 + $0x238] sm:$0xff]  ;;  %v9646_v56 = vld [vmem:[#allocation5 + $0x18] sm:$0x7] }
 0x644   : > { %9852 = vmatpush.bf16.msrb.mxu2 %v13598_v36 }
 0x645   : > { %v8896_v34 = vmax.f32 %v8891_v61, 0.0  ;;  %v13610_v61 = vld [vmem:[%s18843_s10 + $0x230] sm:$0xff] }
 0x646   : > { %9624 = vmatpush.bf16.msrb.mxu0 %v13580_v5 }
 0x647   : > { %v8901_v0 = vsel %vm1018_vm11, %v8896_v34, 0.0  ;;  %9748 = vmatpush.bf16.msrb.mxu1 %v13589_v13  ;;  %9968 = vmatpush.bf16.msrb.mxu3 %v13611_v6  ;;  %v13609_v34 = vld [vmem:[%s18843_s10 + $0x228] sm:$0xff] }
 0x648   : > { %v13638_v46 = vpack.c.bf16 %v8901_v0, %v8900_v28  ;;  %9853 = vmatpush.bf16.msrb.mxu2 %v13597_v24 }
 0x64a   : > { %13652 = vst [vmem:[#allocation5 + $0x10] sm:$0xff] %v13638_v46   ;;  %v8885_v31 = vpop.f32.mrf.mxu2  ;;  %v9546_v46 = vshll.u32 %v9505_v16, 16 }
 0x64b   : > { %9969 = vmatpush.bf16.msrb.mxu3 %v13610_v61 }
 0x64c   : > { %9854 = vmatpush.bf16.msrb.mxu2 %v13596_v10  ;;  %v9548_v53 = vrot.slane %v9546_v46, 1 }
 0x64f   : > { %9970 = vmatpush.bf16.msrb.mxu3 %v13609_v34 }
 0x651   : > { %v18709_v29 = vld [vmem:[#allocation5 + $0x10] sm:$0xff]  }
 0x652   : > { %v8921_v55 = vld [vmem:[#allocation5 + $0x14] sm:$0x1]  ;;  %v18712_v4 = vunpack.c.l.b16 %v18709_v29  ;;  %v9303_v22 = vunpack.c.h.b16 %v18709_v29  ;;  %v9319_v50 = vshrl.u32 %v18709_v29, 16  ;;  %v9322_v40 = vshll.u32 %v18709_v29, 16  ;;  %v18757_v28 = vld [vmem:[#allocation5 + $0xc] sm:$0xff] }
 0x653   : > { %v9160_v20 = vld [vmem:[#allocation5 + $0x14] sm:$0x3]  ;;  %v8949_v19 = vunpack.c.l.b16 %v8921_v55  ;;  %v18763_v49 = vshll.u32 %v18757_v28, 16  ;;  %v18766_v31 = vshrl.u32 %v18757_v28, 16  ;;  %9971 = vmatpush.bf16.msrb.mxu3 %v13608_v38  ;;  %v9549_v55 = vor.u32 %v9548_v53, %v9544_v1 }
 0x654   : > { %v9179_v48 = vunpack.c.l.b16 %v9160_v20  ;;  %v9321_v30 = vrot.slane %v9319_v50, 3  ;;  %v9324_v9 = vrot.slane %v9322_v40, 4  ;;  %v9789_v20 = vunpack.c.l.b16 %v9770_v41 }
 0x655   : > { %v8952_v47 = vpack.c.b16 %v8949_v19, %v18712_v4  ;;  %v9553_v17 = vrot.slane %v18763_v49, 1  ;;  %v9678_v36 = vrot.slane %v18766_v31, 2  ;;  %v9679_v43 = vrot.slane %v18763_v49, 3  ;;  %v18774_v19 = vld [vmem:[#allocation5 + $0x14] sm:$0xff]  }
 0x656   : > { %v9180_v45 = vpack.c.b16 %v9179_v48, %v18712_v4  ;;  %v9325_v11 = vor.u32 %v9324_v9, %v9321_v30  ;;  %v9510_v48 = vld [vmem:[#allocation5 + $0x18] sm:$0x1]  ;;  %v9790_v24 = vpack.c.b16 %v9535_v54, %v9789_v20  ;;  %v9792_v13 = vrot.slane %v18757_v28, 3 }
 0x657   : > { %v9079_v32 = vrot.slane %v8952_v47, 1  ;;  %v8969_v51 = vshll.u32 %v8952_v47, 16  ;;  %9972 = vmatpush.bf16.msrb.mxu3 %v13607_v58  ;;  %v9554_v5 = vsel %vm2719_vm8, %v9549_v55, %v9553_v17  ;;  %v13605_v30 = vld [vmem:[%s18843_s10 + $0x208] sm:$0xff]  ;;  %v9905_v46 = vrot.slane %v18763_v49, 4  ;;  %v13693_v49 = vld [vmem:[%s18844_s11] ss:$0 sm:$0xff] }
 0x658   : > { %v9194_v37 = vshrl.u32 %v9180_v45, 16  ;;  %v9197_v15 = vshll.u32 %v9180_v45, 16  ;;  %v9326_v18 = vsel %vm3756_vm10, %v18637_v35, %v9325_v11  ;;  %v9645_v35 = vld [vmem:[#allocation5 + $0x4] sm:$0xc]  ;;  %v9791_v40 = vrot.slane %v9790_v24, 3 }
 0x659   : > { %v9080_v2 = vsel %vm3097_vm9, %v9077_v44, %v9079_v32  ;;  %v8971_v39 = vrot.slane %v8969_v51, 1  ;;  %v13588_v44 = vld [vmem:[%s18843_s10 + $0x180] sm:$0xff]  ;;  %9391 = vmatmul.bf16.gmra.mxu2 %v9326_v18  ;;  %v9666_v0 = vunpack.c.l.b16 %v9645_v35  ;;  %v9538_v51 = vunpack.c.l.b16 %v18774_v19 }
 0x65a   : > { %v9196_v33 = vrot.slane %v9194_v37, 1  ;;  %v9199_v8 = vrot.slane %v9197_v15, 2  ;;  %9145 = vmatmul.bf16.gmra.mxu0 %v9080_v2  ;;  %9749 = vmatpush.bf16.msrb.mxu1 %v13588_v44  ;;  %v9539_v37 = vunpack.c.l.b16 %v9510_v48  ;;  %v9667_v15 = vunpack.c.l.b16 %v9646_v56 }
 0x65b   : > { %v8972_v52 = vsel %vm2719_vm8, %v8967_v25, %v8971_v39  ;;  %v9668_v23 = vpack.c.b16 %v9535_v54, %v9666_v0  ;;  %v13606_v25 = vld [vmem:[%s18843_s10 + $0x210] sm:$0xff]  ;;  %v9897_v28 = vshrl.u32 %v9790_v24, 16  ;;  %v9904_v0 = vrot.slane %v18766_v31, 3 }
 0x65c   : > { %v9200_v7 = vor.u32 %v9199_v8, %v9196_v33  ;;  %9040 = vmatmul.bf16.gmra.mxu3 %v8972_v52  ;;  %v9669_v33 = vpack.c.b16 %v9667_v15, %v9538_v51  ;;  %v9793_v8 = vsel %vm7390_vm14, %v9791_v40, %v9792_v13  ;;  %v9909_v29 = vshrl.u32 %v18774_v19, 16 }
 0x65d   : > { %v9671_v26 = vshrl.u32 %v9668_v23, 16  ;;  %v9674_v21 = vshll.u32 %v9668_v23, 16  ;;  %9973 = vmatpush.bf16.msrb.mxu3 %v13606_v25  ;;  %v9899_v23 = vrot.slane %v9897_v28, 3  ;;  %v9906_v58 = vor.u32 %v9905_v46, %v9904_v0 }
 0x65e   : > { %v9201_v59 = vsel %vm6220_vm13, %v18626_v14, %v9200_v7  ;;  %v8973_v14 = vshrl.u32 %v8952_v47, 16  ;;  %v9683_v10 = vshrl.u32 %v9669_v33, 16  ;;  %v9686_v52 = vshll.u32 %v9669_v33, 16 }
 0x65f   : > { %9266 = vmatmul.bf16.gmra.mxu1 %v9201_v59  ;;  %v9673_v47 = vrot.slane %v9671_v26, 2  ;;  %v9676_v45 = vrot.slane %v9674_v21, 3  ;;  %v13647_v59 = vunpack.c.h.b16 %v18599_v3  ;;  %v9794_v34 = vrot.slane %v9669_v33, 3 }
 0x660   : > { %v8975_v12 = vor.u32 %v8973_v14, %v8971_v39  ;;  %v9542_v39 = vpack.c.b16 %v9539_v37, %v9538_v51  ;;  %v9688_v6 = vrot.slane %v9686_v52, 3  ;;  %v9425_v3 = vpack.c.b16 %v9303_v22, %v9303_v22 }
 0x661   : > { %v9677_v50 = vor.u32 %v9676_v45, %v9673_v47  ;;  %9974 = vmatpush.bf16.msrb.mxu3 %v13605_v30  ;;  %v9424_v16 = vpack.c.b16 %v18712_v4, %v13647_v59  ;;  %v9795_v14 = vsel %vm7390_vm14, %v9792_v13, %v9794_v34  ;;  %v9900_v4 = vshll.u32 %v9790_v24, 16 }
 0x662   : > { %v9559_v9 = vshll.u32 %v9542_v39, 16  ;;  %v9912_v22 = vshll.u32 %v18774_v19, 16  ;;  %v9911_v21 = vrot.slane %v9909_v29, 3 }
 0x663   : > { %v9902_v38 = vrot.slane %v9900_v4, 4 }
 0x664   : > { %v9561_v44 = vrot.slane %v9559_v9, 1  ;;  %v9914_v41 = vrot.slane %v9912_v22, 4 }
 0x665   : > { %v9903_v53 = vor.u32 %v9902_v38, %v9899_v23 }
 0x666   : > { %v9915_v1 = vor.u32 %v9914_v41, %v9911_v21 }
 0x667   : > { %v9907_v26 = vsel %vm3756_vm10, %v9903_v53, %v9906_v58 }
 0x669   : > { %9396 = vmatmul.bf16.gmra.mxu2 %v9325_v11  ;;  %v9685_v11 = vrot.slane %v9683_v10, 2 }
 0x66a   : > { %9150 = vmatmul.bf16.gmra.mxu0 %v9079_v32  ;;  %v9680_v32 = vor.u32 %v9679_v43, %v9678_v36 }
 0x66b   : > { %v9689_v61 = vor.u32 %v9688_v6, %v9685_v11 }
 0x66c   : > { %9045 = vmatmul.bf16.gmra.mxu3 %v8975_v12  ;;  %v9681_v2 = vsel %vm7155_vm15, %v9677_v50, %v9680_v32  ;;  %v9563_v12 = vshrl.u32 %v9542_v39, 16 }
 0x66d   : > { %v9690_v54 = vsel %vm7155_vm15, %v9680_v32, %v9689_v61 }
 0x66e   : > { %v9565_v35 = vor.u32 %v9563_v12, %v9561_v44 }
 0x66f   : > { %9271 = vmatmul.bf16.gmra.mxu1 %v9200_v7  ;;  %v9557_v7 = vor.u32 %v18766_v31, %v9553_v17  ;;  %v9916_v17 = vsel %vm3756_vm10, %v9906_v58, %v9915_v1 }
 0x671   : > { %v9562_v18 = vsel %vm2719_vm8, %v9557_v7, %v9561_v44 }
 0x679   : > { %9855 = vmatmul.bf16.vlgmr.msrb.gmra.mxu2 %v9793_v8 }
 0x67a   : > { %9625 = vmatmul.bf16.vlgmr.msrb.gmra.mxu0 %v9554_v5 }
 0x67c   : > { %9485 = vmatmul.bf16.vlgmr.msra.gmra.mxu3 %v18686_v60  ;;  %v13604_v60 = vld [vmem:[%s18843_s10 + $0x200] sm:$0xff] }
 0x67d   : > { %9975 = vmatpush.bf16.msrb.mxu3 %v13604_v60 }
 0x67f   : > { %9750 = vmatmul.bf16.vlgmr.msrb.gmra.mxu1 %v9681_v2 }
 0x689   : > { %9860 = vmatmul.bf16.gmra.mxu2 %v9795_v14 }
 0x68a   : > { %9630 = vmatmul.bf16.gmra.mxu0 %v9562_v18 }
 0x68c   : > { %9490 = vmatmul.bf16.gmra.mxu3 %v9424_v16 }
 0x68f   : > { %9755 = vmatmul.bf16.gmra.mxu1 %v9690_v54 }
 0x699   : > { %9865 = vmatmul.bf16.gmra.mxu2 %v9794_v34 }
 0x69a   : > { %9635 = vmatmul.bf16.gmra.mxu0 %v9565_v35 }
 0x69c   : > { %9495 = vmatmul.bf16.gmra.mxu3 %v9425_v3 }
 0x69f   : > { %9760 = vmatmul.bf16.gmra.mxu1 %v9689_v61 }
 0x6ac   : > { %9976 = vmatmul.bf16.vlgmr.msrb.gmra.mxu3 %v9907_v26 }
 0x6ba   : > { %v9141_v31 = vpop.f32.mrf.mxu0 }
 0x6bc   : > { %9981 = vmatmul.bf16.gmra.mxu3 %v9916_v17 }
 0x6be   : > { %v9262_v55 = vpop.f32.mrf.mxu1 }
 0x6c2   : > { %v9036_v36 = vpop.f32.mrf.mxu3  ;;  %v9143_v5 = vpop.f32.mrf.mxu0 }
 0x6c3   : > { %v9050_v43 = vadd.f32 %v13693_v49, %v9036_v36 }
 0x6c5   : > { %v9155_v20 = vadd.f32 %v9141_v31, %v9050_v43  ;;  %v9387_v48 = vpop.f32.mrf.mxu2 }
 0x6c6   : > { %v9264_v32 = vpop.f32.mrf.mxu1 }
 0x6c7   : > { %v9276_v56 = vadd.f32 %v9262_v55, %v9155_v20 }
 0x6c9   : > { %v9401_v47 = vadd.f32 %v9387_v48, %v9276_v56 }
 0x6ca   : > { %v9038_v45 = vpop.f32.mrf.mxu3 }
 0x6cb   : > { %v9051_v19 = vadd.f32 %v13693_v49, %v9038_v45 }
 0x6cc   : > { %9986 = vmatmul.bf16.gmra.mxu3 %v9915_v1 }
 0x6cd   : > { %v9156_v24 = vadd.f32 %v9143_v5, %v9051_v19  ;;  %v9389_v37 = vpop.f32.mrf.mxu2 }
 0x6cf   : > { %v9277_v51 = vadd.f32 %v9264_v32, %v9156_v24 }
 0x6d1   : > { %v9402_v15 = vadd.f32 %v9389_v37, %v9277_v51 }
 0x6d7   : > { %v9146_v13 = vpop.f32.mrf.mxu0 }
 0x6dc   : > { %v9267_v25 = vpop.f32.mrf.mxu1  ;;  %v9392_v33 = vpop.f32.mrf.mxu2 }
 0x6df   : > { %v9041_v50 = vpop.f32.mrf.mxu3  ;;  %v9148_v40 = vpop.f32.mrf.mxu0 }
 0x6e0   : > { %v9052_v2 = vadd.f32 %v13693_v49, %v9041_v50 }
 0x6e2   : > { %v9157_v39 = vadd.f32 %v9146_v13, %v9052_v2 }
 0x6e4   : > { %v9269_v8 = vpop.f32.mrf.mxu1  ;;  %v9278_v30 = vadd.f32 %v9267_v25, %v9157_v39  ;;  %v9394_v44 = vpop.f32.mrf.mxu2 }
 0x6e6   : > { %v9403_v9 = vadd.f32 %v9392_v33, %v9278_v30 }
 0x6e7   : > { %v9043_v10 = vpop.f32.mrf.mxu3  ;;  %v9151_v52 = vpop.f32.mrf.mxu0 }
 0x6e8   : > { %v9053_v60 = vadd.f32 %v13693_v49, %v9043_v10 }
 0x6ea   : > { %v9158_v7 = vadd.f32 %v9148_v40, %v9053_v60 }
 0x6ec   : > { %v9272_v11 = vpop.f32.mrf.mxu1  ;;  %v9279_v6 = vadd.f32 %v9269_v8, %v9158_v7  ;;  %v9397_v54 = vpop.f32.mrf.mxu2 }
 0x6ee   : > { %v9404_v59 = vadd.f32 %v9394_v44, %v9279_v6 }
 0x6ef   : > { %v9046_v18 = vpop.f32.mrf.mxu3  ;;  %v9153_v61 = vpop.f32.mrf.mxu0 }
 0x6f0   : > { %v9054_v16 = vadd.f32 %v13693_v49, %v9046_v18 }
 0x6f2   : > { %v9159_v34 = vadd.f32 %v9151_v52, %v9054_v16 }
 0x6f4   : > { %v9274_v14 = vpop.f32.mrf.mxu1  ;;  %v9280_v12 = vadd.f32 %v9272_v11, %v9159_v34  ;;  %v9399_v4 = vpop.f32.mrf.mxu2 }
 0x6f6   : > { %v9405_v35 = vadd.f32 %v9397_v54, %v9280_v12 }
 0x6f7   : > { %v9048_v3 = vpop.f32.mrf.mxu3  ;;  %v9626_v28 = vpop.f32.mrf.mxu0 }
 0x6fc   : > { %v9751_v0 = vpop.f32.mrf.mxu1  ;;  %v9856_v38 = vpop.f32.mrf.mxu2 }
 0x6ff   : > { %v9486_v46 = vpop.f32.mrf.mxu3  ;;  %v9628_v23 = vpop.f32.mrf.mxu0 }
 0x700   : > { %v9500_v48 = vadd.f32 %v9486_v46, %v9401_v47 }
 0x702   : > { %v9640_v19 = vadd.f32 %v9626_v28, %v9500_v48 }
 0x704   : > { %v9753_v58 = vpop.f32.mrf.mxu1  ;;  %v9858_v29 = vpop.f32.mrf.mxu2  ;;  %v9765_v24 = vadd.f32 %v9751_v0, %v9640_v19 }
 0x706   : > { %v9870_v37 = vadd.f32 %v9856_v38, %v9765_v24 }
 0x707   : > { %v9488_v53 = vpop.f32.mrf.mxu3  ;;  %v9631_v26 = vpop.f32.mrf.mxu0 }
 0x708   : > { %v9501_v32 = vadd.f32 %v9488_v53, %v9402_v15 }
 0x70a   : > { %v9641_v13 = vadd.f32 %v9628_v23, %v9501_v32 }
 0x70c   : > { %v9756_v22 = vpop.f32.mrf.mxu1  ;;  %v9861_v1 = vpop.f32.mrf.mxu2  ;;  %v9766_v40 = vadd.f32 %v9753_v58, %v9641_v13 }
 0x70e   : > { %v9871_v39 = vadd.f32 %v9858_v29, %v9766_v40 }
 0x70f   : > { %v9491_v21 = vpop.f32.mrf.mxu3  ;;  %v9633_v41 = vpop.f32.mrf.mxu0 }
 0x710   : > { %v9502_v2 = vadd.f32 %v9491_v21, %v9403_v9 }
 0x712   : > { %v9642_v33 = vadd.f32 %v9631_v26, %v9502_v2 }
 0x714   : > { %v9758_v17 = vpop.f32.mrf.mxu1  ;;  %v9863_v36 = vpop.f32.mrf.mxu2  ;;  %v9767_v10 = vadd.f32 %v9756_v22, %v9642_v33 }
 0x716   : > { %v9872_v9 = vadd.f32 %v9861_v1, %v9767_v10 }
 0x717   : > { %v9493_v49 = vpop.f32.mrf.mxu3  ;;  %v9636_v31 = vpop.f32.mrf.mxu0 }
 0x718   : > { %v9503_v52 = vadd.f32 %v9493_v49, %v9404_v59 }
 0x71a   : > { %v9643_v60 = vadd.f32 %v9633_v41, %v9503_v52 }
 0x71c   : > { %v9761_v43 = vpop.f32.mrf.mxu1  ;;  %v9866_v56 = vpop.f32.mrf.mxu2  ;;  %v9768_v18 = vadd.f32 %v9758_v17, %v9643_v60 }
 0x71e   : > { %v9873_v63 = vadd.f32 %v9863_v36, %v9768_v18 }
 0x71f   : > { %v9496_v55 = vpop.f32.mrf.mxu3  ;;  %v9638_v20 = vpop.f32.mrf.mxu0 }
 0x720   : > { %v9504_v61 = vadd.f32 %v9496_v55, %v9405_v35 }
 0x722   : > { %v9644_v16 = vadd.f32 %v9636_v31, %v9504_v61 }
 0x724   : > { %v9763_v45 = vpop.f32.mrf.mxu1  ;;  %v9868_v51 = vpop.f32.mrf.mxu2  ;;  %v9769_v12 = vadd.f32 %v9761_v43, %v9644_v16 }
 0x726   : > { %v9874_v3 = vadd.f32 %v9866_v56, %v9769_v12 }
 0x727   : > { %v9498_v5 = vpop.f32.mrf.mxu3 }
 0x72f   : > { %v9977_v25 = vpop.f32.mrf.mxu3 }
 0x730   : > { %v9991_v50 = vadd.f32 %v9977_v25, %v9870_v37 }
 0x732   : > { %13694 = vtanh.f32 %v9991_v50 }
 0x737   : > { %v9979_v47 = vpop.f32.mrf.mxu3 }
 0x738   : > { %v13695_v15 = vpop.eup %13694  ;;  %v9992_v8 = vadd.f32 %v9979_v47, %v9871_v39 }
 0x739   : > { %v10001_v30 = vsel %vm1014_vm6, %v13695_v15, 0.0 }
 0x73a   : > { %10006 = vst [vmem:[%s18813_s29] sm:$0xff] %v10001_v30  ;;  %13696 = vtanh.f32 %v9992_v8 }
 0x73f   : > { %v9982_v7 = vpop.f32.mrf.mxu3 }
 0x740   : > { %v13697_v44 = vpop.eup %13696  ;;  %v9993_v11 = vadd.f32 %v9982_v7, %v9872_v9 }
 0x741   : > { %v10002_v6 = vsel %vm1015_vm7, %v13697_v44, 0.0 }
 0x742   : > { %10007 = vst [vmem:[%s18813_s29 + $0x8] sm:$0xff] %v10002_v6  ;;  %13698 = vtanh.f32 %v9993_v11 }
 0x747   : > { %v9984_v34 = vpop.f32.mrf.mxu3 }
 0x748   : > { %v13699_v59 = vpop.eup %13698  ;;  %v9994_v54 = vadd.f32 %v9984_v34, %v9873_v63 }
 0x749   : > { %v10003_v14 = vsel %vm1016_vm5, %v13699_v59, 0.0 }
 0x74a   : > { %10008 = vst [vmem:[%s18813_s29 + $0x10] sm:$0xff] %v10003_v14  ;;  %13700 = vtanh.f32 %v9994_v54 }
 0x74f   : > { %v9987_v62 = vpop.f32.mrf.mxu3 }
 0x750   : > { %v13701_v28 = vpop.eup %13700  ;;  %v9995_v4 = vadd.f32 %v9987_v62, %v9874_v3 }
 0x751   : > { %v10004_v35 = vsel %vm1017_vm12, %v13701_v28, 0.0 }
 0x752   : > { %10009 = vst [vmem:[%s18813_s29 + $0x18] sm:$0xff] %v10004_v35  ;;  %13702 = vtanh.f32 %v9995_v4 }
 0x757   : > { %v9989_v0 = vpop.f32.mrf.mxu3 }
 0x758   : > { %v13703_v46 = vpop.eup %13702 }
 0x759   : > { %v10005_v23 = vsel %vm1018_vm11, %v13703_v46, 0.0 }
 0x75a   : > { %10010 = vst [vmem:[%s18813_s29 + $0x20] sm:$0xff] %v10005_v23 }
 0x75b PF: > { %s24_s21 = sadd.s32 1, %s13778_s21  }
 0x75c   : > { %p21_p7 = scmp.ge.s32.totalorder %s24_s21, 4  }
 0x75e   :  { %23 = sbr.rel (!%p21_p7) target bundleno = 2 (0x2), region = 165 }
 0x763   :  { %10032 = vsyncpa [#allocation7], 1 }
 0x764   :  { %10034 = vsyncpa [#allocation7 + $0x1], 1 }
 0x765   :  { %10035 = vsyncpa [#allocation9], 1 }

</bundles_post_ra>
